<compile_context>
chip_gen: v7x
topology: tpu7x:2x2x1
jax: 0.10.0
libtpu: 0.0.40
codegen_flags: <defaults>
</compile_context>

<pallas_src>
import math

import jax
import jax.numpy as jnp
from jax.experimental import pallas as pl
from jax.experimental.pallas import tpu as pltpu


_PARALLEL1 = pltpu.CompilerParams(dimension_semantics=("parallel",))

# ~1 MiB of f32 per (rows x lanes) stream buffer per grid step.
_ROW_ELEMS_TARGET = 1 << 18


def _row_tile(m, lanes):
    """Largest row tile keeping each f32 stream buffer around 1 MiB (safe in default scoped VMEM)."""
    target = max(256, _ROW_ELEMS_TARGET // max(int(lanes), 1))
    if m <= target:
        return m
    return max(8, (target // 8) * 8)


def _pick_fold(width, batch, n_pts, s1, s2):
    """Lane-folding factor F: view (M, width) activations as (M/F, F*width) -> 128-lane stores."""
    if width <= 0 or 128 % width != 0:
        return 1
    f = 128 // width
    while f > 1 and ((batch * n_pts) % f != 0 or (batch * s1 * s2) % f != 0):
        f //= 2
    return max(f, 1)


# ----------------------------------------------------------------------------- in-kernel math

_ERF_P = 0.3275911
_ERF_A = (0.254829592, -0.284496736, 1.421413741, -1.453152027, 1.061405429)


def _erf_approx(x):
    # Abramowitz & Stegun 7.1.26, |err| <= 1.5e-7. Exact divide kept (accuracy over the
    # tiny VPU saving of an approx reciprocal); exp rides the EUP slot.
    s = jnp.where(x >= 0.0, 1.0, -1.0)
    ax = jnp.abs(x)
    t = 1.0 / (1.0 + _ERF_P * ax)
    a1, a2, a3, a4, a5 = _ERF_A
    poly = t * (a1 + t * (a2 + t * (a3 + t * (a4 + t * a5))))
    return s * (1.0 - poly * jnp.exp(-ax * ax))


def _gelu(x):
    # erf-based GELU (matches F.gelu default up to ~1e-7).
    return 0.5 * x * (1.0 + _erf_approx(x * (1.0 / math.sqrt(2.0))))


# ----------------------------------------------------------------------------- trig capability probe
# Resolved ONCE at import time (never inside a jit trace). If sin/cos (or the broadcast
# pattern the NUFT kernels use) fail to lower on this toolchain, fall back to an
# XLA-built cos/sin basis fed to basis-consuming kernels.

def _trig_probe_kernel(k_ref, x_ref, o_ref):
    ang = k_ref[:, 0:1] * x_ref[0:1, :] + k_ref[:, 1:2] * x_ref[1:2, :]
    o_ref[...] = jnp.cos(ang) + jnp.sin(ang)


def _probe_trig_support():
    try:
        y = pl.pallas_call(
            _trig_probe_kernel,
            out_shape=jax.ShapeDtypeStruct((8, 128), jnp.float32),
        )(jnp.ones((8, 2), jnp.float32), jnp.ones((2, 128), jnp.float32))
        jax.block_until_ready(y)
        return bool(jnp.all(jnp.isfinite(y)))
    except Exception:
        return False


_TRIG_OK = _probe_trig_support()


# ----------------------------------------------------------------------------- Pallas kernels

def _fc_kernel(x_ref, w_ref, b_ref, o_ref):
    # y = x @ w + b  (lane-folded fc0)
    o_ref[...] = (jnp.dot(x_ref[...], w_ref[...], preferred_element_type=jnp.float32)
                  + b_ref[...])


def _block0_kernel(spec_ref, g_ref, wb_ref, b_ref, o_ref):
    # gelu(spectral + grid @ wb + bias)   -- fuses b0(grid) + add + GELU (lane-folded)
    y = (spec_ref[...]
         + jnp.dot(g_ref[...], wb_ref[...], preferred_element_type=jnp.float32)
         + b_ref[...])
    o_ref[...] = _gelu(y)


def _block_kernel(spec_ref, uc_ref, g_ref, wk_ref, wb_ref, b_ref, o_ref):
    # gelu(spectral + uc @ wk + grid @ wb + bias)  -- fuses w_k, b_k, adds, GELU (lane-folded)
    y = (spec_ref[...]
         + jnp.dot(uc_ref[...], wk_ref[...], preferred_element_type=jnp.float32)
         + jnp.dot(g_ref[...], wb_ref[...], preferred_element_type=jnp.float32)
         + b_ref[...])
    o_ref[...] = _gelu(y)


def _head_kernel(x_ref, w1_ref, b1_ref, w2_ref, b2_ref, o_ref):
    # fc1 -> GELU -> fc2 fused (lane-folded: final store is F*out_channels wide).
    h = _gelu(jnp.dot(x_ref[...], w1_ref[...], preferred_element_type=jnp.float32)
              + b1_ref[...])
    o_ref[...] = (jnp.dot(h, w2_ref[...], preferred_element_type=jnp.float32)
                  + b2_ref[...])


def _cmul_kernel(a_ref, w_ref, o_ref):
    # Per-mode complex channel mix, mode-batched. a: (mt, B, 2Cin) = [ar|ai];
    # w: (mt, 2Cin, 2Cout) = [[wr, wi], [-wi, wr]] -> out: (mt, B, 2Cout) = [real|imag].
    o_ref[...] = jnp.einsum('mbi,mio->mbo', a_ref[...], w_ref[...],
                            preferred_element_type=jnp.float32)


def _nuft_encode_kernel(xT_ref, k_ref, u_ref, or_ref, oi_ref):
    # Nonuniform forward FT, basis built in VMEM: ang[m,n] = -2pi(k1[m]x0[n]+k2[m]x1[n]).
    x0 = xT_ref[0, 0:1, :]                                     # (1, N)
    x1 = xT_ref[0, 1:2, :]
    ang = (-2.0 * math.pi) * (k_ref[:, 0:1] * x0 + k_ref[:, 1:2] * x1)   # (Mm, N)
    u = u_ref[0]                                               # (N, C)
    or_ref[0] = jnp.dot(jnp.cos(ang), u, preferred_element_type=jnp.float32)
    oi_ref[0] = jnp.dot(jnp.sin(ang), u, preferred_element_type=jnp.float32)


def _nuft_encode_basis_kernel(br_ref, bi_ref, u_ref, or_ref, oi_ref):
    u = u_ref[0]
    or_ref[0] = jnp.dot(br_ref[0], u, preferred_element_type=jnp.float32)
    oi_ref[0] = jnp.dot(bi_ref[0], u, preferred_element_type=jnp.float32)


def _nuft_decode_kernel(x_ref, k_ref, fr_ref, fi_ref, w4_ref, b4_ref, o_ref):
    # Re(nonuniform inverse FT), basis in VMEM, + fused b4(x_out) 1x1 Conv1d.
    x = x_ref[0]                                               # (N, 2)
    ang = (2.0 * math.pi) * (x[:, 0:1] * k_ref[0:1, :] + x[:, 1:2] * k_ref[1:2, :])  # (N, Mm)
    y = (jnp.dot(jnp.cos(ang), fr_ref[0], preferred_element_type=jnp.float32)
         - jnp.dot(jnp.sin(ang), fi_ref[0], preferred_element_type=jnp.float32))
    o_ref[0] = y + jnp.dot(x, w4_ref[...], preferred_element_type=jnp.float32) + b4_ref[...]


def _nuft_decode_basis_kernel(br_ref, bi_ref, fr_ref, fi_ref, x_ref, w4_ref, b4_ref, o_ref):
    y = (jnp.dot(br_ref[0], fr_ref[0], preferred_element_type=jnp.float32)
         - jnp.dot(bi_ref[0], fi_ref[0], preferred_element_type=jnp.float32))
    o_ref[0] = (y + jnp.dot(x_ref[0], w4_ref[...], preferred_element_type=jnp.float32)
                + b4_ref[...])


# ----------------------------------------------------------------------------- kernel wrappers

def pallas_linear(x2d, w, b):
    """y = x @ w + b ; x: (M, K) (lane-folded), w: (K, Co), b: (1, Co)."""
    M, K = x2d.shape
    Co = w.shape[1]
    tm = _row_tile(M, Co)
    return pl.pallas_call(
        _fc_kernel,
        out_shape=jax.ShapeDtypeStruct((M, Co), jnp.float32),
        grid=(pl.cdiv(M, tm),),
        in_specs=[pl.BlockSpec((tm, K), lambda i: (i, 0)),
                  pl.BlockSpec((K, Co), lambda i: (0, 0)),
                  pl.BlockSpec((1, Co), lambda i: (0, 0))],
        out_specs=pl.BlockSpec((tm, Co), lambda i: (i, 0)),
        compiler_params=_PARALLEL1,
    )(x2d, w, b)


def fused_block0(spec, grid_rows, wb, bias):
    M, C = spec.shape
    G = grid_rows.shape[1]
    tm = _row_tile(M, C)
    return pl.pallas_call(
        _block0_kernel,
        out_shape=jax.ShapeDtypeStruct((M, C), jnp.float32),
        grid=(pl.cdiv(M, tm),),
        in_specs=[pl.BlockSpec((tm, C), lambda i: (i, 0)),
                  pl.BlockSpec((tm, G), lambda i: (i, 0)),
                  pl.BlockSpec((G, C), lambda i: (0, 0)),
                  pl.BlockSpec((1, C), lambda i: (0, 0))],
        out_specs=pl.BlockSpec((tm, C), lambda i: (i, 0)),
        compiler_params=_PARALLEL1,
    )(spec, grid_rows, wb, bias)


def fused_block(spec, uc, grid_rows, wk, wb, bias):
    M, C = spec.shape
    G = grid_rows.shape[1]
    tm = _row_tile(M, C)
    return pl.pallas_call(
        _block_kernel,
        out_shape=jax.ShapeDtypeStruct((M, C), jnp.float32),
        grid=(pl.cdiv(M, tm),),
        in_specs=[pl.BlockSpec((tm, C), lambda i: (i, 0)),
                  pl.BlockSpec((tm, C), lambda i: (i, 0)),
                  pl.BlockSpec((tm, G), lambda i: (i, 0)),
                  pl.BlockSpec((C, C), lambda i: (0, 0)),
                  pl.BlockSpec((G, C), lambda i: (0, 0)),
                  pl.BlockSpec((1, C), lambda i: (0, 0))],
        out_specs=pl.BlockSpec((tm, C), lambda i: (i, 0)),
        compiler_params=_PARALLEL1,
    )(spec, uc, grid_rows, wk, wb, bias)


def mlp_head(x, w1, b1, w2, b2):
    M, Cin = x.shape
    H = w1.shape[1]
    Co = w2.shape[1]
    tm = _row_tile(M, max(Cin, H))   # the (tm, H) hidden temp dominates VMEM
    return pl.pallas_call(
        _head_kernel,
        out_shape=jax.ShapeDtypeStruct((M, Co), jnp.float32),
        grid=(pl.cdiv(M, tm),),
        in_specs=[pl.BlockSpec((tm, Cin), lambda i: (i, 0)),
                  pl.BlockSpec((Cin, H), lambda i: (0, 0)),
                  pl.BlockSpec((1, H), lambda i: (0, 0)),
                  pl.BlockSpec((H, Co), lambda i: (0, 0)),
                  pl.BlockSpec((1, Co), lambda i: (0, 0))],
        out_specs=pl.BlockSpec((tm, Co), lambda i: (i, 0)),
        compiler_params=_PARALLEL1,
    )(x, w1, b1, w2, b2)


def cmul(a, w):
    """Per-mode complex channel mix: a (Mm, B, 2Cin), w (Mm, 2Cin, 2Cout) -> (Mm, B, 2Cout)."""
    Mm, B, K = a.shape
    No = w.shape[2]
    mt = 16 if (Mm % 16 == 0 and Mm >= 32) else Mm   # mode-tile so v7x's 2 TCs split the work
    return pl.pallas_call(
        _cmul_kernel,
        out_shape=jax.ShapeDtypeStruct((Mm, B, No), jnp.float32),
        grid=(Mm // mt,),
        in_specs=[pl.BlockSpec((mt, B, K), lambda i: (i, 0, 0)),
                  pl.BlockSpec((mt, K, No), lambda i: (i, 0, 0))],
        out_specs=pl.BlockSpec((mt, B, No), lambda i: (i, 0, 0)),
        compiler_params=_PARALLEL1,
    )(a, w)


def nuft_encode(feat, x_in, modes1, modes2):
    """Nonuniform forward FT for only the modes actually used ((2*modes1) x modes2)."""
    B, N, C = feat.shape
    m1 = 2 * modes1
    Mm = m1 * modes2
    k1 = jnp.concatenate([jnp.arange(0, modes1), jnp.arange(-modes1, 0)]).astype(jnp.float32)
    k2 = jnp.arange(0, modes2, dtype=jnp.float32)
    kk = jnp.stack([jnp.broadcast_to(k1[:, None], (m1, modes2)).reshape(-1),
                    jnp.broadcast_to(k2[None, :], (m1, modes2)).reshape(-1)], axis=1)  # (Mm, 2)
    feat = feat.astype(jnp.float32)
    if _TRIG_OK:
        xT = x_in.transpose(0, 2, 1).astype(jnp.float32)       # (B, 2, N)
        return pl.pallas_call(
            _nuft_encode_kernel,
            out_shape=(jax.ShapeDtypeStruct((B, Mm, C), jnp.float32),
                       jax.ShapeDtypeStruct((B, Mm, C), jnp.float32)),
            grid=(B,),
            in_specs=[pl.BlockSpec((1, 2, N), lambda b: (b, 0, 0)),
                      pl.BlockSpec((Mm, 2), lambda b: (0, 0)),
                      pl.BlockSpec((1, N, C), lambda b: (b, 0, 0))],
            out_specs=(pl.BlockSpec((1, Mm, C), lambda b: (b, 0, 0)),
                       pl.BlockSpec((1, Mm, C), lambda b: (b, 0, 0))),
            compiler_params=_PARALLEL1,
        )(xT, kk, feat)
    # Fallback: basis built in XLA (only if sin/cos don't lower in Mosaic on this toolchain).
    ang = (-2.0 * math.pi) * jnp.einsum('md,bnd->bmn', kk, x_in.astype(jnp.float32))
    return pl.pallas_call(
        _nuft_encode_basis_kernel,
        out_shape=(jax.ShapeDtypeStruct((B, Mm, C), jnp.float32),
                   jax.ShapeDtypeStruct((B, Mm, C), jnp.float32)),
        grid=(B,),
        in_specs=[pl.BlockSpec((1, Mm, N), lambda b: (b, 0, 0)),
                  pl.BlockSpec((1, Mm, N), lambda b: (b, 0, 0)),
                  pl.BlockSpec((1, N, C), lambda b: (b, 0, 0))],
        out_specs=(pl.BlockSpec((1, Mm, C), lambda b: (b, 0, 0)),
                   pl.BlockSpec((1, Mm, C), lambda b: (b, 0, 0))),
        compiler_params=_PARALLEL1,
    )(jnp.cos(ang), jnp.sin(ang), feat)


def nuft_decode(full_r, full_i, x_out, w4, b4, modes1, modes2):
    """Re(nonuniform inverse FT) over the hermitian-extended spectrum, + fused b4(x_out)."""
    B, Mm, Cout = full_r.shape
    N = x_out.shape[1]
    m1, m2 = 2 * modes1, 2 * modes2 - 1
    k1 = jnp.concatenate([jnp.arange(0, modes1), jnp.arange(-modes1, 0)]).astype(jnp.float32)
    k2 = jnp.concatenate([jnp.arange(0, modes2), jnp.arange(-(modes2 - 1), 0)]).astype(jnp.float32)
    kk = jnp.stack([jnp.broadcast_to(k1[:, None], (m1, m2)).reshape(-1),
                    jnp.broadcast_to(k2[None, :], (m1, m2)).reshape(-1)], axis=0)   # (2, Mm)
    xf = x_out.astype(jnp.float32)
    if _TRIG_OK:
        return pl.pallas_call(
            _nuft_decode_kernel,
            out_shape=jax.ShapeDtypeStruct((B, N, Cout), jnp.float32),
            grid=(B,),
            in_specs=[pl.BlockSpec((1, N, 2), lambda b: (b, 0, 0)),
                      pl.BlockSpec((2, Mm), lambda b: (0, 0)),
                      pl.BlockSpec((1, Mm, Cout), lambda b: (b, 0, 0)),
                      pl.BlockSpec((1, Mm, Cout), lambda b: (b, 0, 0)),
                      pl.BlockSpec((2, Cout), lambda b: (0, 0)),
                      pl.BlockSpec((1, Cout), lambda b: (0, 0))],
            out_specs=pl.BlockSpec((1, N, Cout), lambda b: (b, 0, 0)),
            compiler_params=_PARALLEL1,
        )(xf, kk, full_r, full_i, w4, b4)
    ang = (2.0 * math.pi) * jnp.einsum('bnd,dm->bnm', xf, kk)
    return pl.pallas_call(
        _nuft_decode_basis_kernel,
        out_shape=jax.ShapeDtypeStruct((B, N, Cout), jnp.float32),
        grid=(B,),
        in_specs=[pl.BlockSpec((1, N, Mm), lambda b: (b, 0, 0)),
                  pl.BlockSpec((1, N, Mm), lambda b: (b, 0, 0)),
                  pl.BlockSpec((1, Mm, Cout), lambda b: (b, 0, 0)),
                  pl.BlockSpec((1, Mm, Cout), lambda b: (b, 0, 0)),
                  pl.BlockSpec((1, N, 2), lambda b: (b, 0, 0)),
                  pl.BlockSpec((2, Cout), lambda b: (0, 0)),
                  pl.BlockSpec((1, Cout), lambda b: (0, 0))],
        out_specs=pl.BlockSpec((1, N, Cout), lambda b: (b, 0, 0)),
        compiler_params=_PARALLEL1,
    )(jnp.cos(ang), jnp.sin(ang), full_r, full_i, xf, w4, b4)


# ----------------------------------------------------------------------------- spectral layers (XLA glue is KB-scale)

def _assemble_out_ft(fr, fi, modes1, modes2, s1, s2):
    """Place the (2*modes1, modes2) mode block into the rfft2 spectrum via concat + pad."""
    B, _, _, C = fr.shape
    out = (fr + 1j * fi).astype(jnp.complex64)
    top = out[:, :modes1]
    bot = out[:, modes1:]
    mid = jnp.zeros((B, s1 - 2 * modes1, modes2, C), jnp.complex64)
    col = jnp.concatenate([top, mid, bot], axis=1)             # (B, s1, modes2, C)
    pad_y = s2 // 2 + 1 - modes2
    return jnp.pad(col, ((0, 0), (0, 0), (0, pad_y), (0, 0)))


def _mix_modes(ur, ui, w_cm):
    """[ar|ai] channel-stack -> one mode-batched cmul -> (B, Mm, Cout) real/imag."""
    Cout = w_cm.shape[2] // 2
    a = jnp.concatenate([ur, ui], axis=-1).transpose(1, 0, 2)  # (Mm, B, 2Cin), ~KBs
    o = cmul(a, w_cm).transpose(1, 0, 2)                       # (B, Mm, 2Cout), ~KBs
    return o[..., :Cout], o[..., Cout:]


def spectral_encode(feat, x_in, w_cm, modes1, modes2, s1, s2):
    """SpectralConv2d with x_in given (nonuniform FT -> mode mix -> irfft2), NHWC out."""
    B = feat.shape[0]
    Cout = w_cm.shape[2] // 2
    ur, ui = nuft_encode(feat, x_in, modes1, modes2)            # (B, 2*m1*m2, Cin) x2
    fr, fi = _mix_modes(ur, ui, w_cm)
    fr = fr.reshape(B, 2 * modes1, modes2, Cout)
    fi = fi.reshape(B, 2 * modes1, modes2, Cout)
    out_ft = _assemble_out_ft(fr, fi, modes1, modes2, s1, s2)
    return jnp.fft.irfft2(out_ft, s=(s1, s2), axes=(1, 2)).astype(jnp.float32)


def _rfft_modes(uc, modes1, modes2):
    B, s1, s2, C = uc.shape
    u_ft = jnp.fft.rfft2(uc, axes=(1, 2))
    sel = jnp.concatenate([u_ft[:, :modes1, :modes2, :],
                           u_ft[:, s1 - modes1:, :modes2, :]], axis=1)
    sel = sel.reshape(B, 2 * modes1 * modes2, C)
    return jnp.real(sel).astype(jnp.float32), jnp.imag(sel).astype(jnp.float32)


def spectral_regular(uc, w_cm, modes1, modes2):
    """SpectralConv2d with x_in=x_out=None (rfft2 -> mode mix -> irfft2), NHWC in/out."""
    B, s1, s2, _ = uc.shape
    Cout = w_cm.shape[2] // 2
    ur, ui = _rfft_modes(uc, modes1, modes2)
    fr, fi = _mix_modes(ur, ui, w_cm)
    fr = fr.reshape(B, 2 * modes1, modes2, Cout)
    fi = fi.reshape(B, 2 * modes1, modes2, Cout)
    out_ft = _assemble_out_ft(fr, fi, modes1, modes2, s1, s2)
    return jnp.fft.irfft2(out_ft, s=(s1, s2), axes=(1, 2)).astype(jnp.float32)


def spectral_decode(uc, x_out, w_cm, w4, b4, modes1, modes2):
    """SpectralConv2d with x_out given (rfft2 -> mode mix -> nonuniform inverse FT + b4)."""
    B = uc.shape[0]
    Cout = w_cm.shape[2] // 2
    ur, ui = _rfft_modes(uc, modes1, modes2)
    fr, fi = _mix_modes(ur, ui, w_cm)
    oft_r = fr.reshape(B, 2 * modes1, modes2, Cout)
    oft_i = fi.reshape(B, 2 * modes1, modes2, Cout)
    # Hermitian extension: u_ft[..., 1:].flip(x, y).conj(), concatenated along y.
    ext_r = jnp.flip(oft_r[:, :, 1:, :], axis=(1, 2))
    ext_i = -jnp.flip(oft_i[:, :, 1:, :], axis=(1, 2))
    full_r = jnp.concatenate([oft_r, ext_r], axis=2).reshape(B, -1, Cout)
    full_i = jnp.concatenate([oft_i, ext_i], axis=2).reshape(B, -1, Cout)
    return nuft_decode(full_r, full_i, x_out, w4, b4, modes1, modes2)   # (B, N, Cout)


# ----------------------------------------------------------------------------- params

def _linear_params(key, cin, cout):
    k1, k2 = jax.random.split(key)
    bound = 1.0 / math.sqrt(cin)
    w = jax.random.uniform(k1, (cin, cout), jnp.float32, -bound, bound)   # stored (Cin, Cout)
    b = jax.random.uniform(k2, (cout,), jnp.float32, -bound, bound)
    return w, b


def _spectral_params(key, cin, cout, modes1, modes2):
    ks = jax.random.split(key, 4)
    scale = 1.0 / (cin * cout)
    shape = (cin, cout, modes1, modes2)
    # (w1_real, w1_imag, w2_real, w2_imag), matching torch.rand(..., dtype=cfloat) * scale.
    return tuple(scale * jax.random.uniform(k, shape, jnp.float32) for k in ks)


def init_params(key, modes1, modes2, width, in_channels, out_channels):
    ks = jax.random.split(key, 16)
    return {
        'fc0': _linear_params(ks[0], in_channels, width),
        'conv0': _spectral_params(ks[1], width, width, modes1, modes2),
        'conv1': _spectral_params(ks[2], width, width, modes1, modes2),
        'conv2': _spectral_params(ks[3], width, width, modes1, modes2),
        'conv3': _spectral_params(ks[4], width, width, modes1, modes2),
        'conv4': _spectral_params(ks[5], width, width, modes1, modes2),
        'w1': _linear_params(ks[6], width, width),
        'w2': _linear_params(ks[7], width, width),
        'w3': _linear_params(ks[8], width, width),
        'b0': _linear_params(ks[9], 2, width),
        'b1': _linear_params(ks[10], 2, width),
        'b2': _linear_params(ks[11], 2, width),
        'b3': _linear_params(ks[12], 2, width),
        'b4': _linear_params(ks[13], 2, width),
        'fc1': _linear_params(ks[14], width, 128),
        'fc2': _linear_params(ks[15], 128, out_channels),
    }


def _stack_cmul_weights(w1r, w1i, w2r, w2i):
    """(Cin,Cout,m1,m2) r/i pairs -> (2*m1*m2, 2Cin, 2Cout): rows [from_real; from_imag],
    cols [to_real | to_imag], i.e. [[wr, wi], [-wi, wr]] per mode."""
    def per(wr, wi):
        cin, cout = wr.shape[0], wr.shape[1]
        wr = jnp.transpose(wr, (2, 3, 0, 1)).reshape(-1, cin, cout)
        wi = jnp.transpose(wi, (2, 3, 0, 1)).reshape(-1, cin, cout)
        top = jnp.concatenate([wr, wi], axis=2)
        bot = jnp.concatenate([-wi, wr], axis=2)
        return jnp.concatenate([top, bot], axis=1)
    return jnp.concatenate([per(w1r, w1i), per(w2r, w2i)], axis=0).astype(jnp.float32)


def prepare_params(p, fold):
    """One-time preprocessing: mode-stacked complex-mix weights, lane-folded (kron'd)
    1x1-conv / fc weights, tiled / pre-summed biases. Keeps all per-call casts,
    transposes and concats out of the jitted forward."""
    F = fold

    def kron_w(w):
        w = w.astype(jnp.float32)
        return w if F == 1 else jnp.kron(jnp.eye(F, dtype=jnp.float32), w)

    def tile_b(b):
        return jnp.tile(b.astype(jnp.float32), F).reshape(1, -1)

    out = {}
    w0, b0 = p['fc0']
    out['fc0'] = (kron_w(w0), tile_b(b0))
    for cname in ('conv0', 'conv1', 'conv2', 'conv3', 'conv4'):
        out[cname] = _stack_cmul_weights(*p[cname])
    wb, bb = p['b0']
    out['blk0'] = (kron_w(wb), tile_b(bb))
    for i, (wname, bname) in enumerate((('w1', 'b1'), ('w2', 'b2'), ('w3', 'b3')), start=1):
        wk, bk = p[wname]
        wb, bb = p[bname]
        out['blk%d' % i] = (kron_w(wk), kron_w(wb), tile_b(bk + bb))   # biases pre-summed
    w4, b4 = p['b4']
    out['b4'] = (w4.astype(jnp.float32), b4.reshape(1, -1).astype(jnp.float32))
    w1, b1 = p['fc1']
    w2, b2 = p['fc2']
    out['head'] = (kron_w(w1), tile_b(b1), kron_w(w2), tile_b(b2))
    return out


# ----------------------------------------------------------------------------- forward

def fno2d_forward(prep, u, modes1, modes2, width, s1, s2, fold):
    """u: (B, N, 2) point cloud; returns (B, N, out_channels). is_mesh=True semantics."""
    B, N, in_ch = u.shape
    F = fold
    x_in = u
    x_out = u
    Ms = (B * s1 * s2) // F           # folded spatial rows
    Mp = (B * N) // F                 # folded point rows

    # get_grid (channels-last), row-folded (free row-major reshape)
    gx = jnp.linspace(0.0, 1.0, s1, dtype=jnp.float32).reshape(1, s1, 1, 1)
    gy = jnp.linspace(0.0, 1.0, s2, dtype=jnp.float32).reshape(1, 1, s2, 1)
    grid = jnp.concatenate([jnp.broadcast_to(gx, (B, s1, s2, 1)),
                            jnp.broadcast_to(gy, (B, s1, s2, 1))], axis=-1)
    grid_f = grid.reshape(Ms, 2 * F)

    # fc0 (lane-folded)
    w0f, b0f = prep['fc0']
    feat = pallas_linear(u.astype(jnp.float32).reshape(Mp, in_ch * F), w0f, b0f)
    feat = feat.reshape(B, N, width)

    # block 0: conv0 (nonuniform FT encode) + b0(grid) + GELU (fused, lane-folded)
    uc1 = spectral_encode(feat, x_in, prep['conv0'], modes1, modes2, s1, s2)  # (B,s1,s2,width)
    wbf, bbf = prep['blk0']
    uc4d = fused_block0(uc1.reshape(Ms, -1), grid_f, wbf, bbf).reshape(B, s1, s2, width)

    # blocks 1..3: spectral conv + 1x1 conv + grid bias + GELU (fully fused, lane-folded)
    for i, cname in enumerate(('conv1', 'conv2', 'conv3'), start=1):
        spec = spectral_regular(uc4d, prep[cname], modes1, modes2)
        wkf, wbf, bf = prep['blk%d' % i]
        uc4d = fused_block(spec.reshape(Ms, -1), uc4d.reshape(Ms, -1), grid_f,
                           wkf, wbf, bf).reshape(B, s1, s2, width)

    # conv4 (nonuniform inverse FT decode) with fused b4(x_out) -> (B, N, width)
    w4, b4 = prep['b4']
    uo = spectral_decode(uc4d, x_out, prep['conv4'], w4, b4, modes1, modes2)

    # fc1 -> GELU -> fc2 (fused head, lane-folded)
    w1f, b1f, w2f, b2f = prep['head']
    out = mlp_head(uo.reshape(Mp, -1), w1f, b1f, w2f, b2f)
    return out.reshape(B, N, -1)


# ----------------------------------------------------------------------------- main

if __name__ == "__main__":
    modes1 = modes2 = 4
    width = 32
    in_channels = 2
    out_channels = 1
    s1 = s2 = 16
    B, N = 2, 64

    key = jax.random.PRNGKey(0)
    pkey, xkey = jax.random.split(key)
    raw = init_params(pkey, modes1, modes2, width, in_channels, out_channels)
    u = jax.random.uniform(xkey, (B, N, in_channels), jnp.float32)

    fold = _pick_fold(width, B, N, s1, s2)
    prep = prepare_params(raw, fold)                  # one-time, outside the jitted forward
    fwd = jax.jit(lambda p, x: fno2d_forward(p, x, modes1, modes2, width, s1, s2, fold))
    out = fwd(prep, u)
    jax.block_until_ready(out)
    assert out.shape == (B, N, out_channels), out.shape
    assert out.dtype == jnp.float32
    print("KERNEL_OK")
</pallas_src>

<mosaic_0001>
module attributes {stable_mosaic.version = 11 : i64} {
  func.func @_trig_probe_kernel(%arg0: memref<8x2xf32, #tpu.memory_space<vmem>>, %arg1: memref<2x128xf32, #tpu.memory_space<vmem>>, %arg2: memref<8x128xf32, #tpu.memory_space<vmem>>) attributes {dimension_semantics = [], scalar_prefetch = 0 : i64, scratch_operands = 0 : i64, tpu.core_type = #tpu.core_type<tc>} {
    %c0 = arith.constant 0 : index
    %c0_0 = arith.constant 0 : index
    %0 = vector.load %arg0[%c0, %c0_0] : memref<8x2xf32, #tpu.memory_space<vmem>>, vector<8x1xf32>
    %c0_1 = arith.constant 0 : index
    %c0_2 = arith.constant 0 : index
    %1 = vector.load %arg1[%c0_1, %c0_2] : memref<2x128xf32, #tpu.memory_space<vmem>>, vector<1x128xf32>
    %2 = vector.broadcast %0 : vector<8x1xf32> to vector<8x128xf32>
    %3 = vector.broadcast %1 : vector<1x128xf32> to vector<8x128xf32>
    %4 = arith.mulf %2, %3 : vector<8x128xf32>
    %c0_3 = arith.constant 0 : index
    %c1 = arith.constant 1 : index
    %5 = vector.load %arg0[%c0_3, %c1] : memref<8x2xf32, #tpu.memory_space<vmem>>, vector<8x1xf32>
    %c1_4 = arith.constant 1 : index
    %c0_5 = arith.constant 0 : index
    %6 = vector.load %arg1[%c1_4, %c0_5] : memref<2x128xf32, #tpu.memory_space<vmem>>, vector<1x128xf32>
    %7 = vector.broadcast %5 : vector<8x1xf32> to vector<8x128xf32>
    %8 = vector.broadcast %6 : vector<1x128xf32> to vector<8x128xf32>
    %9 = arith.mulf %7, %8 : vector<8x128xf32>
    %10 = arith.addf %4, %9 : vector<8x128xf32>
    %11 = math.cos %10 : vector<8x128xf32>
    %12 = math.sin %10 : vector<8x128xf32>
    %13 = arith.addf %11, %12 : vector<8x128xf32>
    %c0_6 = arith.constant 0 : index
    %c0_7 = arith.constant 0 : index
    %14 = vector.load %arg2[%c0_6, %c0_7] : memref<8x128xf32, #tpu.memory_space<vmem>>, vector<8x128xf32>
    tpu.vector_store %arg2[%c0_6, %c0_7], %13 {strides = array<i32>} : memref<8x128xf32, #tpu.memory_space<vmem>>, vector<8x128xf32>,
    return
  }
}

module attributes {stable_mosaic.version = 11 : i64} {
  func.func @_nuft_encode_basis_kernel(%arg0: i32, %arg1: memref<1x32x64xf32, #tpu.memory_space<vmem>>, %arg2: memref<1x32x64xf32, #tpu.memory_space<vmem>>, %arg3: memref<1x64x32xf32, #tpu.memory_space<vmem>>, %arg4: memref<1x32x32xf32, #tpu.memory_space<vmem>>, %arg5: memref<1x32x32xf32, #tpu.memory_space<vmem>>) attributes {dimension_semantics = [#tpu.dimension_semantics<parallel>], iteration_bounds = array<i64: 2>, scalar_prefetch = 0 : i64, scratch_operands = 0 : i64, tpu.core_type = #tpu.core_type<tc>, window_params = [{transform_indices = @transform_0, window_bounds = array<i64: 1, 32, 64>}, {transform_indices = @transform_1, window_bounds = array<i64: 1, 32, 64>}, {transform_indices = @transform_2, window_bounds = array<i64: 1, 64, 32>}, {transform_indices = @transform_3, window_bounds = array<i64: 1, 32, 32>}, {transform_indices = @transform_4, window_bounds = array<i64: 1, 32, 32>}]} {
    %c0 = arith.constant 0 : index
    %c0_0 = arith.constant 0 : index
    %c0_1 = arith.constant 0 : index
    %0 = vector.load %arg3[%c0, %c0_0, %c0_1] : memref<1x64x32xf32, #tpu.memory_space<vmem>>, vector<1x64x32xf32>
    %1 = vector.shape_cast %0 : vector<1x64x32xf32> to vector<64x32xf32>
    %c0_2 = arith.constant 0 : index
    %c0_3 = arith.constant 0 : index
    %c0_4 = arith.constant 0 : index
    %2 = vector.load %arg1[%c0_2, %c0_3, %c0_4] : memref<1x32x64xf32, #tpu.memory_space<vmem>>, vector<1x32x64xf32>
    %3 = vector.shape_cast %2 : vector<1x32x64xf32> to vector<32x64xf32>
    %cst = arith.constant dense<0.000000e+00> : vector<32x32xf32>
    %4 = tpu.matmul %3, %1, %cst {dimension_numbers = #tpu.dot_dimension_numbers<[1], [0], [0], [1], [0, 0, 1, 1], [], []>} : vector<32x64xf32>, vector<64x32xf32>, vector<32x32xf32> -> vector<32x32xf32>
    %c0_5 = arith.constant 0 : index
    %c0_6 = arith.constant 0 : index
    %c0_7 = arith.constant 0 : index
    %5 = vector.load %arg4[%c0_5, %c0_6, %c0_7] : memref<1x32x32xf32, #tpu.memory_space<vmem>>, vector<1x32x32xf32>
    %6 = vector.shape_cast %5 : vector<1x32x32xf32> to vector<32x32xf32>
    %7 = vector.shape_cast %4 : vector<32x32xf32> to vector<1x32x32xf32>
    tpu.vector_store %arg4[%c0_5, %c0_6, %c0_7], %7 {strides = array<i32>} : memref<1x32x32xf32, #tpu.memory_space<vmem>>, vector<1x32x32xf32>,
    %c0_8 = arith.constant 0 : index
    %c0_9 = arith.constant 0 : index
    %c0_10 = arith.constant 0 : index
    %8 = vector.load %arg2[%c0_8, %c0_9, %c0_10] : memref<1x32x64xf32, #tpu.memory_space<vmem>>, vector<1x32x64xf32>
    %9 = vector.shape_cast %8 : vector<1x32x64xf32> to vector<32x64xf32>
    %cst_11 = arith.constant dense<0.000000e+00> : vector<32x32xf32>
    %10 = tpu.matmul %9, %1, %cst_11 {dimension_numbers = #tpu.dot_dimension_numbers<[1], [0], [0], [1], [0, 0, 1, 1], [], []>} : vector<32x64xf32>, vector<64x32xf32>, vector<32x32xf32> -> vector<32x32xf32>
    %c0_12 = arith.constant 0 : index
    %c0_13 = arith.constant 0 : index
    %c0_14 = arith.constant 0 : index
    %11 = vector.load %arg5[%c0_12, %c0_13, %c0_14] : memref<1x32x32xf32, #tpu.memory_space<vmem>>, vector<1x32x32xf32>
    %12 = vector.shape_cast %11 : vector<1x32x32xf32> to vector<32x32xf32>
    %13 = vector.shape_cast %10 : vector<32x32xf32> to vector<1x32x32xf32>
    tpu.vector_store %arg5[%c0_12, %c0_13, %c0_14], %13 {strides = array<i32>} : memref<1x32x32xf32, #tpu.memory_space<vmem>>, vector<1x32x32xf32>,
    return
  }
  func.func @transform_0(%arg0: i32) -> (i32, i32, i32) {
    %c0_i32 = arith.constant 0 : i32
    %c0_i32_0 = arith.constant 0 : i32
    %c0_i32_1 = arith.constant 0 : i32
    return %arg0, %c0_i32, %c0_i32_0 : i32, i32, i32
  }
  func.func @transform_1(%arg0: i32) -> (i32, i32, i32) {
    %c0_i32 = arith.constant 0 : i32
    %c0_i32_0 = arith.constant 0 : i32
    %c0_i32_1 = arith.constant 0 : i32
    return %arg0, %c0_i32, %c0_i32_0 : i32, i32, i32
  }
  func.func @transform_2(%arg0: i32) -> (i32, i32, i32) {
    %c0_i32 = arith.constant 0 : i32
    %c0_i32_0 = arith.constant 0 : i32
    %c0_i32_1 = arith.constant 0 : i32
    return %arg0, %c0_i32, %c0_i32_0 : i32, i32, i32
  }
  func.func @transform_3(%arg0: i32) -> (i32, i32, i32) {
    %c0_i32 = arith.constant 0 : i32
    %c0_i32_0 = arith.constant 0 : i32
    %c0_i32_1 = arith.constant 0 : i32
    return %arg0, %c0_i32, %c0_i32_0 : i32, i32, i32
  }
  func.func @transform_4(%arg0: i32) -> (i32, i32, i32) {
    %c0_i32 = arith.constant 0 : i32
    %c0_i32_0 = arith.constant 0 : i32
    %c0_i32_1 = arith.constant 0 : i32
    return %arg0, %c0_i32, %c0_i32_0 : i32, i32, i32
  }
}

module attributes {stable_mosaic.version = 11 : i64} {
  func.func @_fc_kernel(%arg0: i32, %arg1: memref<32x8xf32, #tpu.memory_space<vmem>>, %arg2: memref<8x128xf32, #tpu.memory_space<vmem>>, %arg3: memref<1x128xf32, #tpu.memory_space<vmem>>, %arg4: memref<32x128xf32, #tpu.memory_space<vmem>>) attributes {dimension_semantics = [#tpu.dimension_semantics<parallel>], iteration_bounds = array<i64: 1>, scalar_prefetch = 0 : i64, scratch_operands = 0 : i64, tpu.core_type = #tpu.core_type<tc>, window_params = [{transform_indices = @transform_0, window_bounds = array<i64: 32, 8>}, {pipeline_mode = #tpu.pipeline_mode<synchronous>, transform_indices = @transform_1, window_bounds = array<i64: 8, 128>}, {pipeline_mode = #tpu.pipeline_mode<synchronous>, transform_indices = @transform_2, window_bounds = array<i64: 1, 128>}, {transform_indices = @transform_3, window_bounds = array<i64: 32, 128>}]} {
    %c0 = arith.constant 0 : index
    %c0_0 = arith.constant 0 : index
    %0 = vector.load %arg1[%c0, %c0_0] : memref<32x8xf32, #tpu.memory_space<vmem>>, vector<32x8xf32>
    %c0_1 = arith.constant 0 : index
    %c0_2 = arith.constant 0 : index
    %1 = vector.load %arg2[%c0_1, %c0_2] : memref<8x128xf32, #tpu.memory_space<vmem>>, vector<8x128xf32>
    %cst = arith.constant dense<0.000000e+00> : vector<32x128xf32>
    %2 = tpu.matmul %0, %1, %cst {dimension_numbers = #tpu.dot_dimension_numbers<[1], [0], [0], [1], [0, 0, 1, 1], [], []>} : vector<32x8xf32>, vector<8x128xf32>, vector<32x128xf32> -> vector<32x128xf32>
    %c0_3 = arith.constant 0 : index
    %c0_4 = arith.constant 0 : index
    %3 = vector.load %arg3[%c0_3, %c0_4] : memref<1x128xf32, #tpu.memory_space<vmem>>, vector<1x128xf32>
    %4 = vector.broadcast %3 : vector<1x128xf32> to vector<32x128xf32>
    %5 = arith.addf %2, %4 : vector<32x128xf32>
    %c0_5 = arith.constant 0 : index
    %c0_6 = arith.constant 0 : index
    %6 = vector.load %arg4[%c0_5, %c0_6] : memref<32x128xf32, #tpu.memory_space<vmem>>, vector<32x128xf32>
    tpu.vector_store %arg4[%c0_5, %c0_6], %5 {strides = array<i32>} : memref<32x128xf32, #tpu.memory_space<vmem>>, vector<32x128xf32>,
    return
  }
  func.func @transform_0(%arg0: i32) -> (i32, i32) {
    %c0_i32 = arith.constant 0 : i32
    %c0_i32_0 = arith.constant 0 : i32
    return %arg0, %c0_i32 : i32, i32
  }
  func.func @transform_1(%arg0: i32) -> (i32, i32) {
    %c0_i32 = arith.constant 0 : i32
    %c0_i32_0 = arith.constant 0 : i32
    %c0_i32_1 = arith.constant 0 : i32
    return %c0_i32, %c0_i32_0 : i32, i32
  }
  func.func @transform_2(%arg0: i32) -> (i32, i32) {
    %c0_i32 = arith.constant 0 : i32
    %c0_i32_0 = arith.constant 0 : i32
    %c0_i32_1 = arith.constant 0 : i32
    return %c0_i32, %c0_i32_0 : i32, i32
  }
  func.func @transform_3(%arg0: i32) -> (i32, i32) {
    %c0_i32 = arith.constant 0 : i32
    %c0_i32_0 = arith.constant 0 : i32
    return %arg0, %c0_i32 : i32, i32
  }
}

module attributes {stable_mosaic.version = 11 : i64} {
  func.func @_cmul_kernel(%arg0: i32, %arg1: memref<16x2x64xf32, #tpu.memory_space<vmem>>, %arg2: memref<16x64x64xf32, #tpu.memory_space<vmem>>, %arg3: memref<16x2x64xf32, #tpu.memory_space<vmem>>) attributes {dimension_semantics = [#tpu.dimension_semantics<parallel>], iteration_bounds = array<i64: 2>, scalar_prefetch = 0 : i64, scratch_operands = 0 : i64, tpu.core_type = #tpu.core_type<tc>, window_params = [{transform_indices = @transform_0, window_bounds = array<i64: 16, 2, 64>}, {transform_indices = @transform_1, window_bounds = array<i64: 16, 64, 64>}, {transform_indices = @transform_2, window_bounds = array<i64: 16, 2, 64>}]} {
    %c0 = arith.constant 0 : index
    %c0_0 = arith.constant 0 : index
    %c0_1 = arith.constant 0 : index
    %0 = vector.load %arg1[%c0, %c0_0, %c0_1] : memref<16x2x64xf32, #tpu.memory_space<vmem>>, vector<16x2x64xf32>
    %c0_2 = arith.constant 0 : index
    %c0_3 = arith.constant 0 : index
    %c0_4 = arith.constant 0 : index
    %1 = vector.load %arg2[%c0_2, %c0_3, %c0_4] : memref<16x64x64xf32, #tpu.memory_space<vmem>>, vector<16x64x64xf32>
    "tpu.trace_start"() <{level = 10 : i32, message = "mbi,mio->mbo"}> : () -> ()
    %cst = arith.constant dense<0.000000e+00> : vector<16x2x64xf32>
    %2 = tpu.matmul %0, %1, %cst {dimension_numbers = #tpu.dot_dimension_numbers<[2], [1], [1], [2], [0, 0, 0, 1, 1, 2], [0], [0]>} : vector<16x2x64xf32>, vector<16x64x64xf32>, vector<16x2x64xf32> -> vector<16x2x64xf32>
    "tpu.trace_stop"() : () -> ()
    %c0_5 = arith.constant 0 : index
    %c0_6 = arith.constant 0 : index
    %c0_7 = arith.constant 0 : index
    %3 = vector.load %arg3[%c0_5, %c0_6, %c0_7] : memref<16x2x64xf32, #tpu.memory_space<vmem>>, vector<16x2x64xf32>
    tpu.vector_store %arg3[%c0_5, %c0_6, %c0_7], %2 {strides = array<i32>} : memref<16x2x64xf32, #tpu.memory_space<vmem>>, vector<16x2x64xf32>,
    return
  }
  func.func @transform_0(%arg0: i32) -> (i32, i32, i32) {
    %c0_i32 = arith.constant 0 : i32
    %c0_i32_0 = arith.constant 0 : i32
    %c0_i32_1 = arith.constant 0 : i32
    return %arg0, %c0_i32, %c0_i32_0 : i32, i32, i32
  }
  func.func @transform_1(%arg0: i32) -> (i32, i32, i32) {
    %c0_i32 = arith.constant 0 : i32
    %c0_i32_0 = arith.constant 0 : i32
    %c0_i32_1 = arith.constant 0 : i32
    return %arg0, %c0_i32, %c0_i32_0 : i32, i32, i32
  }
  func.func @transform_2(%arg0: i32) -> (i32, i32, i32) {
    %c0_i32 = arith.constant 0 : i32
    %c0_i32_0 = arith.constant 0 : i32
    %c0_i32_1 = arith.constant 0 : i32
    return %arg0, %c0_i32, %c0_i32_0 : i32, i32, i32
  }
}

module attributes {stable_mosaic.version = 11 : i64} {
  func.func @_block0_kernel(%arg0: i32, %arg1: memref<128x128xf32, #tpu.memory_space<vmem>>, %arg2: memref<128x8xf32, #tpu.memory_space<vmem>>, %arg3: memref<8x128xf32, #tpu.memory_space<vmem>>, %arg4: memref<1x128xf32, #tpu.memory_space<vmem>>, %arg5: memref<128x128xf32, #tpu.memory_space<vmem>>) attributes {dimension_semantics = [#tpu.dimension_semantics<parallel>], iteration_bounds = array<i64: 1>, scalar_prefetch = 0 : i64, scratch_operands = 0 : i64, tpu.core_type = #tpu.core_type<tc>, window_params = [{transform_indices = @transform_0, window_bounds = array<i64: 128, 128>}, {transform_indices = @transform_1, window_bounds = array<i64: 128, 8>}, {pipeline_mode = #tpu.pipeline_mode<synchronous>, transform_indices = @transform_2, window_bounds = array<i64: 8, 128>}, {pipeline_mode = #tpu.pipeline_mode<synchronous>, transform_indices = @transform_3, window_bounds = array<i64: 1, 128>}, {transform_indices = @transform_4, window_bounds = array<i64: 128, 128>}]} {
    %c0 = arith.constant 0 : index
    %c0_0 = arith.constant 0 : index
    %0 = vector.load %arg1[%c0, %c0_0] : memref<128x128xf32, #tpu.memory_space<vmem>>, vector<128x128xf32>
    %c0_1 = arith.constant 0 : index
    %c0_2 = arith.constant 0 : index
    %1 = vector.load %arg2[%c0_1, %c0_2] : memref<128x8xf32, #tpu.memory_space<vmem>>, vector<128x8xf32>
    %c0_3 = arith.constant 0 : index
    %c0_4 = arith.constant 0 : index
    %2 = vector.load %arg3[%c0_3, %c0_4] : memref<8x128xf32, #tpu.memory_space<vmem>>, vector<8x128xf32>
    %cst = arith.constant dense<0.000000e+00> : vector<128x128xf32>
    %3 = tpu.matmul %1, %2, %cst {dimension_numbers = #tpu.dot_dimension_numbers<[1], [0], [0], [1], [0, 0, 1, 1], [], []>} : vector<128x8xf32>, vector<8x128xf32>, vector<128x128xf32> -> vector<128x128xf32>
    %4 = arith.addf %0, %3 : vector<128x128xf32>
    %c0_5 = arith.constant 0 : index
    %c0_6 = arith.constant 0 : index
    %5 = vector.load %arg4[%c0_5, %c0_6] : memref<1x128xf32, #tpu.memory_space<vmem>>, vector<1x128xf32>
    %6 = vector.broadcast %5 : vector<1x128xf32> to vector<128x128xf32>
    %7 = arith.addf %4, %6 : vector<128x128xf32>
    %cst_7 = arith.constant 5.000000e-01 : f32
    %8 = vector.broadcast %cst_7 : f32 to vector<128x128xf32>
    %9 = arith.mulf %8, %7 : vector<128x128xf32>
    %cst_8 = arith.constant 0.707106769 : f32
    %10 = vector.broadcast %cst_8 : f32 to vector<128x128xf32>
    %11 = arith.mulf %7, %10 : vector<128x128xf32>
    %cst_9 = arith.constant 0.000000e+00 : f32
    %12 = vector.broadcast %cst_9 : f32 to vector<128x128xf32>
    %13 = arith.cmpf oge, %11, %12 : vector<128x128xf32>
    %cst_10 = arith.constant 1.000000e+00 : f32
    %cst_11 = arith.constant -1.000000e+00 : f32
    %14 = vector.broadcast %cst_10 : f32 to vector<128x128xf32>
    %15 = vector.broadcast %cst_11 : f32 to vector<128x128xf32>
    %16 = arith.select %13, %14, %15 : vector<128x128xi1>, vector<128x128xf32>
    %17 = math.absf %11 : vector<128x128xf32>
    %cst_12 = arith.constant 0.327591091 : f32
    %18 = vector.broadcast %cst_12 : f32 to vector<128x128xf32>
    %19 = arith.mulf %18, %17 : vector<128x128xf32>
    %cst_13 = arith.constant 1.000000e+00 : f32
    %20 = vector.broadcast %cst_13 : f32 to vector<128x128xf32>
    %21 = arith.addf %20, %19 : vector<128x128xf32>
    %cst_14 = arith.constant 1.000000e+00 : f32
    %22 = vector.broadcast %cst_14 : f32 to vector<128x128xf32>
    %23 = arith.divf %22, %21 : vector<128x128xf32>
    %cst_15 = arith.constant 1.06140542 : f32
    %24 = vector.broadcast %cst_15 : f32 to vector<128x128xf32>
    %25 = arith.mulf %23, %24 : vector<128x128xf32>
    %cst_16 = arith.constant -1.45315206 : f32
    %26 = vector.broadcast %cst_16 : f32 to vector<128x128xf32>
    %27 = arith.addf %26, %25 : vector<128x128xf32>
    %28 = arith.mulf %23, %27 : vector<128x128xf32>
    %cst_17 = arith.constant 1.42141378 : f32
    %29 = vector.broadcast %cst_17 : f32 to vector<128x128xf32>
    %30 = arith.addf %29, %28 : vector<128x128xf32>
    %31 = arith.mulf %23, %30 : vector<128x128xf32>
    %cst_18 = arith.constant -0.284496725 : f32
    %32 = vector.broadcast %cst_18 : f32 to vector<128x128xf32>
    %33 = arith.addf %32, %31 : vector<128x128xf32>
    %34 = arith.mulf %23, %33 : vector<128x128xf32>
    %cst_19 = arith.constant 0.254829586 : f32
    %35 = vector.broadcast %cst_19 : f32 to vector<128x128xf32>
    %36 = arith.addf %35, %34 : vector<128x128xf32>
    %37 = arith.mulf %23, %36 : vector<128x128xf32>
    %cst_20 = arith.constant 0.000000e+00 : f32
    %38 = vector.broadcast %cst_20 : f32 to vector<128x128xf32>
    %39 = arith.subf %38, %17 : vector<128x128xf32>
    %40 = arith.mulf %39, %17 : vector<128x128xf32>
    %41 = math.exp %40 : vector<128x128xf32>
    %42 = arith.mulf %37, %41 : vector<128x128xf32>
    %cst_21 = arith.constant 1.000000e+00 : f32
    %43 = vector.broadcast %cst_21 : f32 to vector<128x128xf32>
    %44 = arith.subf %43, %42 : vector<128x128xf32>
    %45 = arith.mulf %16, %44 : vector<128x128xf32>
    %cst_22 = arith.constant 1.000000e+00 : f32
    %46 = vector.broadcast %cst_22 : f32 to vector<128x128xf32>
    %47 = arith.addf %46, %45 : vector<128x128xf32>
    %48 = arith.mulf %9, %47 : vector<128x128xf32>
    %c0_23 = arith.constant 0 : index
    %c0_24 = arith.constant 0 : index
    %49 = vector.load %arg5[%c0_23, %c0_24] : memref<128x128xf32, #tpu.memory_space<vmem>>, vector<128x128xf32>
    tpu.vector_store %arg5[%c0_23, %c0_24], %48 {strides = array<i32>} : memref<128x128xf32, #tpu.memory_space<vmem>>, vector<128x128xf32>,
    return
  }
  func.func @transform_0(%arg0: i32) -> (i32, i32) {
    %c0_i32 = arith.constant 0 : i32
    %c0_i32_0 = arith.constant 0 : i32
    return %arg0, %c0_i32 : i32, i32
  }
  func.func @transform_1(%arg0: i32) -> (i32, i32) {
    %c0_i32 = arith.constant 0 : i32
    %c0_i32_0 = arith.constant 0 : i32
    return %arg0, %c0_i32 : i32, i32
  }
  func.func @transform_2(%arg0: i32) -> (i32, i32) {
    %c0_i32 = arith.constant 0 : i32
    %c0_i32_0 = arith.constant 0 : i32
    %c0_i32_1 = arith.constant 0 : i32
    return %c0_i32, %c0_i32_0 : i32, i32
  }
  func.func @transform_3(%arg0: i32) -> (i32, i32) {
    %c0_i32 = arith.constant 0 : i32
    %c0_i32_0 = arith.constant 0 : i32
    %c0_i32_1 = arith.constant 0 : i32
    return %c0_i32, %c0_i32_0 : i32, i32
  }
  func.func @transform_4(%arg0: i32) -> (i32, i32) {
    %c0_i32 = arith.constant 0 : i32
    %c0_i32_0 = arith.constant 0 : i32
    return %arg0, %c0_i32 : i32, i32
  }
}

module attributes {stable_mosaic.version = 11 : i64} {
  func.func @_cmul_kernel(%arg0: i32, %arg1: memref<16x2x64xf32, #tpu.memory_space<vmem>>, %arg2: memref<16x64x64xf32, #tpu.memory_space<vmem>>, %arg3: memref<16x2x64xf32, #tpu.memory_space<vmem>>) attributes {dimension_semantics = [#tpu.dimension_semantics<parallel>], iteration_bounds = array<i64: 2>, scalar_prefetch = 0 : i64, scratch_operands = 0 : i64, tpu.core_type = #tpu.core_type<tc>, window_params = [{transform_indices = @transform_0, window_bounds = array<i64: 16, 2, 64>}, {transform_indices = @transform_1, window_bounds = array<i64: 16, 64, 64>}, {transform_indices = @transform_2, window_bounds = array<i64: 16, 2, 64>}]} {
    %c0 = arith.constant 0 : index
    %c0_0 = arith.constant 0 : index
    %c0_1 = arith.constant 0 : index
    %0 = vector.load %arg1[%c0, %c0_0, %c0_1] : memref<16x2x64xf32, #tpu.memory_space<vmem>>, vector<16x2x64xf32>
    %c0_2 = arith.constant 0 : index
    %c0_3 = arith.constant 0 : index
    %c0_4 = arith.constant 0 : index
    %1 = vector.load %arg2[%c0_2, %c0_3, %c0_4] : memref<16x64x64xf32, #tpu.memory_space<vmem>>, vector<16x64x64xf32>
    "tpu.trace_start"() <{level = 10 : i32, message = "mbi,mio->mbo"}> : () -> ()
    %cst = arith.constant dense<0.000000e+00> : vector<16x2x64xf32>
    %2 = tpu.matmul %0, %1, %cst {dimension_numbers = #tpu.dot_dimension_numbers<[2], [1], [1], [2], [0, 0, 0, 1, 1, 2], [0], [0]>} : vector<16x2x64xf32>, vector<16x64x64xf32>, vector<16x2x64xf32> -> vector<16x2x64xf32>
    "tpu.trace_stop"() : () -> ()
    %c0_5 = arith.constant 0 : index
    %c0_6 = arith.constant 0 : index
    %c0_7 = arith.constant 0 : index
    %3 = vector.load %arg3[%c0_5, %c0_6, %c0_7] : memref<16x2x64xf32, #tpu.memory_space<vmem>>, vector<16x2x64xf32>
    tpu.vector_store %arg3[%c0_5, %c0_6, %c0_7], %2 {strides = array<i32>} : memref<16x2x64xf32, #tpu.memory_space<vmem>>, vector<16x2x64xf32>,
    return
  }
  func.func @transform_0(%arg0: i32) -> (i32, i32, i32) {
    %c0_i32 = arith.constant 0 : i32
    %c0_i32_0 = arith.constant 0 : i32
    %c0_i32_1 = arith.constant 0 : i32
    return %arg0, %c0_i32, %c0_i32_0 : i32, i32, i32
  }
  func.func @transform_1(%arg0: i32) -> (i32, i32, i32) {
    %c0_i32 = arith.constant 0 : i32
    %c0_i32_0 = arith.constant 0 : i32
    %c0_i32_1 = arith.constant 0 : i32
    return %arg0, %c0_i32, %c0_i32_0 : i32, i32, i32
  }
  func.func @transform_2(%arg0: i32) -> (i32, i32, i32) {
    %c0_i32 = arith.constant 0 : i32
    %c0_i32_0 = arith.constant 0 : i32
    %c0_i32_1 = arith.constant 0 : i32
    return %arg0, %c0_i32, %c0_i32_0 : i32, i32, i32
  }
}

module attributes {stable_mosaic.version = 11 : i64} {
  func.func @_block_kernel(%arg0: i32, %arg1: memref<128x128xf32, #tpu.memory_space<vmem>>, %arg2: memref<128x128xf32, #tpu.memory_space<vmem>>, %arg3: memref<128x8xf32, #tpu.memory_space<vmem>>, %arg4: memref<128x128xf32, #tpu.memory_space<vmem>>, %arg5: memref<8x128xf32, #tpu.memory_space<vmem>>, %arg6: memref<1x128xf32, #tpu.memory_space<vmem>>, %arg7: memref<128x128xf32, #tpu.memory_space<vmem>>) attributes {dimension_semantics = [#tpu.dimension_semantics<parallel>], iteration_bounds = array<i64: 1>, scalar_prefetch = 0 : i64, scratch_operands = 0 : i64, tpu.core_type = #tpu.core_type<tc>, window_params = [{transform_indices = @transform_0, window_bounds = array<i64: 128, 128>}, {transform_indices = @transform_1, window_bounds = array<i64: 128, 128>}, {transform_indices = @transform_2, window_bounds = array<i64: 128, 8>}, {pipeline_mode = #tpu.pipeline_mode<synchronous>, transform_indices = @transform_3, window_bounds = array<i64: 128, 128>}, {pipeline_mode = #tpu.pipeline_mode<synchronous>, transform_indices = @transform_4, window_bounds = array<i64: 8, 128>}, {pipeline_mode = #tpu.pipeline_mode<synchronous>, transform_indices = @transform_5, window_bounds = array<i64: 1, 128>}, {transform_indices = @transform_6, window_bounds = array<i64: 128, 128>}]} {
    %c0 = arith.constant 0 : index
    %c0_0 = arith.constant 0 : index
    %0 = vector.load %arg1[%c0, %c0_0] : memref<128x128xf32, #tpu.memory_space<vmem>>, vector<128x128xf32>
    %c0_1 = arith.constant 0 : index
    %c0_2 = arith.constant 0 : index
    %1 = vector.load %arg2[%c0_1, %c0_2] : memref<128x128xf32, #tpu.memory_space<vmem>>, vector<128x128xf32>
    %c0_3 = arith.constant 0 : index
    %c0_4 = arith.constant 0 : index
    %2 = vector.load %arg4[%c0_3, %c0_4] : memref<128x128xf32, #tpu.memory_space<vmem>>, vector<128x128xf32>
    %cst = arith.constant dense<0.000000e+00> : vector<128x128xf32>
    %3 = tpu.matmul %1, %2, %cst {dimension_numbers = #tpu.dot_dimension_numbers<[1], [0], [0], [1], [0, 0, 1, 1], [], []>} : vector<128x128xf32>, vector<128x128xf32>, vector<128x128xf32> -> vector<128x128xf32>
    %4 = arith.addf %0, %3 : vector<128x128xf32>
    %c0_5 = arith.constant 0 : index
    %c0_6 = arith.constant 0 : index
    %5 = vector.load %arg3[%c0_5, %c0_6] : memref<128x8xf32, #tpu.memory_space<vmem>>, vector<128x8xf32>
    %c0_7 = arith.constant 0 : index
    %c0_8 = arith.constant 0 : index
    %6 = vector.load %arg5[%c0_7, %c0_8] : memref<8x128xf32, #tpu.memory_space<vmem>>, vector<8x128xf32>
    %cst_9 = arith.constant dense<0.000000e+00> : vector<128x128xf32>
    %7 = tpu.matmul %5, %6, %cst_9 {dimension_numbers = #tpu.dot_dimension_numbers<[1], [0], [0], [1], [0, 0, 1, 1], [], []>} : vector<128x8xf32>, vector<8x128xf32>, vector<128x128xf32> -> vector<128x128xf32>
    %8 = arith.addf %4, %7 : vector<128x128xf32>
    %c0_10 = arith.constant 0 : index
    %c0_11 = arith.constant 0 : index
    %9 = vector.load %arg6[%c0_10, %c0_11] : memref<1x128xf32, #tpu.memory_space<vmem>>, vector<1x128xf32>
    %10 = vector.broadcast %9 : vector<1x128xf32> to vector<128x128xf32>
    %11 = arith.addf %8, %10 : vector<128x128xf32>
    %cst_12 = arith.constant 5.000000e-01 : f32
    %12 = vector.broadcast %cst_12 : f32 to vector<128x128xf32>
    %13 = arith.mulf %12, %11 : vector<128x128xf32>
    %cst_13 = arith.constant 0.707106769 : f32
    %14 = vector.broadcast %cst_13 : f32 to vector<128x128xf32>
    %15 = arith.mulf %11, %14 : vector<128x128xf32>
    %cst_14 = arith.constant 0.000000e+00 : f32
    %16 = vector.broadcast %cst_14 : f32 to vector<128x128xf32>
    %17 = arith.cmpf oge, %15, %16 : vector<128x128xf32>
    %cst_15 = arith.constant 1.000000e+00 : f32
    %cst_16 = arith.constant -1.000000e+00 : f32
    %18 = vector.broadcast %cst_15 : f32 to vector<128x128xf32>
    %19 = vector.broadcast %cst_16 : f32 to vector<128x128xf32>
    %20 = arith.select %17, %18, %19 : vector<128x128xi1>, vector<128x128xf32>
    %21 = math.absf %15 : vector<128x128xf32>
    %cst_17 = arith.constant 0.327591091 : f32
    %22 = vector.broadcast %cst_17 : f32 to vector<128x128xf32>
    %23 = arith.mulf %22, %21 : vector<128x128xf32>
    %cst_18 = arith.constant 1.000000e+00 : f32
    %24 = vector.broadcast %cst_18 : f32 to vector<128x128xf32>
    %25 = arith.addf %24, %23 : vector<128x128xf32>
    %cst_19 = arith.constant 1.000000e+00 : f32
    %26 = vector.broadcast %cst_19 : f32 to vector<128x128xf32>
    %27 = arith.divf %26, %25 : vector<128x128xf32>
    %cst_20 = arith.constant 1.06140542 : f32
    %28 = vector.broadcast %cst_20 : f32 to vector<128x128xf32>
    %29 = arith.mulf %27, %28 : vector<128x128xf32>
    %cst_21 = arith.constant -1.45315206 : f32
    %30 = vector.broadcast %cst_21 : f32 to vector<128x128xf32>
    %31 = arith.addf %30, %29 : vector<128x128xf32>
    %32 = arith.mulf %27, %31 : vector<128x128xf32>
    %cst_22 = arith.constant 1.42141378 : f32
    %33 = vector.broadcast %cst_22 : f32 to vector<128x128xf32>
    %34 = arith.addf %33, %32 : vector<128x128xf32>
    %35 = arith.mulf %27, %34 : vector<128x128xf32>
    %cst_23 = arith.constant -0.284496725 : f32
    %36 = vector.broadcast %cst_23 : f32 to vector<128x128xf32>
    %37 = arith.addf %36, %35 : vector<128x128xf32>
    %38 = arith.mulf %27, %37 : vector<128x128xf32>
    %cst_24 = arith.constant 0.254829586 : f32
    %39 = vector.broadcast %cst_24 : f32 to vector<128x128xf32>
    %40 = arith.addf %39, %38 : vector<128x128xf32>
    %41 = arith.mulf %27, %40 : vector<128x128xf32>
    %cst_25 = arith.constant 0.000000e+00 : f32
    %42 = vector.broadcast %cst_25 : f32 to vector<128x128xf32>
    %43 = arith.subf %42, %21 : vector<128x128xf32>
    %44 = arith.mulf %43, %21 : vector<128x128xf32>
    %45 = math.exp %44 : vector<128x128xf32>
    %46 = arith.mulf %41, %45 : vector<128x128xf32>
    %cst_26 = arith.constant 1.000000e+00 : f32
    %47 = vector.broadcast %cst_26 : f32 to vector<128x128xf32>
    %48 = arith.subf %47, %46 : vector<128x128xf32>
    %49 = arith.mulf %20, %48 : vector<128x128xf32>
    %cst_27 = arith.constant 1.000000e+00 : f32
    %50 = vector.broadcast %cst_27 : f32 to vector<128x128xf32>
    %51 = arith.addf %50, %49 : vector<128x128xf32>
    %52 = arith.mulf %13, %51 : vector<128x128xf32>
    %c0_28 = arith.constant 0 : index
    %c0_29 = arith.constant 0 : index
    %53 = vector.load %arg7[%c0_28, %c0_29] : memref<128x128xf32, #tpu.memory_space<vmem>>, vector<128x128xf32>
    tpu.vector_store %arg7[%c0_28, %c0_29], %52 {strides = array<i32>} : memref<128x128xf32, #tpu.memory_space<vmem>>, vector<128x128xf32>,
    return
  }
  func.func @transform_0(%arg0: i32) -> (i32, i32) {
    %c0_i32 = arith.constant 0 : i32
    %c0_i32_0 = arith.constant 0 : i32
    return %arg0, %c0_i32 : i32, i32
  }
  func.func @transform_1(%arg0: i32) -> (i32, i32) {
    %c0_i32 = arith.constant 0 : i32
    %c0_i32_0 = arith.constant 0 : i32
    return %arg0, %c0_i32 : i32, i32
  }
  func.func @transform_2(%arg0: i32) -> (i32, i32) {
    %c0_i32 = arith.constant 0 : i32
    %c0_i32_0 = arith.constant 0 : i32
    return %arg0, %c0_i32 : i32, i32
  }
  func.func @transform_3(%arg0: i32) -> (i32, i32) {
    %c0_i32 = arith.constant 0 : i32
    %c0_i32_0 = arith.constant 0 : i32
    %c0_i32_1 = arith.constant 0 : i32
    return %c0_i32, %c0_i32_0 : i32, i32
  }
  func.func @transform_4(%arg0: i32) -> (i32, i32) {
    %c0_i32 = arith.constant 0 : i32
    %c0_i32_0 = arith.constant 0 : i32
    %c0_i32_1 = arith.constant 0 : i32
    return %c0_i32, %c0_i32_0 : i32, i32
  }
  func.func @transform_5(%arg0: i32) -> (i32, i32) {
    %c0_i32 = arith.constant 0 : i32
    %c0_i32_0 = arith.constant 0 : i32
    %c0_i32_1 = arith.constant 0 : i32
    return %c0_i32, %c0_i32_0 : i32, i32
  }
  func.func @transform_6(%arg0: i32) -> (i32, i32) {
    %c0_i32 = arith.constant 0 : i32
    %c0_i32_0 = arith.constant 0 : i32
    return %arg0, %c0_i32 : i32, i32
  }
}

module attributes {stable_mosaic.version = 11 : i64} {
  func.func @_nuft_decode_basis_kernel(%arg0: i32, %arg1: memref<1x64x56xf32, #tpu.memory_space<vmem>>, %arg2: memref<1x64x56xf32, #tpu.memory_space<vmem>>, %arg3: memref<1x56x32xf32, #tpu.memory_space<vmem>>, %arg4: memref<1x56x32xf32, #tpu.memory_space<vmem>>, %arg5: memref<1x64x2xf32, #tpu.memory_space<vmem>>, %arg6: memref<2x32xf32, #tpu.memory_space<vmem>>, %arg7: memref<1x32xf32, #tpu.memory_space<vmem>>, %arg8: memref<1x64x32xf32, #tpu.memory_space<vmem>>) attributes {dimension_semantics = [#tpu.dimension_semantics<parallel>], iteration_bounds = array<i64: 2>, scalar_prefetch = 0 : i64, scratch_operands = 0 : i64, tpu.core_type = #tpu.core_type<tc>, window_params = [{transform_indices = @transform_0, window_bounds = array<i64: 1, 64, 56>}, {transform_indices = @transform_1, window_bounds = array<i64: 1, 64, 56>}, {transform_indices = @transform_2, window_bounds = array<i64: 1, 56, 32>}, {transform_indices = @transform_3, window_bounds = array<i64: 1, 56, 32>}, {transform_indices = @transform_4, window_bounds = array<i64: 1, 64, 2>}, {pipeline_mode = #tpu.pipeline_mode<synchronous>, transform_indices = @transform_5, window_bounds = array<i64: 2, 32>}, {pipeline_mode = #tpu.pipeline_mode<synchronous>, transform_indices = @transform_6, window_bounds = array<i64: 1, 32>}, {transform_indices = @transform_7, window_bounds = array<i64: 1, 64, 32>}]} {
    %c0 = arith.constant 0 : index
    %c0_0 = arith.constant 0 : index
    %c0_1 = arith.constant 0 : index
    %0 = vector.load %arg1[%c0, %c0_0, %c0_1] : memref<1x64x56xf32, #tpu.memory_space<vmem>>, vector<1x64x56xf32>
    %1 = vector.shape_cast %0 : vector<1x64x56xf32> to vector<64x56xf32>
    %c0_2 = arith.constant 0 : index
    %c0_3 = arith.constant 0 : index
    %c0_4 = arith.constant 0 : index
    %2 = vector.load %arg3[%c0_2, %c0_3, %c0_4] : memref<1x56x32xf32, #tpu.memory_space<vmem>>, vector<1x56x32xf32>
    %3 = vector.shape_cast %2 : vector<1x56x32xf32> to vector<56x32xf32>
    %cst = arith.constant dense<0.000000e+00> : vector<64x32xf32>
    %4 = tpu.matmul %1, %3, %cst {dimension_numbers = #tpu.dot_dimension_numbers<[1], [0], [0], [1], [0, 0, 1, 1], [], []>} : vector<64x56xf32>, vector<56x32xf32>, vector<64x32xf32> -> vector<64x32xf32>
    %c0_5 = arith.constant 0 : index
    %c0_6 = arith.constant 0 : index
    %c0_7 = arith.constant 0 : index
    %5 = vector.load %arg2[%c0_5, %c0_6, %c0_7] : memref<1x64x56xf32, #tpu.memory_space<vmem>>, vector<1x64x56xf32>
    %6 = vector.shape_cast %5 : vector<1x64x56xf32> to vector<64x56xf32>
    %c0_8 = arith.constant 0 : index
    %c0_9 = arith.constant 0 : index
    %c0_10 = arith.constant 0 : index
    %7 = vector.load %arg4[%c0_8, %c0_9, %c0_10] : memref<1x56x32xf32, #tpu.memory_space<vmem>>, vector<1x56x32xf32>
    %8 = vector.shape_cast %7 : vector<1x56x32xf32> to vector<56x32xf32>
    %cst_11 = arith.constant dense<0.000000e+00> : vector<64x32xf32>
    %9 = tpu.matmul %6, %8, %cst_11 {dimension_numbers = #tpu.dot_dimension_numbers<[1], [0], [0], [1], [0, 0, 1, 1], [], []>} : vector<64x56xf32>, vector<56x32xf32>, vector<64x32xf32> -> vector<64x32xf32>
    %10 = arith.subf %4, %9 : vector<64x32xf32>
    %c0_12 = arith.constant 0 : index
    %c0_13 = arith.constant 0 : index
    %c0_14 = arith.constant 0 : index
    %11 = vector.load %arg5[%c0_12, %c0_13, %c0_14] : memref<1x64x2xf32, #tpu.memory_space<vmem>>, vector<1x64x2xf32>
    %12 = vector.shape_cast %11 : vector<1x64x2xf32> to vector<64x2xf32>
    %c0_15 = arith.constant 0 : index
    %c0_16 = arith.constant 0 : index
    %13 = vector.load %arg6[%c0_15, %c0_16] : memref<2x32xf32, #tpu.memory_space<vmem>>, vector<2x32xf32>
    %cst_17 = arith.constant dense<0.000000e+00> : vector<64x32xf32>
    %14 = tpu.matmul %12, %13, %cst_17 {dimension_numbers = #tpu.dot_dimension_numbers<[1], [0], [0], [1], [0, 0, 1, 1], [], []>} : vector<64x2xf32>, vector<2x32xf32>, vector<64x32xf32> -> vector<64x32xf32>
    %15 = arith.addf %10, %14 : vector<64x32xf32>
    %c0_18 = arith.constant 0 : index
    %c0_19 = arith.constant 0 : index
    %16 = vector.load %arg7[%c0_18, %c0_19] : memref<1x32xf32, #tpu.memory_space<vmem>>, vector<1x32xf32>
    %17 = vector.broadcast %16 : vector<1x32xf32> to vector<64x32xf32>
    %18 = arith.addf %15, %17 : vector<64x32xf32>
    %c0_20 = arith.constant 0 : index
    %c0_21 = arith.constant 0 : index
    %c0_22 = arith.constant 0 : index
    %19 = vector.load %arg8[%c0_20, %c0_21, %c0_22] : memref<1x64x32xf32, #tpu.memory_space<vmem>>, vector<1x64x32xf32>
    %20 = vector.shape_cast %19 : vector<1x64x32xf32> to vector<64x32xf32>
    %21 = vector.shape_cast %18 : vector<64x32xf32> to vector<1x64x32xf32>
    tpu.vector_store %arg8[%c0_20, %c0_21, %c0_22], %21 {strides = array<i32>} : memref<1x64x32xf32, #tpu.memory_space<vmem>>, vector<1x64x32xf32>,
    return
  }
  func.func @transform_0(%arg0: i32) -> (i32, i32, i32) {
    %c0_i32 = arith.constant 0 : i32
    %c0_i32_0 = arith.constant 0 : i32
    %c0_i32_1 = arith.constant 0 : i32
    return %arg0, %c0_i32, %c0_i32_0 : i32, i32, i32
  }
  func.func @transform_1(%arg0: i32) -> (i32, i32, i32) {
    %c0_i32 = arith.constant 0 : i32
    %c0_i32_0 = arith.constant 0 : i32
    %c0_i32_1 = arith.constant 0 : i32
    return %arg0, %c0_i32, %c0_i32_0 : i32, i32, i32
  }
  func.func @transform_2(%arg0: i32) -> (i32, i32, i32) {
    %c0_i32 = arith.constant 0 : i32
    %c0_i32_0 = arith.constant 0 : i32
    %c0_i32_1 = arith.constant 0 : i32
    return %arg0, %c0_i32, %c0_i32_0 : i32, i32, i32
  }
  func.func @transform_3(%arg0: i32) -> (i32, i32, i32) {
    %c0_i32 = arith.constant 0 : i32
    %c0_i32_0 = arith.constant 0 : i32
    %c0_i32_1 = arith.constant 0 : i32
    return %arg0, %c0_i32, %c0_i32_0 : i32, i32, i32
  }
  func.func @transform_4(%arg0: i32) -> (i32, i32, i32) {
    %c0_i32 = arith.constant 0 : i32
    %c0_i32_0 = arith.constant 0 : i32
    %c0_i32_1 = arith.constant 0 : i32
    return %arg0, %c0_i32, %c0_i32_0 : i32, i32, i32
  }
  func.func @transform_5(%arg0: i32) -> (i32, i32) {
    %c0_i32 = arith.constant 0 : i32
    %c0_i32_0 = arith.constant 0 : i32
    %c0_i32_1 = arith.constant 0 : i32
    return %c0_i32, %c0_i32_0 : i32, i32
  }
  func.func @transform_6(%arg0: i32) -> (i32, i32) {
    %c0_i32 = arith.constant 0 : i32
    %c0_i32_0 = arith.constant 0 : i32
    %c0_i32_1 = arith.constant 0 : i32
    return %c0_i32, %c0_i32_0 : i32, i32
  }
  func.func @transform_7(%arg0: i32) -> (i32, i32, i32) {
    %c0_i32 = arith.constant 0 : i32
    %c0_i32_0 = arith.constant 0 : i32
    %c0_i32_1 = arith.constant 0 : i32
    return %arg0, %c0_i32, %c0_i32_0 : i32, i32, i32
  }
}

module attributes {stable_mosaic.version = 11 : i64} {
  func.func @_head_kernel(%arg0: i32, %arg1: memref<32x128xf32, #tpu.memory_space<vmem>>, %arg2: memref<128x512xf32, #tpu.memory_space<vmem>>, %arg3: memref<1x512xf32, #tpu.memory_space<vmem>>, %arg4: memref<512x4xf32, #tpu.memory_space<vmem>>, %arg5: memref<1x4xf32, #tpu.memory_space<vmem>>, %arg6: memref<32x4xf32, #tpu.memory_space<vmem>>) attributes {dimension_semantics = [#tpu.dimension_semantics<parallel>], iteration_bounds = array<i64: 1>, scalar_prefetch = 0 : i64, scratch_operands = 0 : i64, tpu.core_type = #tpu.core_type<tc>, window_params = [{transform_indices = @transform_0, window_bounds = array<i64: 32, 128>}, {pipeline_mode = #tpu.pipeline_mode<synchronous>, transform_indices = @transform_1, window_bounds = array<i64: 128, 512>}, {pipeline_mode = #tpu.pipeline_mode<synchronous>, transform_indices = @transform_2, window_bounds = array<i64: 1, 512>}, {pipeline_mode = #tpu.pipeline_mode<synchronous>, transform_indices = @transform_3, window_bounds = array<i64: 512, 4>}, {pipeline_mode = #tpu.pipeline_mode<synchronous>, transform_indices = @transform_4, window_bounds = array<i64: 1, 4>}, {transform_indices = @transform_5, window_bounds = array<i64: 32, 4>}]} {
    %c0 = arith.constant 0 : index
    %c0_0 = arith.constant 0 : index
    %0 = vector.load %arg1[%c0, %c0_0] : memref<32x128xf32, #tpu.memory_space<vmem>>, vector<32x128xf32>
    %c0_1 = arith.constant 0 : index
    %c0_2 = arith.constant 0 : index
    %1 = vector.load %arg2[%c0_1, %c0_2] : memref<128x512xf32, #tpu.memory_space<vmem>>, vector<128x512xf32>
    %cst = arith.constant dense<0.000000e+00> : vector<32x512xf32>
    %2 = tpu.matmul %0, %1, %cst {dimension_numbers = #tpu.dot_dimension_numbers<[1], [0], [0], [1], [0, 0, 1, 1], [], []>} : vector<32x128xf32>, vector<128x512xf32>, vector<32x512xf32> -> vector<32x512xf32>
    %c0_3 = arith.constant 0 : index
    %c0_4 = arith.constant 0 : index
    %3 = vector.load %arg3[%c0_3, %c0_4] : memref<1x512xf32, #tpu.memory_space<vmem>>, vector<1x512xf32>
    %4 = vector.broadcast %3 : vector<1x512xf32> to vector<32x512xf32>
    %5 = arith.addf %2, %4 : vector<32x512xf32>
    %cst_5 = arith.constant 5.000000e-01 : f32
    %6 = vector.broadcast %cst_5 : f32 to vector<32x512xf32>
    %7 = arith.mulf %6, %5 : vector<32x512xf32>
    %cst_6 = arith.constant 0.707106769 : f32
    %8 = vector.broadcast %cst_6 : f32 to vector<32x512xf32>
    %9 = arith.mulf %5, %8 : vector<32x512xf32>
    %cst_7 = arith.constant 0.000000e+00 : f32
    %10 = vector.broadcast %cst_7 : f32 to vector<32x512xf32>
    %11 = arith.cmpf oge, %9, %10 : vector<32x512xf32>
    %cst_8 = arith.constant 1.000000e+00 : f32
    %cst_9 = arith.constant -1.000000e+00 : f32
    %12 = vector.broadcast %cst_8 : f32 to vector<32x512xf32>
    %13 = vector.broadcast %cst_9 : f32 to vector<32x512xf32>
    %14 = arith.select %11, %12, %13 : vector<32x512xi1>, vector<32x512xf32>
    %15 = math.absf %9 : vector<32x512xf32>
    %cst_10 = arith.constant 0.327591091 : f32
    %16 = vector.broadcast %cst_10 : f32 to vector<32x512xf32>
    %17 = arith.mulf %16, %15 : vector<32x512xf32>
    %cst_11 = arith.constant 1.000000e+00 : f32
    %18 = vector.broadcast %cst_11 : f32 to vector<32x512xf32>
    %19 = arith.addf %18, %17 : vector<32x512xf32>
    %cst_12 = arith.constant 1.000000e+00 : f32
    %20 = vector.broadcast %cst_12 : f32 to vector<32x512xf32>
    %21 = arith.divf %20, %19 : vector<32x512xf32>
    %cst_13 = arith.constant 1.06140542 : f32
    %22 = vector.broadcast %cst_13 : f32 to vector<32x512xf32>
    %23 = arith.mulf %21, %22 : vector<32x512xf32>
    %cst_14 = arith.constant -1.45315206 : f32
    %24 = vector.broadcast %cst_14 : f32 to vector<32x512xf32>
    %25 = arith.addf %24, %23 : vector<32x512xf32>
    %26 = arith.mulf %21, %25 : vector<32x512xf32>
    %cst_15 = arith.constant 1.42141378 : f32
    %27 = vector.broadcast %cst_15 : f32 to vector<32x512xf32>
    %28 = arith.addf %27, %26 : vector<32x512xf32>
    %29 = arith.mulf %21, %28 : vector<32x512xf32>
    %cst_16 = arith.constant -0.284496725 : f32
    %30 = vector.broadcast %cst_16 : f32 to vector<32x512xf32>
    %31 = arith.addf %30, %29 : vector<32x512xf32>
    %32 = arith.mulf %21, %31 : vector<32x512xf32>
    %cst_17 = arith.constant 0.254829586 : f32
    %33 = vector.broadcast %cst_17 : f32 to vector<32x512xf32>
    %34 = arith.addf %33, %32 : vector<32x512xf32>
    %35 = arith.mulf %21, %34 : vector<32x512xf32>
    %cst_18 = arith.constant 0.000000e+00 : f32
    %36 = vector.broadcast %cst_18 : f32 to vector<32x512xf32>
    %37 = arith.subf %36, %15 : vector<32x512xf32>
    %38 = arith.mulf %37, %15 : vector<32x512xf32>
    %39 = math.exp %38 : vector<32x512xf32>
    %40 = arith.mulf %35, %39 : vector<32x512xf32>
    %cst_19 = arith.constant 1.000000e+00 : f32
    %41 = vector.broadcast %cst_19 : f32 to vector<32x512xf32>
    %42 = arith.subf %41, %40 : vector<32x512xf32>
    %43 = arith.mulf %14, %42 : vector<32x512xf32>
    %cst_20 = arith.constant 1.000000e+00 : f32
    %44 = vector.broadcast %cst_20 : f32 to vector<32x512xf32>
    %45 = arith.addf %44, %43 : vector<32x512xf32>
    %46 = arith.mulf %7, %45 : vector<32x512xf32>
    %c0_21 = arith.constant 0 : index
    %c0_22 = arith.constant 0 : index
    %47 = vector.load %arg4[%c0_21, %c0_22] : memref<512x4xf32, #tpu.memory_space<vmem>>, vector<512x4xf32>
    %cst_23 = arith.constant dense<0.000000e+00> : vector<32x4xf32>
    %48 = tpu.matmul %46, %47, %cst_23 {dimension_numbers = #tpu.dot_dimension_numbers<[1], [0], [0], [1], [0, 0, 1, 1], [], []>} : vector<32x512xf32>, vector<512x4xf32>, vector<32x4xf32> -> vector<32x4xf32>
    %c0_24 = arith.constant 0 : index
    %c0_25 = arith.constant 0 : index
    %49 = vector.load %arg5[%c0_24, %c0_25] : memref<1x4xf32, #tpu.memory_space<vmem>>, vector<1x4xf32>
    %50 = vector.broadcast %49 : vector<1x4xf32> to vector<32x4xf32>
    %51 = arith.addf %48, %50 : vector<32x4xf32>
    %c0_26 = arith.constant 0 : index
    %c0_27 = arith.constant 0 : index
    %52 = vector.load %arg6[%c0_26, %c0_27] : memref<32x4xf32, #tpu.memory_space<vmem>>, vector<32x4xf32>
    tpu.vector_store %arg6[%c0_26, %c0_27], %51 {strides = array<i32>} : memref<32x4xf32, #tpu.memory_space<vmem>>, vector<32x4xf32>,
    return
  }
  func.func @transform_0(%arg0: i32) -> (i32, i32) {
    %c0_i32 = arith.constant 0 : i32
    %c0_i32_0 = arith.constant 0 : i32
    return %arg0, %c0_i32 : i32, i32
  }
  func.func @transform_1(%arg0: i32) -> (i32, i32) {
    %c0_i32 = arith.constant 0 : i32
    %c0_i32_0 = arith.constant 0 : i32
    %c0_i32_1 = arith.constant 0 : i32
    return %c0_i32, %c0_i32_0 : i32, i32
  }
  func.func @transform_2(%arg0: i32) -> (i32, i32) {
    %c0_i32 = arith.constant 0 : i32
    %c0_i32_0 = arith.constant 0 : i32
    %c0_i32_1 = arith.constant 0 : i32
    return %c0_i32, %c0_i32_0 : i32, i32
  }
  func.func @transform_3(%arg0: i32) -> (i32, i32) {
    %c0_i32 = arith.constant 0 : i32
    %c0_i32_0 = arith.constant 0 : i32
    %c0_i32_1 = arith.constant 0 : i32
    return %c0_i32, %c0_i32_0 : i32, i32
  }
  func.func @transform_4(%arg0: i32) -> (i32, i32) {
    %c0_i32 = arith.constant 0 : i32
    %c0_i32_0 = arith.constant 0 : i32
    %c0_i32_1 = arith.constant 0 : i32
    return %c0_i32, %c0_i32_0 : i32, i32
  }
  func.func @transform_5(%arg0: i32) -> (i32, i32) {
    %c0_i32 = arith.constant 0 : i32
    %c0_i32_0 = arith.constant 0 : i32
    return %arg0, %c0_i32 : i32, i32
  }
}

</mosaic_0001>

<bundles_post_ra>
// kernel: tpu_custom_call.1
= control target key start
LH: loop header
LB: loop body
LE: loop exit
PB: predicated region body
PF: predicated region fallthrough
CT: control target
= control target key end

     0   :  { %v311_v1 = vmov 0   ;;  %s377_s0 = inlined_call_operand.vmem [shape: f32[8,2], index: 0, kind: input, shape index: {}]   ;;  %s378_s1 = inlined_call_operand.vmem [shape: f32[2,128], index: 1, kind: input, shape index: {}]   ;;  %s379_s2 = inlined_call_operand.hbm [shape: f32[8,128], index: 2, kind: output, shape index: {}]  }
   0x1   :  { %v12_v0 = vld [vmem:[%s377_s0] sm:$0xff]  ;;  %281 = vset.pattern.permute.xlu0 %v311_v1 }
   0x2   :  { %7 = vsyncpa [#allocation3], 0  ;;  %16 = vperm.xlu0 %281, %v12_v0   ;;  %v312_v2 = vmov 1   ;;  %v258_v4 = vld [vmem:[%s378_s1] ss:$0 sm:$0xff]  ;;  %s319_s0 = smov [#allocation2]  }
   0x3   :  { %v259_v5 = vld [vmem:[%s378_s1 + $0x1] ss:$0 sm:$0xff]  ;;  %v313_v21 = vmov 2102212464   ;;  %v314_v23 = vmov 920167782  }
   0x4   :  { %v315_v27 = vmov 1326507024   ;;  %v316_v29 = vmov 683565275   ;;  %v317_v31 = vmov 2475754826  }
   0x5   :  { %v318_v34 = vmov 2131351028   ;;  %s250_s1 = sshll.u32 %s319_s0, 4  ;;  %s251_s1 = int_to_ptr.vmem [resolvable:$true] %s250_s1 }
   0x6   :  { %282 = vset.pattern.permute.xlu0 %v312_v2  ;;  %s287_s15 = scalar_lea.vmem %s251_s1, 128  ;;  %p292_p1 = scmp.lt.s32.totalorder %s251_s1, %s251_s1 }
   0x7   :  { %26 = vperm.xlu0 %282, %v12_v0   ;;  %p288_p0 = scmp.ne.s32.totalorder %s251_s1, %s287_s15  ;;  %p293_p2 = scmp.lt.s32.totalorder %s287_s15, %s287_s15 }
   0x9   :  { %p294_p3 = por %p293_p2, %p292_p1 }
   0xb   :  { %p295_p4 = pnand %p294_p3, %p288_p0 }
  0x81   :  { %v17_v3 = vpop.permute.xlu0 %16 }
  0x82   :  { %v23_v7 = vmul.f32 %v258_v4, %v17_v3 }
  0x86   :  { %v27_v6 = vpop.permute.xlu0 %26 }
  0x87   :  { %v33_v8 = vmul.f32 %v259_v5, %v27_v6 }
  0x89   :  { %v344_v9 = vadd.f32 %v33_v8, %v23_v7 }
  0x8b   :  { %v38_v10 = vand.u32 2139095040, %v344_v9  ;;  %v35_v11 = vand.u32 2147483647, %v344_v9  ;;  %vm37_vm7 = vcmp.lt.s32.totalorder %v344_v9, 0  ;;  %vm127_vm15 = vweird.f32 %v344_v9 }
  0x8d   :  { %v39_v12 = vshrl.u32 %v38_v10, 23  ;;  %v42_v14 = vand.u32 8388607, %v35_v11  ;;  %vm36_vm8 = vcmp.le.f32.partialorder %v35_v11, 0.7853982 }
  0x8f   :  { %v260_v13 = vadd.s32 4294967169, %v39_v12  ;;  %v43_v17 = vor.u32 8388608, %v42_v14 }
  0x91   :  { %v45_v15 = vadd.s32 1, %v260_v13  ;;  %v83_v25 = vshll.u32 %v43_v17, 8 }
  0x93   :  { %vm46_vm0 = vcmp.gt.s32.totalorder %v45_v15, 0 }
  0x94   :  { %v47_v16 = vsel %vm46_vm0, %v45_v15, 0 }
  0x95   :  { %v49_v18 = vand.u32 31, %v47_v16  ;;  %v48_v19 = vshrl.u32 %v47_v16, 5 }
  0x97   :  { %v50_v20 = vsub.s32 32, %v49_v18  ;;  %v61_v22 = vshll.u32 %v313_v21, %v49_v18  ;;  %v64_v24 = vshll.u32 %v314_v23, %v49_v18  ;;  %v52_v30 = vshll.u32 %v316_v29, %v49_v18 }
  0x98   :  { %v55_v33 = vshll.u32 %v317_v31, %v49_v18  ;;  %v58_v36 = vshll.u32 %v318_v34, %v49_v18  ;;  %vm70_vm1 = vcmp.lt.s32.totalorder %v48_v19, 4  ;;  %vm67_vm2 = vcmp.lt.s32.totalorder %v48_v19, 1 }
  0x99   :  { %v62_v26 = vshrl.u32 %v314_v23, %v50_v20  ;;  %v65_v28 = vshrl.u32 %v315_v27, %v50_v20  ;;  %v53_v32 = vshrl.u32 %v317_v31, %v50_v20  ;;  %v56_v35 = vshrl.u32 %v318_v34, %v50_v20 }
  0x9a   :  { %v59_v37 = vshrl.u32 %v313_v21, %v50_v20  ;;  %v51_v41 = vshrl.u32 %v316_v29, %v50_v20  ;;  %vm68_vm3 = vcmp.lt.s32.totalorder %v48_v19, 2  ;;  %vm69_vm4 = vcmp.lt.s32.totalorder %v48_v19, 3 }
  0x9b   :  { %v63_v38 = vor.u32 %v62_v26, %v61_v22  ;;  %v66_v39 = vor.u32 %v65_v28, %v64_v24  ;;  %v54_v40 = vor.u32 %v53_v32, %v52_v30  ;;  %v57_v42 = vor.u32 %v56_v35, %v55_v33 }
  0x9c   :  { %v60_v43 = vor.u32 %v59_v37, %v58_v36 }
  0x9d   :  { %v76_v44 = vsel %vm70_vm1, %v63_v38, 920167782  ;;  %v80_v45 = vsel %vm70_vm1, %v66_v39, 1326507024  ;;  %v75_v47 = vsel %vm67_vm2, %v54_v40, %v57_v42  ;;  %v71_v50 = vsel %vm67_vm2, %v51_v41, %v54_v40 }
  0x9e   :  { %v72_v46 = vsel %vm70_vm1, %v60_v43, 2102212464  ;;  %v77_v48 = vsel %vm69_vm4, %v60_v43, %v76_v44  ;;  %v79_v49 = vsel %vm67_vm2, %v57_v42, %v60_v43  ;;  %v81_v53 = vsel %vm69_vm4, %v63_v38, %v80_v45 }
  0x9f   :  { %v73_v51 = vsel %vm69_vm4, %v57_v42, %v72_v46  ;;  %v78_v52 = vsel %vm68_vm3, %v75_v47, %v77_v48  ;;  %v82_v54 = vsel %vm68_vm3, %v79_v49, %v81_v53 }
  0xa0   :  { %v350_v55 = vmul.u32.u64.low %v83_v25, %v78_v52  ;;  %v351_v56 = vmul.u32.u64.high %v83_v25, %v78_v52, %v350_v55  ;;  %v353_v57 = vmul.u32.u64.low %v83_v25, %v82_v54  ;;  %v354_v58 = vmul.u32.u64.high %v83_v25, %v82_v54, %v353_v57 }
  0xa1   :  { %v74_v59 = vsel %vm68_vm3, %v71_v50, %v73_v51 }
  0xa2   :  { %v93_v60 = vadd.s32 1, %v351_v56  ;;  %v90_v61 = vmul.u32 %v83_v25, %v74_v59  ;;  %vm92_vm5 = vc.u32 %v354_v58, %v350_v55  ;;  %v91_v10 = vadd.s32 %v350_v55, %v354_v58 }
  0xa4   :  { %v94_v62 = vsel %vm92_vm5, %v93_v60, %v351_v56 }
  0xa5   :  { %v95_v63 = vadd.s32 %v94_v62, %v90_v61 }
  0xa7   :  { %v96_v0 = vadd.s32 536870912, %v95_v63 }
  0xa9   :  { %v97_v1 = vshrl.u32 %v96_v0, 30 }
  0xab   :  { %v98_v2 = vshll.u32 %v97_v1, 30  ;;  %v121_v23 = vsub.s32 4, %v97_v1 }
  0xad   :  { %v99_v3 = vsub.s32 %v95_v63, %v98_v2  ;;  %v122_v26 = vsel %vm37_vm7, %v121_v23, %v97_v1 }
  0xae   :  { %v124_v28 = vsel %vm36_vm8, 0, %v122_v26 }
  0xaf   :  { %v101_v4 = vsub.s32 0, %v99_v3  ;;  %v231_v29 = vadd.s32 3, %v124_v28  ;;  %v128_v30 = vand.u32 3, %v124_v28 }
  0xb1   :  { %v261_v5 = vmin.u32 %v101_v4, %v99_v3  ;;  %v232_v31 = vand.u32 3, %v231_v29  ;;  %vm133_vm9 = vcmp.eq.s32.totalorder %v128_v30, 2  ;;  %vm130_vm11 = vcmp.eq.s32.totalorder %v128_v30, 0 }
  0xb2   :  { %vm129_vm13 = vcmp.lt.s32.totalorder %v128_v30, 2 }
  0xb3   :  { %v103_v6 = vclz %v261_v5  ;;  %vm237_vm10 = vcmp.eq.s32.totalorder %v232_v31, 2  ;;  %vm234_vm12 = vcmp.eq.s32.totalorder %v232_v31, 0  ;;  %vm233_vm14 = vcmp.lt.s32.totalorder %v232_v31, 2 }
  0xb5   :  { %v262_v7 = vadd.s32 4294967294, %v103_v6 }
  0xb7   :  { %vm263_vm6 = vcmp.lt.s32.totalorder %v262_v7, 0 }
  0xb8   :  { %v106_v8 = vsel %vm263_vm6, 0, %v262_v7 }
  0xb9   :  { %v107_v12 = vsub.s32 32, %v106_v8  ;;  %v111_v13 = vsub.s32 4294967266, %v106_v8  ;;  %v108_v14 = vshll.u32 %v99_v3, %v106_v8 }
  0xbb   :  { %v109_v15 = vshrl.u32 %v91_v10, %v107_v12  ;;  %v112_v16 = vadd.s32 127, %v111_v13 }
  0xbd   :  { %v110_v17 = vor.u32 %v109_v15, %v108_v14  ;;  %v113_v18 = vshll.u32 %v112_v16, 23 }
  0xbf   :  { %v114_v19 = vor.u32 4788187, %v113_v18  ;;  %v117_v21 = vcvt.s32.f32 %v110_v17 }
  0xc1   :  { %v115_v20 = vand.u32 2147483647, %v114_v19 }
  0xc3   :  { %v118_v22 = vmul.f32 %v117_v21, %v115_v20 }
  0xc5   :  { %v119_v24 = vxor.u32 2147483648, %v118_v22 }
  0xc7   :  { %v120_v25 = vsel %vm37_vm7, %v119_v24, %v118_v22 }
  0xc8   :  { %v123_v27 = vsel %vm36_vm8, %v344_v9, %v120_v25 }
  0xc9   :  { %283 = vcosq.f32 %v123_v27 }
  0xca   :  { %285 = vsinq.f32 %v123_v27 }
  0xd3   :  { %v284_v32 = vpop.eup %283 }
  0xd4   :  { %v286_v33 = vpop.eup %285  ;;  %v134_v34 = vxor.u32 2147483648, %v284_v32 }
  0xd5   :  { %v131_v35 = vxor.u32 2147483648, %v286_v33 }
  0xd6   :  { %v135_v36 = vsel %vm133_vm9, %v134_v34, %v286_v33  ;;  %v239_v11 = vsel %vm237_vm10, %v134_v34, %v286_v33 }
  0xd7   :  { %v132_v37 = vsel %vm130_vm11, %v284_v32, %v131_v35  ;;  %v236_v38 = vsel %vm234_vm12, %v284_v32, %v131_v35 }
  0xd8   :  { %v136_v39 = vsel %vm129_vm13, %v132_v37, %v135_v36  ;;  %v240_v40 = vsel %vm233_vm14, %v236_v38, %v239_v11 }
  0xd9   :  { %v137_v41 = vsel %vm127_vm15, nan, %v136_v39  ;;  %v241_v42 = vsel %vm127_vm15, nan, %v240_v40 }
  0xda   :  { %v242_v43 = vadd.f32 %v241_v42, %v137_v41 }
  0xdc   :  { %243 = vst [vmem:[#allocation2] sm:$0xff] %v242_v43 }
  0xdd   :  { %298 = shalt.err (!%p295_p4)
}
  0xde   :  { %s299_s18 = scalar_lea.hbm %s379_s2, 128 }
  0xdf   :  { %p300_p5 = scmp.ne.s32.totalorder %s379_s2, %s299_s18  ;;  %p303_p6 = scmp.lt.u32.totalorder %s299_s18, %s379_s2 }
  0xe1   :  { %p305_p7 = pnand %p303_p6, %p300_p5 }
  0xe3   :  { %308 = shalt.err (!%p305_p7)
}
  0xe4   :  { %253 = dma.vmem_to_hbm [thread:$0]  %s251_s1, 128, %s379_s2, [#allocation3]  }
  0xe5   :  { %309 = dma.done.wait [#allocation3], 128  }
  0xe6   :  { %310 = vsyncadd [#allocation3], 4294967168 }
  0xe7   :  { %257 = vsyncpa [#allocation3], 1 }

// kernel: _lambda_.13
= control target key start
LH: loop header
LB: loop body
LE: loop exit
PB: predicated region body
PF: predicated region fallthrough
CT: control target
= control target key end

     0   :  { %vm26_vm0 = vcmask 64512   ;;  %s202_s1 = inlined_call_operand.vmem [shape: f32[8,128], index: 1, kind: input, shape index: {}]   ;;  %s203_s0 = inlined_call_operand.vmem [shape: f32[32,8], index: 0, kind: input, shape index: {}]   ;;  %s204_s2 = inlined_call_operand.vmem [shape: f32[1,128], index: 2, kind: input, shape index: {}]   ;;  %s205_s3 = inlined_call_operand.vmem [shape: f32[32,128], index: 3, kind: output, shape index: {}]  }
   0x1   :  { %v18_v0 = vld [vmem:[%s202_s1] sm:$0xff]  ;;  %v16_v2 = vld [vmem:[%s203_s0 + $0x10] sm:$0xff]  ;;  %v15_v3 = vld [vmem:[%s203_s0 + $0x8] sm:$0xff] }
   0x2   :  { %v14_v1 = vld [vmem:[%s203_s0] sm:$0xff]  ;;  %142 = vmatprep.subr.mxu0 %v18_v0  ;;  %150 = vmatprep.subr.mxu1 %v18_v0  ;;  %v17_v4 = vld [vmem:[%s203_s0 + $0x18] sm:$0xff] }
   0x3   :  { %143 = vmatpush3.msra.mxu0 %v18_v0  ;;  %151 = vmatpush3.msra.mxu1 %v18_v0  ;;  %v132_v5 = vld [vmem:[%s204_s2] ss:$0 sm:$0xff] }
   0x4   :  { %144 = vmatprep.mubr.msk.f32.mxu0 %vm26_vm0, %v14_v1  ;;  %147 = vmatprep.mubr.msk.f32.mxu1 %vm26_vm0, %v16_v2 }
   0x5   :  { %145 = vmatmul.mubr.msk.f32.vlgmr.msra.gmra.mrb[0].mxu0 %vm26_vm0, %v15_v3  ;;  %148 = vmatmul.mubr.msk.f32.vlgmr.msra.gmra.mrb[0].mxu1 %vm26_vm0, %v17_v4 }
  0xd8   :  { %v146_v6 = vpop.f32.mrb[0].mxu0  ;;  %v149_v7 = vpop.f32.mrb[0].mxu1 }
  0xd9   :  { %v111_v8 = vadd.f32 %v146_v6, %v132_v5  ;;  %v121_v9 = vadd.f32 %v149_v7, %v132_v5  ;;  %v105_v10 = vpop.f32.mrb[1].mxu0  ;;  %v115_v11 = vpop.f32.mrb[1].mxu1 }
  0xda   :  { %v106_v12 = vadd.f32 %v132_v5, %v105_v10  ;;  %v116_v13 = vadd.f32 %v132_v5, %v115_v11 }
  0xdb   :  { %125 = vst [vmem:[%s205_s3 + $0x8] sm:$0xff] %v111_v8  ;;  %127 = vst [vmem:[%s205_s3 + $0x18] sm:$0xff] %v121_v9 }
  0xdc   :  { %124 = vst [vmem:[%s205_s3] sm:$0xff] %v106_v12  ;;  %126 = vst [vmem:[%s205_s3 + $0x10] sm:$0xff] %v116_v13 }

// kernel: _lambda_.14
= control target key start
LH: loop header
LB: loop body
LE: loop exit
PB: predicated region body
PF: predicated region fallthrough
CT: control target
= control target key end

     0   :  { %s754_s15 = smov 0   ;;  %s814_s0 = inlined_call_operand.vmem [shape: f32[2,32,64], index: 0, kind: input, shape index: {}]   ;;  %s815_s1 = inlined_call_operand.vmem [shape: f32[2,32,64], index: 1, kind: input, shape index: {}]   ;;  %s816_s2 = inlined_call_operand.vmem [shape: f32[2,64,32], index: 2, kind: input, shape index: {}]   ;;  %s817_s3 = inlined_call_operand.vmem [shape: f32[2,32,32], index: 3, kind: output, shape index: {0}]   ;;  %s818_s4 = inlined_call_operand.vmem [shape: f32[2,32,32], index: 4, kind: output, shape index: {1}]  }
   0x1 LB: > { %s583_s16 = sadd.s32 4294967295, %s727_s15   ;;  %p587_p0 = scmp.ge.s32.totalorder %s727_s15, 1  ;;  %s727_s15 = sphi %s754_s15, %s15_s15  }
   0x2   : > { %p185_p1 = scmp.lt.s32.totalorder %s727_s15, 3 }
   0x4   : > { %p186_p2 = pnand %p587_p0, %p185_p1 }
   0x5   : > { %p226_p3 = scmp.lt.s32.totalorder (!%p186_p2), %s583_s16, 1  ;;  %vm263_vm0 = vcmask (!%p186_p2), 523264   ;;  %vm361_vm1 = vcmask (!%p186_p2), 261120  }
   0x6   : > { %189 = sbr.rel (%p186_p2) target bundleno = 253 (0xfd), region = 32 }
   0xd   : > { %s820_s16 = smov (!%p226_p3, %s583_s16), 1 }
   0xe   : > { %s610_s17 = sshll.u32 %s820_s16, 6  ;;  %s762_s18 = sshll.u32 %s820_s16, 5 }
   0xf   : > { %s240_s21 = scalar_lea.vmem %s816_s2, %s610_s17  ;;  %s771_s24 = scalar_lea.vmem %s814_s0, %s762_s18 }
  0x10   : > { %v251_v0 = vld [vmem:[%s240_s21] sm:$0xff]  ;;  %v252_v1 = vld [vmem:[%s240_s21 + $0x8] sm:$0xff]  ;;  %v253_v2 = vld [vmem:[%s240_s21 + $0x10] sm:$0xff]  ;;  %s777_s27 = scalar_lea.vmem %s815_s1, %s762_s18  ;;  %s245_s30 = scalar_lea.vmem %s817_s3, %s762_s18 }
  0x11   : > { %v681_v3 = vpack.c.bf16 %v252_v1, %v251_v0  ;;  %v254_v4 = vld [vmem:[%s240_s21 + $0x18] sm:$0xff]  ;;  %v255_v6 = vld [vmem:[%s240_s21 + $0x20] sm:$0xff]  ;;  %v256_v7 = vld [vmem:[%s240_s21 + $0x28] sm:$0xff]  ;;  %s250_s7 = scalar_lea.vmem %s818_s4, %s762_s18 }
  0x12   : > { %v685_v5 = vpack.c.bf16 %v254_v4, %v253_v2  ;;  %v259_v8 = vld [vmem:[%s771_s24] sm:$0xff]  ;;  %v689_v10 = vpack.c.bf16 %v256_v7, %v255_v6  ;;  %v257_v11 = vld [vmem:[%s240_s21 + $0x30] sm:$0xff]  ;;  %v258_v12 = vld [vmem:[%s240_s21 + $0x38] sm:$0xff] }
  0x13   : > { %682 = vmatprep.subr.bf16.mxu0 %v681_v3  ;;  %698 = vmatprep.subr.bf16.mxu1 %v681_v3  ;;  %v366_v9 = vld [vmem:[%s777_s27] sm:$0xff]  ;;  %v693_v13 = vpack.c.bf16 %v258_v12, %v257_v11  ;;  %v260_v14 = vld [vmem:[%s771_s24 + $0x8] sm:$0xff]  ;;  %v261_v16 = vld [vmem:[%s771_s24 + $0x10] sm:$0xff] }
  0x14   : > { %684 = vmatpush3.bf16.msra.mxu0 %v681_v3  ;;  %700 = vmatpush3.bf16.msra.mxu1 %v681_v3  ;;  %v367_v15 = vld [vmem:[%s777_s27 + $0x8] sm:$0xff]  ;;  %v368_v17 = vld [vmem:[%s777_s27 + $0x10] sm:$0xff]  ;;  %v262_v18 = vld [vmem:[%s771_s24 + $0x18] sm:$0xff] }
  0x15   : > { %686 = vmatprep.subr.bf16.mxu0 %v685_v5  ;;  %702 = vmatprep.subr.bf16.mxu1 %v685_v5  ;;  %v369_v19 = vld [vmem:[%s777_s27 + $0x18] sm:$0xff] }
  0x16   : > { %653 = vmatprep.mubr.msk.f32.mxu0 %vm263_vm0, %v259_v8  ;;  %675 = vmatprep.mubr.msk.f32.mxu1 %vm263_vm0, %v366_v9 }
  0x18   : > { %688 = vmatpush3.bf16.msra.mxu0 %v685_v5  ;;  %704 = vmatpush3.bf16.msra.mxu1 %v685_v5 }
  0x19   : > { %690 = vmatprep.subr.bf16.mxu0 %v689_v10  ;;  %706 = vmatprep.subr.bf16.mxu1 %v689_v10 }
  0x1c   : > { %692 = vmatpush3.bf16.msra.mxu0 %v689_v10  ;;  %708 = vmatpush3.bf16.msra.mxu1 %v689_v10 }
  0x1d   : > { %694 = vmatprep.subr.bf16.mxu0 %v693_v13  ;;  %710 = vmatprep.subr.bf16.mxu1 %v693_v13 }
  0x20   : > { %696 = vmatpush3.bf16.msra.mxu0 %v693_v13  ;;  %712 = vmatpush3.bf16.msra.mxu1 %v693_v13 }
  0x23   : > { %654 = vmatmul.mubr.msk.f32.vlgmr.msra.gmra.mrb[0].mxu0 %vm263_vm0, %v260_v14  ;;  %676 = vmatmul.mubr.msk.f32.vlgmr.msra.gmra.mrb[0].mxu1 %vm263_vm0, %v367_v15 }
  0x24   : > { %656 = vmatprep.mubr.msk.f32.mxu0 %vm263_vm0, %v261_v16  ;;  %678 = vmatprep.mubr.msk.f32.mxu1 %vm263_vm0, %v368_v17 }
  0x27   : > { %657 = vmatmul.mubr.msk.f32.gmra.mrb[2].mxu0 %vm263_vm0, %v262_v18  ;;  %679 = vmatmul.mubr.msk.f32.gmra.mrb[2].mxu1 %vm263_vm0, %v369_v19 }
  0xf6   : > { %v655_v20 = vpop.f32.mrb[0].mxu0  ;;  %v677_v21 = vpop.f32.mrb[0].mxu1 }
  0xf7   : > { %363 = vst.msk [vmem:[%s245_s30 + $0x8] sm:$0xff] %vm361_vm1, %v655_v20  ;;  %468 = vst.msk [vmem:[%s250_s7 + $0x8] sm:$0xff] %vm361_vm1, %v677_v21  ;;  %v342_v22 = vpop.f32.mrb[1].mxu0  ;;  %v448_v23 = vpop.f32.mrb[1].mxu1 }
  0xf8   : > { %362 = vst.msk [vmem:[%s245_s30] sm:$0xff] %vm361_vm1, %v342_v22  ;;  %467 = vst.msk [vmem:[%s250_s7] sm:$0xff] %vm361_vm1, %v448_v23 }
  0xfa   : > { %v658_v24 = vpop.f32.mrb[2].mxu0  ;;  %v680_v25 = vpop.f32.mrb[2].mxu1 }
  0xfb   : > { %365 = vst.msk [vmem:[%s245_s30 + $0x18] sm:$0xff] %vm361_vm1, %v658_v24  ;;  %470 = vst.msk [vmem:[%s250_s7 + $0x18] sm:$0xff] %vm361_vm1, %v680_v25  ;;  %v352_v26 = vpop.f32.mrb[3].mxu0  ;;  %v458_v27 = vpop.f32.mrb[3].mxu1 }
  0xfc   : > { %364 = vst.msk [vmem:[%s245_s30 + $0x10] sm:$0xff] %vm361_vm1, %v352_v26  ;;  %469 = vst.msk [vmem:[%s250_s7 + $0x10] sm:$0xff] %vm361_vm1, %v458_v27 }
  0xfd PF: > { %s15_s15 = sadd.s32 1, %s727_s15  }
  0xfe   : > { %p12_p4 = scmp.ge.s32.totalorder %s15_s15, 4  }
 0x100   :  { %14 = sbr.rel (!%p12_p4) target bundleno = 1 (0x1), region = 80 }

// kernel: reverse.8
= control target key start
LH: loop header
LB: loop body
LE: loop exit
PB: predicated region body
PF: predicated region fallthrough
CT: control target
= control target key end

     0   :  { %s344_s0 = inlined_call_operand.vmem [shape: f32[2,32,16,7], index: 0, kind: input, shape index: {}]   ;;  %s345_s1 = inlined_call_operand.vmem [shape: f32[2,32,16,7], index: 1, kind: output, shape index: {}]  }
   0x1   :  { %v112_v0 = vld [vmem:[%s344_s0 + $0x60] sm:$0xff]  ;;  %v113_v1 = vld [vmem:[%s344_s0 + $0xd0] sm:$0xff]  ;;  %v138_v14 = vld [vmem:[%s344_s0 + $0x68] sm:$0xff] }
   0x2   :  { %v115_v2 = vld [vmem:[%s344_s0 + $0x50] sm:$0xff]  ;;  %4 = vst [vmem:[%s345_s1] sm:$0xff] %v112_v0  ;;  %114 = vst [vmem:[%s345_s1 + $0x70] sm:$0xff] %v113_v1  ;;  %v117_v3 = vld [vmem:[%s344_s0 + $0xc0] sm:$0xff] }
   0x3   :  { %116 = vst [vmem:[%s345_s1 + $0x10] sm:$0xff] %v115_v2  ;;  %v119_v4 = vld [vmem:[%s344_s0 + $0x40] sm:$0xff]  ;;  %v121_v5 = vld [vmem:[%s344_s0 + $0xb0] sm:$0xff]  ;;  %118 = vst [vmem:[%s345_s1 + $0x80] sm:$0xff] %v117_v3 }
   0x4   :  { %120 = vst [vmem:[%s345_s1 + $0x20] sm:$0xff] %v119_v4  ;;  %122 = vst [vmem:[%s345_s1 + $0x90] sm:$0xff] %v121_v5  ;;  %v123_v6 = vld [vmem:[%s344_s0 + $0x30] sm:$0xff]  ;;  %v125_v7 = vld [vmem:[%s344_s0 + $0xa0] sm:$0xff] }
   0x5   :  { %v127_v8 = vld [vmem:[%s344_s0 + $0x20] sm:$0xff]  ;;  %124 = vst [vmem:[%s345_s1 + $0x30] sm:$0xff] %v123_v6  ;;  %126 = vst [vmem:[%s345_s1 + $0xa0] sm:$0xff] %v125_v7  ;;  %v129_v9 = vld [vmem:[%s344_s0 + $0x90] sm:$0xff] }
   0x6   :  { %128 = vst [vmem:[%s345_s1 + $0x40] sm:$0xff] %v127_v8  ;;  %v131_v10 = vld [vmem:[%s344_s0 + $0x10] sm:$0xff]  ;;  %v133_v11 = vld [vmem:[%s344_s0 + $0x80] sm:$0xff]  ;;  %130 = vst [vmem:[%s345_s1 + $0xb0] sm:$0xff] %v129_v9 }
   0x7   :  { %132 = vst [vmem:[%s345_s1 + $0x50] sm:$0xff] %v131_v10  ;;  %134 = vst [vmem:[%s345_s1 + $0xc0] sm:$0xff] %v133_v11  ;;  %v49_v12 = vld [vmem:[%s344_s0] sm:$0xff]  ;;  %v136_v13 = vld [vmem:[%s344_s0 + $0x70] sm:$0xff] }
   0x8   :  { %135 = vst [vmem:[%s345_s1 + $0x60] sm:$0xff] %v49_v12  ;;  %137 = vst [vmem:[%s345_s1 + $0xd0] sm:$0xff] %v136_v13  ;;  %v140_v15 = vld [vmem:[%s344_s0 + $0xd8] sm:$0xff]  ;;  %v144_v17 = vld [vmem:[%s344_s0 + $0xc8] sm:$0xff] }
   0x9   :  { %139 = vst [vmem:[%s345_s1 + $0x8] sm:$0xff] %v138_v14  ;;  %v142_v16 = vld [vmem:[%s344_s0 + $0x58] sm:$0xff]  ;;  %141 = vst [vmem:[%s345_s1 + $0x78] sm:$0xff] %v140_v15  ;;  %v146_v18 = vld [vmem:[%s344_s0 + $0x48] sm:$0xff] }
   0xa   :  { %143 = vst [vmem:[%s345_s1 + $0x18] sm:$0xff] %v142_v16  ;;  %145 = vst [vmem:[%s345_s1 + $0x88] sm:$0xff] %v144_v17  ;;  %v148_v19 = vld [vmem:[%s344_s0 + $0xb8] sm:$0xff]  ;;  %v152_v21 = vld [vmem:[%s344_s0 + $0xa8] sm:$0xff] }
   0xb   :  { %v150_v20 = vld [vmem:[%s344_s0 + $0x38] sm:$0xff]  ;;  %147 = vst [vmem:[%s345_s1 + $0x28] sm:$0xff] %v146_v18  ;;  %149 = vst [vmem:[%s345_s1 + $0x98] sm:$0xff] %v148_v19  ;;  %v154_v22 = vld [vmem:[%s344_s0 + $0x28] sm:$0xff] }
   0xc   :  { %151 = vst [vmem:[%s345_s1 + $0x38] sm:$0xff] %v150_v20  ;;  %v156_v23 = vld [vmem:[%s344_s0 + $0x98] sm:$0xff]  ;;  %153 = vst [vmem:[%s345_s1 + $0xa8] sm:$0xff] %v152_v21  ;;  %v160_v25 = vld [vmem:[%s344_s0 + $0x88] sm:$0xff] }
   0xd   :  { %155 = vst [vmem:[%s345_s1 + $0x48] sm:$0xff] %v154_v22  ;;  %157 = vst [vmem:[%s345_s1 + $0xb8] sm:$0xff] %v156_v23  ;;  %v158_v24 = vld [vmem:[%s344_s0 + $0x18] sm:$0xff]  ;;  %v162_v26 = vld [vmem:[%s344_s0 + $0x8] sm:$0xff] }
   0xe   :  { %159 = vst [vmem:[%s345_s1 + $0x58] sm:$0xff] %v158_v24  ;;  %161 = vst [vmem:[%s345_s1 + $0xc8] sm:$0xff] %v160_v25  ;;  %v164_v27 = vld [vmem:[%s344_s0 + $0x78] sm:$0xff] }
   0xf   :  { %163 = vst [vmem:[%s345_s1 + $0x68] sm:$0xff] %v162_v26  ;;  %165 = vst [vmem:[%s345_s1 + $0xd8] sm:$0xff] %v164_v27 }

// kernel: _lambda_.15
= control target key start
LH: loop header
LB: loop body
LE: loop exit
PB: predicated region body
PF: predicated region fallthrough
CT: control target
= control target key end

     0   :  { %7 = vsyncpa [#allocation3], 0  ;;  %s2815_s0 = inlined_call_operand.vmem [shape: f32[32,2,64], index: 0, kind: input, shape index: {}]   ;;  %s2816_s1 = inlined_call_operand.hbm [shape: f32[32,64,64], index: 1, kind: input, shape index: {}]   ;;  %s2817_s2 = inlined_call_operand.vmem [shape: f32[32,2,64], index: 2, kind: output, shape index: {}]  }
   0x1   :  { %9 = vsyncpa [#allocation3 + $0x1], 0  ;;  %s2403_s9 = smov 0   ;;  %s2405_s10 = smov 0  }
   0x2   :  { %s2407_s11 = smov 0   ;;  %s2409_s12 = smov 0  }
   0x3 LB: > { %s1598_s13 = sadd.s32 4294967295, %s2380_s12   ;;  %s2423_s14 = sadd.s32 1, %s2380_s12   ;;  %s2380_s12 = sphi %s2409_s12, %s2824_s12   ;;  %s2376_s11 = sphi %s2407_s11, %s2823_s11   ;;  %s2372_s10 = sphi %s2405_s10, %s2822_s10   ;;  %s2368_s9 = sphi %s2403_s9, %s2821_s9  }
   0x4   : > { %s45_s15 = ssub.s32 %s2380_s12, %s2423_s14  ;;  %s48_s16 = sadd.s32 1, %s2376_s11 }
   0x5   : > { %p46_p0 = scmp.eq.s32.totalorder %s45_s15, 0  ;;  %p55_p1 = scmp.ne.s32.totalorder %s2376_s11, %s2372_s10 }
   0x6   : > { %p56_p2 = scmp.eq.s32.totalorder %s2380_s12, 0  ;;  %p61_p3 = scmp.ne.s32.totalorder %s2372_s10, %s2368_s9 }
   0x7   : > { %s2433_s17 = scalar_select %p46_p0, %s2376_s11, %s48_s16  }
   0x8   : > { %p57_p4 = por %p56_p2, %p55_p1  ;;  %p62_p5 = scmp.eq.s32.totalorder %s1598_s13, 0 }
   0x9   : > { %p2278_p6 = scmp.lt.s32.totalorder %s2380_s12, 2  ;;  %s120_s19 = sand.u32 1, %s2376_s11  }
   0xa   : > { %p2438_p7 = por %p62_p5, %p61_p3  ;;  %s1602_s20 = sshll.u32 %s120_s19, 10 }
   0xb   : > { %s1631_s21 = sshll.u32 %s2380_s12, 14  ;;  %s124_s25 = scalar_lea.vmem [#allocation2], %s1602_s20 }
   0xc   : > { %s2447_s24 = scalar_lea.hbm %s2816_s1, %s1631_s21  ;;  %s132_s26 = sshll.u32 %s124_s25, 4  ;;  %s2449_s26 = int_to_ptr.vmem [resolvable:$true] %s132_s26 }
   0xd   : > { %p2451_p8 = pnand %p2278_p6, %p57_p4  ;;  %s2456_s28 = scalar_lea.sflag [#allocation3], %s120_s19 }
   0xe   : > { %s2316_s29 = scalar_lea.hbm %s2447_s24, 16384  ;;  %s2321_s4 = scalar_lea.hbm %s2816_s1, 32768 }
   0xf   : > { %p2317_p10 = scmp.ne.s32.totalorder %s2447_s24, %s2316_s29  ;;  %p2318_p11 = pneg %p2451_p8 }
  0x10   : > { %p2322_p0 = scmp.lt.u32.totalorder %s2447_s24, %s2816_s1  ;;  %p2323_p1 = scmp.lt.u32.totalorder %s2321_s4, %s2316_s29 }
  0x11   : > { %p2319_p12 = pnand %p2318_p11, %p2317_p10  ;;  %p2325_p3 = scmp.lt.u32.totalorder %s2316_s29, %s2447_s24 }
  0x12   : > { %p2324_p2 = por %p2323_p1, %p2322_p0 }
  0x13   : > { %p2320_p13 = pneg %p2319_p12 }
  0x14   : > { %p2326_p4 = por %p2325_p3, %p2324_p2 }
  0x16   : > { %p2327_p5 = pnand %p2326_p4, %p2320_p13 }
  0x18   : > { %2330 = shalt.err (!%p2327_p5)
}
  0x19   : > { %s2331_s7 = scalar_lea.vmem %s2449_s26, 16384  ;;  %s2382_s8 = smov [#allocation2]  }
  0x1a   : > { %p2332_p6 = scmp.ne.s32.totalorder %s2449_s26, %s2331_s7  ;;  %s2336_s9 = sshll.u32 %s2382_s8, 4  ;;  %s2337_s9 = int_to_ptr.vmem [resolvable:$false] %s2336_s9 }
  0x1b   : > { %s2338_s15 = scalar_lea.vmem %s2337_s9, 32768  ;;  %p2339_p9 = scmp.lt.s32.totalorder %s2449_s26, %s2337_s9 }
  0x1c   : > { %p2334_p10 = pnand %p2332_p6, %p2318_p11  ;;  %p2340_p0 = scmp.lt.s32.totalorder %s2338_s15, %s2331_s7 }
  0x1e   : > { %p2335_p12 = pneg %p2334_p10  ;;  %p2341_p1 = por %p2340_p0, %p2339_p9 }
  0x20   : > { %p2342_p2 = pnand %p2341_p1, %p2335_p12 }
  0x22   : > { %2345 = shalt.err (!%p2342_p2)
}
  0x23   : > { %s2383_s16 = smov 128   ;;  %s2384_s19 = smov 8  }
  0x24   : > { %2277 = dma.hbm_to_vmem [thread:$0]  (!%p2451_p8), %s2447_s24, 16384, %s2449_s26, %s2456_s28, %s2383_s16, %s2383_s16, %s2384_s19  }
  0x25   : > { %p140_p11 = scmp.lt.s32.totalorder %s2380_s12, 3  ;;  %p2820_p13 = scmp.ge.s32.totalorder %s2380_s12, 1 }
  0x27   : > { %p141_p3 = pnand %p2820_p13, %p140_p11 }
  0x28   : > { %s146_s20 = sand.u32 (!%p141_p3), 1, %s2372_s10  }
  0x29   : > { %144 = sbr.rel (%p141_p3) target bundleno = 394 (0x18a), region = 28  ;;  %s1607_s21 = sshll.u32 (!%p141_p3), %s146_s20, 10 }
  0x2a   : > { %s147_s22 = scalar_lea.sflag (!%p141_p3), [#allocation3], %s146_s20  ;;  %s2488_s23 = scalar_lea.vmem (!%p141_p3), [#allocation2], %s1607_s21 }
  0x30   : > { %2363 = dma.done.wait (%p2438_p7), %s147_s22, 16384  }
  0x31   : > { %2365 = vsyncadd (%p2438_p7), %s147_s22, 4294950912  ;;  %v2385_v0 = vmov 0.0|0.0   ;;  %vm2386_vm0 = vmmov 0   ;;  %v2387_v1 = vmov 0.0   ;;  %s1608_s18 = sshll.u32 %s1598_s13, 4  ;;  %v205_v2 = vld [vmem:[%s2488_s23] sm:$0xff] }
  0x32   : > { %2080 = vmatprep.subr.bf16.mxu0 %v2385_v0  ;;  %2092 = vmatprep.subr.bf16.mxu1 %v2385_v0  ;;  %v206_v3 = vld [vmem:[%s2488_s23 + $0x8] sm:$0xff]  ;;  %v213_v4 = vld [vmem:[%s2488_s23 + $0x40] sm:$0xff]  ;;  %v207_v7 = vld [vmem:[%s2488_s23 + $0x10] sm:$0xff]  ;;  %p177_p7 = scmp.lt.s32.totalorder %s1608_s18, 31  ;;  %vm333_vm1 = vcmask 523264   ;;  %vm1502_vm2 = vcmask 517120  }
  0x33   : > { %1792 = vmatprep.mubr.msk.f32.mxu0 %vm2386_vm0, %v2387_v1  ;;  %1811 = vmatprep.mubr.msk.f32.mxu1 %vm2386_vm0, %v2387_v1  ;;  %v2081_v5 = vpack.c.bf16 %v206_v3, %v205_v2  ;;  %v214_v6 = vld [vmem:[%s2488_s23 + $0x48] sm:$0xff]  ;;  %v208_v8 = vld [vmem:[%s2488_s23 + $0x18] sm:$0xff]  ;;  %v215_v10 = vld [vmem:[%s2488_s23 + $0x50] sm:$0xff] }
  0x34   : > { %v2093_v9 = vpack.c.bf16 %v214_v6, %v213_v4  ;;  %v216_v11 = vld [vmem:[%s2488_s23 + $0x58] sm:$0xff]  ;;  %v2084_v12 = vpack.c.bf16 %v208_v8, %v207_v7  ;;  %v209_v14 = vld [vmem:[%s2488_s23 + $0x20] sm:$0xff]  ;;  %v210_v15 = vld [vmem:[%s2488_s23 + $0x28] sm:$0xff]  ;;  %s2826_s18 = smov (!%p177_p7, %s1608_s18), 31 }
  0x35   : > { %2082 = vmatpush3.bf16.msra.mxu0 %v2081_v5  ;;  %v2096_v13 = vpack.c.bf16 %v216_v11, %v215_v10  ;;  %v217_v16 = vld [vmem:[%s2488_s23 + $0x60] sm:$0xff]  ;;  %v218_v17 = vld [vmem:[%s2488_s23 + $0x68] sm:$0xff]  ;;  %v2087_v18 = vpack.c.bf16 %v210_v15, %v209_v14  ;;  %v211_v20 = vld [vmem:[%s2488_s23 + $0x30] sm:$0xff]  ;;  %s1609_s12 = sshll.u32 %s2826_s18, 1 }
  0x36   : > { %2094 = vmatpush3.bf16.msra.mxu1 %v2093_v9  ;;  %2083 = vmatprep.subr.bf16.mxu0 %v2385_v0  ;;  %v2099_v19 = vpack.c.bf16 %v218_v17, %v217_v16  ;;  %v212_v21 = vld [vmem:[%s2488_s23 + $0x38] sm:$0xff]  ;;  %v219_v22 = vld [vmem:[%s2488_s23 + $0x70] sm:$0xff]  ;;  %s2532_s25 = scalar_lea.vmem %s2815_s0, %s1609_s12  ;;  %v221_v26 = vld [vmem:[%s2488_s23 + $0x80] sm:$0xff]  ;;  %s2768_s28 = scalar_lea.vmem %s2817_s2, %s1609_s12 }
  0x37   : > { %2095 = vmatprep.subr.bf16.mxu1 %v2385_v0  ;;  %v220_v23 = vld [vmem:[%s2488_s23 + $0x78] sm:$0xff]  ;;  %v2090_v24 = vpack.c.bf16 %v212_v21, %v211_v20  ;;  %v222_v27 = vld [vmem:[%s2488_s23 + $0x88] sm:$0xff]  ;;  %v229_v28 = vld [vmem:[%s2488_s23 + $0xc0] sm:$0xff] }
  0x38   : > { %v2102_v25 = vpack.c.bf16 %v220_v23, %v219_v22  ;;  %v230_v29 = vld [vmem:[%s2488_s23 + $0xc8] sm:$0xff]  ;;  %v189_v30 = vld [vmem:[%s2532_s25] sm:$0x3]  ;;  %v2105_v31 = vpack.c.bf16 %v222_v27, %v221_v26  ;;  %v190_v32 = vld [vmem:[%s2532_s25 + $0x2] sm:$0x3] }
  0x39   : > { %2085 = vmatpush3.bf16.msra.mxu0 %v2084_v12  ;;  %v2117_v33 = vpack.c.bf16 %v230_v29, %v229_v28  ;;  %v223_v34 = vld [vmem:[%s2488_s23 + $0x90] sm:$0xff]  ;;  %v224_v35 = vld [vmem:[%s2488_s23 + $0x98] sm:$0xff]  ;;  %v225_v40 = vld [vmem:[%s2488_s23 + $0xa0] sm:$0xff] }
  0x3a   : > { %2097 = vmatpush3.bf16.msra.mxu1 %v2096_v13  ;;  %2086 = vmatprep.subr.bf16.mxu0 %v2385_v0  ;;  %v231_v36 = vld [vmem:[%s2488_s23 + $0xd0] sm:$0xff]  ;;  %v232_v37 = vld [vmem:[%s2488_s23 + $0xd8] sm:$0xff]  ;;  %v2108_v38 = vpack.c.bf16 %v224_v35, %v223_v34  ;;  %v226_v41 = vld [vmem:[%s2488_s23 + $0xa8] sm:$0xff] }
  0x3b   : > { %2098 = vmatprep.subr.bf16.mxu1 %v2385_v0  ;;  %v2120_v39 = vpack.c.bf16 %v232_v37, %v231_v36  ;;  %v233_v42 = vld [vmem:[%s2488_s23 + $0xe0] sm:$0xff]  ;;  %v234_v43 = vld [vmem:[%s2488_s23 + $0xe8] sm:$0xff]  ;;  %v2111_v44 = vpack.c.bf16 %v226_v41, %v225_v40  ;;  %v227_v46 = vld [vmem:[%s2488_s23 + $0xb0] sm:$0xff] }
  0x3c   : > { %v2123_v45 = vpack.c.bf16 %v234_v43, %v233_v42  ;;  %v228_v47 = vld [vmem:[%s2488_s23 + $0xb8] sm:$0xff]  ;;  %v235_v48 = vld [vmem:[%s2488_s23 + $0xf0] sm:$0xff]  ;;  %v237_v52 = vld [vmem:[%s2488_s23 + $0x100] sm:$0xff] }
  0x3d   : > { %2088 = vmatpush3.bf16.msra.mxu0 %v2087_v18  ;;  %v236_v49 = vld [vmem:[%s2488_s23 + $0xf8] sm:$0xff]  ;;  %v2114_v50 = vpack.c.bf16 %v228_v47, %v227_v46  ;;  %v238_v53 = vld [vmem:[%s2488_s23 + $0x108] sm:$0xff]  ;;  %v245_v54 = vld [vmem:[%s2488_s23 + $0x140] sm:$0xff] }
  0x3e   : > { %2100 = vmatpush3.bf16.msra.mxu1 %v2099_v19  ;;  %2089 = vmatprep.subr.bf16.mxu0 %v2385_v0  ;;  %v2126_v51 = vpack.c.bf16 %v236_v49, %v235_v48  ;;  %v246_v55 = vld [vmem:[%s2488_s23 + $0x148] sm:$0xff]  ;;  %v191_v56 = vld [vmem:[%s2532_s25 + $0x4] sm:$0x3]  ;;  %v2129_v57 = vpack.c.bf16 %v238_v53, %v237_v52  ;;  %v192_v58 = vld [vmem:[%s2532_s25 + $0x6] sm:$0x3] }
  0x3f   : > { %2101 = vmatprep.subr.bf16.mxu1 %v2385_v0  ;;  %v2141_v59 = vpack.c.bf16 %v246_v55, %v245_v54  ;;  %v239_v60 = vld [vmem:[%s2488_s23 + $0x110] sm:$0xff]  ;;  %v240_v61 = vld [vmem:[%s2488_s23 + $0x118] sm:$0xff]  ;;  %v241_v4 = vld [vmem:[%s2488_s23 + $0x120] sm:$0xff] }
  0x40   : > { %v247_v62 = vld [vmem:[%s2488_s23 + $0x150] sm:$0xff]  ;;  %v248_v63 = vld [vmem:[%s2488_s23 + $0x158] sm:$0xff]  ;;  %v2132_v2 = vpack.c.bf16 %v240_v61, %v239_v60  ;;  %v242_v5 = vld [vmem:[%s2488_s23 + $0x128] sm:$0xff] }
  0x41   : > { %2091 = vmatpush3.bf16.msra.mxu0 %v2090_v24  ;;  %v2144_v3 = vpack.c.bf16 %v248_v63, %v247_v62  ;;  %v249_v6 = vld [vmem:[%s2488_s23 + $0x160] sm:$0xff]  ;;  %v250_v7 = vld [vmem:[%s2488_s23 + $0x168] sm:$0xff]  ;;  %v2135_v8 = vpack.c.bf16 %v242_v5, %v241_v4  ;;  %v243_v10 = vld [vmem:[%s2488_s23 + $0x130] sm:$0xff] }
  0x42   : > { %2103 = vmatpush3.bf16.msra.mxu1 %v2102_v25  ;;  %2104 = vmatprep.subr.bf16.mxu0 %v2385_v0  ;;  %v2147_v9 = vpack.c.bf16 %v250_v7, %v249_v6  ;;  %v244_v11 = vld [vmem:[%s2488_s23 + $0x138] sm:$0xff]  ;;  %v251_v12 = vld [vmem:[%s2488_s23 + $0x170] sm:$0xff]  ;;  %v253_v16 = vld [vmem:[%s2488_s23 + $0x180] sm:$0xff] }
  0x43   : > { %2116 = vmatprep.subr.bf16.mxu1 %v2385_v0  ;;  %v252_v13 = vld [vmem:[%s2488_s23 + $0x178] sm:$0xff]  ;;  %v2138_v14 = vpack.c.bf16 %v244_v11, %v243_v10  ;;  %v254_v17 = vld [vmem:[%s2488_s23 + $0x188] sm:$0xff]  ;;  %v261_v18 = vld [vmem:[%s2488_s23 + $0x1c0] sm:$0xff] }
  0x44   : > { %1793 = vmatmul.mubr.msk.f32.vlgmr.msra.gmra.mrb[0].mxu0 %vm333_vm1, %v189_v30  ;;  %v2150_v15 = vpack.c.bf16 %v252_v13, %v251_v12  ;;  %v262_v19 = vld [vmem:[%s2488_s23 + $0x1c8] sm:$0xff]  ;;  %v2153_v21 = vpack.c.bf16 %v254_v17, %v253_v16  ;;  %v255_v24 = vld [vmem:[%s2488_s23 + $0x190] sm:$0xff]  ;;  %v256_v25 = vld [vmem:[%s2488_s23 + $0x198] sm:$0xff] }
  0x45   : > { %1812 = vmatmul.mubr.msk.f32.vlgmr.msra.gmra.mrb[0].mxu1 %vm333_vm1, %v190_v32  ;;  %2106 = vmatpush3.bf16.msra.mxu0 %v2105_v31  ;;  %v193_v20 = vld [vmem:[%s2532_s25 + $0x8] sm:$0x3]  ;;  %v194_v22 = vld [vmem:[%s2532_s25 + $0xa] sm:$0x3]  ;;  %v2165_v23 = vpack.c.bf16 %v262_v19, %v261_v18  ;;  %v263_v26 = vld [vmem:[%s2488_s23 + $0x1d0] sm:$0xff]  ;;  %v2156_v28 = vpack.c.bf16 %v256_v25, %v255_v24 }
  0x46   : > { %2118 = vmatpush3.bf16.msra.mxu1 %v2117_v33  ;;  %2107 = vmatprep.subr.bf16.mxu0 %v2385_v0  ;;  %v264_v27 = vld [vmem:[%s2488_s23 + $0x1d8] sm:$0xff]  ;;  %v257_v30 = vld [vmem:[%s2488_s23 + $0x1a0] sm:$0xff]  ;;  %v258_v31 = vld [vmem:[%s2488_s23 + $0x1a8] sm:$0xff] }
  0x47   : > { %2119 = vmatprep.subr.bf16.mxu1 %v2385_v0  ;;  %1830 = vmatprep.mubr.msk.f32.mxu0 %vm2386_vm0, %v2387_v1  ;;  %v2168_v29 = vpack.c.bf16 %v264_v27, %v263_v26  ;;  %v265_v32 = vld [vmem:[%s2488_s23 + $0x1e0] sm:$0xff]  ;;  %v266_v33 = vld [vmem:[%s2488_s23 + $0x1e8] sm:$0xff]  ;;  %v2159_v34 = vpack.c.bf16 %v258_v31, %v257_v30  ;;  %v259_v36 = vld [vmem:[%s2488_s23 + $0x1b0] sm:$0xff] }
  0x48   : > { %1849 = vmatprep.mubr.msk.f32.mxu1 %vm2386_vm0, %v2387_v1  ;;  %v2171_v35 = vpack.c.bf16 %v266_v33, %v265_v32  ;;  %v260_v37 = vld [vmem:[%s2488_s23 + $0x1b8] sm:$0xff]  ;;  %v269_v42 = vld [vmem:[%s2488_s23 + $0x200] sm:$0xff]  ;;  %v270_v43 = vld [vmem:[%s2488_s23 + $0x208] sm:$0xff] }
  0x49   : > { %2109 = vmatpush3.bf16.msra.mxu0 %v2108_v38  ;;  %v267_v38 = vld [vmem:[%s2488_s23 + $0x1f0] sm:$0xff]  ;;  %v2162_v40 = vpack.c.bf16 %v260_v37, %v259_v36  ;;  %v195_v46 = vld [vmem:[%s2532_s25 + $0xc] sm:$0x3]  ;;  %v2177_v47 = vpack.c.bf16 %v270_v43, %v269_v42  ;;  %v196_v48 = vld [vmem:[%s2532_s25 + $0xe] sm:$0x3] }
  0x4a   : > { %2121 = vmatpush3.bf16.msra.mxu1 %v2120_v39  ;;  %2110 = vmatprep.subr.bf16.mxu0 %v2385_v0  ;;  %v268_v39 = vld [vmem:[%s2488_s23 + $0x1f8] sm:$0xff]  ;;  %v279_v52 = vld [vmem:[%s2488_s23 + $0x250] sm:$0xff]  ;;  %v285_v6 = vld [vmem:[%s2488_s23 + $0x280] sm:$0xff] }
  0x4b   : > { %2122 = vmatprep.subr.bf16.mxu1 %v2385_v0  ;;  %v2174_v41 = vpack.c.bf16 %v268_v39, %v267_v38  ;;  %v280_v53 = vld [vmem:[%s2488_s23 + $0x258] sm:$0xff]  ;;  %v275_v62 = vld [vmem:[%s2488_s23 + $0x230] sm:$0xff]  ;;  %v286_v7 = vld [vmem:[%s2488_s23 + $0x288] sm:$0xff] }
  0x4c   : > { %v2192_v55 = vpack.c.bf16 %v280_v53, %v279_v52  ;;  %v276_v63 = vld [vmem:[%s2488_s23 + $0x238] sm:$0xff]  ;;  %v197_v10 = vld [vmem:[%s2532_s25 + $0x10] sm:$0x3]  ;;  %v2201_v11 = vpack.c.bf16 %v286_v7, %v285_v6  ;;  %v198_v12 = vld [vmem:[%s2532_s25 + $0x12] sm:$0x3] }
  0x4d   : > { %2112 = vmatpush3.bf16.msra.mxu0 %v2111_v44  ;;  %v277_v44 = vld [vmem:[%s2488_s23 + $0x240] sm:$0xff]  ;;  %v2186_v4 = vpack.c.bf16 %v276_v63, %v275_v62  ;;  %v295_v16 = vld [vmem:[%s2488_s23 + $0x2d0] sm:$0xff]  ;;  %v296_v17 = vld [vmem:[%s2488_s23 + $0x2d8] sm:$0xff] }
  0x4e   : > { %2124 = vmatpush3.bf16.msra.mxu1 %v2123_v45  ;;  %2113 = vmatprep.subr.bf16.mxu0 %v2385_v0  ;;  %v278_v45 = vld [vmem:[%s2488_s23 + $0x248] sm:$0xff]  ;;  %v2216_v19 = vpack.c.bf16 %v296_v17, %v295_v16  ;;  %v291_v26 = vld [vmem:[%s2488_s23 + $0x2b0] sm:$0xff]  ;;  %v292_v27 = vld [vmem:[%s2488_s23 + $0x2b8] sm:$0xff] }
  0x4f   : > { %2125 = vmatprep.subr.bf16.mxu1 %v2385_v0  ;;  %v2189_v49 = vpack.c.bf16 %v278_v45, %v277_v44  ;;  %v2210_v30 = vpack.c.bf16 %v292_v27, %v291_v26  ;;  %v301_v32 = vld [vmem:[%s2488_s23 + $0x300] sm:$0xff]  ;;  %v302_v33 = vld [vmem:[%s2488_s23 + $0x308] sm:$0xff]  ;;  %v199_v36 = vld [vmem:[%s2532_s25 + $0x14] sm:$0x3] }
  0x50   : > { %v2225_v37 = vpack.c.bf16 %v302_v33, %v301_v32  ;;  %v200_v38 = vld [vmem:[%s2532_s25 + $0x16] sm:$0x3]  ;;  %v312_v43 = vld [vmem:[%s2488_s23 + $0x358] sm:$0xff] }
  0x51   : > { %2115 = vmatpush3.bf16.msra.mxu0 %v2114_v50  ;;  %v271_v50 = vld [vmem:[%s2488_s23 + $0x210] sm:$0xff]  ;;  %v308_v53 = vld [vmem:[%s2488_s23 + $0x338] sm:$0xff] }
  0x52   : > { %2127 = vmatpush3.bf16.msra.mxu1 %v2126_v51  ;;  %2128 = vmatprep.subr.bf16.mxu0 %v2385_v0  ;;  %v272_v51 = vld [vmem:[%s2488_s23 + $0x218] sm:$0xff]  ;;  %v311_v42 = vld [vmem:[%s2488_s23 + $0x350] sm:$0xff] }
  0x53   : > { %2140 = vmatprep.subr.bf16.mxu1 %v2385_v0  ;;  %v2180_v54 = vpack.c.bf16 %v272_v51, %v271_v50  ;;  %v2240_v45 = vpack.c.bf16 %v312_v43, %v311_v42  ;;  %v307_v52 = vld [vmem:[%s2488_s23 + $0x330] sm:$0xff]  ;;  %v201_v62 = vld [vmem:[%s2532_s25 + $0x18] sm:$0x3] }
  0x54   : > { %1831 = vmatmul.mubr.msk.f32.vlgmr.msra.gmra.mrb[2].mxu0 %vm333_vm1, %v191_v56  ;;  %v273_v56 = vld [vmem:[%s2488_s23 + $0x220] sm:$0xff]  ;;  %v327_v6 = vld [vmem:[%s2488_s23 + $0x3d0] sm:$0xff]  ;;  %v328_v7 = vld [vmem:[%s2488_s23 + $0x3d8] sm:$0xff] }
  0x55   : > { %1850 = vmatmul.mubr.msk.f32.vlgmr.msra.gmra.mrb[2].mxu1 %vm333_vm1, %v192_v58  ;;  %2130 = vmatpush3.bf16.msra.mxu0 %v2129_v57  ;;  %v274_v57 = vld [vmem:[%s2488_s23 + $0x228] sm:$0xff]  ;;  %v281_v58 = vld [vmem:[%s2488_s23 + $0x260] sm:$0xff]  ;;  %v323_v16 = vld [vmem:[%s2488_s23 + $0x3b0] sm:$0xff] }
  0x56   : > { %2142 = vmatpush3.bf16.msra.mxu1 %v2141_v59  ;;  %2131 = vmatprep.subr.bf16.mxu0 %v2385_v0  ;;  %v282_v59 = vld [vmem:[%s2488_s23 + $0x268] sm:$0xff]  ;;  %v2183_v60 = vpack.c.bf16 %v274_v57, %v273_v56  ;;  %v2234_v56 = vpack.c.bf16 %v308_v53, %v307_v52  ;;  %v324_v17 = vld [vmem:[%s2488_s23 + $0x3b8] sm:$0xff] }
  0x57   : > { %2143 = vmatprep.subr.bf16.mxu1 %v2385_v0  ;;  %1868 = vmatprep.mubr.msk.f32.mxu0 %vm2386_vm0, %v2387_v1  ;;  %v2195_v61 = vpack.c.bf16 %v282_v59, %v281_v58  ;;  %v317_v58 = vld [vmem:[%s2488_s23 + $0x380] sm:$0xff]  ;;  %v318_v59 = vld [vmem:[%s2488_s23 + $0x388] sm:$0xff] }
  0x58   : > { %1887 = vmatprep.mubr.msk.f32.mxu1 %vm2386_vm0, %v2387_v1  ;;  %v2249_v63 = vpack.c.bf16 %v318_v59, %v317_v58 }
  0x59   : > { %2133 = vmatpush3.bf16.msra.mxu0 %v2132_v2  ;;  %v283_v2 = vld [vmem:[%s2488_s23 + $0x270] sm:$0xff] }
  0x5a   : > { %2145 = vmatpush3.bf16.msra.mxu1 %v2144_v3  ;;  %2134 = vmatprep.subr.bf16.mxu0 %v2385_v0  ;;  %v284_v3 = vld [vmem:[%s2488_s23 + $0x278] sm:$0xff] }
  0x5b   : > { %2146 = vmatprep.subr.bf16.mxu1 %v2385_v0  ;;  %v2198_v5 = vpack.c.bf16 %v284_v3, %v283_v2  ;;  %v202_v2 = vld [vmem:[%s2532_s25 + $0x1a] sm:$0x3] }
  0x5d   : > { %2136 = vmatpush3.bf16.msra.mxu0 %v2135_v8  ;;  %v293_v8 = vld [vmem:[%s2488_s23 + $0x2c0] sm:$0xff] }
  0x5e   : > { %2148 = vmatpush3.bf16.msra.mxu1 %v2147_v9  ;;  %2137 = vmatprep.subr.bf16.mxu0 %v2385_v0  ;;  %v294_v9 = vld [vmem:[%s2488_s23 + $0x2c8] sm:$0xff] }
  0x5f   : > { %2149 = vmatprep.subr.bf16.mxu1 %v2385_v0  ;;  %v2213_v13 = vpack.c.bf16 %v294_v9, %v293_v8  ;;  %v2264_v9 = vpack.c.bf16 %v328_v7, %v327_v6 }
  0x61   : > { %2139 = vmatpush3.bf16.msra.mxu0 %v2138_v14  ;;  %v287_v14 = vld [vmem:[%s2488_s23 + $0x290] sm:$0xff] }
  0x62   : > { %2151 = vmatpush3.bf16.msra.mxu1 %v2150_v15  ;;  %2152 = vmatprep.subr.bf16.mxu0 %v2385_v0  ;;  %v288_v15 = vld [vmem:[%s2488_s23 + $0x298] sm:$0xff] }
  0x63   : > { %2164 = vmatprep.subr.bf16.mxu1 %v2385_v0  ;;  %v2204_v18 = vpack.c.bf16 %v288_v15, %v287_v14 }
  0x64   : > { %1869 = vmatmul.mubr.msk.f32.vlgmr.msra.gmra.mrb[4].mxu0 %vm333_vm1, %v193_v20  ;;  %v289_v20 = vld [vmem:[%s2488_s23 + $0x2a0] sm:$0xff] }
  0x65   : > { %1888 = vmatmul.mubr.msk.f32.vlgmr.msra.gmra.mrb[4].mxu1 %vm333_vm1, %v194_v22  ;;  %2154 = vmatpush3.bf16.msra.mxu0 %v2153_v21  ;;  %v290_v21 = vld [vmem:[%s2488_s23 + $0x2a8] sm:$0xff]  ;;  %v297_v22 = vld [vmem:[%s2488_s23 + $0x2e0] sm:$0xff] }
  0x66   : > { %2166 = vmatpush3.bf16.msra.mxu1 %v2165_v23  ;;  %2155 = vmatprep.subr.bf16.mxu0 %v2385_v0  ;;  %v298_v23 = vld [vmem:[%s2488_s23 + $0x2e8] sm:$0xff]  ;;  %v2207_v24 = vpack.c.bf16 %v290_v21, %v289_v20  ;;  %v2258_v20 = vpack.c.bf16 %v324_v17, %v323_v16  ;;  %v203_v21 = vld [vmem:[%s2532_s25 + $0x1c] sm:$0x3] }
  0x67   : > { %2167 = vmatprep.subr.bf16.mxu1 %v2385_v0  ;;  %1906 = vmatprep.mubr.msk.f32.mxu0 %vm2386_vm0, %v2387_v1  ;;  %v2219_v25 = vpack.c.bf16 %v298_v23, %v297_v22  ;;  %v204_v22 = vld [vmem:[%s2532_s25 + $0x1e] sm:$0x3] }
  0x68   : > { %1925 = vmatprep.mubr.msk.f32.mxu1 %vm2386_vm0, %v2387_v1 }
  0x69   : > { %2157 = vmatpush3.bf16.msra.mxu0 %v2156_v28  ;;  %v299_v28 = vld [vmem:[%s2488_s23 + $0x2f0] sm:$0xff] }
  0x6a   : > { %2169 = vmatpush3.bf16.msra.mxu1 %v2168_v29  ;;  %2158 = vmatprep.subr.bf16.mxu0 %v2385_v0  ;;  %v300_v29 = vld [vmem:[%s2488_s23 + $0x2f8] sm:$0xff] }
  0x6b   : > { %2170 = vmatprep.subr.bf16.mxu1 %v2385_v0  ;;  %v2222_v31 = vpack.c.bf16 %v300_v29, %v299_v28 }
  0x6d   : > { %2160 = vmatpush3.bf16.msra.mxu0 %v2159_v34  ;;  %v309_v34 = vld [vmem:[%s2488_s23 + $0x340] sm:$0xff] }
  0x6e   : > { %2172 = vmatpush3.bf16.msra.mxu1 %v2171_v35  ;;  %2161 = vmatprep.subr.bf16.mxu0 %v2385_v0  ;;  %v310_v35 = vld [vmem:[%s2488_s23 + $0x348] sm:$0xff] }
  0x6f   : > { %2173 = vmatprep.subr.bf16.mxu1 %v2385_v0  ;;  %v2237_v39 = vpack.c.bf16 %v310_v35, %v309_v34 }
  0x71   : > { %2163 = vmatpush3.bf16.msra.mxu0 %v2162_v40  ;;  %v303_v40 = vld [vmem:[%s2488_s23 + $0x310] sm:$0xff] }
  0x72   : > { %2175 = vmatpush3.bf16.msra.mxu1 %v2174_v41  ;;  %2176 = vmatprep.subr.bf16.mxu0 %v2385_v0  ;;  %v304_v41 = vld [vmem:[%s2488_s23 + $0x318] sm:$0xff] }
  0x73   : > { %2188 = vmatprep.subr.bf16.mxu1 %v2385_v0  ;;  %v2228_v44 = vpack.c.bf16 %v304_v41, %v303_v40 }
  0x74   : > { %1907 = vmatmul.mubr.msk.f32.vlgmr.msra.gmra.mrb[6].mxu0 %vm333_vm1, %v195_v46  ;;  %v305_v46 = vld [vmem:[%s2488_s23 + $0x320] sm:$0xff] }
  0x75   : > { %1926 = vmatmul.mubr.msk.f32.vlgmr.msra.gmra.mrb[6].mxu1 %vm333_vm1, %v196_v48  ;;  %2178 = vmatpush3.bf16.msra.mxu0 %v2177_v47  ;;  %v306_v47 = vld [vmem:[%s2488_s23 + $0x328] sm:$0xff]  ;;  %v313_v48 = vld [vmem:[%s2488_s23 + $0x360] sm:$0xff] }
  0x76   : > { %2190 = vmatpush3.bf16.msra.mxu1 %v2189_v49  ;;  %2179 = vmatprep.subr.bf16.mxu0 %v2385_v0  ;;  %v314_v49 = vld [vmem:[%s2488_s23 + $0x368] sm:$0xff]  ;;  %v2231_v50 = vpack.c.bf16 %v306_v47, %v305_v46 }
  0x77   : > { %2191 = vmatprep.subr.bf16.mxu1 %v2385_v0  ;;  %1944 = vmatprep.mubr.msk.f32.mxu0 %vm2386_vm0, %v2387_v1  ;;  %v2243_v51 = vpack.c.bf16 %v314_v49, %v313_v48 }
  0x78   : > { %1963 = vmatprep.mubr.msk.f32.mxu1 %vm2386_vm0, %v2387_v1 }
  0x79   : > { %2181 = vmatpush3.bf16.msra.mxu0 %v2180_v54  ;;  %v315_v54 = vld [vmem:[%s2488_s23 + $0x370] sm:$0xff] }
  0x7a   : > { %2193 = vmatpush3.bf16.msra.mxu1 %v2192_v55  ;;  %2182 = vmatprep.subr.bf16.mxu0 %v2385_v0  ;;  %v316_v55 = vld [vmem:[%s2488_s23 + $0x378] sm:$0xff] }
  0x7b   : > { %2194 = vmatprep.subr.bf16.mxu1 %v2385_v0  ;;  %v2246_v57 = vpack.c.bf16 %v316_v55, %v315_v54 }
  0x7d   : > { %2184 = vmatpush3.bf16.msra.mxu0 %v2183_v60  ;;  %v325_v60 = vld [vmem:[%s2488_s23 + $0x3c0] sm:$0xff] }
  0x7e   : > { %2196 = vmatpush3.bf16.msra.mxu1 %v2195_v61  ;;  %2185 = vmatprep.subr.bf16.mxu0 %v2385_v0  ;;  %v326_v61 = vld [vmem:[%s2488_s23 + $0x3c8] sm:$0xff] }
  0x7f   : > { %2197 = vmatprep.subr.bf16.mxu1 %v2385_v0  ;;  %v2261_v3 = vpack.c.bf16 %v326_v61, %v325_v60 }
  0x81   : > { %2187 = vmatpush3.bf16.msra.mxu0 %v2186_v4  ;;  %v319_v4 = vld [vmem:[%s2488_s23 + $0x390] sm:$0xff] }
  0x82   : > { %2199 = vmatpush3.bf16.msra.mxu1 %v2198_v5  ;;  %2200 = vmatprep.subr.bf16.mxu0 %v2385_v0  ;;  %v320_v5 = vld [vmem:[%s2488_s23 + $0x398] sm:$0xff] }
  0x83   : > { %2212 = vmatprep.subr.bf16.mxu1 %v2385_v0  ;;  %v2252_v8 = vpack.c.bf16 %v320_v5, %v319_v4 }
  0x84   : > { %1945 = vmatmul.mubr.msk.f32.vlgmr.msra.gmra.mrb[8].mxu0 %vm333_vm1, %v197_v10  ;;  %v321_v10 = vld [vmem:[%s2488_s23 + $0x3a0] sm:$0xff] }
  0x85   : > { %1964 = vmatmul.mubr.msk.f32.vlgmr.msra.gmra.mrb[8].mxu1 %vm333_vm1, %v198_v12  ;;  %2202 = vmatpush3.bf16.msra.mxu0 %v2201_v11  ;;  %v322_v11 = vld [vmem:[%s2488_s23 + $0x3a8] sm:$0xff]  ;;  %v329_v12 = vld [vmem:[%s2488_s23 + $0x3e0] sm:$0xff] }
  0x86   : > { %2214 = vmatpush3.bf16.msra.mxu1 %v2213_v13  ;;  %2203 = vmatprep.subr.bf16.mxu0 %v2385_v0  ;;  %v330_v13 = vld [vmem:[%s2488_s23 + $0x3e8] sm:$0xff]  ;;  %v2255_v14 = vpack.c.bf16 %v322_v11, %v321_v10 }
  0x87   : > { %2215 = vmatprep.subr.bf16.mxu1 %v2385_v0  ;;  %1982 = vmatprep.mubr.msk.f32.mxu0 %vm2386_vm0, %v2387_v1  ;;  %v2267_v15 = vpack.c.bf16 %v330_v13, %v329_v12 }
  0x88   : > { %2001 = vmatprep.mubr.msk.f32.mxu1 %vm2386_vm0, %v2387_v1 }
  0x89   : > { %2205 = vmatpush3.bf16.msra.mxu0 %v2204_v18  ;;  %v331_v18 = vld [vmem:[%s2488_s23 + $0x3f0] sm:$0xff] }
  0x8a   : > { %2217 = vmatpush3.bf16.msra.mxu1 %v2216_v19  ;;  %2206 = vmatprep.subr.bf16.mxu0 %v2385_v0  ;;  %v332_v19 = vld [vmem:[%s2488_s23 + $0x3f8] sm:$0xff] }
  0x8b   : > { %2218 = vmatprep.subr.bf16.mxu1 %v2385_v0 }
  0x8d   : > { %2208 = vmatpush3.bf16.msra.mxu0 %v2207_v24 }
  0x8e   : > { %2220 = vmatpush3.bf16.msra.mxu1 %v2219_v25  ;;  %2209 = vmatprep.subr.bf16.mxu0 %v2385_v0 }
  0x8f   : > { %2221 = vmatprep.subr.bf16.mxu1 %v2385_v0 }
  0x91   : > { %2211 = vmatpush3.bf16.msra.mxu0 %v2210_v30 }
  0x92   : > { %2223 = vmatpush3.bf16.msra.mxu1 %v2222_v31  ;;  %2224 = vmatprep.subr.bf16.mxu0 %v2385_v0 }
  0x93   : > { %2236 = vmatprep.subr.bf16.mxu1 %v2385_v0 }
  0x94   : > { %1983 = vmatmul.mubr.msk.f32.vlgmr.msra.gmra.mrb[10].mxu0 %vm333_vm1, %v199_v36 }
  0x95   : > { %2002 = vmatmul.mubr.msk.f32.vlgmr.msra.gmra.mrb[10].mxu1 %vm333_vm1, %v200_v38  ;;  %2226 = vmatpush3.bf16.msra.mxu0 %v2225_v37 }
  0x96   : > { %2238 = vmatpush3.bf16.msra.mxu1 %v2237_v39  ;;  %2227 = vmatprep.subr.bf16.mxu0 %v2385_v0 }
  0x97   : > { %2239 = vmatprep.subr.bf16.mxu1 %v2385_v0  ;;  %2020 = vmatprep.mubr.msk.f32.mxu0 %vm2386_vm0, %v2387_v1 }
  0x98   : > { %2039 = vmatprep.mubr.msk.f32.mxu1 %vm2386_vm0, %v2387_v1 }
  0x99   : > { %2229 = vmatpush3.bf16.msra.mxu0 %v2228_v44 }
  0x9a   : > { %2241 = vmatpush3.bf16.msra.mxu1 %v2240_v45  ;;  %2230 = vmatprep.subr.bf16.mxu0 %v2385_v0 }
  0x9b   : > { %2242 = vmatprep.subr.bf16.mxu1 %v2385_v0 }
  0x9d   : > { %2232 = vmatpush3.bf16.msra.mxu0 %v2231_v50 }
  0x9e   : > { %2244 = vmatpush3.bf16.msra.mxu1 %v2243_v51  ;;  %2233 = vmatprep.subr.bf16.mxu0 %v2385_v0 }
  0x9f   : > { %2245 = vmatprep.subr.bf16.mxu1 %v2385_v0 }
  0xa1   : > { %2235 = vmatpush3.bf16.msra.mxu0 %v2234_v56 }
  0xa2   : > { %2247 = vmatpush3.bf16.msra.mxu1 %v2246_v57  ;;  %2248 = vmatprep.subr.bf16.mxu0 %v2385_v0 }
  0xa3   : > { %2260 = vmatprep.subr.bf16.mxu1 %v2385_v0 }
  0xa4   : > { %2021 = vmatmul.mubr.msk.f32.vlgmr.msra.gmra.mrb[12].mxu0 %vm333_vm1, %v201_v62 }
  0xa5   : > { %2040 = vmatmul.mubr.msk.f32.vlgmr.msra.gmra.mrb[12].mxu1 %vm333_vm1, %v202_v2  ;;  %2250 = vmatpush3.bf16.msra.mxu0 %v2249_v63 }
  0xa6   : > { %2262 = vmatpush3.bf16.msra.mxu1 %v2261_v3  ;;  %2251 = vmatprep.subr.bf16.mxu0 %v2385_v0 }
  0xa7   : > { %2263 = vmatprep.subr.bf16.mxu1 %v2385_v0  ;;  %2058 = vmatprep.mubr.msk.f32.mxu0 %vm2386_vm0, %v2387_v1 }
  0xa8   : > { %2077 = vmatprep.mubr.msk.f32.mxu1 %vm2386_vm0, %v2387_v1  ;;  %v2270_v1 = vpack.c.bf16 %v332_v19, %v331_v18 }
  0xa9   : > { %2253 = vmatpush3.bf16.msra.mxu0 %v2252_v8 }
  0xaa   : > { %2265 = vmatpush3.bf16.msra.mxu1 %v2264_v9  ;;  %2254 = vmatprep.subr.bf16.mxu0 %v2385_v0 }
  0xab   : > { %2266 = vmatprep.subr.bf16.mxu1 %v2385_v0 }
  0xad   : > { %2256 = vmatpush3.bf16.msra.mxu0 %v2255_v14 }
  0xae   : > { %2268 = vmatpush3.bf16.msra.mxu1 %v2267_v15  ;;  %2257 = vmatprep.subr.bf16.mxu0 %v2385_v0 }
  0xaf   : > { %2269 = vmatprep.subr.bf16.mxu1 %v2385_v0 }
  0xb1   : > { %2259 = vmatpush3.bf16.msra.mxu0 %v2258_v20 }
  0xb2   : > { %2271 = vmatpush3.bf16.msra.mxu1 %v2270_v1 }
  0xb4   : > { %2059 = vmatmul.mubr.msk.f32.vlgmr.msra.gmra.mrb[14].mxu0 %vm333_vm1, %v203_v21 }
  0xb5   : > { %2078 = vmatmul.mubr.msk.f32.vlgmr.msra.gmra.mrb[14].mxu1 %vm333_vm1, %v204_v22 }
 0x117   : > { %v403_v0 = vpop.f32.mrb[0].mxu0 }
 0x118   : > { %1503 = vst.msk [vmem:[%s2768_s28] sm:$0x3] %vm1502_vm2, %v403_v0  ;;  %v476_v23 = vpop.f32.mrb[0].mxu1  ;;  %v1794_v24 = vpop.f32.mrb[1].mxu0 }
 0x119   : > { %1504 = vst.msk [vmem:[%s2768_s28 + $0x2] sm:$0x3] %vm1502_vm2, %v476_v23  ;;  %v1813_v25 = vpop.f32.mrb[1].mxu1 }
 0x127   : > { %v549_v26 = vpop.f32.mrb[2].mxu0 }
 0x128   : > { %1505 = vst.msk [vmem:[%s2768_s28 + $0x4] sm:$0x3] %vm1502_vm2, %v549_v26  ;;  %v622_v27 = vpop.f32.mrb[2].mxu1  ;;  %v1832_v28 = vpop.f32.mrb[3].mxu0 }
 0x129   : > { %1506 = vst.msk [vmem:[%s2768_s28 + $0x6] sm:$0x3] %vm1502_vm2, %v622_v27  ;;  %v1851_v29 = vpop.f32.mrb[3].mxu1 }
 0x137   : > { %v695_v30 = vpop.f32.mrb[4].mxu0 }
 0x138   : > { %1507 = vst.msk [vmem:[%s2768_s28 + $0x8] sm:$0x3] %vm1502_vm2, %v695_v30  ;;  %v768_v31 = vpop.f32.mrb[4].mxu1  ;;  %v1870_v32 = vpop.f32.mrb[5].mxu0 }
 0x139   : > { %1508 = vst.msk [vmem:[%s2768_s28 + $0xa] sm:$0x3] %vm1502_vm2, %v768_v31  ;;  %v1889_v33 = vpop.f32.mrb[5].mxu1 }
 0x147   : > { %v841_v34 = vpop.f32.mrb[6].mxu0 }
 0x148   : > { %1509 = vst.msk [vmem:[%s2768_s28 + $0xc] sm:$0x3] %vm1502_vm2, %v841_v34  ;;  %v914_v35 = vpop.f32.mrb[6].mxu1  ;;  %v1908_v36 = vpop.f32.mrb[7].mxu0 }
 0x149   : > { %1510 = vst.msk [vmem:[%s2768_s28 + $0xe] sm:$0x3] %vm1502_vm2, %v914_v35  ;;  %v1927_v37 = vpop.f32.mrb[7].mxu1 }
 0x157   : > { %v987_v38 = vpop.f32.mrb[8].mxu0 }
 0x158   : > { %1511 = vst.msk [vmem:[%s2768_s28 + $0x10] sm:$0x3] %vm1502_vm2, %v987_v38  ;;  %v1060_v39 = vpop.f32.mrb[8].mxu1  ;;  %v1946_v40 = vpop.f32.mrb[9].mxu0 }
 0x159   : > { %1512 = vst.msk [vmem:[%s2768_s28 + $0x12] sm:$0x3] %vm1502_vm2, %v1060_v39  ;;  %v1965_v41 = vpop.f32.mrb[9].mxu1 }
 0x167   : > { %v1133_v42 = vpop.f32.mrb[10].mxu0 }
 0x168   : > { %1513 = vst.msk [vmem:[%s2768_s28 + $0x14] sm:$0x3] %vm1502_vm2, %v1133_v42  ;;  %v1206_v43 = vpop.f32.mrb[10].mxu1  ;;  %v1984_v44 = vpop.f32.mrb[11].mxu0 }
 0x169   : > { %1514 = vst.msk [vmem:[%s2768_s28 + $0x16] sm:$0x3] %vm1502_vm2, %v1206_v43  ;;  %v2003_v45 = vpop.f32.mrb[11].mxu1 }
 0x177   : > { %v1279_v46 = vpop.f32.mrb[12].mxu0 }
 0x178   : > { %1515 = vst.msk [vmem:[%s2768_s28 + $0x18] sm:$0x3] %vm1502_vm2, %v1279_v46  ;;  %v1352_v47 = vpop.f32.mrb[12].mxu1  ;;  %v2022_v48 = vpop.f32.mrb[13].mxu0 }
 0x179   : > { %1516 = vst.msk [vmem:[%s2768_s28 + $0x1a] sm:$0x3] %vm1502_vm2, %v1352_v47  ;;  %v2041_v49 = vpop.f32.mrb[13].mxu1 }
 0x187   : > { %v1425_v50 = vpop.f32.mrb[14].mxu0 }
 0x188   : > { %1517 = vst.msk [vmem:[%s2768_s28 + $0x1c] sm:$0x3] %vm1502_vm2, %v1425_v50  ;;  %v1498_v51 = vpop.f32.mrb[14].mxu1  ;;  %v2060_v52 = vpop.f32.mrb[15].mxu0 }
 0x189   : > { %1518 = vst.msk [vmem:[%s2768_s28 + $0x1e] sm:$0x3] %vm1502_vm2, %v1498_v51  ;;  %v2079_v53 = vpop.f32.mrb[15].mxu1 }
 0x18a PF: > { %p12_p8 = scmp.ge.s32.totalorder %s2423_s14, 4   ;;  %s2821_s9 = smov %s2372_s10 }
 0x18b   : > { %s2822_s10 = smov %s2376_s11  ;;  %s2823_s11 = smov %s2433_s17 }
 0x18c   : > { %s2824_s12 = smov %s2423_s14  ;;  %14 = sbr.rel (!%p12_p8) target bundleno = 3 (0x3), region = 71 }
 0x193   :  { %1541 = vsyncpa [#allocation3], 1 }
 0x194   :  { %1543 = vsyncpa [#allocation3 + $0x1], 1 }

// kernel: _lambda_.16
= control target key start
LH: loop header
LB: loop body
LE: loop exit
PB: predicated region body
PF: predicated region fallthrough
CT: control target
= control target key end

     0   :  { %vm50_vm0 = vcmask 64512   ;;  %s1390_s2 = inlined_call_operand.vmem [shape: f32[8,128], index: 2, kind: input, shape index: {}]   ;;  %s1391_s1 = inlined_call_operand.vmem [shape: f32[128,8], index: 1, kind: input, shape index: {}]   ;;  %s1392_s0 = inlined_call_operand.vmem [shape: f32[128,128], index: 0, kind: input, shape index: {}]   ;;  %s1393_s3 = inlined_call_operand.vmem [shape: f32[1,128], index: 3, kind: input, shape index: {}]   ;;  %s1394_s4 = inlined_call_operand.vmem [shape: f32[128,128], index: 4, kind: output, shape index: {}]  }
   0x1   :  { %v49_v0 = vld [vmem:[%s1390_s2] sm:$0xff]  ;;  %v34_v3 = vld [vmem:[%s1391_s1 + $0x8] sm:$0xff]  ;;  %v35_v5 = vld [vmem:[%s1391_s1 + $0x10] sm:$0xff] }
   0x2   :  { %v33_v1 = vld [vmem:[%s1391_s1] sm:$0xff]  ;;  %769 = vmatprep.subr.mxu0 %v49_v0  ;;  %795 = vmatprep.subr.mxu1 %v49_v0  ;;  %v42_v4 = vld [vmem:[%s1391_s1 + $0x48] sm:$0xff]  ;;  %v43_v6 = vld [vmem:[%s1391_s1 + $0x50] sm:$0xff] }
   0x3   :  { %v41_v2 = vld [vmem:[%s1391_s1 + $0x40] sm:$0xff]  ;;  %770 = vmatpush3.msra.mxu0 %v49_v0  ;;  %796 = vmatpush3.msra.mxu1 %v49_v0  ;;  %v36_v7 = vld [vmem:[%s1391_s1 + $0x18] sm:$0xff]  ;;  %v38_v11 = vld [vmem:[%s1391_s1 + $0x28] sm:$0xff] }
   0x4   :  { %771 = vmatprep.mubr.msk.f32.mxu0 %vm50_vm0, %v33_v1  ;;  %783 = vmatprep.mubr.msk.f32.mxu1 %vm50_vm0, %v41_v2  ;;  %v44_v8 = vld [vmem:[%s1391_s1 + $0x58] sm:$0xff]  ;;  %v37_v9 = vld [vmem:[%s1391_s1 + $0x20] sm:$0xff]  ;;  %v46_v12 = vld [vmem:[%s1391_s1 + $0x68] sm:$0xff] }
   0x5   :  { %772 = vmatmul.mubr.msk.f32.vlgmr.msra.gmra.mrb[0].mxu0 %vm50_vm0, %v34_v3  ;;  %784 = vmatmul.mubr.msk.f32.vlgmr.msra.gmra.mrb[0].mxu1 %vm50_vm0, %v42_v4  ;;  %v45_v10 = vld [vmem:[%s1391_s1 + $0x60] sm:$0xff]  ;;  %v39_v13 = vld [vmem:[%s1391_s1 + $0x30] sm:$0xff]  ;;  %v40_v15 = vld [vmem:[%s1391_s1 + $0x38] sm:$0xff] }
   0x6   :  { %774 = vmatprep.mubr.msk.f32.mxu0 %vm50_vm0, %v35_v5  ;;  %786 = vmatprep.mubr.msk.f32.mxu1 %vm50_vm0, %v43_v6  ;;  %v47_v14 = vld [vmem:[%s1391_s1 + $0x70] sm:$0xff]  ;;  %v48_v16 = vld [vmem:[%s1391_s1 + $0x78] sm:$0xff]  ;;  %v18_v17 = vld [vmem:[%s1392_s0 + $0x8] sm:$0xff] }
   0x7   :  { %v26_v18 = vld [vmem:[%s1392_s0 + $0x48] sm:$0xff]  ;;  %v17_v19 = vld [vmem:[%s1392_s0] sm:$0xff]  ;;  %v20_v46 = vld [vmem:[%s1392_s0 + $0x18] sm:$0xff] }
   0x8   :  { %v25_v20 = vld [vmem:[%s1392_s0 + $0x40] sm:$0xff]  ;;  %v28_v50 = vld [vmem:[%s1392_s0 + $0x58] sm:$0xff]  ;;  %v19_v55 = vld [vmem:[%s1392_s0 + $0x10] sm:$0xff] }
   0x9   :  { %775 = vmatmul.mubr.msk.f32.gmra.mrb[2].mxu0 %vm50_vm0, %v36_v7  ;;  %787 = vmatmul.mubr.msk.f32.gmra.mrb[2].mxu1 %vm50_vm0, %v44_v8  ;;  %v970_v22 = vld [vmem:[%s1393_s3] ss:$0 sm:$0xff] }
   0xa   :  { %777 = vmatprep.mubr.msk.f32.mxu0 %vm50_vm0, %v37_v9  ;;  %789 = vmatprep.mubr.msk.f32.mxu1 %vm50_vm0, %v45_v10 }
   0xd   :  { %778 = vmatmul.mubr.msk.f32.gmra.mrb[4].mxu0 %vm50_vm0, %v38_v11  ;;  %790 = vmatmul.mubr.msk.f32.gmra.mrb[4].mxu1 %vm50_vm0, %v46_v12  ;;  %v27_v12 = vld [vmem:[%s1392_s0 + $0x50] sm:$0xff] }
   0xe   :  { %780 = vmatprep.mubr.msk.f32.mxu0 %vm50_vm0, %v39_v13  ;;  %792 = vmatprep.mubr.msk.f32.mxu1 %vm50_vm0, %v47_v14 }
  0x11   :  { %781 = vmatmul.mubr.msk.f32.gmra.mrb[6].mxu0 %vm50_vm0, %v40_v15  ;;  %793 = vmatmul.mubr.msk.f32.gmra.mrb[6].mxu1 %vm50_vm0, %v48_v16 }
  0xd8   :  { %v773_v21 = vpop.f32.mrb[0].mxu0  ;;  %v785_v23 = vpop.f32.mrb[0].mxu1 }
  0xd9   :  { %v245_v24 = vadd.f32 %v773_v21, %v18_v17  ;;  %v253_v25 = vadd.f32 %v785_v23, %v26_v18  ;;  %v165_v26 = vpop.f32.mrb[1].mxu0  ;;  %v205_v27 = vpop.f32.mrb[1].mxu1 }
  0xda   :  { %v244_v28 = vadd.f32 %v165_v26, %v17_v19  ;;  %v252_v29 = vadd.f32 %v205_v27, %v25_v20 }
  0xdb   :  { %v268_v30 = vadd.f32 %v970_v22, %v245_v24  ;;  %v276_v31 = vadd.f32 %v970_v22, %v253_v25  ;;  %v862_v25 = vmov -1.0  }
  0xdc   :  { %v267_v32 = vadd.f32 %v970_v22, %v244_v28  ;;  %v976_v33 = vadd.f32 %v970_v22, %v252_v29  ;;  %v776_v34 = vpop.f32.mrb[2].mxu0  ;;  %v788_v35 = vpop.f32.mrb[2].mxu1 }
  0xdd   :  { %v300_v36 = vmul.f32 0.70710677, %v268_v30  ;;  %v308_v37 = vmul.f32 0.70710677, %v276_v31  ;;  %v175_v43 = vpop.f32.mrb[3].mxu0  ;;  %v215_v51 = vpop.f32.mrb[3].mxu1  ;;  %v247_v1 = vadd.f32 %v776_v34, %v20_v46  ;;  %v255_v10 = vadd.f32 %v788_v35, %v28_v50 }
  0xde   :  { %v978_v38 = vmul.f32 0.70710677, %v267_v32  ;;  %v982_v42 = vmul.f32 0.70710677, %v976_v33  ;;  %v990_v52 = vmul.f32 0.5, %v268_v30  ;;  %v999_v58 = vmul.f32 0.5, %v276_v31 }
  0xdf   :  { %v348_v39 = vand.u32 2147483647, %v300_v36  ;;  %v356_v40 = vand.u32 2147483647, %v308_v37  ;;  %v1001_v59 = vmul.f32 0.5, %v267_v32  ;;  %v270_v9 = vadd.f32 %v970_v22, %v247_v1 }
  0xe0   :  { %v347_v41 = vand.u32 2147483647, %v978_v38  ;;  %v995_v56 = vpop.f32.mrb[4].mxu0  ;;  %v997_v57 = vpop.f32.mrb[4].mxu1  ;;  %v355_v60 = vand.u32 2147483647, %v982_v42  ;;  %v246_v11 = vadd.f32 %v175_v43, %v19_v55  ;;  %v1025_v16 = vadd.f32 %v970_v22, %v255_v10 }
  0xe1   :  { %v364_v44 = vmul.f32 0.3275911, %v348_v39  ;;  %v372_v45 = vmul.f32 0.3275911, %v356_v40  ;;  %v572_v47 = vsub.f32 0.0, %v348_v39  ;;  %v580_v48 = vsub.f32 0.0, %v356_v40 }
  0xe2   :  { %v363_v49 = vmul.f32 0.3275911, %v347_v41  ;;  %v1004_v61 = vpop.f32.mrb[5].mxu0  ;;  %v1006_v62 = vpop.f32.mrb[5].mxu1  ;;  %v571_v0 = vsub.f32 0.0, %v347_v41  ;;  %v579_v8 = vsub.f32 0.0, %v355_v60  ;;  %v1028_v19 = vadd.f32 %v970_v22, %v246_v11 }
  0xe3   :  { %v380_v53 = vadd.f32 1.0, %v364_v44  ;;  %v388_v54 = vadd.f32 1.0, %v372_v45  ;;  %v588_v4 = vmul.f32 %v572_v47, %v348_v39  ;;  %v596_v5 = vmul.f32 %v580_v48, %v356_v40 }
  0xe4   :  { %v379_v63 = vadd.f32 1.0, %v363_v49  ;;  %v1008_v2 = vpop.f32.mrb[6].mxu0  ;;  %v1010_v3 = vpop.f32.mrb[6].mxu1  ;;  %v371_v6 = vmul.f32 0.3275911, %v355_v60  ;;  %vm316_vm1 = vcmp.ge.f32.partialorder %v300_v36, 0.0  ;;  %v587_v18 = vmul.f32 %v571_v0, %v347_v41 }
  0xe5   :  { %798 = vrcp.f32 %v380_v53  ;;  %v1012_v7 = vpop.f32.mrb[7].mxu0  ;;  %v1018_v13 = vpop.f32.mrb[7].mxu1  ;;  %vm324_vm2 = vcmp.ge.f32.partialorder %v308_v37, 0.0  ;;  %vm315_vm3 = vcmp.ge.f32.partialorder %v978_v38, 0.0  ;;  %vm323_vm4 = vcmp.ge.f32.partialorder %v982_v42, 0.0  ;;  %v22_v49 = vld [vmem:[%s1392_s0 + $0x28] sm:$0xff] }
  0xe6   :  { %800 = vrcp.f32 %v388_v54  ;;  %v387_v14 = vadd.f32 1.0, %v371_v6  ;;  %v1022_v15 = vmul.f32 0.70710677, %v270_v9  ;;  %v605_v17 = vmul.f32 1.442695, %v588_v4 }
  0xe7   :  { %802 = vrcp.f32 %v379_v63  ;;  %v254_v20 = vadd.f32 %v215_v51, %v27_v12  ;;  %v621_v21 = vmul.f32 1.442695, %v596_v5  ;;  %v595_v23 = vmul.f32 %v579_v8, %v355_v60 }
  0xe8   :  { %804 = vrcp.f32 %v387_v14  ;;  %v350_v24 = vand.u32 2147483647, %v1022_v15  ;;  %v1033_v26 = vsel %vm316_vm1, 1.0, %v862_v25  ;;  %v1037_v27 = vsel %vm324_vm2, 1.0, %v862_v25 }
  0xe9   :  { %v1040_v28 = vmul.f32 0.5, %v976_v33  ;;  %v1043_v29 = vmul.f32 0.70710677, %v1025_v16  ;;  %v1048_v30 = vsel %vm315_vm3, 1.0, %v862_v25  ;;  %v1051_v34 = vmul.f32 0.70710677, %v1028_v19 }
  0xea   :  { %v366_v31 = vmul.f32 0.3275911, %v350_v24  ;;  %v574_v32 = vsub.f32 0.0, %v350_v24  ;;  %806 = vpow2.f32 %v605_v17  ;;  %v1056_v35 = vsel %vm323_vm4, 1.0, %v862_v25 }
  0xeb   :  { %v358_v33 = vand.u32 2147483647, %v1043_v29  ;;  %v1060_v36 = vadd.f32 %v970_v22, %v254_v20  ;;  %808 = vpow2.f32 %v621_v21  ;;  %v603_v38 = vmul.f32 1.442695, %v587_v18 }
  0xec   :  { %v619_v39 = vmul.f32 1.442695, %v595_v23  ;;  %v382_v40 = vadd.f32 1.0, %v366_v31  ;;  %v1067_v44 = vmul.f32 0.5, %v270_v9  ;;  %v590_v47 = vmul.f32 %v574_v32, %v350_v24 }
  0xed   :  { %v374_v42 = vmul.f32 0.3275911, %v358_v33  ;;  %v582_v45 = vsub.f32 0.0, %v358_v33  ;;  %v349_v48 = vand.u32 2147483647, %v1051_v34  ;;  %vm318_vm5 = vcmp.ge.f32.partialorder %v1022_v15, 0.0 }
  0xee   :  { %810 = vrcp.f32 %v382_v40  ;;  %v1075_v54 = vmul.f32 0.70710677, %v1060_v36  ;;  %v249_v5 = vadd.f32 %v995_v56, %v22_v49  ;;  %v609_v9 = vmul.f32 1.442695, %v590_v47 }
  0xef   :  { %v1062_v37 = vpop.eup %798  ;;  %v390_v51 = vadd.f32 1.0, %v374_v42  ;;  %v598_v53 = vmul.f32 %v582_v45, %v358_v33  ;;  %v365_v63 = vmul.f32 0.3275911, %v349_v48  ;;  %v573_v0 = vsub.f32 0.0, %v349_v48 }
  0xf0   :  { %v1064_v41 = vpop.eup %800  ;;  %v428_v43 = vmul.f32 1.0614054, %v1062_v37  ;;  %v357_v21 = vand.u32 2147483647, %v1075_v54  ;;  %vm326_vm6 = vcmp.ge.f32.partialorder %v1043_v29, 0.0  ;;  %vm317_vm7 = vcmp.ge.f32.partialorder %v1051_v34, 0.0 }
  0xf1   :  { %v436_v46 = vmul.f32 1.0614054, %v1064_v41  ;;  %v1077_v55 = vpop.eup %802  ;;  %812 = vrcp.f32 %v390_v51  ;;  %v625_v10 = vmul.f32 1.442695, %v598_v53  ;;  %v381_v11 = vadd.f32 1.0, %v365_v63 }
  0xf2   :  { %v444_v50 = vadd.f32 -1.4531521, %v428_v43  ;;  %v427_v4 = vmul.f32 1.0614054, %v1077_v55  ;;  %v1083_v6 = vpop.eup %804  ;;  %814 = vpow2.f32 %v603_v38  ;;  %v589_v20 = vmul.f32 %v573_v0, %v349_v48 }
  0xf3   :  { %v452_v60 = vadd.f32 -1.4531521, %v436_v46  ;;  %v435_v17 = vmul.f32 1.0614054, %v1083_v6  ;;  %816 = vrcp.f32 %v381_v11  ;;  %v373_v40 = vmul.f32 0.3275911, %v357_v21 }
  0xf4   :  { %v460_v1 = vmul.f32 %v1062_v37, %v444_v50  ;;  %v443_v14 = vadd.f32 -1.4531521, %v427_v4  ;;  %v807_v23 = vpop.eup %806  ;;  %818 = vpow2.f32 %v619_v39  ;;  %v1092_v38 = vadd.f32 %v970_v22, %v249_v5  ;;  %v30_v4 = vld [vmem:[%s1392_s0 + $0x68] sm:$0xff] }
  0xf5   :  { %v468_v8 = vmul.f32 %v1064_v41, %v452_v60  ;;  %v451_v31 = vadd.f32 -1.4531521, %v435_v17  ;;  %v809_v32 = vpop.eup %808  ;;  %820 = vpow2.f32 %v609_v9  ;;  %v607_v48 = vmul.f32 1.442695, %v589_v20 }
  0xf6   :  { %v476_v12 = vadd.f32 1.4214138, %v460_v1  ;;  %v459_v24 = vmul.f32 %v1077_v55, %v443_v14  ;;  %822 = vpow2.f32 %v625_v10  ;;  %v389_v49 = vadd.f32 1.0, %v373_v40 }
  0xf7   :  { %v484_v18 = vadd.f32 1.4214138, %v468_v8  ;;  %v467_v45 = vmul.f32 %v1083_v6, %v451_v31  ;;  %v581_v50 = vsub.f32 0.0, %v357_v21  ;;  %v1104_v0 = vsel %vm318_vm5, 1.0, %v862_v25 }
  0xf8   :  { %v492_v56 = vmul.f32 %v1062_v37, %v476_v12  ;;  %v475_v42 = vadd.f32 1.4214138, %v459_v24  ;;  %v1095_v46 = vpop.eup %810  ;;  %824 = vrcp.f32 %v389_v49  ;;  %v1107_v1 = vmul.f32 0.70710677, %v1092_v38 }
  0xf9   :  { %v500_v33 = vmul.f32 %v1064_v41, %v484_v18  ;;  %v483_v53 = vadd.f32 1.4214138, %v467_v45  ;;  %v430_v60 = vmul.f32 1.0614054, %v1095_v46  ;;  %826 = vpow2.f32 %v607_v48 }
  0xfa   :  { %v508_v43 = vadd.f32 -0.28449672, %v492_v56  ;;  %v491_v51 = vmul.f32 %v1077_v55, %v475_v42  ;;  %v1116_v14 = vmul.f32 %v581_v50, %v357_v21  ;;  %v257_v42 = vadd.f32 %v997_v57, %v30_v4 }
  0xfb   :  { %v516_v47 = vadd.f32 -0.28449672, %v500_v33  ;;  %v1112_v5 = vpop.eup %812  ;;  %v499_v10 = vmul.f32 %v1083_v6, %v483_v53  ;;  %v446_v11 = vadd.f32 -1.4531521, %v430_v60  ;;  %v285_v34 = vmul.f32 0.5, %v1028_v19 }
  0xfc   :  { %v524_v39 = vmul.f32 %v1062_v37, %v508_v43  ;;  %v507_v9 = vadd.f32 -0.28449672, %v491_v51  ;;  %v438_v15 = vmul.f32 1.0614054, %v1112_v5  ;;  %v815_v17 = vpop.eup %814  ;;  %v1125_v43 = vand.u32 2147483647, %v1107_v1 }
  0xfd   :  { %v532_v63 = vmul.f32 %v1064_v41, %v516_v47  ;;  %v515_v56 = vadd.f32 -0.28449672, %v499_v10  ;;  %v462_v24 = vmul.f32 %v1095_v46, %v446_v11  ;;  %v1121_v31 = vpop.eup %816  ;;  %vm325_vm8 = vcmp.ge.f32.partialorder %v1075_v54, 0.0 }
  0xfe   :  { %v540_v8 = vadd.f32 0.2548296, %v524_v39  ;;  %v523_v20 = vmul.f32 %v1077_v55, %v507_v9  ;;  %v454_v40 = vadd.f32 -1.4531521, %v438_v15  ;;  %v819_v21 = vpop.eup %818  ;;  %v429_v51 = vmul.f32 1.0614054, %v1121_v31 }
  0xff   :  { %v548_v12 = vadd.f32 0.2548296, %v532_v63  ;;  %v478_v48 = vadd.f32 1.4214138, %v462_v24  ;;  %v821_v49 = vpop.eup %820  ;;  %v341_v54 = vsel %vm325_vm8, 1.0, %v862_v25  ;;  %vm320_vm9 = vcmp.ge.f32.partialorder %v1107_v1, 0.0 }
 0x100   :  { %v556_v18 = vmul.f32 %v1062_v37, %v540_v8  ;;  %v539_v47 = vadd.f32 0.2548296, %v523_v20  ;;  %v531_v37 = vmul.f32 %v1083_v6, %v515_v56  ;;  %v470_v39 = vmul.f32 %v1112_v5, %v454_v40  ;;  %v823_v53 = vpop.eup %822 }
 0x101   :  { %v564_v33 = vmul.f32 %v1064_v41, %v548_v12  ;;  %v368_v41 = vmul.f32 0.3275911, %v1125_v43  ;;  %v494_v57 = vmul.f32 %v1095_v46, %v478_v48  ;;  %v445_v9 = vadd.f32 -1.4531521, %v429_v51 }
 0x102   :  { %v636_v45 = vmul.f32 %v807_v23, %v556_v18  ;;  %v555_v63 = vmul.f32 %v1077_v55, %v539_v47  ;;  %v547_v8 = vadd.f32 0.2548296, %v531_v37  ;;  %v486_v4 = vadd.f32 1.4214138, %v470_v39  ;;  %v1136_v18 = vpop.eup %824 }
 0x103   :  { %v644_v50 = vmul.f32 %v809_v32, %v564_v33  ;;  %v384_v10 = vadd.f32 1.0, %v368_v41  ;;  %v510_v15 = vadd.f32 -0.28449672, %v494_v57  ;;  %v461_v55 = vmul.f32 %v1121_v31, %v445_v9  ;;  %v827_v47 = vpop.eup %826 }
 0x104   :  { %v652_v60 = vsub.f32 1.0, %v636_v45  ;;  %v635_v32 = vmul.f32 %v815_v17, %v555_v63  ;;  %v563_v12 = vmul.f32 %v1083_v6, %v547_v8  ;;  %v502_v56 = vmul.f32 %v1112_v5, %v486_v4 }
 0x105   :  { %v660_v23 = vsub.f32 1.0, %v644_v50  ;;  %828 = vrcp.f32 %v384_v10  ;;  %v526_v45 = vmul.f32 %v1095_v46, %v510_v15  ;;  %v477_v37 = vadd.f32 1.4214138, %v461_v55 }
 0x106   :  { %v668_v11 = vmul.f32 %v652_v60, %v1033_v26  ;;  %v651_v33 = vsub.f32 1.0, %v635_v32  ;;  %v643_v40 = vmul.f32 %v819_v21, %v563_v12  ;;  %v518_v17 = vadd.f32 -0.28449672, %v502_v56 }
 0x107   :  { %v676_v20 = vmul.f32 %v660_v23, %v1037_v27  ;;  %v576_v6 = vsub.f32 0.0, %v1125_v43  ;;  %v542_v39 = vadd.f32 0.2548296, %v526_v45  ;;  %v493_v21 = vmul.f32 %v1121_v31, %v477_v37 }
 0x108   :  { %v684_v24 = vadd.f32 1.0, %v668_v11  ;;  %v667_v27 = vmul.f32 %v651_v33, %v1048_v30  ;;  %v659_v50 = vsub.f32 1.0, %v643_v40  ;;  %v534_v41 = vmul.f32 %v1112_v5, %v518_v17 }
 0x109   :  { %v692_v26 = vadd.f32 1.0, %v676_v20  ;;  %v437_v60 = vmul.f32 1.0614054, %v1136_v18  ;;  %v509_v30 = vadd.f32 -0.28449672, %v493_v21  ;;  %v1159_v23 = vadd.f32 %v970_v22, %v257_v42 }
 0x10a   :  { %v700_v48 = vmul.f32 %v684_v24, %v990_v52  ;;  %v683_v63 = vadd.f32 1.0, %v667_v27  ;;  %v675_v8 = vmul.f32 %v659_v50, %v1056_v35  ;;  %v558_v52 = vmul.f32 %v1095_v46, %v542_v39  ;;  %v21_v46 = vld [vmem:[%s1392_s0 + $0x20] sm:$0xff] }
 0x10b   :  { %v708_v51 = vmul.f32 %v692_v26, %v999_v58  ;;  %v550_v58 = vadd.f32 0.2548296, %v534_v41  ;;  %v453_v57 = vadd.f32 -1.4531521, %v437_v60  ;;  %v623_v35 = vmul.f32 1.442695, %v1116_v14 }
 0x10c   :  { %716 = vst [vmem:[%s1394_s4 + $0x8] sm:$0xff] %v700_v48  ;;  %v699_v4 = vmul.f32 %v683_v63, %v1001_v59  ;;  %v691_v9 = vadd.f32 1.0, %v675_v8  ;;  %v638_v10 = vmul.f32 %v821_v49, %v558_v52  ;;  %v525_v32 = vmul.f32 %v1121_v31, %v509_v30  ;;  %v24_v30 = vld [vmem:[%s1392_s0 + $0x38] sm:$0xff] }
 0x10d   :  { %724 = vst [vmem:[%s1394_s4 + $0x48] sm:$0xff] %v708_v51  ;;  %v566_v11 = vmul.f32 %v1112_v5, %v550_v58  ;;  %v469_v12 = vmul.f32 %v1136_v18, %v453_v57  ;;  %v592_v15 = vmul.f32 %v576_v6, %v1125_v43  ;;  %v342_v14 = vsel %vm326_vm6, 1.0, %v862_v25  ;;  %v29_v51 = vld [vmem:[%s1392_s0 + $0x60] sm:$0xff] }
 0x10e   :  { %715 = vst [vmem:[%s1394_s4] sm:$0xff] %v699_v4  ;;  %v707_v59 = vmul.f32 %v691_v9, %v1040_v28  ;;  %v654_v42 = vsub.f32 1.0, %v638_v10  ;;  %v1178_v49 = vmul.f32 0.70710677, %v1159_v23  ;;  %v541_v56 = vadd.f32 0.2548296, %v525_v32 }
 0x10f   :  { %v1180_v5 = vpop.eup %828  ;;  %v646_v20 = vmul.f32 %v823_v53, %v566_v11  ;;  %v485_v55 = vadd.f32 1.4214138, %v469_v12  ;;  %v248_v43 = vadd.f32 %v1004_v61, %v21_v46  ;;  %830 = vpow2.f32 %v623_v35 }
 0x110   :  { %723 = vst [vmem:[%s1394_s4 + $0x40] sm:$0xff] %v707_v59  ;;  %v670_v28 = vmul.f32 %v654_v42, %v1104_v0  ;;  %v432_v29 = vmul.f32 1.0614054, %v1180_v5  ;;  %v360_v24 = vand.u32 2147483647, %v1178_v49  ;;  %v557_v40 = vmul.f32 %v1121_v31, %v541_v56 }
 0x111   :  { %v662_v33 = vsub.f32 1.0, %v646_v20  ;;  %v501_v53 = vmul.f32 %v1136_v18, %v485_v55  ;;  %v613_v45 = vmul.f32 1.442695, %v592_v15  ;;  %v1193_v0 = vadd.f32 %v970_v22, %v248_v43  ;;  %v32_v15 = vld [vmem:[%s1392_s0 + $0x78] sm:$0xff] }
 0x112   :  { %v686_v26 = vadd.f32 1.0, %v670_v28  ;;  %v448_v61 = vadd.f32 -1.4531521, %v432_v29  ;;  %v376_v17 = vmul.f32 0.3275911, %v360_v24  ;;  %v637_v6 = vmul.f32 %v827_v47, %v557_v40 }
 0x113   :  { %v678_v37 = vmul.f32 %v662_v33, %v342_v14  ;;  %v517_v48 = vadd.f32 -0.28449672, %v501_v53  ;;  %v294_v50 = vmul.f32 0.5, %v1025_v16  ;;  %832 = vpow2.f32 %v613_v45 }
 0x114   :  { %v702_v27 = vmul.f32 %v686_v26, %v1067_v44  ;;  %v464_v31 = vmul.f32 %v1180_v5, %v448_v61  ;;  %v392_v39 = vadd.f32 1.0, %v376_v17  ;;  %v653_v21 = vsub.f32 1.0, %v637_v6 }
 0x115   :  { %v694_v41 = vadd.f32 1.0, %v678_v37  ;;  %v533_v60 = vmul.f32 %v1136_v18, %v517_v48  ;;  %v333_v16 = vsel %vm317_vm7, 1.0, %v862_v25  ;;  %v1209_v47 = vmul.f32 0.70710677, %v1193_v0 }
 0x116   :  { %718 = vst [vmem:[%s1394_s4 + $0x18] sm:$0xff] %v702_v27  ;;  %v480_v44 = vadd.f32 1.4214138, %v464_v31  ;;  %834 = vrcp.f32 %v392_v39  ;;  %v669_v8 = vmul.f32 %v653_v21, %v333_v16  ;;  %v256_v58 = vadd.f32 %v1006_v62, %v29_v51  ;;  %v31_v16 = vld [vmem:[%s1392_s0 + $0x70] sm:$0xff] }
 0x117   :  { %v710_v63 = vmul.f32 %v694_v41, %v294_v50  ;;  %v549_v52 = vadd.f32 0.2548296, %v533_v60  ;;  %v1217_v4 = vand.u32 2147483647, %v1209_v47  ;;  %v584_v11 = vsub.f32 0.0, %v360_v24 }
 0x118   :  { %v496_v57 = vmul.f32 %v1180_v5, %v480_v44  ;;  %v685_v9 = vadd.f32 1.0, %v669_v8  ;;  %v1225_v62 = vadd.f32 %v970_v22, %v256_v58  ;;  %v251_v12 = vadd.f32 %v1008_v2, %v24_v30 }
 0x119   :  { %726 = vst [vmem:[%s1394_s4 + $0x58] sm:$0xff] %v710_v63  ;;  %v565_v10 = vmul.f32 %v1136_v18, %v549_v52  ;;  %v831_v35 = vpop.eup %830  ;;  %v367_v32 = vmul.f32 0.3275911, %v1217_v4  ;;  %v259_v55 = vadd.f32 %v1010_v3, %v32_v15  ;;  %v600_v28 = vmul.f32 %v584_v11, %v360_v24 }
 0x11a   :  { %v512_v46 = vadd.f32 -0.28449672, %v496_v57  ;;  %v701_v59 = vmul.f32 %v685_v9, %v285_v34  ;;  %v1234_v18 = vmul.f32 0.70710677, %v1225_v62  ;;  %v1238_v20 = vadd.f32 %v970_v22, %v251_v12 }
 0x11b   :  { %v645_v19 = vmul.f32 %v831_v35, %v565_v10  ;;  %v383_v14 = vadd.f32 1.0, %v367_v32  ;;  %v293_v45 = vmul.f32 0.5, %v1060_v36  ;;  %v1255_v6 = vadd.f32 %v970_v22, %v259_v55  ;;  %v23_v36 = vld [vmem:[%s1392_s0 + $0x30] sm:$0xff] }
 0x11c   :  { %v528_v42 = vmul.f32 %v1180_v5, %v512_v46  ;;  %717 = vst [vmem:[%s1394_s4 + $0x10] sm:$0xff] %v701_v59  ;;  %v359_v56 = vand.u32 2147483647, %v1234_v18  ;;  %v1251_v61 = vmul.f32 0.70710677, %v1238_v20  ;;  %v575_v39 = vsub.f32 0.0, %v1217_v4 }
 0x11d   :  { %v661_v2 = vsub.f32 1.0, %v645_v19  ;;  %836 = vrcp.f32 %v383_v14  ;;  %v833_v29 = vpop.eup %832  ;;  %v629_v48 = vmul.f32 1.442695, %v600_v28  ;;  %v336_v1 = vsel %vm320_vm9, 1.0, %v862_v25 }
 0x11e   :  { %v544_v43 = vadd.f32 0.2548296, %v528_v42  ;;  %v375_v40 = vmul.f32 0.3275911, %v359_v56  ;;  %v354_v27 = vand.u32 2147483647, %v1251_v61  ;;  %v250_v60 = vadd.f32 %v1012_v7, %v23_v36 }
 0x11f   :  { %v677_v33 = vmul.f32 %v661_v2, %v341_v54  ;;  %v1269_v21 = vmul.f32 0.70710677, %v1255_v6  ;;  %v288_v44 = vmul.f32 0.5, %v1092_v38  ;;  %v583_v58 = vsub.f32 0.0, %v359_v56 }
 0x120   :  { %v1246_v53 = vpop.eup %834  ;;  %v560_v26 = vmul.f32 %v1180_v5, %v544_v43  ;;  %v391_v37 = vadd.f32 1.0, %v375_v40  ;;  %v370_v51 = vmul.f32 0.3275911, %v354_v27  ;;  %v1278_v57 = vadd.f32 %v970_v22, %v250_v60 }
 0x121   :  { %v693_v17 = vadd.f32 1.0, %v677_v33  ;;  %v440_v3 = vmul.f32 1.0614054, %v1246_v53  ;;  %v362_v30 = vand.u32 2147483647, %v1269_v21  ;;  %v591_v7 = vmul.f32 %v575_v39, %v1217_v4 }
 0x122   :  { %v640_v24 = vmul.f32 %v833_v29, %v560_v26  ;;  %838 = vrcp.f32 %v391_v37  ;;  %v386_v8 = vadd.f32 1.0, %v370_v51  ;;  %v258_v10 = vadd.f32 %v1018_v13, %v31_v16 }
 0x123   :  { %v709_v5 = vmul.f32 %v693_v17, %v293_v45  ;;  %v456_v50 = vadd.f32 -1.4531521, %v440_v3  ;;  %840 = vpow2.f32 %v629_v48  ;;  %v378_v46 = vmul.f32 0.3275911, %v362_v30 }
 0x124   :  { %v656_v31 = vsub.f32 1.0, %v640_v24  ;;  %842 = vrcp.f32 %v386_v8  ;;  %v1287_v32 = vmul.f32 0.70710677, %v1278_v57  ;;  %v599_v59 = vmul.f32 %v583_v58, %v359_v56 }
 0x125   :  { %725 = vst [vmem:[%s1394_s4 + $0x50] sm:$0xff] %v709_v5  ;;  %v472_v41 = vmul.f32 %v1246_v53, %v456_v50  ;;  %v394_v19 = vadd.f32 1.0, %v378_v46  ;;  %v611_v4 = vmul.f32 1.442695, %v591_v7  ;;  %v1296_v42 = vadd.f32 %v970_v22, %v258_v10 }
 0x126   :  { %v672_v63 = vmul.f32 %v656_v31, %v336_v1  ;;  %v1293_v13 = vand.u32 2147483647, %v1287_v32  ;;  %v578_v54 = vsub.f32 0.0, %v354_v27  ;;  %v627_v33 = vmul.f32 1.442695, %v599_v59 }
 0x127   :  { %v488_v52 = vadd.f32 1.4214138, %v472_v41  ;;  %v1280_v34 = vpop.eup %836  ;;  %844 = vrcp.f32 %v394_v19  ;;  %v1305_v26 = vmul.f32 0.70710677, %v1296_v42  ;;  %vm328_vm10 = vcmp.ge.f32.partialorder %v1178_v49, 0.0 }
 0x128   :  { %v688_v9 = vadd.f32 1.0, %v672_v63  ;;  %v431_v35 = vmul.f32 1.0614054, %v1280_v34  ;;  %v369_v43 = vmul.f32 0.3275911, %v1293_v13  ;;  %846 = vpow2.f32 %v611_v4 }
 0x129   :  { %v504_v38 = vmul.f32 %v1246_v53, %v488_v52  ;;  %v594_v37 = vmul.f32 %v578_v54, %v354_v27  ;;  %v586_v31 = vsub.f32 0.0, %v362_v30  ;;  %v1315_v51 = vand.u32 2147483647, %v1305_v26 }
 0x12a   :  { %v704_v11 = vmul.f32 %v688_v9, %v288_v44  ;;  %v447_v15 = vadd.f32 -1.4531521, %v431_v35  ;;  %v385_v22 = vadd.f32 1.0, %v369_v43  ;;  %v296_v49 = vmul.f32 0.5, %v1159_v23 }
 0x12b   :  { %v520_v12 = vadd.f32 -0.28449672, %v504_v38  ;;  %v617_v41 = vmul.f32 1.442695, %v594_v37  ;;  %v344_v60 = vsel %vm328_vm10, 1.0, %v862_v25  ;;  %v602_v9 = vmul.f32 %v586_v31, %v362_v30 }
 0x12c   :  { %720 = vst [vmem:[%s1394_s4 + $0x28] sm:$0xff] %v704_v11  ;;  %v1298_v14 = vpop.eup %838  ;;  %v463_v55 = vmul.f32 %v1280_v34, %v447_v15  ;;  %848 = vrcp.f32 %v385_v22  ;;  %v377_v44 = vmul.f32 0.3275911, %v1315_v51  ;;  %v577_v38 = vsub.f32 0.0, %v1293_v13 }
 0x12d   :  { %v536_v2 = vmul.f32 %v1246_v53, %v520_v12  ;;  %v439_v56 = vmul.f32 1.0614054, %v1298_v14  ;;  %v841_v40 = vpop.eup %840  ;;  %850 = vpow2.f32 %v627_v33  ;;  %vm319_vm11 = vcmp.ge.f32.partialorder %v1209_v47, 0.0 }
 0x12e   :  { %v479_v29 = vadd.f32 1.4214138, %v463_v55  ;;  %v1309_v24 = vpop.eup %842  ;;  %v393_v35 = vadd.f32 1.0, %v377_v44  ;;  %852 = vpow2.f32 %v617_v41  ;;  %vm327_vm12 = vcmp.ge.f32.partialorder %v1234_v18, 0.0 }
 0x12f   :  { %v552_v28 = vadd.f32 0.2548296, %v536_v2  ;;  %v455_v45 = vadd.f32 -1.4531521, %v439_v56  ;;  %v434_v50 = vmul.f32 1.0614054, %v1309_v24 }
 0x130   :  { %v495_v3 = vmul.f32 %v1280_v34, %v479_v29  ;;  %854 = vrcp.f32 %v393_v35  ;;  %v633_v2 = vmul.f32 1.442695, %v602_v9  ;;  %v343_v41 = vsel %vm327_vm12, 1.0, %v862_v25 }
 0x131   :  { %v568_v17 = vmul.f32 %v1246_v53, %v552_v28  ;;  %v471_v48 = vmul.f32 %v1298_v14, %v455_v45  ;;  %v450_v1 = vadd.f32 -1.4531521, %v434_v50  ;;  %v1322_v63 = vpop.eup %844  ;;  %v287_v50 = vmul.f32 0.5, %v1193_v0 }
 0x132   :  { %v511_v5 = vadd.f32 -0.28449672, %v495_v3  ;;  %v442_v10 = vmul.f32 1.0614054, %v1322_v63  ;;  %v847_v12 = vpop.eup %846  ;;  %856 = vpow2.f32 %v633_v2  ;;  %vm322_vm13 = vcmp.ge.f32.partialorder %v1251_v61, 0.0 }
 0x133   :  { %v648_v36 = vmul.f32 %v841_v40, %v568_v17  ;;  %v487_v39 = vadd.f32 1.4214138, %v471_v48  ;;  %v466_v58 = vmul.f32 %v1309_v24, %v450_v1  ;;  %v335_v40 = vsel %vm319_vm11, 1.0, %v862_v25 }
 0x134   :  { %v527_v27 = vmul.f32 %v1280_v34, %v511_v5  ;;  %v458_v59 = vadd.f32 -1.4531521, %v442_v10  ;;  %v585_v5 = vsub.f32 0.0, %v1315_v51  ;;  %vm330_vm14 = vcmp.ge.f32.partialorder %v1269_v21, 0.0 }
 0x135   :  { %v664_v53 = vsub.f32 1.0, %v648_v36  ;;  %v503_v16 = vmul.f32 %v1298_v14, %v487_v39  ;;  %v482_v11 = vadd.f32 1.4214138, %v466_v58  ;;  %vm321_vm15 = vcmp.ge.f32.partialorder %v1287_v32, 0.0 }
 0x136   :  { %v543_v52 = vadd.f32 0.2548296, %v527_v27  ;;  %v1331_v55 = vpop.eup %848  ;;  %v474_v56 = vmul.f32 %v1322_v63, %v458_v59  ;;  %v601_v0 = vmul.f32 %v585_v5, %v1315_v51  ;;  %v338_v51 = vsel %vm322_vm13, 1.0, %v862_v25 }
 0x137   :  { %v680_v8 = vmul.f32 %v664_v53, %v344_v60  ;;  %v519_v7 = vadd.f32 -0.28449672, %v503_v16  ;;  %v498_v4 = vmul.f32 %v1309_v24, %v482_v11  ;;  %v433_v29 = vmul.f32 1.0614054, %v1331_v55  ;;  %v851_v33 = vpop.eup %850 }
 0x138   :  { %v559_v46 = vmul.f32 %v1280_v34, %v543_v52  ;;  %v593_v34 = vmul.f32 %v577_v38, %v1293_v13  ;;  %v490_v22 = vadd.f32 1.4214138, %v474_v56  ;;  %v853_v27 = vpop.eup %852  ;;  %v631_v11 = vmul.f32 1.442695, %v601_v0 }
 0x139   :  { %v696_v23 = vadd.f32 1.0, %v680_v8  ;;  %v535_v15 = vmul.f32 %v1298_v14, %v519_v7  ;;  %v514_v28 = vadd.f32 -0.28449672, %v498_v4  ;;  %v449_v3 = vadd.f32 -1.4531521, %v433_v29 }
 0x13a   :  { %v639_v30 = vmul.f32 %v847_v12, %v559_v46  ;;  %v506_v48 = vmul.f32 %v1322_v63, %v490_v22  ;;  %v615_v36 = vmul.f32 1.442695, %v593_v34  ;;  %v855_v16 = vpop.eup %854  ;;  %v346_v56 = vsel %vm330_vm14, 1.0, %v862_v25 }
 0x13b   :  { %v712_v19 = vmul.f32 %v696_v23, %v296_v49  ;;  %v551_v54 = vadd.f32 0.2548296, %v535_v15  ;;  %v530_v13 = vmul.f32 %v1309_v24, %v514_v28  ;;  %v465_v39 = vmul.f32 %v1331_v55, %v449_v3 }
 0x13c   :  { %v655_v43 = vsub.f32 1.0, %v639_v30  ;;  %858 = vpow2.f32 %v615_v36  ;;  %v441_v58 = vmul.f32 1.0614054, %v855_v16  ;;  %v857_v12 = vpop.eup %856  ;;  %vm329_vm0 = vcmp.ge.f32.partialorder %v1305_v26, 0.0 }
 0x13d   :  { %728 = vst [vmem:[%s1394_s4 + $0x68] sm:$0xff] %v712_v19  ;;  %v567_v45 = vmul.f32 %v1298_v14, %v551_v54  ;;  %v546_v31 = vadd.f32 0.2548296, %v530_v13  ;;  %v522_v14 = vadd.f32 -0.28449672, %v506_v48  ;;  %v290_v19 = vmul.f32 0.5, %v1238_v20 }
 0x13e   :  { %v671_v17 = vmul.f32 %v655_v43, %v335_v40  ;;  %v481_v60 = vadd.f32 1.4214138, %v465_v39  ;;  %v457_v35 = vadd.f32 -1.4531521, %v441_v58  ;;  %860 = vpow2.f32 %v631_v11 }
 0x13f   :  { %v647_v37 = vmul.f32 %v851_v33, %v567_v45  ;;  %v562_v49 = vmul.f32 %v1309_v24, %v546_v31  ;;  %v538_v8 = vmul.f32 %v1322_v63, %v522_v14  ;;  %v295_v24 = vmul.f32 0.5, %v1225_v62 }
 0x140   :  { %v687_v47 = vadd.f32 1.0, %v671_v17  ;;  %v497_v18 = vmul.f32 %v1331_v55, %v481_v60  ;;  %v473_v59 = vmul.f32 %v855_v16, %v457_v35  ;;  %v298_v33 = vmul.f32 0.5, %v1255_v6 }
 0x141   :  { %v663_v53 = vsub.f32 1.0, %v647_v37  ;;  %v642_v52 = vmul.f32 %v853_v27, %v562_v49  ;;  %v554_v7 = vadd.f32 0.2548296, %v538_v8  ;;  %v337_v13 = vsel %vm321_vm15, 1.0, %v862_v25 }
 0x142   :  { %v703_v1 = vmul.f32 %v687_v47, %v287_v50  ;;  %v513_v38 = vadd.f32 -0.28449672, %v497_v18  ;;  %v489_v2 = vadd.f32 1.4214138, %v473_v59  ;;  %v289_v37 = vmul.f32 0.5, %v1278_v57 }
 0x143   :  { %v679_v44 = vmul.f32 %v663_v53, %v343_v41  ;;  %v658_v10 = vsub.f32 1.0, %v642_v52  ;;  %v570_v46 = vmul.f32 %v1322_v63, %v554_v7  ;;  %v345_v47 = vsel %vm329_vm0, 1.0, %v862_v25 }
 0x144   :  { %719 = vst [vmem:[%s1394_s4 + $0x20] sm:$0xff] %v703_v1  ;;  %v529_v61 = vmul.f32 %v1331_v55, %v513_v38  ;;  %v505_v43 = vmul.f32 %v855_v16, %v489_v2  ;;  %v297_v39 = vmul.f32 0.5, %v1296_v42 }
 0x145   :  { %v695_v9 = vadd.f32 1.0, %v679_v44  ;;  %v674_v15 = vmul.f32 %v658_v10, %v338_v51  ;;  %v650_v62 = vmul.f32 %v857_v12, %v570_v46 }
 0x146   :  { %v545_v4 = vadd.f32 0.2548296, %v529_v61  ;;  %v859_v28 = vpop.eup %858  ;;  %v521_v21 = vadd.f32 -0.28449672, %v505_v43 }
 0x147   :  { %v711_v23 = vmul.f32 %v695_v9, %v295_v24  ;;  %v690_v30 = vadd.f32 1.0, %v674_v15  ;;  %v666_v54 = vsub.f32 1.0, %v650_v62 }
 0x148   :  { %v561_v34 = vmul.f32 %v1331_v55, %v545_v4  ;;  %v537_v22 = vmul.f32 %v855_v16, %v521_v21  ;;  %v861_v36 = vpop.eup %860 }
 0x149   :  { %727 = vst [vmem:[%s1394_s4 + $0x60] sm:$0xff] %v711_v23  ;;  %v706_v63 = vmul.f32 %v690_v30, %v290_v19  ;;  %v682_v29 = vmul.f32 %v666_v54, %v346_v56 }
 0x14a   :  { %v641_v20 = vmul.f32 %v859_v28, %v561_v34  ;;  %v553_v3 = vadd.f32 0.2548296, %v537_v22 }
 0x14b   :  { %722 = vst [vmem:[%s1394_s4 + $0x38] sm:$0xff] %v706_v63  ;;  %v698_v40 = vadd.f32 1.0, %v682_v29 }
 0x14c   :  { %v657_v45 = vsub.f32 1.0, %v641_v20  ;;  %v569_v32 = vmul.f32 %v855_v16, %v553_v3 }
 0x14d   :  { %v714_v17 = vmul.f32 %v698_v40, %v298_v33 }
 0x14e   :  { %v673_v55 = vmul.f32 %v657_v45, %v337_v13  ;;  %v649_v6 = vmul.f32 %v861_v36, %v569_v32 }
 0x14f   :  { %730 = vst [vmem:[%s1394_s4 + $0x78] sm:$0xff] %v714_v17 }
 0x150   :  { %v689_v48 = vadd.f32 1.0, %v673_v55  ;;  %v665_v50 = vsub.f32 1.0, %v649_v6 }
 0x152   :  { %v705_v5 = vmul.f32 %v689_v48, %v289_v37  ;;  %v681_v31 = vmul.f32 %v665_v50, %v345_v47 }
 0x154   :  { %721 = vst [vmem:[%s1394_s4 + $0x30] sm:$0xff] %v705_v5  ;;  %v697_v53 = vadd.f32 1.0, %v681_v31 }
 0x156   :  { %v713_v14 = vmul.f32 %v697_v53, %v297_v39 }
 0x158   :  { %729 = vst [vmem:[%s1394_s4 + $0x70] sm:$0xff] %v713_v14 }

// kernel: _lambda_.17
= control target key start
LH: loop header
LB: loop body
LE: loop exit
PB: predicated region body
PF: predicated region fallthrough
CT: control target
= control target key end

     0   :  { %s2278_s9 = smov 0   ;;  %s2600_s0 = inlined_call_operand.vmem [shape: f32[32,2,64], index: 0, kind: input, shape index: {}]   ;;  %s2601_s1 = inlined_call_operand.vmem [shape: f32[32,64,64], index: 1, kind: input, shape index: {}]   ;;  %s2602_s2 = inlined_call_operand.vmem [shape: f32[32,2,64], index: 2, kind: output, shape index: {}]  }
   0x1 LB: > { %s1570_s10 = sadd.s32 4294967295, %s2258_s9   ;;  %p1574_p0 = scmp.ge.s32.totalorder %s2258_s9, 1  ;;  %s2258_s9 = sphi %s2278_s9, %s12_s9  }
   0x2   : > { %p125_p1 = scmp.lt.s32.totalorder %s2258_s9, 3 }
   0x4   : > { %p126_p2 = pnand %p1574_p0, %p125_p1 }
   0x5   : > { %s1575_s11 = sshll.u32 (!%p126_p2), %s1570_s10, 4  ;;  %v2260_v0 = vmov (!%p126_p2), 0.0|0.0   ;;  %vm2261_vm0 = vmmov (!%p126_p2), 0   ;;  %v2262_v1 = vmov (!%p126_p2), 0.0   ;;  %vm316_vm1 = vcmask (!%p126_p2), 523264  }
   0x6   : > { %129 = sbr.rel (%p126_p2) target bundleno = 360 (0x168), region = 28  ;;  %2049 = vmatprep.subr.bf16.mxu0 (!%p126_p2), %v2260_v0  ;;  %2061 = vmatprep.subr.bf16.mxu1 (!%p126_p2), %v2260_v0  ;;  %p154_p3 = scmp.lt.s32.totalorder (!%p126_p2), %s1575_s11, 31  ;;  %vm1485_vm2 = vcmask (!%p126_p2), 517120  }
   0x7   : > { %1761 = vmatprep.mubr.msk.f32.mxu0 (!%p126_p2), %vm2261_vm0, %v2262_v1  ;;  %1780 = vmatprep.mubr.msk.f32.mxu1 (!%p126_p2), %vm2261_vm0, %v2262_v1 }
   0xd   : > { %s2604_s11 = smov (!%p154_p3, %s1575_s11), 31 }
   0xe   : > { %s1600_s12 = sshll.u32 %s2604_s11, 6  ;;  %s1576_s16 = sshll.u32 %s2604_s11, 1 }
   0xf   : > { %s2298_s15 = scalar_lea.vmem %s2601_s1, %s1600_s12  ;;  %s2327_s19 = scalar_lea.vmem %s2600_s0, %s1576_s16 }
  0x10   : > { %v188_v2 = vld [vmem:[%s2298_s15] sm:$0xff]  ;;  %v189_v3 = vld [vmem:[%s2298_s15 + $0x8] sm:$0xff]  ;;  %v190_v7 = vld [vmem:[%s2298_s15 + $0x10] sm:$0xff]  ;;  %s2563_s22 = scalar_lea.vmem %s2602_s2, %s1576_s16 }
  0x11   : > { %v196_v4 = vld [vmem:[%s2298_s15 + $0x40] sm:$0xff]  ;;  %v2050_v5 = vpack.c.bf16 %v189_v3, %v188_v2  ;;  %v197_v6 = vld [vmem:[%s2298_s15 + $0x48] sm:$0xff]  ;;  %v191_v8 = vld [vmem:[%s2298_s15 + $0x18] sm:$0xff] }
  0x12   : > { %v2062_v9 = vpack.c.bf16 %v197_v6, %v196_v4  ;;  %v198_v10 = vld [vmem:[%s2298_s15 + $0x50] sm:$0xff]  ;;  %v199_v11 = vld [vmem:[%s2298_s15 + $0x58] sm:$0xff]  ;;  %v2053_v12 = vpack.c.bf16 %v191_v8, %v190_v7  ;;  %v192_v14 = vld [vmem:[%s2298_s15 + $0x20] sm:$0xff] }
  0x13   : > { %2051 = vmatpush3.bf16.msra.mxu0 %v2050_v5  ;;  %v2065_v13 = vpack.c.bf16 %v199_v11, %v198_v10  ;;  %v193_v15 = vld [vmem:[%s2298_s15 + $0x28] sm:$0xff]  ;;  %v200_v16 = vld [vmem:[%s2298_s15 + $0x60] sm:$0xff]  ;;  %v194_v20 = vld [vmem:[%s2298_s15 + $0x30] sm:$0xff] }
  0x14   : > { %2063 = vmatpush3.bf16.msra.mxu1 %v2062_v9  ;;  %2052 = vmatprep.subr.bf16.mxu0 %v2260_v0  ;;  %v201_v17 = vld [vmem:[%s2298_s15 + $0x68] sm:$0xff]  ;;  %v2056_v18 = vpack.c.bf16 %v193_v15, %v192_v14  ;;  %v195_v21 = vld [vmem:[%s2298_s15 + $0x38] sm:$0xff]  ;;  %v202_v22 = vld [vmem:[%s2298_s15 + $0x70] sm:$0xff] }
  0x15   : > { %2064 = vmatprep.subr.bf16.mxu1 %v2260_v0  ;;  %v2068_v19 = vpack.c.bf16 %v201_v17, %v200_v16  ;;  %v203_v23 = vld [vmem:[%s2298_s15 + $0x78] sm:$0xff]  ;;  %v2059_v24 = vpack.c.bf16 %v195_v21, %v194_v20  ;;  %v204_v26 = vld [vmem:[%s2298_s15 + $0x80] sm:$0xff]  ;;  %v205_v27 = vld [vmem:[%s2298_s15 + $0x88] sm:$0xff] }
  0x16   : > { %v2071_v25 = vpack.c.bf16 %v203_v23, %v202_v22  ;;  %v212_v28 = vld [vmem:[%s2298_s15 + $0xc0] sm:$0xff]  ;;  %v213_v29 = vld [vmem:[%s2298_s15 + $0xc8] sm:$0xff]  ;;  %v2074_v31 = vpack.c.bf16 %v205_v27, %v204_v26  ;;  %v206_v34 = vld [vmem:[%s2298_s15 + $0x90] sm:$0xff] }
  0x17   : > { %2054 = vmatpush3.bf16.msra.mxu0 %v2053_v12  ;;  %v172_v30 = vld [vmem:[%s2327_s19] sm:$0x3]  ;;  %v173_v32 = vld [vmem:[%s2327_s19 + $0x2] sm:$0x3]  ;;  %v2086_v33 = vpack.c.bf16 %v213_v29, %v212_v28  ;;  %v207_v35 = vld [vmem:[%s2298_s15 + $0x98] sm:$0xff] }
  0x18   : > { %2066 = vmatpush3.bf16.msra.mxu1 %v2065_v13  ;;  %2055 = vmatprep.subr.bf16.mxu0 %v2260_v0  ;;  %v214_v36 = vld [vmem:[%s2298_s15 + $0xd0] sm:$0xff]  ;;  %v215_v37 = vld [vmem:[%s2298_s15 + $0xd8] sm:$0xff]  ;;  %v2077_v38 = vpack.c.bf16 %v207_v35, %v206_v34  ;;  %v208_v40 = vld [vmem:[%s2298_s15 + $0xa0] sm:$0xff] }
  0x19   : > { %2067 = vmatprep.subr.bf16.mxu1 %v2260_v0  ;;  %v2089_v39 = vpack.c.bf16 %v215_v37, %v214_v36  ;;  %v209_v41 = vld [vmem:[%s2298_s15 + $0xa8] sm:$0xff]  ;;  %v216_v42 = vld [vmem:[%s2298_s15 + $0xe0] sm:$0xff]  ;;  %v210_v46 = vld [vmem:[%s2298_s15 + $0xb0] sm:$0xff] }
  0x1a   : > { %v217_v43 = vld [vmem:[%s2298_s15 + $0xe8] sm:$0xff]  ;;  %v2080_v44 = vpack.c.bf16 %v209_v41, %v208_v40  ;;  %v211_v47 = vld [vmem:[%s2298_s15 + $0xb8] sm:$0xff]  ;;  %v218_v48 = vld [vmem:[%s2298_s15 + $0xf0] sm:$0xff] }
  0x1b   : > { %2057 = vmatpush3.bf16.msra.mxu0 %v2056_v18  ;;  %v2092_v45 = vpack.c.bf16 %v217_v43, %v216_v42  ;;  %v219_v49 = vld [vmem:[%s2298_s15 + $0xf8] sm:$0xff]  ;;  %v2083_v50 = vpack.c.bf16 %v211_v47, %v210_v46  ;;  %v220_v52 = vld [vmem:[%s2298_s15 + $0x100] sm:$0xff]  ;;  %v221_v53 = vld [vmem:[%s2298_s15 + $0x108] sm:$0xff] }
  0x1c   : > { %2069 = vmatpush3.bf16.msra.mxu1 %v2068_v19  ;;  %2058 = vmatprep.subr.bf16.mxu0 %v2260_v0  ;;  %v2095_v51 = vpack.c.bf16 %v219_v49, %v218_v48  ;;  %v228_v54 = vld [vmem:[%s2298_s15 + $0x140] sm:$0xff]  ;;  %v229_v55 = vld [vmem:[%s2298_s15 + $0x148] sm:$0xff]  ;;  %v2098_v57 = vpack.c.bf16 %v221_v53, %v220_v52  ;;  %v222_v60 = vld [vmem:[%s2298_s15 + $0x110] sm:$0xff] }
  0x1d   : > { %2070 = vmatprep.subr.bf16.mxu1 %v2260_v0  ;;  %v174_v56 = vld [vmem:[%s2327_s19 + $0x4] sm:$0x3]  ;;  %v175_v58 = vld [vmem:[%s2327_s19 + $0x6] sm:$0x3]  ;;  %v2110_v59 = vpack.c.bf16 %v229_v55, %v228_v54  ;;  %v223_v61 = vld [vmem:[%s2298_s15 + $0x118] sm:$0xff] }
  0x1e   : > { %v230_v62 = vld [vmem:[%s2298_s15 + $0x150] sm:$0xff]  ;;  %v231_v63 = vld [vmem:[%s2298_s15 + $0x158] sm:$0xff]  ;;  %v2101_v2 = vpack.c.bf16 %v223_v61, %v222_v60  ;;  %v224_v4 = vld [vmem:[%s2298_s15 + $0x120] sm:$0xff] }
  0x1f   : > { %2060 = vmatpush3.bf16.msra.mxu0 %v2059_v24  ;;  %v2113_v3 = vpack.c.bf16 %v231_v63, %v230_v62  ;;  %v225_v5 = vld [vmem:[%s2298_s15 + $0x128] sm:$0xff]  ;;  %v232_v6 = vld [vmem:[%s2298_s15 + $0x160] sm:$0xff]  ;;  %v226_v10 = vld [vmem:[%s2298_s15 + $0x130] sm:$0xff] }
  0x20   : > { %2072 = vmatpush3.bf16.msra.mxu1 %v2071_v25  ;;  %2073 = vmatprep.subr.bf16.mxu0 %v2260_v0  ;;  %v233_v7 = vld [vmem:[%s2298_s15 + $0x168] sm:$0xff]  ;;  %v2104_v8 = vpack.c.bf16 %v225_v5, %v224_v4  ;;  %v227_v11 = vld [vmem:[%s2298_s15 + $0x138] sm:$0xff]  ;;  %v234_v12 = vld [vmem:[%s2298_s15 + $0x170] sm:$0xff] }
  0x21   : > { %2085 = vmatprep.subr.bf16.mxu1 %v2260_v0  ;;  %v2116_v9 = vpack.c.bf16 %v233_v7, %v232_v6  ;;  %v235_v13 = vld [vmem:[%s2298_s15 + $0x178] sm:$0xff]  ;;  %v2107_v14 = vpack.c.bf16 %v227_v11, %v226_v10  ;;  %v236_v16 = vld [vmem:[%s2298_s15 + $0x180] sm:$0xff]  ;;  %v237_v17 = vld [vmem:[%s2298_s15 + $0x188] sm:$0xff] }
  0x22   : > { %1762 = vmatmul.mubr.msk.f32.vlgmr.msra.gmra.mrb[0].mxu0 %vm316_vm1, %v172_v30  ;;  %v2119_v15 = vpack.c.bf16 %v235_v13, %v234_v12  ;;  %v244_v18 = vld [vmem:[%s2298_s15 + $0x1c0] sm:$0xff]  ;;  %v245_v19 = vld [vmem:[%s2298_s15 + $0x1c8] sm:$0xff]  ;;  %v2122_v21 = vpack.c.bf16 %v237_v17, %v236_v16  ;;  %v238_v24 = vld [vmem:[%s2298_s15 + $0x190] sm:$0xff] }
  0x23   : > { %1781 = vmatmul.mubr.msk.f32.vlgmr.msra.gmra.mrb[0].mxu1 %vm316_vm1, %v173_v32  ;;  %2075 = vmatpush3.bf16.msra.mxu0 %v2074_v31  ;;  %v176_v20 = vld [vmem:[%s2327_s19 + $0x8] sm:$0x3]  ;;  %v177_v22 = vld [vmem:[%s2327_s19 + $0xa] sm:$0x3]  ;;  %v2134_v23 = vpack.c.bf16 %v245_v19, %v244_v18  ;;  %v239_v25 = vld [vmem:[%s2298_s15 + $0x198] sm:$0xff] }
  0x24   : > { %2087 = vmatpush3.bf16.msra.mxu1 %v2086_v33  ;;  %2076 = vmatprep.subr.bf16.mxu0 %v2260_v0  ;;  %v246_v26 = vld [vmem:[%s2298_s15 + $0x1d0] sm:$0xff]  ;;  %v247_v27 = vld [vmem:[%s2298_s15 + $0x1d8] sm:$0xff]  ;;  %v2125_v28 = vpack.c.bf16 %v239_v25, %v238_v24  ;;  %v240_v30 = vld [vmem:[%s2298_s15 + $0x1a0] sm:$0xff] }
  0x25   : > { %2088 = vmatprep.subr.bf16.mxu1 %v2260_v0  ;;  %1799 = vmatprep.mubr.msk.f32.mxu0 %vm2261_vm0, %v2262_v1  ;;  %v2137_v29 = vpack.c.bf16 %v247_v27, %v246_v26  ;;  %v241_v31 = vld [vmem:[%s2298_s15 + $0x1a8] sm:$0xff]  ;;  %v248_v32 = vld [vmem:[%s2298_s15 + $0x1e0] sm:$0xff]  ;;  %v242_v36 = vld [vmem:[%s2298_s15 + $0x1b0] sm:$0xff] }
  0x26   : > { %1818 = vmatprep.mubr.msk.f32.mxu1 %vm2261_vm0, %v2262_v1  ;;  %v249_v33 = vld [vmem:[%s2298_s15 + $0x1e8] sm:$0xff]  ;;  %v2128_v34 = vpack.c.bf16 %v241_v31, %v240_v30  ;;  %v243_v37 = vld [vmem:[%s2298_s15 + $0x1b8] sm:$0xff]  ;;  %v252_v42 = vld [vmem:[%s2298_s15 + $0x200] sm:$0xff] }
  0x27   : > { %2078 = vmatpush3.bf16.msra.mxu0 %v2077_v38  ;;  %v2140_v35 = vpack.c.bf16 %v249_v33, %v248_v32  ;;  %v250_v38 = vld [vmem:[%s2298_s15 + $0x1f0] sm:$0xff]  ;;  %v2131_v40 = vpack.c.bf16 %v243_v37, %v242_v36  ;;  %v253_v43 = vld [vmem:[%s2298_s15 + $0x208] sm:$0xff]  ;;  %v263_v53 = vld [vmem:[%s2298_s15 + $0x258] sm:$0xff] }
  0x28   : > { %2090 = vmatpush3.bf16.msra.mxu1 %v2089_v39  ;;  %2079 = vmatprep.subr.bf16.mxu0 %v2260_v0  ;;  %v251_v39 = vld [vmem:[%s2298_s15 + $0x1f8] sm:$0xff]  ;;  %v178_v46 = vld [vmem:[%s2327_s19 + $0xc] sm:$0x3]  ;;  %v2146_v47 = vpack.c.bf16 %v253_v43, %v252_v42  ;;  %v179_v48 = vld [vmem:[%s2327_s19 + $0xe] sm:$0x3] }
  0x29   : > { %2091 = vmatprep.subr.bf16.mxu1 %v2260_v0  ;;  %v2143_v41 = vpack.c.bf16 %v251_v39, %v250_v38  ;;  %v262_v52 = vld [vmem:[%s2298_s15 + $0x250] sm:$0xff]  ;;  %v259_v63 = vld [vmem:[%s2298_s15 + $0x238] sm:$0xff]  ;;  %v268_v6 = vld [vmem:[%s2298_s15 + $0x280] sm:$0xff] }
  0x2a   : > { %v2161_v55 = vpack.c.bf16 %v263_v53, %v262_v52  ;;  %v258_v62 = vld [vmem:[%s2298_s15 + $0x230] sm:$0xff]  ;;  %v269_v7 = vld [vmem:[%s2298_s15 + $0x288] sm:$0xff]  ;;  %v279_v17 = vld [vmem:[%s2298_s15 + $0x2d8] sm:$0xff] }
  0x2b   : > { %2081 = vmatpush3.bf16.msra.mxu0 %v2080_v44  ;;  %v260_v44 = vld [vmem:[%s2298_s15 + $0x240] sm:$0xff]  ;;  %v2155_v4 = vpack.c.bf16 %v259_v63, %v258_v62  ;;  %v180_v10 = vld [vmem:[%s2327_s19 + $0x10] sm:$0x3]  ;;  %v2170_v11 = vpack.c.bf16 %v269_v7, %v268_v6  ;;  %v181_v12 = vld [vmem:[%s2327_s19 + $0x12] sm:$0x3] }
  0x2c   : > { %2093 = vmatpush3.bf16.msra.mxu1 %v2092_v45  ;;  %2082 = vmatprep.subr.bf16.mxu0 %v2260_v0  ;;  %v261_v45 = vld [vmem:[%s2298_s15 + $0x248] sm:$0xff]  ;;  %v278_v16 = vld [vmem:[%s2298_s15 + $0x2d0] sm:$0xff]  ;;  %v275_v27 = vld [vmem:[%s2298_s15 + $0x2b8] sm:$0xff] }
  0x2d   : > { %2094 = vmatprep.subr.bf16.mxu1 %v2260_v0  ;;  %v2158_v49 = vpack.c.bf16 %v261_v45, %v260_v44  ;;  %v2185_v19 = vpack.c.bf16 %v279_v17, %v278_v16  ;;  %v274_v26 = vld [vmem:[%s2298_s15 + $0x2b0] sm:$0xff]  ;;  %v284_v32 = vld [vmem:[%s2298_s15 + $0x300] sm:$0xff]  ;;  %v285_v33 = vld [vmem:[%s2298_s15 + $0x308] sm:$0xff] }
  0x2e   : > { %v2179_v30 = vpack.c.bf16 %v275_v27, %v274_v26  ;;  %v182_v36 = vld [vmem:[%s2327_s19 + $0x14] sm:$0x3]  ;;  %v2194_v37 = vpack.c.bf16 %v285_v33, %v284_v32  ;;  %v183_v38 = vld [vmem:[%s2327_s19 + $0x16] sm:$0x3]  ;;  %v295_v43 = vld [vmem:[%s2298_s15 + $0x358] sm:$0xff] }
  0x2f   : > { %2084 = vmatpush3.bf16.msra.mxu0 %v2083_v50  ;;  %v254_v50 = vld [vmem:[%s2298_s15 + $0x210] sm:$0xff]  ;;  %v291_v53 = vld [vmem:[%s2298_s15 + $0x338] sm:$0xff] }
  0x30   : > { %2096 = vmatpush3.bf16.msra.mxu1 %v2095_v51  ;;  %2097 = vmatprep.subr.bf16.mxu0 %v2260_v0  ;;  %v255_v51 = vld [vmem:[%s2298_s15 + $0x218] sm:$0xff]  ;;  %v294_v42 = vld [vmem:[%s2298_s15 + $0x350] sm:$0xff] }
  0x31   : > { %2109 = vmatprep.subr.bf16.mxu1 %v2260_v0  ;;  %v2149_v54 = vpack.c.bf16 %v255_v51, %v254_v50  ;;  %v2209_v45 = vpack.c.bf16 %v295_v43, %v294_v42  ;;  %v290_v52 = vld [vmem:[%s2298_s15 + $0x330] sm:$0xff]  ;;  %v184_v62 = vld [vmem:[%s2327_s19 + $0x18] sm:$0x3] }
  0x32   : > { %1800 = vmatmul.mubr.msk.f32.vlgmr.msra.gmra.mrb[2].mxu0 %vm316_vm1, %v174_v56  ;;  %v256_v56 = vld [vmem:[%s2298_s15 + $0x220] sm:$0xff]  ;;  %v310_v6 = vld [vmem:[%s2298_s15 + $0x3d0] sm:$0xff]  ;;  %v311_v7 = vld [vmem:[%s2298_s15 + $0x3d8] sm:$0xff] }
  0x33   : > { %1819 = vmatmul.mubr.msk.f32.vlgmr.msra.gmra.mrb[2].mxu1 %vm316_vm1, %v175_v58  ;;  %2099 = vmatpush3.bf16.msra.mxu0 %v2098_v57  ;;  %v257_v57 = vld [vmem:[%s2298_s15 + $0x228] sm:$0xff]  ;;  %v264_v58 = vld [vmem:[%s2298_s15 + $0x260] sm:$0xff]  ;;  %v306_v16 = vld [vmem:[%s2298_s15 + $0x3b0] sm:$0xff] }
  0x34   : > { %2111 = vmatpush3.bf16.msra.mxu1 %v2110_v59  ;;  %2100 = vmatprep.subr.bf16.mxu0 %v2260_v0  ;;  %v265_v59 = vld [vmem:[%s2298_s15 + $0x268] sm:$0xff]  ;;  %v2152_v60 = vpack.c.bf16 %v257_v57, %v256_v56  ;;  %v2203_v56 = vpack.c.bf16 %v291_v53, %v290_v52  ;;  %v307_v17 = vld [vmem:[%s2298_s15 + $0x3b8] sm:$0xff] }
  0x35   : > { %2112 = vmatprep.subr.bf16.mxu1 %v2260_v0  ;;  %1837 = vmatprep.mubr.msk.f32.mxu0 %vm2261_vm0, %v2262_v1  ;;  %v2164_v61 = vpack.c.bf16 %v265_v59, %v264_v58  ;;  %v300_v58 = vld [vmem:[%s2298_s15 + $0x380] sm:$0xff]  ;;  %v301_v59 = vld [vmem:[%s2298_s15 + $0x388] sm:$0xff] }
  0x36   : > { %1856 = vmatprep.mubr.msk.f32.mxu1 %vm2261_vm0, %v2262_v1  ;;  %v2218_v63 = vpack.c.bf16 %v301_v59, %v300_v58 }
  0x37   : > { %2102 = vmatpush3.bf16.msra.mxu0 %v2101_v2  ;;  %v266_v2 = vld [vmem:[%s2298_s15 + $0x270] sm:$0xff] }
  0x38   : > { %2114 = vmatpush3.bf16.msra.mxu1 %v2113_v3  ;;  %2103 = vmatprep.subr.bf16.mxu0 %v2260_v0  ;;  %v267_v3 = vld [vmem:[%s2298_s15 + $0x278] sm:$0xff] }
  0x39   : > { %2115 = vmatprep.subr.bf16.mxu1 %v2260_v0  ;;  %v2167_v5 = vpack.c.bf16 %v267_v3, %v266_v2  ;;  %v185_v2 = vld [vmem:[%s2327_s19 + $0x1a] sm:$0x3] }
  0x3b   : > { %2105 = vmatpush3.bf16.msra.mxu0 %v2104_v8  ;;  %v276_v8 = vld [vmem:[%s2298_s15 + $0x2c0] sm:$0xff] }
  0x3c   : > { %2117 = vmatpush3.bf16.msra.mxu1 %v2116_v9  ;;  %2106 = vmatprep.subr.bf16.mxu0 %v2260_v0  ;;  %v277_v9 = vld [vmem:[%s2298_s15 + $0x2c8] sm:$0xff] }
  0x3d   : > { %2118 = vmatprep.subr.bf16.mxu1 %v2260_v0  ;;  %v2182_v13 = vpack.c.bf16 %v277_v9, %v276_v8  ;;  %v2233_v9 = vpack.c.bf16 %v311_v7, %v310_v6 }
  0x3f   : > { %2108 = vmatpush3.bf16.msra.mxu0 %v2107_v14  ;;  %v270_v14 = vld [vmem:[%s2298_s15 + $0x290] sm:$0xff] }
  0x40   : > { %2120 = vmatpush3.bf16.msra.mxu1 %v2119_v15  ;;  %2121 = vmatprep.subr.bf16.mxu0 %v2260_v0  ;;  %v271_v15 = vld [vmem:[%s2298_s15 + $0x298] sm:$0xff] }
  0x41   : > { %2133 = vmatprep.subr.bf16.mxu1 %v2260_v0  ;;  %v2173_v18 = vpack.c.bf16 %v271_v15, %v270_v14 }
  0x42   : > { %1838 = vmatmul.mubr.msk.f32.vlgmr.msra.gmra.mrb[4].mxu0 %vm316_vm1, %v176_v20  ;;  %v272_v20 = vld [vmem:[%s2298_s15 + $0x2a0] sm:$0xff] }
  0x43   : > { %1857 = vmatmul.mubr.msk.f32.vlgmr.msra.gmra.mrb[4].mxu1 %vm316_vm1, %v177_v22  ;;  %2123 = vmatpush3.bf16.msra.mxu0 %v2122_v21  ;;  %v273_v21 = vld [vmem:[%s2298_s15 + $0x2a8] sm:$0xff]  ;;  %v280_v22 = vld [vmem:[%s2298_s15 + $0x2e0] sm:$0xff] }
  0x44   : > { %2135 = vmatpush3.bf16.msra.mxu1 %v2134_v23  ;;  %2124 = vmatprep.subr.bf16.mxu0 %v2260_v0  ;;  %v281_v23 = vld [vmem:[%s2298_s15 + $0x2e8] sm:$0xff]  ;;  %v2176_v24 = vpack.c.bf16 %v273_v21, %v272_v20  ;;  %v2227_v20 = vpack.c.bf16 %v307_v17, %v306_v16  ;;  %v186_v21 = vld [vmem:[%s2327_s19 + $0x1c] sm:$0x3] }
  0x45   : > { %2136 = vmatprep.subr.bf16.mxu1 %v2260_v0  ;;  %1875 = vmatprep.mubr.msk.f32.mxu0 %vm2261_vm0, %v2262_v1  ;;  %v2188_v25 = vpack.c.bf16 %v281_v23, %v280_v22  ;;  %v187_v22 = vld [vmem:[%s2327_s19 + $0x1e] sm:$0x3] }
  0x46   : > { %1894 = vmatprep.mubr.msk.f32.mxu1 %vm2261_vm0, %v2262_v1 }
  0x47   : > { %2126 = vmatpush3.bf16.msra.mxu0 %v2125_v28  ;;  %v282_v28 = vld [vmem:[%s2298_s15 + $0x2f0] sm:$0xff] }
  0x48   : > { %2138 = vmatpush3.bf16.msra.mxu1 %v2137_v29  ;;  %2127 = vmatprep.subr.bf16.mxu0 %v2260_v0  ;;  %v283_v29 = vld [vmem:[%s2298_s15 + $0x2f8] sm:$0xff] }
  0x49   : > { %2139 = vmatprep.subr.bf16.mxu1 %v2260_v0  ;;  %v2191_v31 = vpack.c.bf16 %v283_v29, %v282_v28 }
  0x4b   : > { %2129 = vmatpush3.bf16.msra.mxu0 %v2128_v34  ;;  %v292_v34 = vld [vmem:[%s2298_s15 + $0x340] sm:$0xff] }
  0x4c   : > { %2141 = vmatpush3.bf16.msra.mxu1 %v2140_v35  ;;  %2130 = vmatprep.subr.bf16.mxu0 %v2260_v0  ;;  %v293_v35 = vld [vmem:[%s2298_s15 + $0x348] sm:$0xff] }
  0x4d   : > { %2142 = vmatprep.subr.bf16.mxu1 %v2260_v0  ;;  %v2206_v39 = vpack.c.bf16 %v293_v35, %v292_v34 }
  0x4f   : > { %2132 = vmatpush3.bf16.msra.mxu0 %v2131_v40  ;;  %v286_v40 = vld [vmem:[%s2298_s15 + $0x310] sm:$0xff] }
  0x50   : > { %2144 = vmatpush3.bf16.msra.mxu1 %v2143_v41  ;;  %2145 = vmatprep.subr.bf16.mxu0 %v2260_v0  ;;  %v287_v41 = vld [vmem:[%s2298_s15 + $0x318] sm:$0xff] }
  0x51   : > { %2157 = vmatprep.subr.bf16.mxu1 %v2260_v0  ;;  %v2197_v44 = vpack.c.bf16 %v287_v41, %v286_v40 }
  0x52   : > { %1876 = vmatmul.mubr.msk.f32.vlgmr.msra.gmra.mrb[6].mxu0 %vm316_vm1, %v178_v46  ;;  %v288_v46 = vld [vmem:[%s2298_s15 + $0x320] sm:$0xff] }
  0x53   : > { %1895 = vmatmul.mubr.msk.f32.vlgmr.msra.gmra.mrb[6].mxu1 %vm316_vm1, %v179_v48  ;;  %2147 = vmatpush3.bf16.msra.mxu0 %v2146_v47  ;;  %v289_v47 = vld [vmem:[%s2298_s15 + $0x328] sm:$0xff]  ;;  %v296_v48 = vld [vmem:[%s2298_s15 + $0x360] sm:$0xff] }
  0x54   : > { %2159 = vmatpush3.bf16.msra.mxu1 %v2158_v49  ;;  %2148 = vmatprep.subr.bf16.mxu0 %v2260_v0  ;;  %v297_v49 = vld [vmem:[%s2298_s15 + $0x368] sm:$0xff]  ;;  %v2200_v50 = vpack.c.bf16 %v289_v47, %v288_v46 }
  0x55   : > { %2160 = vmatprep.subr.bf16.mxu1 %v2260_v0  ;;  %1913 = vmatprep.mubr.msk.f32.mxu0 %vm2261_vm0, %v2262_v1  ;;  %v2212_v51 = vpack.c.bf16 %v297_v49, %v296_v48 }
  0x56   : > { %1932 = vmatprep.mubr.msk.f32.mxu1 %vm2261_vm0, %v2262_v1 }
  0x57   : > { %2150 = vmatpush3.bf16.msra.mxu0 %v2149_v54  ;;  %v298_v54 = vld [vmem:[%s2298_s15 + $0x370] sm:$0xff] }
  0x58   : > { %2162 = vmatpush3.bf16.msra.mxu1 %v2161_v55  ;;  %2151 = vmatprep.subr.bf16.mxu0 %v2260_v0  ;;  %v299_v55 = vld [vmem:[%s2298_s15 + $0x378] sm:$0xff] }
  0x59   : > { %2163 = vmatprep.subr.bf16.mxu1 %v2260_v0  ;;  %v2215_v57 = vpack.c.bf16 %v299_v55, %v298_v54 }
  0x5b   : > { %2153 = vmatpush3.bf16.msra.mxu0 %v2152_v60  ;;  %v308_v60 = vld [vmem:[%s2298_s15 + $0x3c0] sm:$0xff] }
  0x5c   : > { %2165 = vmatpush3.bf16.msra.mxu1 %v2164_v61  ;;  %2154 = vmatprep.subr.bf16.mxu0 %v2260_v0  ;;  %v309_v61 = vld [vmem:[%s2298_s15 + $0x3c8] sm:$0xff] }
  0x5d   : > { %2166 = vmatprep.subr.bf16.mxu1 %v2260_v0  ;;  %v2230_v3 = vpack.c.bf16 %v309_v61, %v308_v60 }
  0x5f   : > { %2156 = vmatpush3.bf16.msra.mxu0 %v2155_v4  ;;  %v302_v4 = vld [vmem:[%s2298_s15 + $0x390] sm:$0xff] }
  0x60   : > { %2168 = vmatpush3.bf16.msra.mxu1 %v2167_v5  ;;  %2169 = vmatprep.subr.bf16.mxu0 %v2260_v0  ;;  %v303_v5 = vld [vmem:[%s2298_s15 + $0x398] sm:$0xff] }
  0x61   : > { %2181 = vmatprep.subr.bf16.mxu1 %v2260_v0  ;;  %v2221_v8 = vpack.c.bf16 %v303_v5, %v302_v4 }
  0x62   : > { %1914 = vmatmul.mubr.msk.f32.vlgmr.msra.gmra.mrb[8].mxu0 %vm316_vm1, %v180_v10  ;;  %v304_v10 = vld [vmem:[%s2298_s15 + $0x3a0] sm:$0xff] }
  0x63   : > { %1933 = vmatmul.mubr.msk.f32.vlgmr.msra.gmra.mrb[8].mxu1 %vm316_vm1, %v181_v12  ;;  %2171 = vmatpush3.bf16.msra.mxu0 %v2170_v11  ;;  %v305_v11 = vld [vmem:[%s2298_s15 + $0x3a8] sm:$0xff]  ;;  %v312_v12 = vld [vmem:[%s2298_s15 + $0x3e0] sm:$0xff] }
  0x64   : > { %2183 = vmatpush3.bf16.msra.mxu1 %v2182_v13  ;;  %2172 = vmatprep.subr.bf16.mxu0 %v2260_v0  ;;  %v313_v13 = vld [vmem:[%s2298_s15 + $0x3e8] sm:$0xff]  ;;  %v2224_v14 = vpack.c.bf16 %v305_v11, %v304_v10 }
  0x65   : > { %2184 = vmatprep.subr.bf16.mxu1 %v2260_v0  ;;  %1951 = vmatprep.mubr.msk.f32.mxu0 %vm2261_vm0, %v2262_v1  ;;  %v2236_v15 = vpack.c.bf16 %v313_v13, %v312_v12 }
  0x66   : > { %1970 = vmatprep.mubr.msk.f32.mxu1 %vm2261_vm0, %v2262_v1 }
  0x67   : > { %2174 = vmatpush3.bf16.msra.mxu0 %v2173_v18  ;;  %v314_v18 = vld [vmem:[%s2298_s15 + $0x3f0] sm:$0xff] }
  0x68   : > { %2186 = vmatpush3.bf16.msra.mxu1 %v2185_v19  ;;  %2175 = vmatprep.subr.bf16.mxu0 %v2260_v0  ;;  %v315_v19 = vld [vmem:[%s2298_s15 + $0x3f8] sm:$0xff] }
  0x69   : > { %2187 = vmatprep.subr.bf16.mxu1 %v2260_v0 }
  0x6b   : > { %2177 = vmatpush3.bf16.msra.mxu0 %v2176_v24 }
  0x6c   : > { %2189 = vmatpush3.bf16.msra.mxu1 %v2188_v25  ;;  %2178 = vmatprep.subr.bf16.mxu0 %v2260_v0 }
  0x6d   : > { %2190 = vmatprep.subr.bf16.mxu1 %v2260_v0 }
  0x6f   : > { %2180 = vmatpush3.bf16.msra.mxu0 %v2179_v30 }
  0x70   : > { %2192 = vmatpush3.bf16.msra.mxu1 %v2191_v31  ;;  %2193 = vmatprep.subr.bf16.mxu0 %v2260_v0 }
  0x71   : > { %2205 = vmatprep.subr.bf16.mxu1 %v2260_v0 }
  0x72   : > { %1952 = vmatmul.mubr.msk.f32.vlgmr.msra.gmra.mrb[10].mxu0 %vm316_vm1, %v182_v36 }
  0x73   : > { %1971 = vmatmul.mubr.msk.f32.vlgmr.msra.gmra.mrb[10].mxu1 %vm316_vm1, %v183_v38  ;;  %2195 = vmatpush3.bf16.msra.mxu0 %v2194_v37 }
  0x74   : > { %2207 = vmatpush3.bf16.msra.mxu1 %v2206_v39  ;;  %2196 = vmatprep.subr.bf16.mxu0 %v2260_v0 }
  0x75   : > { %2208 = vmatprep.subr.bf16.mxu1 %v2260_v0  ;;  %1989 = vmatprep.mubr.msk.f32.mxu0 %vm2261_vm0, %v2262_v1 }
  0x76   : > { %2008 = vmatprep.mubr.msk.f32.mxu1 %vm2261_vm0, %v2262_v1 }
  0x77   : > { %2198 = vmatpush3.bf16.msra.mxu0 %v2197_v44 }
  0x78   : > { %2210 = vmatpush3.bf16.msra.mxu1 %v2209_v45  ;;  %2199 = vmatprep.subr.bf16.mxu0 %v2260_v0 }
  0x79   : > { %2211 = vmatprep.subr.bf16.mxu1 %v2260_v0 }
  0x7b   : > { %2201 = vmatpush3.bf16.msra.mxu0 %v2200_v50 }
  0x7c   : > { %2213 = vmatpush3.bf16.msra.mxu1 %v2212_v51  ;;  %2202 = vmatprep.subr.bf16.mxu0 %v2260_v0 }
  0x7d   : > { %2214 = vmatprep.subr.bf16.mxu1 %v2260_v0 }
  0x7f   : > { %2204 = vmatpush3.bf16.msra.mxu0 %v2203_v56 }
  0x80   : > { %2216 = vmatpush3.bf16.msra.mxu1 %v2215_v57  ;;  %2217 = vmatprep.subr.bf16.mxu0 %v2260_v0 }
  0x81   : > { %2229 = vmatprep.subr.bf16.mxu1 %v2260_v0 }
  0x82   : > { %1990 = vmatmul.mubr.msk.f32.vlgmr.msra.gmra.mrb[12].mxu0 %vm316_vm1, %v184_v62 }
  0x83   : > { %2009 = vmatmul.mubr.msk.f32.vlgmr.msra.gmra.mrb[12].mxu1 %vm316_vm1, %v185_v2  ;;  %2219 = vmatpush3.bf16.msra.mxu0 %v2218_v63 }
  0x84   : > { %2231 = vmatpush3.bf16.msra.mxu1 %v2230_v3  ;;  %2220 = vmatprep.subr.bf16.mxu0 %v2260_v0 }
  0x85   : > { %2232 = vmatprep.subr.bf16.mxu1 %v2260_v0  ;;  %2027 = vmatprep.mubr.msk.f32.mxu0 %vm2261_vm0, %v2262_v1 }
  0x86   : > { %2046 = vmatprep.mubr.msk.f32.mxu1 %vm2261_vm0, %v2262_v1  ;;  %v2239_v1 = vpack.c.bf16 %v315_v19, %v314_v18 }
  0x87   : > { %2222 = vmatpush3.bf16.msra.mxu0 %v2221_v8 }
  0x88   : > { %2234 = vmatpush3.bf16.msra.mxu1 %v2233_v9  ;;  %2223 = vmatprep.subr.bf16.mxu0 %v2260_v0 }
  0x89   : > { %2235 = vmatprep.subr.bf16.mxu1 %v2260_v0 }
  0x8b   : > { %2225 = vmatpush3.bf16.msra.mxu0 %v2224_v14 }
  0x8c   : > { %2237 = vmatpush3.bf16.msra.mxu1 %v2236_v15  ;;  %2226 = vmatprep.subr.bf16.mxu0 %v2260_v0 }
  0x8d   : > { %2238 = vmatprep.subr.bf16.mxu1 %v2260_v0 }
  0x8f   : > { %2228 = vmatpush3.bf16.msra.mxu0 %v2227_v20 }
  0x90   : > { %2240 = vmatpush3.bf16.msra.mxu1 %v2239_v1 }
  0x92   : > { %2028 = vmatmul.mubr.msk.f32.vlgmr.msra.gmra.mrb[14].mxu0 %vm316_vm1, %v186_v21 }
  0x93   : > { %2047 = vmatmul.mubr.msk.f32.vlgmr.msra.gmra.mrb[14].mxu1 %vm316_vm1, %v187_v22 }
  0xf5   : > { %v386_v0 = vpop.f32.mrb[0].mxu0 }
  0xf6   : > { %1486 = vst.msk [vmem:[%s2563_s22] sm:$0x3] %vm1485_vm2, %v386_v0  ;;  %v459_v23 = vpop.f32.mrb[0].mxu1  ;;  %v1763_v24 = vpop.f32.mrb[1].mxu0 }
  0xf7   : > { %1487 = vst.msk [vmem:[%s2563_s22 + $0x2] sm:$0x3] %vm1485_vm2, %v459_v23  ;;  %v1782_v25 = vpop.f32.mrb[1].mxu1 }
 0x105   : > { %v532_v26 = vpop.f32.mrb[2].mxu0 }
 0x106   : > { %1488 = vst.msk [vmem:[%s2563_s22 + $0x4] sm:$0x3] %vm1485_vm2, %v532_v26  ;;  %v605_v27 = vpop.f32.mrb[2].mxu1  ;;  %v1801_v28 = vpop.f32.mrb[3].mxu0 }
 0x107   : > { %1489 = vst.msk [vmem:[%s2563_s22 + $0x6] sm:$0x3] %vm1485_vm2, %v605_v27  ;;  %v1820_v29 = vpop.f32.mrb[3].mxu1 }
 0x115   : > { %v678_v30 = vpop.f32.mrb[4].mxu0 }
 0x116   : > { %1490 = vst.msk [vmem:[%s2563_s22 + $0x8] sm:$0x3] %vm1485_vm2, %v678_v30  ;;  %v751_v31 = vpop.f32.mrb[4].mxu1  ;;  %v1839_v32 = vpop.f32.mrb[5].mxu0 }
 0x117   : > { %1491 = vst.msk [vmem:[%s2563_s22 + $0xa] sm:$0x3] %vm1485_vm2, %v751_v31  ;;  %v1858_v33 = vpop.f32.mrb[5].mxu1 }
 0x125   : > { %v824_v34 = vpop.f32.mrb[6].mxu0 }
 0x126   : > { %1492 = vst.msk [vmem:[%s2563_s22 + $0xc] sm:$0x3] %vm1485_vm2, %v824_v34  ;;  %v897_v35 = vpop.f32.mrb[6].mxu1  ;;  %v1877_v36 = vpop.f32.mrb[7].mxu0 }
 0x127   : > { %1493 = vst.msk [vmem:[%s2563_s22 + $0xe] sm:$0x3] %vm1485_vm2, %v897_v35  ;;  %v1896_v37 = vpop.f32.mrb[7].mxu1 }
 0x135   : > { %v970_v38 = vpop.f32.mrb[8].mxu0 }
 0x136   : > { %1494 = vst.msk [vmem:[%s2563_s22 + $0x10] sm:$0x3] %vm1485_vm2, %v970_v38  ;;  %v1043_v39 = vpop.f32.mrb[8].mxu1  ;;  %v1915_v40 = vpop.f32.mrb[9].mxu0 }
 0x137   : > { %1495 = vst.msk [vmem:[%s2563_s22 + $0x12] sm:$0x3] %vm1485_vm2, %v1043_v39  ;;  %v1934_v41 = vpop.f32.mrb[9].mxu1 }
 0x145   : > { %v1116_v42 = vpop.f32.mrb[10].mxu0 }
 0x146   : > { %1496 = vst.msk [vmem:[%s2563_s22 + $0x14] sm:$0x3] %vm1485_vm2, %v1116_v42  ;;  %v1189_v43 = vpop.f32.mrb[10].mxu1  ;;  %v1953_v44 = vpop.f32.mrb[11].mxu0 }
 0x147   : > { %1497 = vst.msk [vmem:[%s2563_s22 + $0x16] sm:$0x3] %vm1485_vm2, %v1189_v43  ;;  %v1972_v45 = vpop.f32.mrb[11].mxu1 }
 0x155   : > { %v1262_v46 = vpop.f32.mrb[12].mxu0 }
 0x156   : > { %1498 = vst.msk [vmem:[%s2563_s22 + $0x18] sm:$0x3] %vm1485_vm2, %v1262_v46  ;;  %v1335_v47 = vpop.f32.mrb[12].mxu1  ;;  %v1991_v48 = vpop.f32.mrb[13].mxu0 }
 0x157   : > { %1499 = vst.msk [vmem:[%s2563_s22 + $0x1a] sm:$0x3] %vm1485_vm2, %v1335_v47  ;;  %v2010_v49 = vpop.f32.mrb[13].mxu1 }
 0x165   : > { %v1408_v50 = vpop.f32.mrb[14].mxu0 }
 0x166   : > { %1500 = vst.msk [vmem:[%s2563_s22 + $0x1c] sm:$0x3] %vm1485_vm2, %v1408_v50  ;;  %v1481_v51 = vpop.f32.mrb[14].mxu1  ;;  %v2029_v52 = vpop.f32.mrb[15].mxu0 }
 0x167   : > { %1501 = vst.msk [vmem:[%s2563_s22 + $0x1e] sm:$0x3] %vm1485_vm2, %v1481_v51  ;;  %v2048_v53 = vpop.f32.mrb[15].mxu1 }
 0x168 PF: > { %s12_s9 = sadd.s32 1, %s2258_s9  }
 0x169   : > { %p9_p4 = scmp.ge.s32.totalorder %s12_s9, 4  }
 0x16b   :  { %11 = sbr.rel (!%p9_p4) target bundleno = 1 (0x1), region = 61 }

// kernel: _lambda_.18
= control target key start
LH: loop header
LB: loop body
LE: loop exit
PB: predicated region body
PF: predicated region fallthrough
CT: control target
= control target key end

     0   :  { %vm249_vm0 = vcmask 64512   ;;  %s1877_s3 = inlined_call_operand.vmem [shape: f32[128,128], index: 3, kind: input, shape index: {}]   ;;  %s1878_s1 = inlined_call_operand.vmem [shape: f32[128,128], index: 1, kind: input, shape index: {}]   ;;  %s1879_s4 = inlined_call_operand.vmem [shape: f32[8,128], index: 4, kind: input, shape index: {}]   ;;  %s1880_s2 = inlined_call_operand.vmem [shape: f32[128,8], index: 2, kind: input, shape index: {}]   ;;  %s1881_s0 = inlined_call_operand.vmem [shape: f32[128,128], index: 0, kind: input, shape index: {}]   ;;  %s1882_s5 = inlined_call_operand.vmem [shape: f32[1,128], index: 5, kind: input, shape index: {}]   ;;  %s1883_s6 = inlined_call_operand.vmem [shape: f32[128,128], index: 6, kind: output, shape index: {}]  }
   0x1   :  { %v55_v0 = vld [vmem:[%s1877_s3] sm:$0xff]  ;;  %v56_v1 = vld [vmem:[%s1877_s3 + $0x8] sm:$0xff]  ;;  %v57_v2 = vld [vmem:[%s1877_s3 + $0x10] sm:$0xff] }
   0x2   :  { %v1082_v3 = vpack.c.bf16 %v56_v1, %v55_v0  ;;  %v58_v4 = vld [vmem:[%s1877_s3 + $0x18] sm:$0xff]  ;;  %v59_v6 = vld [vmem:[%s1877_s3 + $0x20] sm:$0xff]  ;;  %v60_v7 = vld [vmem:[%s1877_s3 + $0x28] sm:$0xff] }
   0x3   :  { %v1086_v5 = vpack.c.bf16 %v58_v4, %v57_v2  ;;  %v1090_v8 = vpack.c.bf16 %v60_v7, %v59_v6  ;;  %v61_v9 = vld [vmem:[%s1877_s3 + $0x30] sm:$0xff]  ;;  %v39_v10 = vld [vmem:[%s1878_s1] sm:$0xff]  ;;  %v62_v12 = vld [vmem:[%s1877_s3 + $0x38] sm:$0xff] }
   0x4   :  { %1083 = vmatprep.subr.bf16.mxu1 %v1082_v3  ;;  %v248_v11 = vld [vmem:[%s1879_s4] sm:$0xff]  ;;  %1032 = vmatprep.mubr.f32.mxu1 %v39_v10  ;;  %v233_v14 = vld [vmem:[%s1880_s2 + $0x8] sm:$0xff]  ;;  %v234_v15 = vld [vmem:[%s1880_s2 + $0x10] sm:$0xff]  ;;  %v1094_v16 = vpack.c.bf16 %v62_v12, %v61_v9 }
   0x5   :  { %1085 = vmatpush3.bf16.msra.mxu1 %v1082_v3  ;;  %1056 = vmatprep.subr.mxu0 %v248_v11  ;;  %v232_v13 = vld [vmem:[%s1880_s2] sm:$0xff]  ;;  %v235_v17 = vld [vmem:[%s1880_s2 + $0x18] sm:$0xff]  ;;  %v64_v19 = vld [vmem:[%s1877_s3 + $0x48] sm:$0xff] }
   0x6   :  { %1087 = vmatprep.subr.bf16.mxu1 %v1086_v5  ;;  %1057 = vmatpush3.msra.mxu0 %v248_v11  ;;  %v63_v18 = vld [vmem:[%s1877_s3 + $0x40] sm:$0xff]  ;;  %v237_v22 = vld [vmem:[%s1880_s2 + $0x28] sm:$0xff]  ;;  %v65_v23 = vld [vmem:[%s1877_s3 + $0x50] sm:$0xff] }
   0x7   :  { %1058 = vmatprep.mubr.msk.f32.mxu0 %vm249_vm0, %v232_v13  ;;  %v236_v20 = vld [vmem:[%s1880_s2 + $0x20] sm:$0xff]  ;;  %v1098_v21 = vpack.c.bf16 %v64_v19, %v63_v18  ;;  %v66_v24 = vld [vmem:[%s1877_s3 + $0x58] sm:$0xff]  ;;  %v238_v25 = vld [vmem:[%s1880_s2 + $0x30] sm:$0xff] }
   0x8   :  { %1059 = vmatmul.mubr.msk.f32.vlgmr.msra.gmra.mrb[0].mxu0 %vm249_vm0, %v233_v14  ;;  %v1102_v26 = vpack.c.bf16 %v66_v24, %v65_v23  ;;  %v239_v27 = vld [vmem:[%s1880_s2 + $0x38] sm:$0xff]  ;;  %v67_v28 = vld [vmem:[%s1877_s3 + $0x60] sm:$0xff]  ;;  %v68_v29 = vld [vmem:[%s1877_s3 + $0x68] sm:$0xff] }
   0x9   :  { %1089 = vmatpush3.bf16.msra.mxu1 %v1086_v5  ;;  %1061 = vmatprep.mubr.msk.f32.mxu0 %vm249_vm0, %v234_v15  ;;  %v240_v30 = vld [vmem:[%s1880_s2 + $0x40] sm:$0xff]  ;;  %v1106_v31 = vpack.c.bf16 %v68_v29, %v67_v28  ;;  %v241_v32 = vld [vmem:[%s1880_s2 + $0x48] sm:$0xff]  ;;  %v69_v33 = vld [vmem:[%s1877_s3 + $0x70] sm:$0xff] }
   0xa   :  { %1091 = vmatprep.subr.bf16.mxu1 %v1090_v8  ;;  %v70_v34 = vld [vmem:[%s1877_s3 + $0x78] sm:$0xff]  ;;  %v242_v35 = vld [vmem:[%s1880_s2 + $0x50] sm:$0xff]  ;;  %v244_v38 = vld [vmem:[%s1880_s2 + $0x60] sm:$0xff] }
   0xb   :  { %v1110_v36 = vpack.c.bf16 %v70_v34, %v69_v33  ;;  %v243_v37 = vld [vmem:[%s1880_s2 + $0x58] sm:$0xff]  ;;  %v245_v39 = vld [vmem:[%s1880_s2 + $0x68] sm:$0xff]  ;;  %v246_v40 = vld [vmem:[%s1880_s2 + $0x70] sm:$0xff] }
   0xc   :  { %1062 = vmatmul.mubr.msk.f32.gmra.mrb[2].mxu0 %vm249_vm0, %v235_v17  ;;  %v40_v41 = vld [vmem:[%s1878_s1 + $0x8] sm:$0xff]  ;;  %v41_v42 = vld [vmem:[%s1878_s1 + $0x10] sm:$0xff]  ;;  %v247_v43 = vld [vmem:[%s1880_s2 + $0x78] sm:$0xff] }
   0xd   :  { %1093 = vmatpush3.bf16.msra.mxu1 %v1090_v8  ;;  %1064 = vmatprep.mubr.msk.f32.mxu0 %vm249_vm0, %v236_v20  ;;  %v42_v44 = vld [vmem:[%s1878_s1 + $0x18] sm:$0xff]  ;;  %v43_v45 = vld [vmem:[%s1878_s1 + $0x20] sm:$0xff]  ;;  %v44_v46 = vld [vmem:[%s1878_s1 + $0x28] sm:$0xff] }
   0xe   :  { %1095 = vmatprep.subr.bf16.mxu1 %v1094_v16  ;;  %v45_v47 = vld [vmem:[%s1878_s1 + $0x30] sm:$0xff]  ;;  %v46_v48 = vld [vmem:[%s1878_s1 + $0x38] sm:$0xff]  ;;  %v47_v49 = vld [vmem:[%s1878_s1 + $0x40] sm:$0xff] }
   0xf   :  { %v48_v50 = vld [vmem:[%s1878_s1 + $0x48] sm:$0xff]  ;;  %v49_v51 = vld [vmem:[%s1878_s1 + $0x50] sm:$0xff]  ;;  %v50_v52 = vld [vmem:[%s1878_s1 + $0x58] sm:$0xff] }
  0x10   :  { %1065 = vmatmul.mubr.msk.f32.gmra.mrb[4].mxu0 %vm249_vm0, %v237_v22  ;;  %v51_v53 = vld [vmem:[%s1878_s1 + $0x60] sm:$0xff]  ;;  %v52_v54 = vld [vmem:[%s1878_s1 + $0x68] sm:$0xff]  ;;  %v53_v55 = vld [vmem:[%s1878_s1 + $0x70] sm:$0xff] }
  0x11   :  { %1097 = vmatpush3.bf16.msra.mxu1 %v1094_v16  ;;  %1067 = vmatprep.mubr.msk.f32.mxu0 %vm249_vm0, %v238_v25  ;;  %v54_v56 = vld [vmem:[%s1878_s1 + $0x78] sm:$0xff]  ;;  %v24_v6 = vld [vmem:[%s1881_s0 + $0x8] sm:$0xff]  ;;  %v23_v8 = vld [vmem:[%s1881_s0] sm:$0xff] }
  0x12   :  { %1099 = vmatprep.subr.bf16.mxu1 %v1098_v21  ;;  %v1441_v14 = vld [vmem:[%s1882_s5] ss:$0 sm:$0xff]  ;;  %v26_v15 = vld [vmem:[%s1881_s0 + $0x18] sm:$0xff]  ;;  %v25_v18 = vld [vmem:[%s1881_s0 + $0x10] sm:$0xff] }
  0x14   :  { %1068 = vmatmul.mubr.msk.f32.gmra.mrb[6].mxu0 %vm249_vm0, %v239_v27 }
  0x15   :  { %1101 = vmatpush3.bf16.msra.mxu1 %v1098_v21  ;;  %1070 = vmatprep.mubr.msk.f32.mxu0 %vm249_vm0, %v240_v30 }
  0x16   :  { %1103 = vmatprep.subr.bf16.mxu1 %v1102_v26 }
  0x18   :  { %1071 = vmatmul.mubr.msk.f32.gmra.mrb[8].mxu0 %vm249_vm0, %v241_v32 }
  0x19   :  { %1105 = vmatpush3.bf16.msra.mxu1 %v1102_v26  ;;  %1073 = vmatprep.mubr.msk.f32.mxu0 %vm249_vm0, %v242_v35 }
  0x1a   :  { %1107 = vmatprep.subr.bf16.mxu1 %v1106_v31 }
  0x1c   :  { %1074 = vmatmul.mubr.msk.f32.gmra.mrb[10].mxu0 %vm249_vm0, %v243_v37 }
  0x1d   :  { %1109 = vmatpush3.bf16.msra.mxu1 %v1106_v31  ;;  %1076 = vmatprep.mubr.msk.f32.mxu0 %vm249_vm0, %v244_v38  ;;  %v27_v38 = vld [vmem:[%s1881_s0 + $0x20] sm:$0xff] }
  0x1e   :  { %1111 = vmatprep.subr.bf16.mxu1 %v1110_v36 }
  0x20   :  { %1077 = vmatmul.mubr.msk.f32.gmra.mrb[12].mxu0 %vm249_vm0, %v245_v39 }
  0x21   :  { %1113 = vmatpush3.bf16.msra.mxu1 %v1110_v36  ;;  %1079 = vmatprep.mubr.msk.f32.mxu0 %vm249_vm0, %v246_v40  ;;  %v28_v36 = vld [vmem:[%s1881_s0 + $0x28] sm:$0xff] }
  0x24   :  { %1033 = vmatmul.mubr.f32.vlgmr.msra.gmra.mrb[0].mxu1 %v40_v41  ;;  %1080 = vmatmul.mubr.msk.f32.gmra.mrb[14].mxu0 %vm249_vm0, %v247_v43 }
  0x25   :  { %1035 = vmatprep.mubr.f32.mxu1 %v41_v42 }
  0x28   :  { %1036 = vmatmul.mubr.f32.gmra.mrb[2].mxu1 %v42_v44 }
  0x29   :  { %1038 = vmatprep.mubr.f32.mxu1 %v43_v45 }
  0x2c   :  { %1039 = vmatmul.mubr.f32.gmra.mrb[4].mxu1 %v44_v46 }
  0x2d   :  { %1041 = vmatprep.mubr.f32.mxu1 %v45_v47 }
  0x30   :  { %1042 = vmatmul.mubr.f32.gmra.mrb[6].mxu1 %v46_v48 }
  0x31   :  { %1044 = vmatprep.mubr.f32.mxu1 %v47_v49 }
  0x34   :  { %1045 = vmatmul.mubr.f32.gmra.mrb[8].mxu1 %v48_v50 }
  0x35   :  { %1047 = vmatprep.mubr.f32.mxu1 %v49_v51 }
  0x38   :  { %1048 = vmatmul.mubr.f32.gmra.mrb[10].mxu1 %v50_v52  ;;  %v30_v52 = vld [vmem:[%s1881_s0 + $0x38] sm:$0xff] }
  0x39   :  { %1050 = vmatprep.mubr.f32.mxu1 %v51_v53 }
  0x3c   :  { %1051 = vmatmul.mubr.f32.gmra.mrb[12].mxu1 %v52_v54 }
  0x3d   :  { %1053 = vmatprep.mubr.f32.mxu1 %v53_v55 }
  0x40   :  { %1054 = vmatmul.mubr.f32.gmra.mrb[14].mxu1 %v54_v56 }
  0xdb   :  { %v1060_v57 = vpop.f32.mrb[0].mxu0 }
  0xdc   :  { %v364_v58 = vpop.f32.mrb[1].mxu0 }
  0xdf   :  { %v1063_v59 = vpop.f32.mrb[2].mxu0 }
  0xe0   :  { %v374_v60 = vpop.f32.mrb[3].mxu0 }
  0xe3   :  { %v1410_v61 = vpop.f32.mrb[4].mxu0 }
  0xe4   :  { %v1412_v62 = vpop.f32.mrb[5].mxu0 }
  0xe7   :  { %v1414_v63 = vpop.f32.mrb[6].mxu0 }
  0xe8   :  { %v1416_v0 = vpop.f32.mrb[7].mxu0 }
  0xeb   :  { %v1418_v1 = vpop.f32.mrb[8].mxu0 }
  0xec   :  { %v1420_v2 = vpop.f32.mrb[9].mxu0 }
  0xef   :  { %v1422_v3 = vpop.f32.mrb[10].mxu0 }
  0xf0   :  { %v1424_v4 = vpop.f32.mrb[11].mxu0 }
  0xf3   :  { %v1426_v5 = vpop.f32.mrb[12].mxu0 }
  0xf4   :  { %v1431_v7 = vpop.f32.mrb[13].mxu0 }
  0xf7   :  { %v1034_v9 = vpop.f32.mrb[0].mxu1  ;;  %v1436_v12 = vpop.f32.mrb[14].mxu0 }
  0xf8   :  { %v217_v10 = vadd.f32 %v1034_v9, %v24_v6  ;;  %v137_v11 = vpop.f32.mrb[1].mxu1  ;;  %v1446_v16 = vpop.f32.mrb[15].mxu0 }
  0xf9   :  { %v216_v13 = vadd.f32 %v137_v11, %v23_v8  ;;  %v1884_v11 = vmov -1.0  }
  0xfa   :  { %v444_v17 = vadd.f32 %v1060_v57, %v217_v10 }
  0xfb   :  { %v443_v19 = vadd.f32 %v364_v58, %v216_v13  ;;  %v1037_v20 = vpop.f32.mrb[2].mxu1 }
  0xfc   :  { %v467_v21 = vadd.f32 %v1441_v14, %v444_v17  ;;  %v219_v22 = vadd.f32 %v1037_v20, %v26_v15  ;;  %v147_v23 = vpop.f32.mrb[3].mxu1 }
  0xfd   :  { %v466_v24 = vadd.f32 %v1441_v14, %v443_v19  ;;  %v218_v25 = vadd.f32 %v147_v23, %v25_v18 }
  0xfe   :  { %v499_v26 = vmul.f32 0.70710677, %v467_v21  ;;  %v446_v27 = vadd.f32 %v1063_v59, %v219_v22  ;;  %v1468_v54 = vmul.f32 0.5, %v467_v21 }
  0xff   :  { %v498_v28 = vmul.f32 0.70710677, %v466_v24  ;;  %v445_v29 = vadd.f32 %v374_v60, %v218_v25  ;;  %v1040_v30 = vpop.f32.mrb[4].mxu1  ;;  %v1482_v15 = vmul.f32 0.5, %v466_v24 }
 0x100   :  { %v547_v31 = vand.u32 2147483647, %v499_v26  ;;  %v469_v32 = vadd.f32 %v1441_v14, %v446_v27  ;;  %v157_v33 = vpop.f32.mrb[5].mxu1  ;;  %v221_v43 = vadd.f32 %v1040_v30, %v28_v36  ;;  %vm515_vm1 = vcmp.ge.f32.partialorder %v499_v26, 0.0 }
 0x101   :  { %v546_v34 = vand.u32 2147483647, %v498_v28  ;;  %v468_v35 = vadd.f32 %v1441_v14, %v445_v29  ;;  %v220_v48 = vadd.f32 %v157_v33, %v27_v38  ;;  %vm514_vm2 = vcmp.ge.f32.partialorder %v498_v28, 0.0 }
 0x102   :  { %v563_v37 = vmul.f32 0.3275911, %v547_v31  ;;  %v501_v40 = vmul.f32 0.70710677, %v469_v32  ;;  %v771_v45 = vsub.f32 0.0, %v547_v31  ;;  %v448_v56 = vadd.f32 %v1410_v61, %v221_v43 }
 0x103   :  { %v562_v39 = vmul.f32 0.3275911, %v546_v34  ;;  %v1461_v42 = vmul.f32 0.70710677, %v468_v35  ;;  %v1043_v44 = vpop.f32.mrb[6].mxu1  ;;  %v770_v50 = vsub.f32 0.0, %v546_v34  ;;  %v447_v60 = vadd.f32 %v1412_v62, %v220_v48 }
 0x104   :  { %v579_v41 = vadd.f32 1.0, %v563_v37  ;;  %v549_v47 = vand.u32 2147483647, %v501_v40  ;;  %v167_v49 = vpop.f32.mrb[7].mxu1  ;;  %v787_v58 = vmul.f32 %v771_v45, %v547_v31  ;;  %v471_v9 = vadd.f32 %v1441_v14, %v448_v56  ;;  %v29_v62 = vld [vmem:[%s1881_s0 + $0x30] sm:$0xff] }
 0x105   :  { %v578_v46 = vadd.f32 1.0, %v562_v39  ;;  %v1471_v55 = vand.u32 2147483647, %v1461_v42  ;;  %v786_v6 = vmul.f32 %v770_v50, %v546_v34  ;;  %v223_v10 = vadd.f32 %v1043_v44, %v30_v52  ;;  %v32_v50 = vld [vmem:[%s1881_s0 + $0x48] sm:$0xff] }
 0x106   :  { %1147 = vrcp.f32 %v579_v41  ;;  %v565_v51 = vmul.f32 0.3275911, %v549_v47  ;;  %v1480_v13 = vsel %vm515_vm1, 1.0, %v1884_v11  ;;  %v1485_v61 = vadd.f32 %v1441_v14, %v447_v60 }
 0x107   :  { %1149 = vrcp.f32 %v578_v46  ;;  %v1466_v53 = vpop.f32.mrb[8].mxu1  ;;  %v564_v8 = vmul.f32 0.3275911, %v1471_v55  ;;  %v1493_v18 = vsel %vm514_vm2, 1.0, %v1884_v11  ;;  %v773_v19 = vsub.f32 0.0, %v549_v47 }
 0x108   :  { %v1474_v57 = vpop.f32.mrb[9].mxu1  ;;  %v581_v59 = vadd.f32 1.0, %v565_v51  ;;  %v1495_v21 = vmul.f32 0.70710677, %v471_v9  ;;  %v804_v23 = vmul.f32 1.442695, %v787_v58  ;;  %v450_v25 = vadd.f32 %v1414_v63, %v223_v10 }
 0x109   :  { %v580_v20 = vadd.f32 1.0, %v564_v8  ;;  %vm517_vm3 = vcmp.ge.f32.partialorder %v501_v40, 0.0  ;;  %v1500_v24 = vmul.f32 0.70710677, %v1485_v61  ;;  %v802_v26 = vmul.f32 1.442695, %v786_v6 }
 0x10a   :  { %1151 = vrcp.f32 %v581_v59  ;;  %v1503_v27 = vmul.f32 0.5, %v469_v32  ;;  %v551_v28 = vand.u32 2147483647, %v1495_v21  ;;  %v1506_v29 = vmul.f32 0.5, %v468_v35 }
 0x10b   :  { %v1490_v17 = vpop.f32.mrb[10].mxu1  ;;  %1153 = vrcp.f32 %v580_v20  ;;  %v550_v30 = vand.u32 2147483647, %v1500_v24  ;;  %v222_v31 = vadd.f32 %v167_v49, %v29_v62  ;;  %v1510_v33 = vadd.f32 %v1441_v14, %v450_v25 }
 0x10c   :  { %v1497_v22 = vpop.f32.mrb[11].mxu1  ;;  %v1517_v63 = vsel %vm517_vm3, 1.0, %v1884_v11  ;;  %v789_v32 = vmul.f32 %v773_v19, %v549_v47  ;;  %vm516_vm4 = vcmp.ge.f32.partialorder %v1461_v42, 0.0  ;;  %v567_v37 = vmul.f32 0.3275911, %v551_v28 }
 0x10d   :  { %1155 = vpow2.f32 %v804_v23  ;;  %v772_v40 = vsub.f32 0.0, %v1471_v55  ;;  %v566_v41 = vmul.f32 0.3275911, %v550_v30  ;;  %v1528_v45 = vmul.f32 0.70710677, %v1510_v33 }
 0x10e   :  { %1157 = vpow2.f32 %v802_v26  ;;  %v583_v44 = vadd.f32 1.0, %v567_v37  ;;  %v775_v47 = vsub.f32 0.0, %v551_v28  ;;  %v449_v49 = vadd.f32 %v1416_v0, %v222_v31 }
 0x10f   :  { %v1512_v34 = vpop.f32.mrb[12].mxu1  ;;  %v582_v48 = vadd.f32 1.0, %v566_v41  ;;  %v808_v56 = vmul.f32 1.442695, %v789_v32  ;;  %v1539_v58 = vsel %vm516_vm4, 1.0, %v1884_v11  ;;  %v788_v6 = vmul.f32 %v772_v40, %v1471_v55 }
 0x110   :  { %v1514_v36 = vpop.eup %1147  ;;  %v1520_v38 = vpop.f32.mrb[13].mxu1  ;;  %1159 = vrcp.f32 %v583_v44  ;;  %v774_v8 = vsub.f32 0.0, %v550_v30  ;;  %v1549_v19 = vmul.f32 0.5, %v471_v9  ;;  %v553_v42 = vand.u32 2147483647, %v1528_v45 }
 0x111   :  { %v1522_v35 = vpop.eup %1149  ;;  %v627_v39 = vmul.f32 1.0614054, %v1514_v36  ;;  %1161 = vrcp.f32 %v582_v48  ;;  %v791_v23 = vmul.f32 %v775_v47, %v551_v28  ;;  %v1553_v25 = vadd.f32 %v1441_v14, %v449_v49  ;;  %v31_v28 = vld [vmem:[%s1881_s0 + $0x40] sm:$0xff] }
 0x112   :  { %v626_v43 = vmul.f32 1.0614054, %v1522_v35  ;;  %v225_v26 = vadd.f32 %v1466_v53, %v32_v50  ;;  %1163 = vpow2.f32 %v808_v56  ;;  %v569_v37 = vmul.f32 0.3275911, %v553_v42 }
 0x113   :  { %v643_v46 = vadd.f32 -1.4531521, %v627_v39  ;;  %v1534_v51 = vpop.f32.mrb[14].mxu1  ;;  %v806_v40 = vmul.f32 1.442695, %v788_v6  ;;  %v790_v41 = vmul.f32 %v774_v8, %v550_v30  ;;  %v224_v6 = vadd.f32 %v1474_v57, %v31_v28 }
 0x114   :  { %v642_v52 = vadd.f32 -1.4531521, %v626_v43  ;;  %v1541_v59 = vpop.f32.mrb[15].mxu1  ;;  %v1543_v60 = vpop.eup %1151  ;;  %v585_v44 = vadd.f32 1.0, %v569_v37  ;;  %v812_v50 = vmul.f32 1.442695, %v791_v23 }
 0x115   :  { %v659_v0 = vmul.f32 %v1514_v36, %v643_v46  ;;  %v629_v62 = vmul.f32 1.0614054, %v1543_v60  ;;  %v1556_v31 = vpop.eup %1153  ;;  %v1566_v46 = vmul.f32 0.70710677, %v1553_v25  ;;  %v1584_v28 = vadd.f32 %v1420_v2, %v224_v6 }
 0x116   :  { %v658_v10 = vmul.f32 %v1522_v35, %v642_v52  ;;  %v628_v9 = vmul.f32 1.0614054, %v1556_v31  ;;  %v452_v52 = vadd.f32 %v1418_v1, %v225_v26  ;;  %1165 = vrcp.f32 %v585_v44 }
 0x117   :  { %v675_v20 = vadd.f32 1.4214138, %v659_v0  ;;  %v645_v32 = vadd.f32 -1.4531521, %v629_v62  ;;  %v1156_v47 = vpop.eup %1155  ;;  %1167 = vpow2.f32 %v806_v40  ;;  %v810_v62 = vmul.f32 1.442695, %v790_v41 }
 0x118   :  { %v674_v55 = vadd.f32 1.4214138, %v658_v10  ;;  %v644_v49 = vadd.f32 -1.4531521, %v628_v9  ;;  %v1158_v56 = vpop.eup %1157  ;;  %v1577_v1 = vand.u32 2147483647, %v1566_v46  ;;  %1169 = vpow2.f32 %v812_v50 }
 0x119   :  { %v691_v39 = vmul.f32 %v1514_v36, %v675_v20  ;;  %v661_v53 = vmul.f32 %v1543_v60, %v645_v32  ;;  %v777_v32 = vsub.f32 0.0, %v553_v42  ;;  %1171 = vpow2.f32 %v810_v62 }
 0x11a   :  { %v690_v43 = vmul.f32 %v1522_v35, %v674_v55  ;;  %v660_v10 = vmul.f32 %v1556_v31, %v644_v49  ;;  %v1572_v20 = vpop.eup %1159  ;;  %vm519_vm5 = vcmp.ge.f32.partialorder %v1495_v21, 0.0  ;;  %vm518_vm6 = vcmp.ge.f32.partialorder %v1500_v24, 0.0 }
 0x11b   :  { %v707_v48 = vadd.f32 -0.28449672, %v691_v39  ;;  %v677_v0 = vadd.f32 1.4214138, %v661_v53  ;;  %v1579_v26 = vpop.eup %1161  ;;  %v631_v39 = vmul.f32 1.0614054, %v1572_v20 }
 0x11c   :  { %v706_v30 = vadd.f32 -0.28449672, %v690_v43  ;;  %v676_v57 = vadd.f32 1.4214138, %v660_v10  ;;  %v630_v41 = vmul.f32 1.0614054, %v1579_v26  ;;  %v1164_v49 = vpop.eup %1163 }
 0x11d   :  { %v723_v8 = vmul.f32 %v1514_v36, %v707_v48  ;;  %v693_v23 = vmul.f32 %v1543_v60, %v677_v0  ;;  %v647_v44 = vadd.f32 -1.4531521, %v631_v39  ;;  %v568_v48 = vmul.f32 0.3275911, %v1577_v1 }
 0x11e   :  { %v722_v55 = vmul.f32 %v1522_v35, %v706_v30  ;;  %v692_v53 = vmul.f32 %v1556_v31, %v676_v57  ;;  %v646_v50 = vadd.f32 -1.4531521, %v630_v41  ;;  %vm521_vm7 = vcmp.ge.f32.partialorder %v1528_v45, 0.0 }
 0x11f   :  { %v739_v37 = vadd.f32 0.2548296, %v723_v8  ;;  %v709_v40 = vadd.f32 -0.28449672, %v693_v23  ;;  %v793_v8 = vmul.f32 %v777_v32, %v553_v42  ;;  %v663_v23 = vmul.f32 %v1572_v20, %v647_v44 }
 0x120   :  { %v738_v9 = vadd.f32 0.2548296, %v722_v55  ;;  %v708_v55 = vadd.f32 -0.28449672, %v692_v53  ;;  %v584_v2 = vadd.f32 1.0, %v568_v48  ;;  %vm520_vm8 = vcmp.ge.f32.partialorder %v1566_v46, 0.0 }
 0x121   :  { %v755_v43 = vmul.f32 %v1514_v36, %v739_v37  ;;  %v725_v0 = vmul.f32 %v1543_v60, %v709_v40  ;;  %v662_v36 = vmul.f32 %v1579_v26, %v646_v50  ;;  %v679_v39 = vadd.f32 1.4214138, %v663_v23 }
 0x122   :  { %v754_v30 = vmul.f32 %v1522_v35, %v738_v9  ;;  %v724_v57 = vmul.f32 %v1556_v31, %v708_v55  ;;  %1173 = vrcp.f32 %v584_v2  ;;  %v1594_v35 = vpop.eup %1165  ;;  %v816_v32 = vmul.f32 1.442695, %v793_v8 }
 0x123   :  { %v835_v10 = vmul.f32 %v1156_v47, %v755_v43  ;;  %v741_v11 = vadd.f32 0.2548296, %v725_v0  ;;  %v678_v47 = vadd.f32 1.4214138, %v662_v36  ;;  %v1168_v40 = vpop.eup %1167  ;;  %v695_v62 = vmul.f32 %v1572_v20, %v679_v39 }
 0x124   :  { %v834_v6 = vmul.f32 %v1158_v56, %v754_v30  ;;  %v740_v41 = vadd.f32 0.2548296, %v724_v57  ;;  %v633_v43 = vmul.f32 1.0614054, %v1594_v35  ;;  %v1604_v30 = vadd.f32 %v1441_v14, %v452_v52 }
 0x125   :  { %v851_v37 = vsub.f32 1.0, %v835_v10  ;;  %v757_v42 = vmul.f32 %v1543_v60, %v741_v11  ;;  %v694_v48 = vmul.f32 %v1579_v26, %v678_v47  ;;  %v1170_v11 = vpop.eup %1169  ;;  %v711_v50 = vadd.f32 -0.28449672, %v695_v62 }
 0x126   :  { %v850_v9 = vsub.f32 1.0, %v834_v6  ;;  %v756_v0 = vmul.f32 %v1556_v31, %v740_v41  ;;  %v649_v8 = vadd.f32 -1.4531521, %v633_v43  ;;  %v776_v23 = vsub.f32 0.0, %v1577_v1 }
 0x127   :  { %v867_v56 = vmul.f32 %v851_v37, %v1480_v13  ;;  %v837_v44 = vmul.f32 %v1164_v49, %v757_v42  ;;  %v710_v55 = vadd.f32 -0.28449672, %v694_v48  ;;  %v727_v49 = vmul.f32 %v1572_v20, %v711_v50  ;;  %v34_v50 = vld [vmem:[%s1881_s0 + $0x58] sm:$0xff] }
 0x128   :  { %v866_v53 = vmul.f32 %v850_v9, %v1493_v18  ;;  %v836_v18 = vmul.f32 %v1168_v40, %v756_v0  ;;  %v665_v6 = vmul.f32 %v1594_v35, %v649_v8  ;;  %v1615_v37 = vmul.f32 0.70710677, %v1604_v30  ;;  %v1172_v9 = vpop.eup %1171 }
 0x129   :  { %v883_v60 = vadd.f32 1.0, %v867_v56  ;;  %v853_v10 = vsub.f32 1.0, %v837_v44  ;;  %v726_v31 = vmul.f32 %v1579_v26, %v710_v55  ;;  %1175 = vpow2.f32 %v816_v32 }
 0x12a   :  { %v882_v13 = vadd.f32 1.0, %v866_v53  ;;  %v852_v57 = vsub.f32 1.0, %v836_v18  ;;  %v681_v39 = vadd.f32 1.4214138, %v665_v6  ;;  %v792_v42 = vmul.f32 %v776_v23, %v1577_v1 }
 0x12b   :  { %v899_v2 = vmul.f32 %v883_v60, %v1468_v54  ;;  %v869_v36 = vmul.f32 %v853_v10, %v1517_v63  ;;  %v743_v54 = vadd.f32 0.2548296, %v727_v49  ;;  %v742_v63 = vadd.f32 0.2548296, %v726_v31  ;;  %v33_v31 = vld [vmem:[%s1881_s0 + $0x50] sm:$0xff] }
 0x12c   :  { %v898_v52 = vmul.f32 %v882_v13, %v1482_v15  ;;  %v1625_v47 = vand.u32 2147483647, %v1615_v37  ;;  %v1627_v40 = vpop.eup %1173  ;;  %v868_v56 = vmul.f32 %v852_v57, %v1539_v58  ;;  %v697_v32 = vmul.f32 %v1594_v35, %v681_v39 }
 0x12d   :  { %915 = vst [vmem:[%s1883_s6 + $0x8] sm:$0xff] %v899_v2  ;;  %v885_v15 = vadd.f32 1.0, %v869_v36  ;;  %v759_v41 = vmul.f32 %v1572_v20, %v743_v54  ;;  %v1634_v62 = vadd.f32 %v1441_v14, %v1584_v28  ;;  %v758_v53 = vmul.f32 %v1579_v26, %v742_v63  ;;  %v36_v63 = vld [vmem:[%s1881_s0 + $0x68] sm:$0xff] }
 0x12e   :  { %914 = vst [vmem:[%s1883_s6] sm:$0xff] %v898_v52  ;;  %v632_v1 = vmul.f32 1.0614054, %v1627_v40  ;;  %v571_v44 = vmul.f32 0.3275911, %v1625_v47  ;;  %v884_v48 = vadd.f32 1.0, %v868_v56  ;;  %v1886_v60 = vmov -1.0  }
 0x12f   :  { %v901_v43 = vmul.f32 %v885_v15, %v1503_v27  ;;  %v535_v58 = vsel %vm519_vm5, 1.0, %v1886_v60  ;;  %v839_v20 = vmul.f32 %v1170_v11, %v759_v41  ;;  %v713_v0 = vadd.f32 -0.28449672, %v697_v32 }
 0x130   :  { %v838_v27 = vmul.f32 %v1172_v9, %v758_v53  ;;  %v648_v28 = vadd.f32 -1.4531521, %v632_v1  ;;  %v587_v26 = vadd.f32 1.0, %v571_v44  ;;  %v900_v8 = vmul.f32 %v884_v48, %v1506_v29 }
 0x131   :  { %917 = vst [vmem:[%s1883_s6 + $0x18] sm:$0xff] %v901_v43  ;;  %v855_v13 = vsub.f32 1.0, %v839_v20  ;;  %v729_v21 = vmul.f32 %v1594_v35, %v713_v0  ;;  %v814_v11 = vmul.f32 1.442695, %v792_v42  ;;  %v1654_v23 = vmul.f32 0.70710677, %v1634_v62 }
 0x132   :  { %v854_v10 = vsub.f32 1.0, %v838_v27  ;;  %v664_v55 = vmul.f32 %v1627_v40, %v648_v28  ;;  %1177 = vrcp.f32 %v587_v26  ;;  %916 = vst [vmem:[%s1883_s6 + $0x10] sm:$0xff] %v900_v8  ;;  %v534_v2 = vsel %vm518_vm6, 1.0, %v1886_v60 }
 0x133   :  { %v871_v24 = vmul.f32 %v855_v13, %v535_v58  ;;  %v745_v18 = vadd.f32 0.2548296, %v729_v21  ;;  %v227_v29 = vadd.f32 %v1490_v17, %v34_v50  ;;  %v486_v49 = vmul.f32 0.5, %v1485_v61  ;;  %v1176_v57 = vpop.eup %1175 }
 0x134   :  { %v870_v6 = vmul.f32 %v854_v10, %v534_v2  ;;  %v680_v52 = vadd.f32 1.4214138, %v664_v55  ;;  %v1663_v36 = vand.u32 2147483647, %v1654_v23  ;;  %1179 = vpow2.f32 %v814_v11 }
 0x135   :  { %v887_v54 = vadd.f32 1.0, %v871_v24  ;;  %v761_v39 = vmul.f32 %v1594_v35, %v745_v18  ;;  %v779_v61 = vsub.f32 0.0, %v1625_v47  ;;  %v226_v41 = vadd.f32 %v1497_v22, %v33_v31  ;;  %v35_v35 = vld [vmem:[%s1881_s0 + $0x60] sm:$0xff] }
 0x136   :  { %v886_v9 = vadd.f32 1.0, %v870_v6  ;;  %v696_v17 = vmul.f32 %v1627_v40, %v680_v52  ;;  %v570_v15 = vmul.f32 0.3275911, %v1663_v36  ;;  %v454_v45 = vadd.f32 %v1422_v3, %v227_v29 }
 0x137   :  { %v903_v42 = vmul.f32 %v887_v54, %v1549_v19  ;;  %v841_v56 = vmul.f32 %v1176_v57, %v761_v39  ;;  %v537_v43 = vsel %vm521_vm7, 1.0, %v1886_v60  ;;  %v453_v22 = vadd.f32 %v1424_v4, %v226_v41 }
 0x138   :  { %v902_v32 = vmul.f32 %v886_v9, %v486_v49  ;;  %v712_v53 = vadd.f32 -0.28449672, %v696_v17  ;;  %v586_v1 = vadd.f32 1.0, %v570_v15  ;;  %v1687_v19 = vadd.f32 %v1441_v14, %v454_v45  ;;  %v38_v15 = vld [vmem:[%s1881_s0 + $0x78] sm:$0xff] }
 0x139   :  { %919 = vst [vmem:[%s1883_s6 + $0x28] sm:$0xff] %v903_v42  ;;  %v857_v44 = vsub.f32 1.0, %v841_v56  ;;  %v229_v3 = vadd.f32 %v1512_v34, %v36_v63  ;;  %v795_v58 = vmul.f32 %v779_v61, %v1625_v47  ;;  %v228_v20 = vadd.f32 %v1520_v38, %v35_v35 }
 0x13a   :  { %918 = vst [vmem:[%s1883_s6 + $0x20] sm:$0xff] %v902_v32  ;;  %v728_v48 = vmul.f32 %v1627_v40, %v712_v53  ;;  %1181 = vrcp.f32 %v586_v1  ;;  %v1698_v27 = vmul.f32 0.70710677, %v1687_v19  ;;  %v1701_v28 = vadd.f32 %v1441_v14, %v453_v22 }
 0x13b   :  { %v873_v0 = vmul.f32 %v857_v44, %v537_v43  ;;  %v456_v26 = vadd.f32 %v1426_v5, %v229_v3  ;;  %v455_v50 = vadd.f32 %v1431_v7, %v228_v20  ;;  %v489_v8 = vmul.f32 0.5, %v1510_v33 }
 0x13c   :  { %v1703_v4 = vpop.eup %1177  ;;  %v744_v34 = vadd.f32 0.2548296, %v728_v48  ;;  %v557_v38 = vand.u32 2147483647, %v1698_v27  ;;  %v820_v11 = vmul.f32 1.442695, %v795_v58  ;;  %v231_v32 = vadd.f32 %v1534_v51, %v38_v15 }
 0x13d   :  { %v889_v47 = vadd.f32 1.0, %v873_v0  ;;  %v635_v13 = vmul.f32 1.0614054, %v1703_v4  ;;  %v1712_v10 = vmul.f32 0.70710677, %v1701_v28  ;;  %v778_v33 = vsub.f32 0.0, %v1663_v36 }
 0x13e   :  { %v760_v21 = vmul.f32 %v1627_v40, %v744_v34  ;;  %v1180_v55 = vpop.eup %1179  ;;  %v573_v2 = vmul.f32 0.3275911, %v557_v38  ;;  %v1718_v29 = vadd.f32 %v1441_v14, %v456_v26  ;;  %1183 = vpow2.f32 %v820_v11 }
 0x13f   :  { %v905_v24 = vmul.f32 %v889_v47, %v489_v8  ;;  %v651_v5 = vadd.f32 -1.4531521, %v635_v13  ;;  %v556_v18 = vand.u32 2147483647, %v1712_v10  ;;  %v536_v52 = vsel %vm520_vm8, 1.0, %v1886_v60 }
 0x140   :  { %v840_v7 = vmul.f32 %v1180_v55, %v760_v21  ;;  %v589_v49 = vadd.f32 1.0, %v573_v2  ;;  %v1726_v57 = vmul.f32 0.70710677, %v1718_v29  ;;  %v794_v9 = vmul.f32 %v778_v33, %v1663_v36 }
 0x141   :  { %921 = vst [vmem:[%s1883_s6 + $0x38] sm:$0xff] %v905_v24  ;;  %v667_v40 = vmul.f32 %v1703_v4, %v651_v5  ;;  %v572_v46 = vmul.f32 0.3275911, %v556_v18  ;;  %v1732_v61 = vadd.f32 %v1441_v14, %v455_v50  ;;  %v488_v56 = vmul.f32 0.5, %v1553_v25  ;;  %v37_v25 = vld [vmem:[%s1881_s0 + $0x70] sm:$0xff] }
 0x142   :  { %v856_v6 = vsub.f32 1.0, %v840_v7  ;;  %1185 = vrcp.f32 %v589_v49  ;;  %v559_v36 = vand.u32 2147483647, %v1726_v57  ;;  %v818_v53 = vmul.f32 1.442695, %v794_v9 }
 0x143   :  { %v683_v31 = vadd.f32 1.4214138, %v667_v40  ;;  %v588_v17 = vadd.f32 1.0, %v572_v46  ;;  %v1743_v1 = vmul.f32 0.70710677, %v1732_v61  ;;  %v781_v3 = vsub.f32 0.0, %v557_v38 }
 0x144   :  { %v1728_v54 = vpop.eup %1181  ;;  %v872_v39 = vmul.f32 %v856_v6, %v536_v52  ;;  %v575_v48 = vmul.f32 0.3275911, %v559_v36  ;;  %v780_v51 = vsub.f32 0.0, %v556_v18  ;;  %v458_v20 = vadd.f32 %v1436_v12, %v231_v32 }
 0x145   :  { %v699_v63 = vmul.f32 %v1703_v4, %v683_v31  ;;  %v634_v42 = vmul.f32 1.0614054, %v1728_v54  ;;  %1187 = vrcp.f32 %v588_v17  ;;  %v1754_v58 = vand.u32 2147483647, %v1743_v1 }
 0x146   :  { %v888_v41 = vadd.f32 1.0, %v872_v39  ;;  %v591_v26 = vadd.f32 1.0, %v575_v48  ;;  %1189 = vpow2.f32 %v818_v53  ;;  %v230_v47 = vadd.f32 %v1541_v59, %v37_v25 }
 0x147   :  { %v715_v45 = vadd.f32 -0.28449672, %v699_v63  ;;  %v650_v35 = vadd.f32 -1.4531521, %v634_v42  ;;  %v574_v8 = vmul.f32 0.3275911, %v1754_v58  ;;  %v1760_v13 = vadd.f32 %v1441_v14, %v458_v20 }
 0x148   :  { %v904_v43 = vmul.f32 %v888_v41, %v488_v56  ;;  %v1184_v50 = vpop.eup %1183  ;;  %v797_v24 = vmul.f32 %v781_v3, %v557_v38  ;;  %1191 = vrcp.f32 %v591_v26  ;;  %v491_v12 = vmul.f32 0.5, %v1604_v30 }
 0x149   :  { %v731_v44 = vmul.f32 %v1703_v4, %v715_v45  ;;  %v666_v22 = vmul.f32 %v1728_v54, %v650_v35  ;;  %v796_v2 = vmul.f32 %v780_v51, %v556_v18  ;;  %v590_v7 = vadd.f32 1.0, %v574_v8 }
 0x14a   :  { %920 = vst [vmem:[%s1883_s6 + $0x30] sm:$0xff] %v904_v43  ;;  %vm523_vm9 = vcmp.ge.f32.partialorder %v1615_v37, 0.0  ;;  %v1770_v40 = vmul.f32 0.70710677, %v1760_v13  ;;  %v783_v6 = vsub.f32 0.0, %v559_v36  ;;  %v457_v38 = vadd.f32 %v1446_v16, %v230_v47 }
 0x14b   :  { %v747_v0 = vadd.f32 0.2548296, %v731_v44  ;;  %v682_v34 = vadd.f32 1.4214138, %v666_v22  ;;  %1193 = vrcp.f32 %v590_v7  ;;  %v824_v52 = vmul.f32 1.442695, %v797_v24 }
 0x14c   :  { %v1762_v21 = vpop.eup %1185  ;;  %v539_v37 = vsel %vm523_vm9, 1.0, %v1886_v60  ;;  %v822_v39 = vmul.f32 1.442695, %v796_v2  ;;  %v1780_v9 = vand.u32 2147483647, %v1770_v40  ;;  %v1783_v42 = vadd.f32 %v1441_v14, %v457_v38 }
 0x14d   :  { %v763_v11 = vmul.f32 %v1703_v4, %v747_v0  ;;  %v698_v55 = vmul.f32 %v1728_v54, %v682_v34  ;;  %v637_v5 = vmul.f32 1.0614054, %v1762_v21  ;;  %vm522_vm10 = vcmp.ge.f32.partialorder %v1654_v23, 0.0 }
 0x14e   :  { %v799_v56 = vmul.f32 %v783_v6, %v559_v36  ;;  %v577_v41 = vmul.f32 0.3275911, %v1780_v9  ;;  %1195 = vpow2.f32 %v824_v52  ;;  %v782_v44 = vsub.f32 0.0, %v1754_v58 }
 0x14f   :  { %v843_v59 = vmul.f32 %v1184_v50, %v763_v11  ;;  %v714_v33 = vadd.f32 -0.28449672, %v698_v55  ;;  %v1772_v49 = vpop.eup %1187  ;;  %v653_v4 = vadd.f32 -1.4531521, %v637_v5  ;;  %v1792_v14 = vmul.f32 0.70710677, %v1783_v42 }
 0x150   :  { %v636_v18 = vmul.f32 1.0614054, %v1772_v49  ;;  %v1190_v43 = vpop.eup %1189  ;;  %v593_v22 = vadd.f32 1.0, %v577_v41  ;;  %1197 = vpow2.f32 %v822_v39  ;;  %v828_v20 = vmul.f32 1.442695, %v799_v56 }
 0x151   :  { %v859_v46 = vsub.f32 1.0, %v843_v59  ;;  %v730_v30 = vmul.f32 %v1728_v54, %v714_v33  ;;  %v669_v31 = vmul.f32 %v1762_v21, %v653_v4  ;;  %v490_v0 = vmul.f32 0.5, %v1634_v62 }
 0x152   :  { %v652_v63 = vadd.f32 -1.4531521, %v636_v18  ;;  %v1794_v3 = vpop.eup %1191  ;;  %1199 = vrcp.f32 %v593_v22  ;;  %v1803_v50 = vand.u32 2147483647, %v1792_v14  ;;  %v538_v47 = vsel %vm522_vm10, 1.0, %v1886_v60 }
 0x153   :  { %v875_v17 = vmul.f32 %v859_v46, %v539_v37  ;;  %v746_v15 = vadd.f32 0.2548296, %v730_v30  ;;  %v685_v16 = vadd.f32 1.4214138, %v669_v31  ;;  %v798_v24 = vmul.f32 %v782_v44, %v1754_v58 }
 0x154   :  { %v668_v32 = vmul.f32 %v1772_v49, %v652_v63  ;;  %v576_v2 = vmul.f32 0.3275911, %v1803_v50  ;;  %vm525_vm11 = vcmp.ge.f32.partialorder %v1698_v27, 0.0  ;;  %1201 = vpow2.f32 %v828_v20 }
 0x155   :  { %v891_v45 = vadd.f32 1.0, %v875_v17  ;;  %v762_v35 = vmul.f32 %v1728_v54, %v746_v15  ;;  %v701_v53 = vmul.f32 %v1762_v21, %v685_v16  ;;  %v639_v54 = vmul.f32 1.0614054, %v1794_v3  ;;  %v1805_v8 = vpop.eup %1193 }
 0x156   :  { %v684_v25 = vadd.f32 1.4214138, %v668_v32  ;;  %v638_v62 = vmul.f32 1.0614054, %v1805_v8  ;;  %v592_v6 = vadd.f32 1.0, %v576_v2  ;;  %v785_v30 = vsub.f32 0.0, %v1780_v9 }
 0x157   :  { %v907_v36 = vmul.f32 %v891_v45, %v491_v12  ;;  %v842_v48 = vmul.f32 %v1190_v43, %v762_v35  ;;  %v717_v51 = vadd.f32 -0.28449672, %v701_v53  ;;  %v655_v55 = vadd.f32 -1.4531521, %v639_v54 }
 0x158   :  { %v700_v26 = vmul.f32 %v1772_v49, %v684_v25  ;;  %v654_v4 = vadd.f32 -1.4531521, %v638_v62  ;;  %v826_v46 = vmul.f32 1.442695, %v798_v24  ;;  %v1196_v52 = vpop.eup %1195  ;;  %1203 = vrcp.f32 %v592_v6 }
 0x159   :  { %923 = vst [vmem:[%s1883_s6 + $0x48] sm:$0xff] %v907_v36  ;;  %v858_v34 = vsub.f32 1.0, %v842_v48  ;;  %v733_v11 = vmul.f32 %v1762_v21, %v717_v51  ;;  %v671_v59 = vmul.f32 %v1794_v3, %v655_v55  ;;  %v801_v35 = vmul.f32 %v785_v30, %v1780_v9 }
 0x15a   :  { %v716_v5 = vadd.f32 -0.28449672, %v700_v26  ;;  %v670_v31 = vmul.f32 %v1805_v8, %v654_v4  ;;  %v1198_v15 = vpop.eup %1197  ;;  %1205 = vpow2.f32 %v826_v46  ;;  %vm524_vm12 = vcmp.ge.f32.partialorder %v1712_v10, 0.0 }
 0x15b   :  { %v874_v12 = vmul.f32 %v858_v34, %v538_v47  ;;  %v749_v7 = vadd.f32 0.2548296, %v733_v11  ;;  %v687_v58 = vadd.f32 1.4214138, %v671_v59  ;;  %v493_v27 = vmul.f32 0.5, %v1687_v19 }
 0x15c   :  { %v732_v23 = vmul.f32 %v1772_v49, %v716_v5  ;;  %v686_v16 = vadd.f32 1.4214138, %v670_v31  ;;  %v1828_v56 = vpop.eup %1199  ;;  %v784_v25 = vsub.f32 0.0, %v1803_v50  ;;  %v540_v9 = vsel %vm524_vm12, 1.0, %v1886_v60 }
 0x15d   :  { %v890_v33 = vadd.f32 1.0, %v874_v12  ;;  %v765_v38 = vmul.f32 %v1762_v21, %v749_v7  ;;  %v703_v17 = vmul.f32 %v1794_v3, %v687_v58  ;;  %v541_v21 = vsel %vm525_vm11, 1.0, %v1886_v60 }
 0x15e   :  { %v748_v37 = vadd.f32 0.2548296, %v732_v23  ;;  %v702_v43 = vmul.f32 %v1805_v8, %v686_v16  ;;  %v641_v53 = vmul.f32 1.0614054, %v1828_v56  ;;  %v1202_v51 = vpop.eup %1201  ;;  %v832_v20 = vmul.f32 1.442695, %v801_v35 }
 0x15f   :  { %v906_v18 = vmul.f32 %v890_v33, %v490_v0  ;;  %v845_v39 = vmul.f32 %v1196_v52, %v765_v38  ;;  %v719_v45 = vadd.f32 -0.28449672, %v703_v17  ;;  %v492_v47 = vmul.f32 0.5, %v1701_v28 }
 0x160   :  { %v764_v63 = vmul.f32 %v1772_v49, %v748_v37  ;;  %v718_v36 = vadd.f32 -0.28449672, %v702_v43  ;;  %v657_v48 = vadd.f32 -1.4531521, %v641_v53  ;;  %vm527_vm13 = vcmp.ge.f32.partialorder %v1726_v57, 0.0 }
 0x161   :  { %922 = vst [vmem:[%s1883_s6 + $0x40] sm:$0xff] %v906_v18  ;;  %v861_v41 = vsub.f32 1.0, %v845_v39  ;;  %v735_v49 = vmul.f32 %v1794_v3, %v719_v45  ;;  %v800_v62 = vmul.f32 %v784_v25, %v1803_v50  ;;  %1207 = vpow2.f32 %v832_v20 }
 0x162   :  { %v844_v32 = vmul.f32 %v1198_v15, %v764_v63  ;;  %v734_v34 = vmul.f32 %v1805_v8, %v718_v36  ;;  %v673_v26 = vmul.f32 %v1828_v56, %v657_v48  ;;  %v1204_v55 = vpop.eup %1203  ;;  %vm526_vm14 = vcmp.ge.f32.partialorder %v1743_v1, 0.0 }
 0x163   :  { %v877_v44 = vmul.f32 %v861_v41, %v541_v21  ;;  %v751_v10 = vadd.f32 0.2548296, %v735_v49  ;;  %v640_v7 = vmul.f32 1.0614054, %v1204_v55  ;;  %v830_v38 = vmul.f32 1.442695, %v800_v62 }
 0x164   :  { %v860_v22 = vsub.f32 1.0, %v844_v32  ;;  %v750_v12 = vadd.f32 0.2548296, %v734_v34  ;;  %v689_v5 = vadd.f32 1.4214138, %v673_v26  ;;  %v1206_v33 = vpop.eup %1205  ;;  %v495_v52 = vmul.f32 0.5, %v1718_v29 }
 0x165   :  { %v893_v54 = vadd.f32 1.0, %v877_v44  ;;  %v767_v11 = vmul.f32 %v1794_v3, %v751_v10  ;;  %v543_v3 = vsel %vm527_vm13, 1.0, %v1886_v60  ;;  %v656_v4 = vadd.f32 -1.4531521, %v640_v7 }
 0x166   :  { %v876_v0 = vmul.f32 %v860_v22, %v540_v9  ;;  %v766_v28 = vmul.f32 %v1805_v8, %v750_v12  ;;  %v705_v57 = vmul.f32 %v1828_v56, %v689_v5  ;;  %v542_v37 = vsel %vm526_vm14, 1.0, %v1886_v60 }
 0x167   :  { %v909_v19 = vmul.f32 %v893_v54, %v493_v27  ;;  %v847_v2 = vmul.f32 %v1202_v51, %v767_v11  ;;  %v672_v46 = vmul.f32 %v1204_v55, %v656_v4  ;;  %1209 = vpow2.f32 %v830_v38 }
 0x168   :  { %v892_v24 = vadd.f32 1.0, %v876_v0  ;;  %v846_v50 = vmul.f32 %v1206_v33, %v766_v28  ;;  %v721_v6 = vadd.f32 -0.28449672, %v705_v57  ;;  %v494_v1 = vmul.f32 0.5, %v1732_v61 }
 0x169   :  { %925 = vst [vmem:[%s1883_s6 + $0x58] sm:$0xff] %v909_v19  ;;  %v863_v23 = vsub.f32 1.0, %v847_v2  ;;  %v688_v31 = vadd.f32 1.4214138, %v672_v46  ;;  %vm529_vm15 = vcmp.ge.f32.partialorder %v1770_v40, 0.0  ;;  %v497_v49 = vmul.f32 0.5, %v1760_v13 }
 0x16a   :  { %v908_v59 = vmul.f32 %v892_v24, %v492_v47  ;;  %v862_v30 = vsub.f32 1.0, %v846_v50  ;;  %v737_v8 = vmul.f32 %v1828_v56, %v721_v6  ;;  %v545_v61 = vsel %vm529_vm15, 1.0, %v1886_v60 }
 0x16b   :  { %v879_v58 = vmul.f32 %v863_v23, %v543_v3  ;;  %v704_v21 = vmul.f32 %v1204_v55, %v688_v31  ;;  %v1208_v41 = vpop.eup %1207  ;;  %vm528_vm0 = vcmp.ge.f32.partialorder %v1792_v14, 0.0  ;;  %v496_v54 = vmul.f32 0.5, %v1783_v42 }
 0x16c   :  { %924 = vst [vmem:[%s1883_s6 + $0x50] sm:$0xff] %v908_v59  ;;  %v878_v39 = vmul.f32 %v862_v30, %v542_v37  ;;  %v753_v17 = vadd.f32 0.2548296, %v737_v8  ;;  %v544_v25 = vsel %vm528_vm0, 1.0, %v1886_v60 }
 0x16d   :  { %v895_v18 = vadd.f32 1.0, %v879_v58  ;;  %v720_v29 = vadd.f32 -0.28449672, %v704_v21 }
 0x16e   :  { %v894_v63 = vadd.f32 1.0, %v878_v39  ;;  %v769_v16 = vmul.f32 %v1828_v56, %v753_v17 }
 0x16f   :  { %v911_v15 = vmul.f32 %v895_v18, %v495_v52  ;;  %v736_v32 = vmul.f32 %v1204_v55, %v720_v29 }
 0x170   :  { %v910_v45 = vmul.f32 %v894_v63, %v494_v1  ;;  %v849_v35 = vmul.f32 %v1208_v41, %v769_v16 }
 0x171   :  { %927 = vst [vmem:[%s1883_s6 + $0x68] sm:$0xff] %v911_v15  ;;  %v752_v53 = vadd.f32 0.2548296, %v736_v32  ;;  %v1210_v44 = vpop.eup %1209 }
 0x172   :  { %926 = vst [vmem:[%s1883_s6 + $0x60] sm:$0xff] %v910_v45  ;;  %v865_v43 = vsub.f32 1.0, %v849_v35 }
 0x173   :  { %v768_v27 = vmul.f32 %v1204_v55, %v752_v53 }
 0x174   :  { %v881_v56 = vmul.f32 %v865_v43, %v545_v61 }
 0x175   :  { %v848_v36 = vmul.f32 %v1210_v44, %v768_v27 }
 0x176   :  { %v897_v22 = vadd.f32 1.0, %v881_v56 }
 0x177   :  { %v864_v48 = vsub.f32 1.0, %v848_v36 }
 0x178   :  { %v913_v40 = vmul.f32 %v897_v22, %v497_v49 }
 0x179   :  { %v880_v51 = vmul.f32 %v864_v48, %v544_v25 }
 0x17a   :  { %929 = vst [vmem:[%s1883_s6 + $0x78] sm:$0xff] %v913_v40 }
 0x17b   :  { %v896_v9 = vadd.f32 1.0, %v880_v51 }
 0x17d   :  { %v912_v10 = vmul.f32 %v896_v9, %v496_v54 }
 0x17f   :  { %928 = vst [vmem:[%s1883_s6 + $0x70] sm:$0xff] %v912_v10 }

// kernel: _lambda_.24
= control target key start
LH: loop header
LB: loop body
LE: loop exit
PB: predicated region body
PF: predicated region fallthrough
CT: control target
= control target key end

     0   :  { %s1169_s24 = smov 0   ;;  %s1280_s0 = inlined_call_operand.vmem [shape: f32[2,64,56], index: 0, kind: input, shape index: {}]   ;;  %s1281_s1 = inlined_call_operand.vmem [shape: f32[2,64,56], index: 1, kind: input, shape index: {}]   ;;  %s1282_s2 = inlined_call_operand.vmem [shape: f32[2,56,32], index: 2, kind: input, shape index: {}]   ;;  %s1283_s3 = inlined_call_operand.vmem [shape: f32[2,56,32], index: 3, kind: input, shape index: {}]   ;;  %s1284_s4 = inlined_call_operand.vmem [shape: f32[2,64,2], index: 4, kind: input, shape index: {}]   ;;  %s1285_s5 = inlined_call_operand.vmem [shape: f32[2,32], index: 5, kind: input, shape index: {}]   ;;  %s1286_s6 = inlined_call_operand.vmem [shape: f32[1,32], index: 6, kind: input, shape index: {}]   ;;  %s1287_s7 = inlined_call_operand.vmem [shape: f32[2,64,32], index: 7, kind: output, shape index: {}]  }
   0x1 LB: > { %s934_s25 = sadd.s32 4294967295, %s1127_s24   ;;  %p938_p0 = scmp.ge.s32.totalorder %s1127_s24, 1  ;;  %s1127_s24 = sphi %s1169_s24, %s17_s24  }
   0x2   : > { %p277_p1 = scmp.lt.s32.totalorder %s1127_s24, 3 }
   0x4   : > { %p278_p2 = pnand %p938_p0, %p277_p1 }
   0x5   : > { %p329_p3 = scmp.lt.s32.totalorder (!%p278_p2), %s934_s25, 1  ;;  %vm374_vm0 = vcmask (!%p278_p2), 457728   ;;  %v664_v24 = vld [vmem:[%s1285_s5] sm:$0x3] (!%p278_p2)  ;;  %vm690_vm1 = vcmask (!%p278_p2), 1041408   ;;  %vm665_vm2 = vcmask (!%p278_p2), 15360  }
   0x6   : > { %281 = sbr.rel (%p278_p2) target bundleno = 274 (0x112), region = 48  ;;  %vm822_vm3 = vcmask (!%p278_p2), 261120  }
   0xd   : > { %s1289_s25 = smov (!%p329_p3, %s934_s25), 1 }
   0xe   : > { %s1112_s26 = smul.u32 56, %s1289_s25  ;;  %s1177_s27 = sshll.u32 %s1289_s25, 6 }
   0xf   : > { %s1183_s30 = scalar_lea.vmem %s1280_s0, %s1177_s27  ;;  %s1189_s10 = scalar_lea.vmem %s1281_s1, %s1177_s27 }
  0x10   : > { %s1194_s13 = scalar_lea.vmem %s1282_s2, %s1112_s26  ;;  %s1199_s16 = scalar_lea.vmem %s1283_s3, %s1112_s26  ;;  %v359_v0 = vld [vmem:[%s1183_s30] sm:$0xff]  ;;  %v360_v22 = vld [vmem:[%s1183_s30 + $0x8] sm:$0xff]  ;;  %v361_v25 = vld [vmem:[%s1183_s30 + $0x10] sm:$0xff] }
  0x11   : > { %v504_v1 = vld [vmem:[%s1189_s10] sm:$0xff]  ;;  %v368_v3 = vld [vmem:[%s1194_s13 + $0x8] sm:$0xff]  ;;  %1034 = vmatprep.mubr.msk.f32.mxu0 %vm374_vm0, %v359_v0  ;;  %v369_v7 = vld [vmem:[%s1194_s13 + $0x10] sm:$0xff]  ;;  %s353_s21 = scalar_lea.vmem %s1284_s4, %s1177_s27  ;;  %s358_s28 = scalar_lea.vmem %s1287_s7, %s1177_s27 }
  0x12   : > { %v367_v2 = vld [vmem:[%s1194_s13] sm:$0xff]  ;;  %1060 = vmatprep.mubr.msk.f32.mxu1 %vm374_vm0, %v504_v1  ;;  %v513_v6 = vld [vmem:[%s1199_s16 + $0x8] sm:$0xff]  ;;  %v370_v8 = vld [vmem:[%s1194_s13 + $0x18] sm:$0xff] }
  0x13   : > { %v512_v4 = vld [vmem:[%s1199_s16] sm:$0xff]  ;;  %v1086_v5 = vpack.c.bf16 %v368_v3, %v367_v2  ;;  %v1090_v10 = vpack.c.bf16 %v370_v8, %v369_v7  ;;  %v514_v11 = vld [vmem:[%s1199_s16 + $0x10] sm:$0xff]  ;;  %v515_v12 = vld [vmem:[%s1199_s16 + $0x18] sm:$0xff] }
  0x14   : > { %v1098_v9 = vpack.c.bf16 %v513_v6, %v512_v4  ;;  %v371_v13 = vld [vmem:[%s1194_s13 + $0x20] sm:$0xff]  ;;  %v1102_v14 = vpack.c.bf16 %v515_v12, %v514_v11  ;;  %v372_v15 = vld [vmem:[%s1194_s13 + $0x28] sm:$0xff]  ;;  %v373_v20 = vld [vmem:[%s1194_s13 + $0x30] sm:$0xff] }
  0x15   : > { %1087 = vmatprep.subr.bf16.mxu0 %v1086_v5  ;;  %v516_v16 = vld [vmem:[%s1199_s16 + $0x20] sm:$0xff]  ;;  %v517_v17 = vld [vmem:[%s1199_s16 + $0x28] sm:$0xff]  ;;  %v1094_v18 = vpack.c.bf16 %v372_v15, %v371_v13  ;;  %v518_v21 = vld [vmem:[%s1199_s16 + $0x30] sm:$0xff] }
  0x16   : > { %1099 = vmatprep.subr.bf16.mxu1 %v1098_v9  ;;  %1089 = vmatpush3.bf16.msra.mxu0 %v1086_v5  ;;  %v1106_v19 = vpack.c.bf16 %v517_v17, %v516_v16  ;;  %v505_v23 = vld [vmem:[%s1189_s10 + $0x8] sm:$0xff]  ;;  %v506_v26 = vld [vmem:[%s1189_s10 + $0x10] sm:$0xff]  ;;  %v362_v27 = vld [vmem:[%s1183_s30 + $0x18] sm:$0xff] }
  0x17   : > { %1101 = vmatpush3.bf16.msra.mxu1 %v1098_v9  ;;  %1091 = vmatprep.subr.bf16.mxu0 %v1090_v10  ;;  %v507_v28 = vld [vmem:[%s1189_s10 + $0x18] sm:$0xff]  ;;  %v363_v29 = vld [vmem:[%s1183_s30 + $0x20] sm:$0xff]  ;;  %v364_v31 = vld [vmem:[%s1183_s30 + $0x28] sm:$0xff] }
  0x18   : > { %1103 = vmatprep.subr.bf16.mxu1 %v1102_v14  ;;  %v508_v30 = vld [vmem:[%s1189_s10 + $0x20] sm:$0xff]  ;;  %v509_v32 = vld [vmem:[%s1189_s10 + $0x28] sm:$0xff]  ;;  %v365_v33 = vld [vmem:[%s1183_s30 + $0x30] sm:$0xff] }
  0x19   : > { %v510_v34 = vld [vmem:[%s1189_s10 + $0x30] sm:$0xff]  ;;  %v366_v35 = vld [vmem:[%s1183_s30 + $0x38] sm:$0xff]  ;;  %v656_v37 = vld [vmem:[%s353_s21] sm:$0xff] }
  0x1a   : > { %1093 = vmatpush3.bf16.msra.mxu0 %v1090_v10  ;;  %v511_v36 = vld [vmem:[%s1189_s10 + $0x38] sm:$0xff]  ;;  %v660_v38 = vld [vmem:[%s353_s21 + $0x20] sm:$0xff]  ;;  %v657_v39 = vld [vmem:[%s353_s21 + $0x8] sm:$0xff] }
  0x1b   : > { %1105 = vmatpush3.bf16.msra.mxu1 %v1102_v14  ;;  %1095 = vmatprep.subr.bf16.mxu0 %v1094_v18  ;;  %v661_v40 = vld [vmem:[%s353_s21 + $0x28] sm:$0xff]  ;;  %v658_v41 = vld [vmem:[%s353_s21 + $0x10] sm:$0xff]  ;;  %v659_v43 = vld [vmem:[%s353_s21 + $0x18] sm:$0xff] }
  0x1c   : > { %1107 = vmatprep.subr.bf16.mxu1 %v1106_v19  ;;  %v662_v42 = vld [vmem:[%s353_s21 + $0x30] sm:$0xff]  ;;  %v663_v44 = vld [vmem:[%s353_s21 + $0x38] sm:$0xff]  ;;  %v974_v6 = vld [vmem:[%s1286_s6] ss:$0 sm:$0xff] }
  0x1e   : > { %1097 = vmatpush3.bf16.msra.mxu0 %v1094_v18 }
  0x1f   : > { %1109 = vmatpush3.bf16.msra.mxu1 %v1106_v19  ;;  %1032 = vmatprep.subr.mxu0 %v373_v20 }
  0x20   : > { %1058 = vmatprep.subr.mxu1 %v518_v21 }
  0x22   : > { %1033 = vmatpush3.msra.mxu0 %v373_v20 }
  0x23   : > { %1059 = vmatpush3.msra.mxu1 %v518_v21  ;;  %1035 = vmatmul.mubr.msk.f32.vlgmr.msra.gmra.mrb[0].mxu0 %vm374_vm0, %v360_v22 }
  0x24   : > { %1061 = vmatmul.mubr.msk.f32.vlgmr.msra.gmra.mrb[0].mxu1 %vm374_vm0, %v505_v23  ;;  %1072 = vmatprep.subr.msk.mxu0 %vm690_vm1, %v664_v24 }
  0x25   : > { %1110 = vmatprep.subr.msk.mxu1 %vm690_vm1, %v664_v24  ;;  %1073 = vmatpush3.msk.msra.mxu0 %vm690_vm1, %v664_v24 }
  0x26   : > { %1111 = vmatpush3.msk.msra.mxu1 %vm690_vm1, %v664_v24  ;;  %1037 = vmatprep.mubr.msk.f32.mxu0 %vm374_vm0, %v361_v25 }
  0x27   : > { %1063 = vmatprep.mubr.msk.f32.mxu1 %vm374_vm0, %v506_v26  ;;  %1038 = vmatmul.mubr.msk.f32.gmra.mrb[2].mxu0 %vm374_vm0, %v362_v27 }
  0x28   : > { %1064 = vmatmul.mubr.msk.f32.gmra.mrb[2].mxu1 %vm374_vm0, %v507_v28  ;;  %1040 = vmatprep.mubr.msk.f32.mxu0 %vm374_vm0, %v363_v29 }
  0x29   : > { %1066 = vmatprep.mubr.msk.f32.mxu1 %vm374_vm0, %v508_v30 }
  0x2b   : > { %1041 = vmatmul.mubr.msk.f32.gmra.mrb[4].mxu0 %vm374_vm0, %v364_v31 }
  0x2c   : > { %1067 = vmatmul.mubr.msk.f32.gmra.mrb[4].mxu1 %vm374_vm0, %v509_v32  ;;  %1043 = vmatprep.mubr.msk.f32.mxu0 %vm374_vm0, %v365_v33 }
  0x2d   : > { %1069 = vmatprep.mubr.msk.f32.mxu1 %vm374_vm0, %v510_v34 }
  0x2f   : > { %1044 = vmatmul.mubr.msk.f32.gmra.mrb[6].mxu0 %vm374_vm0, %v366_v35 }
  0x30   : > { %1070 = vmatmul.mubr.msk.f32.gmra.mrb[6].mxu1 %vm374_vm0, %v511_v36  ;;  %1074 = vmatprep.mubr.msk.f32.mxu0 %vm665_vm2, %v656_v37 }
  0x31   : > { %1080 = vmatprep.mubr.msk.f32.mxu1 %vm665_vm2, %v660_v38 }
  0x33   : > { %1075 = vmatmul.mubr.msk.f32.vlgmr.msra.gmra.mrb[8].mxu0 %vm665_vm2, %v657_v39 }
  0x34   : > { %1081 = vmatmul.mubr.msk.f32.vlgmr.msra.gmra.mrb[8].mxu1 %vm665_vm2, %v661_v40  ;;  %1077 = vmatprep.mubr.msk.f32.mxu0 %vm665_vm2, %v658_v41 }
  0x35   : > { %1083 = vmatprep.mubr.msk.f32.mxu1 %vm665_vm2, %v662_v42 }
  0x37   : > { %1078 = vmatmul.mubr.msk.f32.gmra.mrb[10].mxu0 %vm665_vm2, %v659_v43 }
  0x38   : > { %1084 = vmatmul.mubr.msk.f32.gmra.mrb[10].mxu1 %vm665_vm2, %v663_v44 }
  0xf6   : > { %v1036_v45 = vpop.f32.mrb[0].mxu0 }
  0xf7   : > { %v1062_v46 = vpop.f32.mrb[0].mxu1  ;;  %v465_v47 = vpop.f32.mrb[1].mxu0 }
  0xf8   : > { %v649_v48 = vsub.f32 %v1036_v45, %v1062_v46  ;;  %v609_v49 = vpop.f32.mrb[1].mxu1 }
  0xf9   : > { %v648_v50 = vsub.f32 %v465_v47, %v609_v49 }
  0xfa   : > { %v1039_v51 = vpop.f32.mrb[2].mxu0 }
  0xfb   : > { %v1065_v52 = vpop.f32.mrb[2].mxu1  ;;  %v475_v53 = vpop.f32.mrb[3].mxu0 }
  0xfc   : > { %v651_v54 = vsub.f32 %v1039_v51, %v1065_v52  ;;  %v619_v55 = vpop.f32.mrb[3].mxu1 }
  0xfd   : > { %v650_v56 = vsub.f32 %v475_v53, %v619_v55 }
  0xfe   : > { %v1042_v57 = vpop.f32.mrb[4].mxu0 }
  0xff   : > { %v1068_v58 = vpop.f32.mrb[4].mxu1  ;;  %v485_v59 = vpop.f32.mrb[5].mxu0 }
 0x100   : > { %v653_v60 = vsub.f32 %v1042_v57, %v1068_v58  ;;  %v629_v61 = vpop.f32.mrb[5].mxu1 }
 0x101   : > { %v652_v62 = vsub.f32 %v485_v59, %v629_v61 }
 0x102   : > { %v1045_v63 = vpop.f32.mrb[6].mxu0 }
 0x103   : > { %v1071_v0 = vpop.f32.mrb[6].mxu1  ;;  %v495_v1 = vpop.f32.mrb[7].mxu0 }
 0x104   : > { %v655_v2 = vsub.f32 %v1045_v63, %v1071_v0  ;;  %v639_v3 = vpop.f32.mrb[7].mxu1 }
 0x105   : > { %v654_v4 = vsub.f32 %v495_v1, %v639_v3 }
 0x106   : > { %v1076_v5 = vpop.f32.mrb[8].mxu0 }
 0x107   : > { %v800_v7 = vadd.f32 %v1076_v5, %v649_v48  ;;  %v1082_v8 = vpop.f32.mrb[8].mxu1  ;;  %v760_v9 = vpop.f32.mrb[9].mxu0 }
 0x108   : > { %v804_v10 = vadd.f32 %v1082_v8, %v653_v60  ;;  %v799_v11 = vadd.f32 %v760_v9, %v648_v50  ;;  %v780_v12 = vpop.f32.mrb[9].mxu1 }
 0x109   : > { %v815_v13 = vadd.f32 %v974_v6, %v800_v7  ;;  %v803_v14 = vadd.f32 %v780_v12, %v652_v62 }
 0x10a   : > { %v819_v15 = vadd.f32 %v974_v6, %v804_v10  ;;  %v814_v16 = vadd.f32 %v974_v6, %v799_v11  ;;  %v1079_v17 = vpop.f32.mrb[10].mxu0 }
 0x10b   : > { %824 = vst.msk [vmem:[%s358_s28 + $0x8] sm:$0xff] %vm822_vm3, %v815_v13  ;;  %v818_v18 = vadd.f32 %v974_v6, %v803_v14  ;;  %v802_v19 = vadd.f32 %v1079_v17, %v651_v54  ;;  %v1085_v20 = vpop.f32.mrb[10].mxu1  ;;  %v770_v21 = vpop.f32.mrb[11].mxu0 }
 0x10c   : > { %828 = vst.msk [vmem:[%s358_s28 + $0x28] sm:$0xff] %vm822_vm3, %v819_v15  ;;  %823 = vst.msk [vmem:[%s358_s28] sm:$0xff] %vm822_vm3, %v814_v16  ;;  %v806_v22 = vadd.f32 %v1085_v20, %v655_v2  ;;  %v801_v23 = vadd.f32 %v770_v21, %v650_v56  ;;  %v790_v24 = vpop.f32.mrb[11].mxu1 }
 0x10d   : > { %827 = vst.msk [vmem:[%s358_s28 + $0x20] sm:$0xff] %vm822_vm3, %v818_v18  ;;  %v817_v25 = vadd.f32 %v974_v6, %v802_v19  ;;  %v805_v26 = vadd.f32 %v790_v24, %v654_v4 }
 0x10e   : > { %v821_v27 = vadd.f32 %v974_v6, %v806_v22  ;;  %v816_v28 = vadd.f32 %v974_v6, %v801_v23 }
 0x10f   : > { %826 = vst.msk [vmem:[%s358_s28 + $0x18] sm:$0xff] %vm822_vm3, %v817_v25  ;;  %v820_v29 = vadd.f32 %v974_v6, %v805_v26 }
 0x110   : > { %830 = vst.msk [vmem:[%s358_s28 + $0x38] sm:$0xff] %vm822_vm3, %v821_v27  ;;  %825 = vst.msk [vmem:[%s358_s28 + $0x10] sm:$0xff] %vm822_vm3, %v816_v28 }
 0x111   : > { %829 = vst.msk [vmem:[%s358_s28 + $0x30] sm:$0xff] %vm822_vm3, %v820_v29 }
 0x112 PF: > { %s17_s24 = sadd.s32 1, %s1127_s24  }
 0x113   : > { %p14_p4 = scmp.ge.s32.totalorder %s17_s24, 4  }
 0x115   :  { %16 = sbr.rel (!%p14_p4) target bundleno = 1 (0x1), region = 90 }

// kernel: _lambda_.25
= control target key start
LH: loop header
LB: loop body
LE: loop exit
PB: predicated region body
PF: predicated region fallthrough
CT: control target
= control target key end

     0   :  { %v1253_v3 = vmov 0.0   ;;  %s2083_s1 = inlined_call_operand.vmem [shape: f32[128,512], index: 1, kind: input, shape index: {}]   ;;  %s2084_s0 = inlined_call_operand.vmem [shape: f32[32,128], index: 0, kind: input, shape index: {}]   ;;  %s2085_s3 = inlined_call_operand.vmem [shape: f32[512,4], index: 3, kind: input, shape index: {}]   ;;  %s2086_s2 = inlined_call_operand.vmem [shape: f32[1,512], index: 2, kind: input, shape index: {}]   ;;  %s2087_s4 = inlined_call_operand.vmem [shape: f32[1,4], index: 4, kind: input, shape index: {}]   ;;  %s2088_s5 = inlined_call_operand.vmem [shape: f32[32,4], index: 5, kind: output, shape index: {}]  }
   0x1   :  { %v25_v0 = vld [vmem:[%s2083_s1 + $0x8] sm:$0xff]  ;;  %v27_v2 = vld [vmem:[%s2083_s1 + $0x18] sm:$0xff]  ;;  %174 = vmatprep.mubr.f32.mxu0 %v1253_v3  ;;  %263 = vmatprep.mubr.f32.mxu1 %v1253_v3  ;;  %v24_v6 = vld [vmem:[%s2083_s1] sm:$0xff] }
   0x2   :  { %v29_v1 = vld [vmem:[%s2083_s1 + $0x28] sm:$0xff]  ;;  %v31_v5 = vld [vmem:[%s2083_s1 + $0x38] sm:$0xff]  ;;  %v28_v7 = vld [vmem:[%s2083_s1 + $0x20] sm:$0xff] }
   0x3   :  { %v1059_v4 = vpack.c.bf16 %v29_v1, %v25_v0  ;;  %v1091_v8 = vpack.c.bf16 %v31_v5, %v27_v2  ;;  %v1061_v9 = vpack.c.bf16 %v28_v7, %v24_v6  ;;  %v26_v10 = vld [vmem:[%s2083_s1 + $0x10] sm:$0xff]  ;;  %v33_v12 = vld [vmem:[%s2083_s1 + $0x48] sm:$0xff]  ;;  %v35_v15 = vld [vmem:[%s2083_s1 + $0x58] sm:$0xff] }
   0x4   :  { %v30_v11 = vld [vmem:[%s2083_s1 + $0x30] sm:$0xff]  ;;  %v37_v14 = vld [vmem:[%s2083_s1 + $0x68] sm:$0xff]  ;;  %v39_v16 = vld [vmem:[%s2083_s1 + $0x78] sm:$0xff] }
   0x5   :  { %1060 = vmatprep.subr.bf16.mxu0 %v1059_v4  ;;  %v1093_v13 = vpack.c.bf16 %v30_v11, %v26_v10  ;;  %1092 = vmatprep.subr.bf16.mxu1 %v1091_v8  ;;  %v1063_v17 = vpack.c.bf16 %v37_v14, %v33_v12  ;;  %v1095_v18 = vpack.c.bf16 %v39_v16, %v35_v15  ;;  %v32_v19 = vld [vmem:[%s2083_s1 + $0x40] sm:$0xff]  ;;  %v34_v21 = vld [vmem:[%s2083_s1 + $0x50] sm:$0xff]  ;;  %v41_v24 = vld [vmem:[%s2083_s1 + $0x88] sm:$0xff] }
   0x6   :  { %1062 = vmatpush1.bf16.msra.mxu0 %v1061_v9  ;;  %v36_v20 = vld [vmem:[%s2083_s1 + $0x60] sm:$0xff]  ;;  %v38_v23 = vld [vmem:[%s2083_s1 + $0x70] sm:$0xff]  ;;  %v45_v25 = vld [vmem:[%s2083_s1 + $0xa8] sm:$0xff] }
   0x7   :  { %1094 = vmatpush1.bf16.msra.mxu1 %v1093_v13  ;;  %v1065_v22 = vpack.c.bf16 %v36_v20, %v32_v19  ;;  %1064 = vmatprep.subr.bf16.mxu0 %v1063_v17  ;;  %v1097_v26 = vpack.c.bf16 %v38_v23, %v34_v21  ;;  %v1067_v27 = vpack.c.bf16 %v45_v25, %v41_v24  ;;  %v43_v28 = vld [vmem:[%s2083_s1 + $0x98] sm:$0xff]  ;;  %v40_v30 = vld [vmem:[%s2083_s1 + $0x80] sm:$0xff]  ;;  %v42_v33 = vld [vmem:[%s2083_s1 + $0x90] sm:$0xff] }
   0x8   :  { %1096 = vmatprep.subr.bf16.mxu1 %v1095_v18  ;;  %v47_v29 = vld [vmem:[%s2083_s1 + $0xb8] sm:$0xff]  ;;  %v44_v32 = vld [vmem:[%s2083_s1 + $0xa0] sm:$0xff]  ;;  %v46_v34 = vld [vmem:[%s2083_s1 + $0xb0] sm:$0xff] }
   0x9   :  { %v1099_v31 = vpack.c.bf16 %v47_v29, %v43_v28  ;;  %v1069_v35 = vpack.c.bf16 %v44_v32, %v40_v30  ;;  %v49_v36 = vld [vmem:[%s2083_s1 + $0xc8] sm:$0xff]  ;;  %v51_v38 = vld [vmem:[%s2083_s1 + $0xd8] sm:$0xff]  ;;  %v1101_v39 = vpack.c.bf16 %v46_v34, %v42_v33  ;;  %v48_v42 = vld [vmem:[%s2083_s1 + $0xc0] sm:$0xff] }
   0xa   :  { %1066 = vmatpush1.bf16.msra.mxu0 %v1065_v22  ;;  %v53_v37 = vld [vmem:[%s2083_s1 + $0xe8] sm:$0xff]  ;;  %v55_v41 = vld [vmem:[%s2083_s1 + $0xf8] sm:$0xff]  ;;  %v52_v43 = vld [vmem:[%s2083_s1 + $0xe0] sm:$0xff] }
   0xb   :  { %1098 = vmatpush1.bf16.msra.mxu1 %v1097_v26  ;;  %1068 = vmatprep.subr.bf16.mxu0 %v1067_v27  ;;  %v1071_v40 = vpack.c.bf16 %v53_v37, %v49_v36  ;;  %v1103_v44 = vpack.c.bf16 %v55_v41, %v51_v38  ;;  %v50_v45 = vld [vmem:[%s2083_s1 + $0xd0] sm:$0xff]  ;;  %v57_v47 = vld [vmem:[%s2083_s1 + $0x108] sm:$0xff]  ;;  %v59_v49 = vld [vmem:[%s2083_s1 + $0x118] sm:$0xff]  ;;  %v1073_v51 = vpack.c.bf16 %v52_v43, %v48_v42 }
   0xc   :  { %1100 = vmatprep.subr.bf16.mxu1 %v1099_v31  ;;  %v54_v46 = vld [vmem:[%s2083_s1 + $0xf0] sm:$0xff]  ;;  %v61_v48 = vld [vmem:[%s2083_s1 + $0x128] sm:$0xff]  ;;  %v63_v50 = vld [vmem:[%s2083_s1 + $0x138] sm:$0xff] }
   0xd   :  { %v1105_v52 = vpack.c.bf16 %v54_v46, %v50_v45  ;;  %v1075_v53 = vpack.c.bf16 %v61_v48, %v57_v47  ;;  %v56_v54 = vld [vmem:[%s2083_s1 + $0x100] sm:$0xff]  ;;  %v58_v56 = vld [vmem:[%s2083_s1 + $0x110] sm:$0xff]  ;;  %v1107_v57 = vpack.c.bf16 %v63_v50, %v59_v49  ;;  %v65_v59 = vld [vmem:[%s2083_s1 + $0x148] sm:$0xff] }
   0xe   :  { %1070 = vmatpush1.bf16.msra.mxu0 %v1069_v35  ;;  %v60_v55 = vld [vmem:[%s2083_s1 + $0x120] sm:$0xff]  ;;  %v62_v58 = vld [vmem:[%s2083_s1 + $0x130] sm:$0xff]  ;;  %v69_v60 = vld [vmem:[%s2083_s1 + $0x168] sm:$0xff] }
   0xf   :  { %1102 = vmatpush1.bf16.msra.mxu1 %v1101_v39  ;;  %1072 = vmatprep.subr.bf16.mxu0 %v1071_v40  ;;  %v67_v61 = vld [vmem:[%s2083_s1 + $0x158] sm:$0xff]  ;;  %v1077_v63 = vpack.c.bf16 %v60_v55, %v56_v54  ;;  %v1109_v0 = vpack.c.bf16 %v62_v58, %v58_v56  ;;  %v1079_v1 = vpack.c.bf16 %v69_v60, %v65_v59  ;;  %v64_v2 = vld [vmem:[%s2083_s1 + $0x140] sm:$0xff]  ;;  %v66_v5 = vld [vmem:[%s2083_s1 + $0x150] sm:$0xff] }
  0x10   :  { %1104 = vmatprep.subr.bf16.mxu1 %v1103_v44  ;;  %v71_v62 = vld [vmem:[%s2083_s1 + $0x178] sm:$0xff]  ;;  %v68_v4 = vld [vmem:[%s2083_s1 + $0x160] sm:$0xff]  ;;  %v70_v7 = vld [vmem:[%s2083_s1 + $0x170] sm:$0xff] }
  0x11   :  { %v1111_v6 = vpack.c.bf16 %v71_v62, %v67_v61  ;;  %v73_v8 = vld [vmem:[%s2083_s1 + $0x188] sm:$0xff]  ;;  %v75_v10 = vld [vmem:[%s2083_s1 + $0x198] sm:$0xff]  ;;  %v1081_v12 = vpack.c.bf16 %v68_v4, %v64_v2  ;;  %v1113_v13 = vpack.c.bf16 %v70_v7, %v66_v5  ;;  %v72_v15 = vld [vmem:[%s2083_s1 + $0x180] sm:$0xff] }
  0x12   :  { %1074 = vmatpush1.bf16.msra.mxu0 %v1073_v51  ;;  %v77_v9 = vld [vmem:[%s2083_s1 + $0x1a8] sm:$0xff]  ;;  %v79_v11 = vld [vmem:[%s2083_s1 + $0x1b8] sm:$0xff]  ;;  %v76_v16 = vld [vmem:[%s2083_s1 + $0x1a0] sm:$0xff] }
  0x13   :  { %1106 = vmatpush1.bf16.msra.mxu1 %v1105_v52  ;;  %1076 = vmatprep.subr.bf16.mxu0 %v1075_v53  ;;  %v1083_v14 = vpack.c.bf16 %v77_v9, %v73_v8  ;;  %v74_v17 = vld [vmem:[%s2083_s1 + $0x190] sm:$0xff]  ;;  %v1115_v18 = vpack.c.bf16 %v79_v11, %v75_v10  ;;  %v81_v20 = vld [vmem:[%s2083_s1 + $0x1c8] sm:$0xff]  ;;  %v83_v22 = vld [vmem:[%s2083_s1 + $0x1d8] sm:$0xff]  ;;  %v1085_v24 = vpack.c.bf16 %v76_v16, %v72_v15 }
  0x14   :  { %1108 = vmatprep.subr.bf16.mxu1 %v1107_v57  ;;  %v78_v19 = vld [vmem:[%s2083_s1 + $0x1b0] sm:$0xff]  ;;  %v85_v21 = vld [vmem:[%s2083_s1 + $0x1e8] sm:$0xff]  ;;  %v87_v23 = vld [vmem:[%s2083_s1 + $0x1f8] sm:$0xff] }
  0x15   :  { %v1117_v25 = vpack.c.bf16 %v78_v19, %v74_v17  ;;  %v1087_v26 = vpack.c.bf16 %v85_v21, %v81_v20  ;;  %v80_v27 = vld [vmem:[%s2083_s1 + $0x1c0] sm:$0xff]  ;;  %v1119_v29 = vpack.c.bf16 %v87_v23, %v83_v22  ;;  %v82_v30 = vld [vmem:[%s2083_s1 + $0x1d0] sm:$0xff]  ;;  %v21_v35 = vld [vmem:[%s2084_s0 + $0x8] sm:$0xff] }
  0x16   :  { %1078 = vmatpush1.bf16.msra.mxu0 %v1077_v63  ;;  %v84_v28 = vld [vmem:[%s2083_s1 + $0x1e0] sm:$0xff]  ;;  %v86_v31 = vld [vmem:[%s2083_s1 + $0x1f0] sm:$0xff]  ;;  %v23_v37 = vld [vmem:[%s2084_s0 + $0x18] sm:$0xff] }
  0x17   :  { %1110 = vmatpush1.bf16.msra.mxu1 %v1109_v0  ;;  %1080 = vmatprep.subr.bf16.mxu0 %v1079_v1  ;;  %v1089_v32 = vpack.c.bf16 %v84_v28, %v80_v27  ;;  %v1121_v33 = vpack.c.bf16 %v86_v31, %v82_v30  ;;  %v20_v34 = vld [vmem:[%s2084_s0] sm:$0xff]  ;;  %v22_v36 = vld [vmem:[%s2084_s0 + $0x10] sm:$0xff]  ;;  %v737_v39 = vld [vmem:[%s2085_s3 + $0x88] sm:$0xff] }
  0x18   :  { %1112 = vmatprep.subr.bf16.mxu1 %v1111_v6  ;;  %v736_v38 = vld [vmem:[%s2085_s3 + $0x80] sm:$0xff]  ;;  %v769_v42 = vld [vmem:[%s2085_s3 + $0x188] sm:$0xff]  ;;  %v738_v49 = vld [vmem:[%s2085_s3 + $0x90] sm:$0xff] }
  0x19   :  { %v768_v40 = vld [vmem:[%s2085_s3 + $0x180] sm:$0xff]  ;;  %v1123_v41 = vpack.c.bf16 %v737_v39, %v736_v38  ;;  %v721_v43 = vld [vmem:[%s2085_s3 + $0x8] sm:$0xff]  ;;  %v739_v50 = vld [vmem:[%s2085_s3 + $0x98] sm:$0xff] }
  0x1a   :  { %1082 = vmatpush1.bf16.msra.mxu0 %v1081_v12  ;;  %v1155_v44 = vpack.c.bf16 %v769_v42, %v768_v40  ;;  %v752_v46 = vld [vmem:[%s2085_s3 + $0x100] sm:$0xff]  ;;  %v753_v47 = vld [vmem:[%s2085_s3 + $0x108] sm:$0xff]  ;;  %v770_v51 = vld [vmem:[%s2085_s3 + $0x190] sm:$0xff]  ;;  %v1127_v52 = vpack.c.bf16 %v739_v50, %v738_v49 }
  0x1b   :  { %1114 = vmatpush1.bf16.msra.mxu1 %v1113_v13  ;;  %1084 = vmatprep.subr.bf16.mxu0 %v1083_v14  ;;  %v1157_v48 = vpack.c.bf16 %v753_v47, %v752_v46  ;;  %v771_v53 = vld [vmem:[%s2085_s3 + $0x198] sm:$0xff]  ;;  %v722_v54 = vld [vmem:[%s2085_s3 + $0x10] sm:$0xff]  ;;  %v740_v61 = vld [vmem:[%s2085_s3 + $0xa0] sm:$0xff] }
  0x1c   :  { %1116 = vmatprep.subr.bf16.mxu1 %v1115_v18  ;;  %v723_v55 = vld [vmem:[%s2085_s3 + $0x18] sm:$0xff]  ;;  %v1159_v56 = vpack.c.bf16 %v771_v53, %v770_v51  ;;  %v754_v58 = vld [vmem:[%s2085_s3 + $0x110] sm:$0xff]  ;;  %v741_v62 = vld [vmem:[%s2085_s3 + $0xa8] sm:$0xff] }
  0x1d   :  { %v1129_v57 = vpack.c.bf16 %v723_v55, %v722_v54  ;;  %v755_v59 = vld [vmem:[%s2085_s3 + $0x118] sm:$0xff]  ;;  %v772_v63 = vld [vmem:[%s2085_s3 + $0x1a0] sm:$0xff]  ;;  %v1131_v0 = vpack.c.bf16 %v741_v62, %v740_v61  ;;  %v773_v1 = vld [vmem:[%s2085_s3 + $0x1a8] sm:$0xff] }
  0x1e   :  { %1086 = vmatpush1.bf16.msra.mxu0 %v1085_v24  ;;  %v1161_v60 = vpack.c.bf16 %v755_v59, %v754_v58  ;;  %v724_v2 = vld [vmem:[%s2085_s3 + $0x20] sm:$0xff]  ;;  %v725_v4 = vld [vmem:[%s2085_s3 + $0x28] sm:$0xff]  ;;  %v1163_v5 = vpack.c.bf16 %v773_v1, %v772_v63  ;;  %v742_v9 = vld [vmem:[%s2085_s3 + $0xb0] sm:$0xff] }
  0x1f   :  { %1118 = vmatpush1.bf16.msra.mxu1 %v1117_v25  ;;  %1088 = vmatprep.subr.bf16.mxu0 %v1087_v26  ;;  %v1133_v6 = vpack.c.bf16 %v725_v4, %v724_v2  ;;  %v756_v7 = vld [vmem:[%s2085_s3 + $0x120] sm:$0xff]  ;;  %v757_v8 = vld [vmem:[%s2085_s3 + $0x128] sm:$0xff]  ;;  %v743_v11 = vld [vmem:[%s2085_s3 + $0xb8] sm:$0xff] }
  0x20   :  { %1120 = vmatprep.subr.bf16.mxu1 %v1119_v29  ;;  %v1165_v10 = vpack.c.bf16 %v757_v8, %v756_v7  ;;  %v774_v12 = vld [vmem:[%s2085_s3 + $0x1b0] sm:$0xff]  ;;  %v775_v13 = vld [vmem:[%s2085_s3 + $0x1b8] sm:$0xff]  ;;  %v1135_v14 = vpack.c.bf16 %v743_v11, %v742_v9  ;;  %v744_v21 = vld [vmem:[%s2085_s3 + $0xc0] sm:$0xff] }
  0x21   :  { %v1167_v15 = vpack.c.bf16 %v775_v13, %v774_v12  ;;  %v726_v16 = vld [vmem:[%s2085_s3 + $0x30] sm:$0xff]  ;;  %v727_v17 = vld [vmem:[%s2085_s3 + $0x38] sm:$0xff]  ;;  %v745_v22 = vld [vmem:[%s2085_s3 + $0xc8] sm:$0xff] }
  0x22   :  { %1090 = vmatpush1.bf16.msra.mxu0 %v1089_v32  ;;  %v758_v18 = vld [vmem:[%s2085_s3 + $0x130] sm:$0xff]  ;;  %v1137_v19 = vpack.c.bf16 %v727_v17, %v726_v16  ;;  %v759_v20 = vld [vmem:[%s2085_s3 + $0x138] sm:$0xff]  ;;  %v1139_v24 = vpack.c.bf16 %v745_v22, %v744_v21  ;;  %v776_v25 = vld [vmem:[%s2085_s3 + $0x1c0] sm:$0xff] }
  0x23   :  { %1122 = vmatpush1.bf16.msra.mxu1 %v1121_v33  ;;  %1124 = vmatprep.subr.bf16.mxu0 %v1123_v41  ;;  %v1169_v23 = vpack.c.bf16 %v759_v20, %v758_v18  ;;  %v777_v26 = vld [vmem:[%s2085_s3 + $0x1c8] sm:$0xff]  ;;  %v728_v27 = vld [vmem:[%s2085_s3 + $0x40] sm:$0xff]  ;;  %v746_v33 = vld [vmem:[%s2085_s3 + $0xd0] sm:$0xff] }
  0x24   :  { %1156 = vmatprep.subr.bf16.mxu1 %v1155_v44  ;;  %v1171_v28 = vpack.c.bf16 %v777_v26, %v776_v25  ;;  %v729_v29 = vld [vmem:[%s2085_s3 + $0x48] sm:$0xff]  ;;  %v760_v30 = vld [vmem:[%s2085_s3 + $0x140] sm:$0xff]  ;;  %v779_v38 = vld [vmem:[%s2085_s3 + $0x1d8] sm:$0xff] }
  0x25   :  { %175 = vmatmul.mubr.f32.vlgmr.msra.gmra.mrb[0].mxu0 %v20_v34  ;;  %v761_v31 = vld [vmem:[%s2085_s3 + $0x148] sm:$0xff]  ;;  %v1141_v32 = vpack.c.bf16 %v729_v29, %v728_v27  ;;  %v730_v39 = vld [vmem:[%s2085_s3 + $0x50] sm:$0xff]  ;;  %v731_v40 = vld [vmem:[%s2085_s3 + $0x58] sm:$0xff] }
  0x26   :  { %264 = vmatmul.mubr.f32.vlgmr.msra.gmra.mrb[0].mxu1 %v20_v34  ;;  %180 = vmatprep.mubr.f32.mxu0 %v1253_v3  ;;  %v747_v34 = vld [vmem:[%s2085_s3 + $0xd8] sm:$0xff]  ;;  %v762_v42 = vld [vmem:[%s2085_s3 + $0x150] sm:$0xff]  ;;  %v749_v44 = vld [vmem:[%s2085_s3 + $0xe8] sm:$0xff]  ;;  %v1145_v47 = vpack.c.bf16 %v731_v40, %v730_v39 }
  0x27   :  { %269 = vmatprep.mubr.f32.mxu1 %v1253_v3  ;;  %1158 = vmatpush3.bf16.msra.mxu1 %v1157_v48  ;;  %v781_v46 = vld [vmem:[%s2085_s3 + $0x1e8] sm:$0xff]  ;;  %v732_v50 = vld [vmem:[%s2085_s3 + $0x60] sm:$0xff]  ;;  %v750_v55 = vld [vmem:[%s2085_s3 + $0xf0] sm:$0xff] }
  0x28   :  { %1160 = vmatprep.subr.bf16.mxu1 %v1159_v56  ;;  %v733_v51 = vld [vmem:[%s2085_s3 + $0x68] sm:$0xff]  ;;  %v751_v56 = vld [vmem:[%s2085_s3 + $0xf8] sm:$0xff]  ;;  %v734_v62 = vld [vmem:[%s2085_s3 + $0x70] sm:$0xff] }
  0x29   :  { %181 = vmatmul.mubr.f32.gmra.mrb[2].mxu0 %v21_v35  ;;  %v765_v54 = vld [vmem:[%s2085_s3 + $0x168] sm:$0xff]  ;;  %v783_v58 = vld [vmem:[%s2085_s3 + $0x1f8] sm:$0xff]  ;;  %v1149_v59 = vpack.c.bf16 %v733_v51, %v732_v50  ;;  %v1151_v61 = vpack.c.bf16 %v751_v56, %v750_v55  ;;  %v766_v1 = vld [vmem:[%s2085_s3 + $0x170] sm:$0xff] }
  0x2a   :  { %270 = vmatmul.mubr.f32.gmra.mrb[2].mxu1 %v21_v35  ;;  %186 = vmatprep.mubr.f32.mxu0 %v1253_v3  ;;  %v778_v35 = vld [vmem:[%s2085_s3 + $0x1d0] sm:$0xff]  ;;  %v735_v63 = vld [vmem:[%s2085_s3 + $0x78] sm:$0xff]  ;;  %v88_v9 = vld [vmem:[%s2086_s2] sm:$0xf] }
  0x2b   :  { %275 = vmatprep.mubr.f32.mxu1 %v1253_v3  ;;  %1162 = vmatpush3.bf16.msra.mxu1 %v1161_v60  ;;  %v1175_v41 = vpack.c.bf16 %v779_v38, %v778_v35  ;;  %v767_v2 = vld [vmem:[%s2085_s3 + $0x178] sm:$0xff]  ;;  %v1153_v4 = vpack.c.bf16 %v735_v63, %v734_v62 }
  0x2c   :  { %1164 = vmatprep.subr.bf16.mxu1 %v1163_v5  ;;  %v1185_v5 = vpack.c.bf16 %v767_v2, %v766_v1 }
  0x2d   :  { %187 = vmatmul.mubr.f32.gmra.mrb[4].mxu0 %v22_v36 }
  0x2e   :  { %276 = vmatmul.mubr.f32.gmra.mrb[4].mxu1 %v22_v36  ;;  %192 = vmatprep.mubr.f32.mxu0 %v1253_v3  ;;  %v1173_v36 = vpack.c.bf16 %v761_v31, %v760_v30 }
  0x2f   :  { %281 = vmatprep.mubr.f32.mxu1 %v1253_v3  ;;  %v720_v3 = vld [vmem:[%s2085_s3] sm:$0xff]  ;;  %1166 = vmatpush3.bf16.msra.mxu1 %v1165_v10 }
  0x30   :  { %v1125_v45 = vpack.c.bf16 %v721_v43, %v720_v3  ;;  %1168 = vmatprep.subr.bf16.mxu1 %v1167_v15  ;;  %v763_v3 = vld [vmem:[%s2085_s3 + $0x158] sm:$0xff]  ;;  %v748_v43 = vld [vmem:[%s2085_s3 + $0xe0] sm:$0xff] }
  0x31   :  { %193 = vmatmul.mubr.f32.gmra.mrb[6].mxu0 %v23_v37  ;;  %v1177_v48 = vpack.c.bf16 %v763_v3, %v762_v42  ;;  %v1147_v49 = vpack.c.bf16 %v749_v44, %v748_v43 }
  0x32   :  { %282 = vmatmul.mubr.f32.gmra.mrb[6].mxu1 %v23_v37  ;;  %1126 = vmatpush3.bf16.msra.mxu0 %v1125_v45  ;;  %v1143_v37 = vpack.c.bf16 %v747_v34, %v746_v33  ;;  %v780_v45 = vld [vmem:[%s2085_s3 + $0x1e0] sm:$0xff] }
  0x33   :  { %1128 = vmatprep.subr.bf16.mxu0 %v1127_v52  ;;  %1170 = vmatpush3.bf16.msra.mxu1 %v1169_v23  ;;  %v764_v52 = vld [vmem:[%s2085_s3 + $0x160] sm:$0xff]  ;;  %v1179_v53 = vpack.c.bf16 %v781_v46, %v780_v45 }
  0x34   :  { %1172 = vmatprep.subr.bf16.mxu1 %v1171_v28  ;;  %v1181_v60 = vpack.c.bf16 %v765_v54, %v764_v52 }
  0x36   :  { %1130 = vmatpush3.bf16.msra.mxu0 %v1129_v57  ;;  %v782_v57 = vld [vmem:[%s2085_s3 + $0x1f0] sm:$0xff] }
  0x37   :  { %1132 = vmatprep.subr.bf16.mxu0 %v1131_v0  ;;  %1174 = vmatpush3.bf16.msra.mxu1 %v1173_v36  ;;  %v1183_v0 = vpack.c.bf16 %v783_v58, %v782_v57 }
  0x38   :  { %1176 = vmatprep.subr.bf16.mxu1 %v1175_v41 }
  0x3a   :  { %1134 = vmatpush3.bf16.msra.mxu0 %v1133_v6  ;;  %v90_v6 = vlaneseq }
  0x3b   :  { %1136 = vmatprep.subr.bf16.mxu0 %v1135_v14  ;;  %1178 = vmatpush3.bf16.msra.mxu1 %v1177_v48 }
  0x3c   :  { %1180 = vmatprep.subr.bf16.mxu1 %v1179_v53  ;;  %v91_v7 = vshrl.u32 %v90_v6, 7  ;;  %v2089_v6 = vmov -1.0  }
  0x3e   :  { %1138 = vmatpush3.bf16.msra.mxu0 %v1137_v19  ;;  %v92_v8 = vsub.s32 0, %v91_v7  ;;  %v100_v10 = vsub.s32 2, %v91_v7  ;;  %v96_v11 = vsub.s32 1, %v91_v7  ;;  %v104_v12 = vsub.s32 3, %v91_v7 }
  0x3f   :  { %1140 = vmatprep.subr.bf16.mxu0 %v1139_v24  ;;  %1182 = vmatpush3.bf16.msra.mxu1 %v1181_v60 }
  0x40   :  { %1184 = vmatprep.subr.bf16.mxu1 %v1183_v0  ;;  %v1692_v13 = vrot.slane %v88_v9, %v92_v8  ;;  %v1694_v14 = vrot.slane %v88_v9, %v100_v10  ;;  %v1696_v15 = vrot.slane %v88_v9, %v96_v11  ;;  %v1698_v17 = vrot.slane %v88_v9, %v104_v12 }
  0x42   :  { %1142 = vmatpush3.bf16.msra.mxu0 %v1141_v32 }
  0x43   :  { %1144 = vmatprep.subr.bf16.mxu0 %v1143_v37  ;;  %1186 = vmatpush3.bf16.msra.mxu1 %v1185_v5 }
  0x46   :  { %1146 = vmatpush3.bf16.msra.mxu0 %v1145_v47 }
  0x47   :  { %1148 = vmatprep.subr.bf16.mxu0 %v1147_v49 }
  0x4a   :  { %1150 = vmatpush3.bf16.msra.mxu0 %v1149_v59 }
  0x4b   :  { %1152 = vmatprep.subr.bf16.mxu0 %v1151_v61 }
  0x4e   :  { %1154 = vmatpush3.bf16.msra.mxu0 %v1153_v4 }
  0xf8   :  { %v176_v16 = vpop.f32.mrb[0].mxu0 }
  0xf9   :  { %v177_v18 = vadd.f32 %v176_v16, %v1692_v13  ;;  %v265_v19 = vpop.f32.mrb[0].mxu1  ;;  %v178_v20 = vpop.f32.mrb[1].mxu0 }
  0xfa   :  { %v266_v21 = vadd.f32 %v265_v19, %v1694_v14  ;;  %v179_v22 = vadd.f32 %v178_v20, %v1696_v15  ;;  %v267_v23 = vpop.f32.mrb[1].mxu1 }
  0xfb   :  { %v304_v24 = vmul.f32 0.70710677, %v177_v18  ;;  %v268_v27 = vadd.f32 %v267_v23, %v1698_v17  ;;  %v1719_v54 = vmul.f32 0.5, %v177_v18 }
  0xfc   :  { %v306_v25 = vmul.f32 0.70710677, %v266_v21  ;;  %v305_v26 = vmul.f32 0.70710677, %v179_v22  ;;  %v182_v30 = vpop.f32.mrb[2].mxu0  ;;  %v1722_v57 = vmul.f32 0.5, %v266_v21 }
  0xfd   :  { %v352_v28 = vand.u32 2147483647, %v304_v24  ;;  %v271_v32 = vpop.f32.mrb[2].mxu1  ;;  %v307_v35 = vmul.f32 0.70710677, %v268_v27  ;;  %v184_v38 = vpop.f32.mrb[3].mxu0  ;;  %v183_v52 = vadd.f32 %v182_v30, %v1692_v13 }
  0xfe   :  { %v354_v29 = vand.u32 2147483647, %v306_v25  ;;  %v353_v34 = vand.u32 2147483647, %v305_v26  ;;  %v273_v39 = vpop.f32.mrb[3].mxu1  ;;  %v272_v56 = vadd.f32 %v271_v32, %v1694_v14  ;;  %v1724_v58 = vmul.f32 0.5, %v179_v22 }
  0xff   :  { %v368_v31 = vmul.f32 0.3275911, %v352_v28  ;;  %v576_v37 = vsub.f32 0.0, %v352_v28  ;;  %v355_v45 = vand.u32 2147483647, %v307_v35  ;;  %vm320_vm0 = vcmp.ge.f32.partialorder %v304_v24, 0.0 }
 0x100   :  { %v370_v33 = vmul.f32 0.3275911, %v354_v29  ;;  %v578_v41 = vsub.f32 0.0, %v354_v29  ;;  %v188_v42 = vpop.f32.mrb[4].mxu0  ;;  %v577_v44 = vsub.f32 0.0, %v353_v34  ;;  %vm322_vm1 = vcmp.ge.f32.partialorder %v306_v25, 0.0 }
 0x101   :  { %v384_v36 = vadd.f32 1.0, %v368_v31  ;;  %v1704_v3 = vpop.f32.mrb[4].mxu1  ;;  %v1706_v43 = vpop.f32.mrb[5].mxu0  ;;  %v592_v48 = vmul.f32 %v576_v37, %v352_v28  ;;  %v369_v55 = vmul.f32 0.3275911, %v353_v34  ;;  %v579_v60 = vsub.f32 0.0, %v355_v45 }
 0x102   :  { %v386_v40 = vadd.f32 1.0, %v370_v33  ;;  %v1708_v46 = vpop.f32.mrb[5].mxu1  ;;  %v594_v51 = vmul.f32 %v578_v41, %v354_v29  ;;  %v593_v59 = vmul.f32 %v577_v44, %v353_v34  ;;  %v371_v62 = vmul.f32 0.3275911, %v355_v45 }
 0x103   :  { %1189 = vrcp.f32 %v384_v36  ;;  %v608_v61 = vmul.f32 1.442695, %v592_v48  ;;  %vm321_vm2 = vcmp.ge.f32.partialorder %v305_v26, 0.0  ;;  %vm323_vm3 = vcmp.ge.f32.partialorder %v307_v35, 0.0 }
 0x104   :  { %1191 = vrcp.f32 %v386_v40  ;;  %v1710_v47 = vpop.f32.mrb[6].mxu0  ;;  %v612_v63 = vmul.f32 1.442695, %v594_v51  ;;  %v308_v0 = vmul.f32 0.70710677, %v183_v52  ;;  %v385_v1 = vadd.f32 1.0, %v369_v55 }
 0x105   :  { %v1712_v49 = vpop.f32.mrb[6].mxu1  ;;  %v1714_v50 = vpop.f32.mrb[7].mxu0  ;;  %v1726_v2 = vmul.f32 0.5, %v268_v27  ;;  %v310_v4 = vmul.f32 0.70710677, %v272_v56  ;;  %v185_v5 = vadd.f32 %v184_v38, %v1696_v15  ;;  %v1730_v7 = vsel %vm320_vm0, 1.0, %v2089_v6 }
 0x106   :  { %v1717_v53 = vpop.f32.mrb[7].mxu1  ;;  %v1733_v8 = vsel %vm322_vm1, 1.0, %v2089_v6  ;;  %v610_v9 = vmul.f32 1.442695, %v593_v59  ;;  %v595_v10 = vmul.f32 %v579_v60, %v355_v45  ;;  %1193 = vpow2.f32 %v608_v61 }
 0x107   :  { %v1738_v12 = vsel %vm321_vm2, 1.0, %v2089_v6  ;;  %v1741_v16 = vsel %vm323_vm3, 1.0, %v2089_v6  ;;  %v387_v18 = vadd.f32 1.0, %v371_v62  ;;  %1195 = vpow2.f32 %v612_v63 }
 0x108   :  { %v356_v21 = vand.u32 2147483647, %v308_v0  ;;  %v1747_v22 = vadd.f32 %v273_v39, %v1698_v17  ;;  %1197 = vrcp.f32 %v385_v1  ;;  %v358_v24 = vand.u32 2147483647, %v310_v4 }
 0x109   :  { %v1750_v25 = vmul.f32 0.70710677, %v185_v5  ;;  %1199 = vpow2.f32 %v610_v9  ;;  %v614_v27 = vmul.f32 1.442695, %v595_v10  ;;  %v1752_v28 = vmul.f32 0.5, %v183_v52 }
 0x10a   :  { %v1754_v30 = vmul.f32 0.5, %v272_v56  ;;  %v1756_v31 = vmul.f32 0.5, %v185_v5  ;;  %v1759_v32 = vadd.f32 %v188_v42, %v1692_v13  ;;  %vm324_vm4 = vcmp.ge.f32.partialorder %v308_v0, 0.0 }
 0x10b   :  { %v580_v34 = vsub.f32 0.0, %v356_v21  ;;  %v1763_v35 = vmul.f32 0.70710677, %v1747_v22  ;;  %vm326_vm5 = vcmp.ge.f32.partialorder %v310_v4, 0.0  ;;  %v582_v37 = vsub.f32 0.0, %v358_v24 }
 0x10c   :  { %2104 = vst [vmem:[#allocation2_spill] sm:$0xff] %v1759_v32  ;;  %v357_v38 = vand.u32 2147483647, %v1750_v25  ;;  %1201 = vrcp.f32 %v387_v18  ;;  %v372_v40 = vmul.f32 0.3275911, %v356_v21  ;;  %v1774_v51 = vsel %vm324_vm4, 1.0, %v2089_v6 }
 0x10d   :  { %v1735_v11 = vpop.eup %1189  ;;  %v374_v41 = vmul.f32 0.3275911, %v358_v24  ;;  %1203 = vpow2.f32 %v614_v27  ;;  %v359_v42 = vand.u32 2147483647, %v1763_v35  ;;  %v1769_v45 = vmul.f32 0.70710677, %v1759_v32 }
 0x10e   :  { %v1743_v19 = vpop.eup %1191  ;;  %v432_v20 = vmul.f32 1.0614054, %v1735_v11  ;;  %v596_v52 = vmul.f32 %v580_v34, %v356_v21  ;;  %v1778_v55 = vadd.f32 %v1704_v3, %v1694_v14  ;;  %v598_v60 = vmul.f32 %v582_v37, %v358_v24 }
 0x10f   :  { %v434_v23 = vmul.f32 1.0614054, %v1743_v19  ;;  %v373_v61 = vmul.f32 0.3275911, %v357_v38  ;;  %v581_v62 = vsub.f32 0.0, %v357_v38  ;;  %v388_v5 = vadd.f32 1.0, %v372_v40 }
 0x110   :  { %v448_v26 = vadd.f32 -1.4531521, %v432_v20  ;;  %2105 = vst [vmem:[#allocation3_spill] sm:$0xff] %v1778_v55  ;;  %v1194_v56 = vpop.eup %1193  ;;  %v1783_v9 = vsel %vm326_vm5, 1.0, %v2089_v6  ;;  %v1787_v0 = vadd.f32 %v1706_v43, %v1696_v15  ;;  %v390_v18 = vadd.f32 1.0, %v374_v41 }
 0x111   :  { %v450_v29 = vadd.f32 -1.4531521, %v434_v23  ;;  %v1196_v63 = vpop.eup %1195  ;;  %v583_v20 = vsub.f32 0.0, %v359_v42  ;;  %v360_v21 = vand.u32 2147483647, %v1769_v45  ;;  %vm325_vm6 = vcmp.ge.f32.partialorder %v1750_v25, 0.0 }
 0x112   :  { %v464_v33 = vmul.f32 %v1735_v11, %v448_v26  ;;  %v1789_v10 = vpop.eup %1197  ;;  %v616_v26 = vmul.f32 1.442695, %v596_v52  ;;  %v1797_v4 = vmul.f32 0.70710677, %v1778_v55  ;;  %v620_v27 = vmul.f32 1.442695, %v598_v60 }
 0x113   :  { %v466_v36 = vmul.f32 %v1743_v19, %v450_v29  ;;  %v1792_v23 = vpop.eup %1199  ;;  %v389_v29 = vadd.f32 1.0, %v373_v61  ;;  %1205 = vrcp.f32 %v388_v5  ;;  %v1801_v37 = vmul.f32 0.70710677, %v1787_v0 }
 0x114   :  { %v480_v39 = vadd.f32 1.4214138, %v464_v33  ;;  %v597_v33 = vmul.f32 %v581_v62, %v357_v38  ;;  %1207 = vrcp.f32 %v390_v18  ;;  %v599_v40 = vmul.f32 %v583_v20, %v359_v42 }
 0x115   :  { %v482_v44 = vadd.f32 1.4214138, %v466_v36  ;;  %v375_v36 = vmul.f32 0.3275911, %v359_v42  ;;  %v584_v41 = vsub.f32 0.0, %v360_v21  ;;  %1209 = vpow2.f32 %v616_v26 }
 0x116   :  { %v496_v48 = vmul.f32 %v1735_v11, %v480_v39  ;;  %v376_v52 = vmul.f32 0.3275911, %v360_v21  ;;  %1211 = vpow2.f32 %v620_v27  ;;  %v618_v61 = vmul.f32 1.442695, %v597_v33 }
 0x117   :  { %v498_v59 = vmul.f32 %v1743_v19, %v482_v44  ;;  %v1803_v44 = vpop.eup %1201  ;;  %v361_v62 = vand.u32 2147483647, %v1801_v37  ;;  %v1814_v42 = vsel %vm325_vm6, 1.0, %v2089_v6  ;;  %1213 = vrcp.f32 %v389_v29 }
 0x118   :  { %v512_v1 = vadd.f32 -0.28449672, %v496_v48  ;;  %v1807_v60 = vpop.eup %1203  ;;  %v622_v5 = vmul.f32 1.442695, %v599_v40  ;;  %v280_v18 = vadd.f32 %v1708_v46, %v1698_v17  ;;  %vm327_vm7 = vcmp.ge.f32.partialorder %v1763_v35, 0.0 }
 0x119   :  { %v514_v3 = vadd.f32 -0.28449672, %v498_v59  ;;  %v362_v59 = vand.u32 2147483647, %v1797_v4  ;;  %1215 = vpow2.f32 %v618_v61  ;;  %v377_v25 = vmul.f32 0.3275911, %v361_v62 }
 0x11a   :  { %v528_v24 = vmul.f32 %v1735_v11, %v512_v1  ;;  %v585_v26 = vsub.f32 0.0, %v361_v62  ;;  %v1824_v29 = vmul.f32 0.5, %v1747_v22  ;;  %vm329_vm8 = vcmp.ge.f32.partialorder %v1801_v37, 0.0 }
 0x11b   :  { %v530_v43 = vmul.f32 %v1743_v19, %v514_v3  ;;  %v600_v3 = vmul.f32 %v584_v41, %v360_v21  ;;  %v1845_v35 = vadd.f32 %v1712_v49, %v1694_v14  ;;  %vm328_vm10 = vcmp.ge.f32.partialorder %v1769_v45, 0.0 }
 0x11c   :  { %v544_v34 = vadd.f32 0.2548296, %v528_v24  ;;  %v586_v24 = vsub.f32 0.0, %v362_v59  ;;  %v601_v40 = vmul.f32 %v585_v26, %v361_v62  ;;  %v1854_v62 = vmul.f32 0.5, %v1787_v0 }
 0x11d   :  { %v546_v39 = vadd.f32 0.2548296, %v530_v43  ;;  %v315_v43 = vmul.f32 0.70710677, %v280_v18  ;;  %v1829_v21 = vpop.eup %1205  ;;  %2108 = vst [vmem:[#allocation6_spill] sm:$0xff] %v1845_v35  ;;  %vm330_vm11 = vcmp.ge.f32.partialorder %v1797_v4, 0.0 }
 0x11e   :  { %v560_v48 = vmul.f32 %v1735_v11, %v544_v34  ;;  %v391_v11 = vadd.f32 1.0, %v375_v36  ;;  %v1834_v34 = vsel %vm327_vm7, 1.0, %v2089_v6  ;;  %v602_v36 = vmul.f32 %v586_v24, %v362_v59  ;;  %v1836_v22 = vpop.eup %1207 }
 0x11f   :  { %v562_v38 = vmul.f32 %v1743_v19, %v546_v39  ;;  %v1820_v19 = vadd.f32 %v1710_v47, %v1692_v13  ;;  %v624_v13 = vmul.f32 1.442695, %v600_v3  ;;  %v378_v47 = vmul.f32 0.3275911, %v362_v59 }
 0x120   :  { %v640_v1 = vmul.f32 %v1194_v56, %v560_v48  ;;  %v392_v56 = vadd.f32 1.0, %v376_v52  ;;  %1217 = vrcp.f32 %v391_v11  ;;  %v393_v39 = vadd.f32 1.0, %v377_v25  ;;  %v1839_v48 = vpop.eup %1209 }
 0x121   :  { %2106 = vst [vmem:[#allocation4_spill] sm:$0xff] %v1820_v19  ;;  %v642_v20 = vmul.f32 %v1196_v63, %v562_v38  ;;  %v1827_v46 = vmul.f32 0.70710677, %v1820_v19  ;;  %1219 = vpow2.f32 %v622_v5  ;;  %v363_v63 = vand.u32 2147483647, %v315_v43  ;;  %v1851_v61 = vpop.eup %1211 }
 0x122   :  { %v656_v27 = vsub.f32 1.0, %v640_v1  ;;  %1221 = vrcp.f32 %v392_v56  ;;  %v1849_v59 = vadd.f32 %v1714_v50, %v1696_v15  ;;  %v394_v1 = vadd.f32 1.0, %v378_v47  ;;  %v1856_v5 = vpop.eup %1213 }
 0x123   :  { %2107 = vst [vmem:[#allocation5_spill] sm:$0xff] %v1827_v46  ;;  %v658_v33 = vsub.f32 1.0, %v642_v20  ;;  %v587_v41 = vsub.f32 0.0, %v363_v63  ;;  %v364_v38 = vand.u32 2147483647, %v1827_v46  ;;  %1223 = vpow2.f32 %v624_v13  ;;  %v1874_v25 = vpop.eup %1215 }
 0x124   :  { %v672_v52 = vmul.f32 %v656_v27, %v1730_v7  ;;  %2109 = vst [vmem:[#allocation7_spill] sm:$0xff] %v1849_v59  ;;  %v379_v11 = vmul.f32 0.3275911, %v363_v63  ;;  %v628_v3 = vmul.f32 1.442695, %v602_v36  ;;  %v1865_v15 = vsel %vm329_vm8, 1.0, %v2089_v6 }
 0x125   :  { %v674_v7 = vmul.f32 %v658_v33, %v1733_v8  ;;  %v603_v20 = vmul.f32 %v587_v41, %v363_v63  ;;  %v1860_v14 = vmul.f32 0.70710677, %v1845_v35  ;;  %v380_v49 = vmul.f32 0.3275911, %v364_v38 }
 0x126   :  { %v588_v50 = vsub.f32 0.0, %v364_v38  ;;  %v1868_v0 = vmul.f32 0.70710677, %v1849_v59  ;;  %v688_v56 = vadd.f32 1.0, %v672_v52  ;;  %1225 = vrcp.f32 %v393_v39 }
 0x127   :  { %2110 = vst [vmem:[#allocation8_spill] sm:$0xff] %v1860_v14  ;;  %v626_v24 = vmul.f32 1.442695, %v601_v40  ;;  %v1872_v8 = vadd.f32 %v1717_v53, %v1698_v17  ;;  %vm331_vm9 = vcmp.ge.f32.partialorder %v315_v43, 0.0  ;;  %v395_v26 = vadd.f32 1.0, %v379_v11 }
 0x128   :  { %2111 = vst [vmem:[#allocation9_spill] sm:$0xff] %v1868_v0  ;;  %v1877_v37 = vand.u32 2147483647, %v1860_v14  ;;  %v365_v27 = vand.u32 2147483647, %v1868_v0  ;;  %v690_v47 = vadd.f32 1.0, %v674_v7  ;;  %1227 = vrcp.f32 %v394_v1 }
 0x129   :  { %2112 = vst [vmem:[#allocation10_spill] sm:$0xff] %v1872_v8  ;;  %v1882_v63 = vmul.f32 0.5, %v280_v18  ;;  %v630_v33 = vmul.f32 1.442695, %v603_v20  ;;  %1229 = vpow2.f32 %v628_v3  ;;  %v396_v17 = vadd.f32 1.0, %v380_v49 }
 0x12a   :  { %v1880_v13 = vpop.eup %1217  ;;  %v604_v53 = vmul.f32 %v588_v50, %v364_v38  ;;  %v589_v39 = vsub.f32 0.0, %v365_v27  ;;  %v1889_v41 = vmul.f32 %v688_v56, %v1719_v54  ;;  %1231 = vpow2.f32 %v626_v24 }
 0x12b   :  { %v1884_v36 = vpop.eup %1219  ;;  %v1893_v52 = vsel %vm331_vm9, 1.0, %v2089_v6  ;;  %v1896_v18 = vmul.f32 0.70710677, %v1872_v8  ;;  %1233 = vrcp.f32 %v395_v26  ;;  %v382_v1 = vmul.f32 0.3275911, %v1877_v37 }
 0x12c   :  { %v1886_v40 = vpop.eup %1221  ;;  %v433_v11 = vmul.f32 1.0614054, %v1789_v10  ;;  %v435_v38 = vmul.f32 1.0614054, %v1803_v44  ;;  %v1902_v7 = vmul.f32 %v690_v47, %v1722_v57  ;;  %1235 = vpow2.f32 %v630_v33 }
 0x12d   :  { %2113 = vst [vmem:[#allocation11_spill] sm:$0xff] %v1896_v18  ;;  %v605_v54 = vmul.f32 %v589_v39, %v365_v27  ;;  %v367_v3 = vand.u32 2147483647, %v1896_v18  ;;  %v1905_v43 = vpop.eup %1223  ;;  %1237 = vrcp.f32 %v396_v17  ;;  %v632_v20 = vmul.f32 1.442695, %v604_v53 }
 0x12e   :  { %2114 = vst [vmem:[#allocation12_spill] sm:$0xff] %v1905_v43  ;;  %v381_v49 = vmul.f32 0.3275911, %v365_v27  ;;  %v449_v50 = vadd.f32 -1.4531521, %v433_v11  ;;  %v398_v35 = vadd.f32 1.0, %v382_v1 }
 0x12f   :  { %v383_v24 = vmul.f32 0.3275911, %v367_v3  ;;  %v591_v26 = vsub.f32 0.0, %v367_v3  ;;  %v451_v6 = vadd.f32 -1.4531521, %v435_v38  ;;  %1239 = vpow2.f32 %v632_v20 }
 0x130   :  { %v465_v19 = vmul.f32 %v1789_v10, %v449_v50  ;;  %v437_v57 = vmul.f32 1.0614054, %v1856_v5  ;;  %v439_v47 = vmul.f32 1.0614054, %v1880_v13  ;;  %v1911_v33 = vpop.eup %1225  ;;  %v1913_v39 = vmul.f32 1.442695, %v605_v54 }
 0x131   :  { %v607_v17 = vmul.f32 %v591_v26, %v367_v3  ;;  %v467_v27 = vmul.f32 %v1803_v44, %v451_v6  ;;  %v436_v53 = vmul.f32 1.0614054, %v1829_v21  ;;  %v397_v50 = vadd.f32 1.0, %v381_v49 }
 0x132   :  { %v481_v11 = vadd.f32 1.4214138, %v465_v19  ;;  %v453_v56 = vadd.f32 -1.4531521, %v437_v57  ;;  %v455_v38 = vadd.f32 -1.4531521, %v439_v47  ;;  %v1917_v1 = vpop.eup %1227  ;;  %1241 = vrcp.f32 %v398_v35 }
 0x133   :  { %v399_v8 = vadd.f32 1.0, %v383_v24  ;;  %v483_v14 = vadd.f32 1.4214138, %v467_v27  ;;  %v452_v59 = vadd.f32 -1.4531521, %v436_v53  ;;  %v1919_v46 = vpop.eup %1229  ;;  %1243 = vrcp.f32 %v397_v50 }
 0x134   :  { %2115 = vst [vmem:[#allocation13_spill] sm:$0xff] %v1919_v46  ;;  %v497_v54 = vmul.f32 %v1789_v10, %v481_v11  ;;  %v469_v3 = vmul.f32 %v1856_v5, %v453_v56  ;;  %v471_v6 = vmul.f32 %v1880_v13, %v455_v38  ;;  %v438_v26 = vmul.f32 1.0614054, %v1836_v22  ;;  %v1925_v20 = vpop.eup %1231 }
 0x135   :  { %v1927_v19 = vmul.f32 1.442695, %v607_v17  ;;  %v499_v57 = vmul.f32 %v1803_v44, %v483_v14  ;;  %v468_v49 = vmul.f32 %v1829_v21, %v452_v59  ;;  %v441_v24 = vmul.f32 1.0614054, %v1911_v33  ;;  %v1932_v47 = vpop.eup %1233 }
 0x136   :  { %v513_v27 = vadd.f32 -0.28449672, %v497_v54  ;;  %v485_v53 = vadd.f32 1.4214138, %v469_v3  ;;  %v487_v56 = vadd.f32 1.4214138, %v471_v6  ;;  %v1934_v11 = vpop.eup %1235  ;;  %1245 = vrcp.f32 %v399_v8 }
 0x137   :  { %v515_v38 = vadd.f32 -0.28449672, %v499_v57  ;;  %v484_v55 = vadd.f32 1.4214138, %v468_v49  ;;  %v454_v18 = vadd.f32 -1.4531521, %v438_v26  ;;  %v1936_v17 = vpop.eup %1237  ;;  %1247 = vpow2.f32 %v1913_v39 }
 0x138   :  { %v529_v14 = vmul.f32 %v1789_v10, %v513_v27  ;;  %v501_v59 = vmul.f32 %v1856_v5, %v485_v53  ;;  %v503_v0 = vmul.f32 %v1880_v13, %v487_v56  ;;  %v457_v46 = vadd.f32 -1.4531521, %v441_v24 }
 0x139   :  { %v531_v35 = vmul.f32 %v1803_v44, %v515_v38  ;;  %v500_v54 = vmul.f32 %v1829_v21, %v484_v55  ;;  %v470_v3 = vmul.f32 %v1836_v22, %v454_v18  ;;  %v443_v50 = vmul.f32 1.0614054, %v1932_v47  ;;  %v1946_v32 = vpop.eup %1239 }
 0x13a   :  { %v545_v6 = vadd.f32 0.2548296, %v529_v14  ;;  %v517_v57 = vadd.f32 -0.28449672, %v501_v59  ;;  %v519_v26 = vadd.f32 -0.28449672, %v503_v0  ;;  %v473_v49 = vmul.f32 %v1911_v33, %v457_v46 }
 0x13b   :  { %v547_v27 = vadd.f32 0.2548296, %v531_v35  ;;  %v516_v43 = vadd.f32 -0.28449672, %v500_v54  ;;  %v486_v53 = vadd.f32 1.4214138, %v470_v3  ;;  %1249 = vpow2.f32 %v1927_v19 }
 0x13c   :  { %v561_v24 = vmul.f32 %v1789_v10, %v545_v6  ;;  %v533_v56 = vmul.f32 %v1856_v5, %v517_v57  ;;  %v535_v55 = vmul.f32 %v1880_v13, %v519_v26  ;;  %v489_v18 = vadd.f32 1.4214138, %v473_v49  ;;  %v1958_v26 = vpop.eup %1241 }
 0x13d   :  { %v563_v38 = vmul.f32 %v1803_v44, %v547_v27  ;;  %v532_v14 = vmul.f32 %v1829_v21, %v516_v43  ;;  %v502_v0 = vmul.f32 %v1836_v22, %v486_v53  ;;  %v459_v46 = vadd.f32 -1.4531521, %v443_v50  ;;  %v1962_v27 = vpop.eup %1243 }
 0x13e   :  { %v641_v8 = vmul.f32 %v1792_v23, %v561_v24  ;;  %v549_v59 = vadd.f32 0.2548296, %v533_v56  ;;  %v551_v35 = vadd.f32 0.2548296, %v535_v55  ;;  %v505_v54 = vmul.f32 %v1911_v33, %v489_v18 }
 0x13f   :  { %v643_v10 = vmul.f32 %v1807_v60, %v563_v38  ;;  %v548_v3 = vadd.f32 0.2548296, %v532_v14  ;;  %v518_v6 = vadd.f32 -0.28449672, %v502_v0  ;;  %v475_v57 = vmul.f32 %v1932_v47, %v459_v46 }
 0x140   :  { %v657_v44 = vsub.f32 1.0, %v641_v8  ;;  %v565_v43 = vmul.f32 %v1856_v5, %v549_v59  ;;  %v567_v49 = vmul.f32 %v1880_v13, %v551_v35  ;;  %v521_v50 = vadd.f32 -0.28449672, %v505_v54  ;;  %v1973_v35 = vpop.eup %1245 }
 0x141   :  { %v659_v23 = vsub.f32 1.0, %v643_v10  ;;  %v564_v53 = vmul.f32 %v1829_v21, %v548_v3  ;;  %v534_v24 = vmul.f32 %v1836_v22, %v518_v6  ;;  %v491_v60 = vadd.f32 1.4214138, %v475_v57 }
 0x142   :  { %v673_v56 = vmul.f32 %v657_v44, %v1738_v12  ;;  %v645_v55 = vmul.f32 %v1874_v25, %v565_v43  ;;  %v647_v18 = vmul.f32 %v1884_v36, %v567_v49  ;;  %v537_v38 = vmul.f32 %v1911_v33, %v521_v50 }
 0x143   :  { %v675_v5 = vmul.f32 %v659_v23, %v1741_v16  ;;  %v644_v13 = vmul.f32 %v1839_v48, %v564_v53  ;;  %v550_v14 = vadd.f32 0.2548296, %v534_v24  ;;  %v507_v0 = vmul.f32 %v1932_v47, %v491_v60 }
 0x144   :  { %v689_v46 = vadd.f32 1.0, %v673_v56  ;;  %v661_v21 = vsub.f32 1.0, %v645_v55  ;;  %v663_v8 = vsub.f32 1.0, %v647_v18  ;;  %v553_v59 = vadd.f32 0.2548296, %v537_v38 }
 0x145   :  { %v691_v12 = vadd.f32 1.0, %v675_v5  ;;  %v660_v54 = vsub.f32 1.0, %v644_v13  ;;  %v566_v25 = vmul.f32 %v1836_v22, %v550_v14  ;;  %v523_v36 = vadd.f32 -0.28449672, %v507_v0 }
 0x146   :  { %v705_v10 = vmul.f32 %v689_v46, %v1724_v58  ;;  %v677_v16 = vmul.f32 %v661_v21, %v1814_v42  ;;  %v679_v48 = vmul.f32 %v663_v8, %v1834_v34  ;;  %v569_v3 = vmul.f32 %v1911_v33, %v553_v59 }
 0x147   :  { %v707_v6 = vmul.f32 %v691_v12, %v1726_v2  ;;  %v676_v57 = vmul.f32 %v660_v54, %v1774_v51  ;;  %v646_v44 = vmul.f32 %v1851_v61, %v566_v25  ;;  %v539_v43 = vmul.f32 %v1932_v47, %v523_v36 }
 0x148   :  { %855 = vmatprep.mubr.f32.mxu0 %v705_v10  ;;  %v693_v49 = vadd.f32 1.0, %v677_v16  ;;  %v695_v22 = vadd.f32 1.0, %v679_v48  ;;  %v649_v50 = vmul.f32 %v1925_v20, %v569_v3  ;;  %v440_v58 = vmul.f32 1.0614054, %v1886_v40 }
 0x149   :  { %940 = vmatprep.mubr.f32.mxu1 %v707_v6  ;;  %856 = vmatmul.mubr.f32.vlgmr.msra.gmra.mrb[8].mxu0 %v1889_v41  ;;  %v692_v42 = vadd.f32 1.0, %v676_v57  ;;  %v662_v34 = vsub.f32 1.0, %v646_v44  ;;  %v555_v33 = vadd.f32 0.2548296, %v539_v43  ;;  %v442_v2 = vmul.f32 1.0614054, %v1917_v1 }
 0x14a   :  { %941 = vmatmul.mubr.f32.vlgmr.msra.gmra.mrb[8].mxu1 %v1902_v7  ;;  %v709_v51 = vmul.f32 %v693_v49, %v1756_v31  ;;  %v711_v61 = vmul.f32 %v695_v22, %v1824_v29  ;;  %v665_v23 = vsub.f32 1.0, %v649_v50  ;;  %v456_v53 = vadd.f32 -1.4531521, %v440_v58 }
 0x14b   :  { %v708_v20 = vmul.f32 %v692_v42, %v1752_v28  ;;  %v678_v24 = vmul.f32 %v662_v34, %v1783_v9  ;;  %v571_v60 = vmul.f32 %v1932_v47, %v555_v33  ;;  %v458_v41 = vadd.f32 -1.4531521, %v442_v2 }
 0x14c   :  { %860 = vmatprep.mubr.f32.mxu0 %v709_v51  ;;  %945 = vmatprep.mubr.f32.mxu1 %v711_v61  ;;  %v681_v56 = vmul.f32 %v665_v23, %v1865_v15  ;;  %v472_v55 = vmul.f32 %v1886_v40, %v456_v53  ;;  %v445_v7 = vmul.f32 1.0614054, %v1962_v27  ;;  %v447_v31 = vmul.f32 1.0614054, %v1973_v35  ;;  %v2117_v23 = vld [vmem:[#allocation2_spill] sm:$0xff] }
 0x14d   :  { %861 = vmatmul.mubr.f32.gmra.mrb[10].mxu0 %v708_v20  ;;  %v694_v29 = vadd.f32 1.0, %v678_v24  ;;  %v651_v18 = vmul.f32 %v1934_v11, %v571_v60  ;;  %v474_v28 = vmul.f32 %v1917_v1, %v458_v41  ;;  %v444_v9 = vmul.f32 1.0614054, %v1936_v17  ;;  %v2118_v60 = vld [vmem:[#allocation12_spill] sm:$0xff] }
 0x14e   :  { %v2116_v47 = vsub.f32 0.0, %v1877_v37  ;;  %v697_v5 = vadd.f32 1.0, %v681_v56  ;;  %v488_v15 = vadd.f32 1.4214138, %v472_v55  ;;  %v461_v13 = vadd.f32 -1.4531521, %v445_v7 }
 0x14f   :  { %v710_v14 = vmul.f32 %v694_v29, %v1754_v30  ;;  %v667_v0 = vsub.f32 1.0, %v651_v18  ;;  %v490_v46 = vadd.f32 1.4214138, %v474_v28  ;;  %v463_v21 = vadd.f32 -1.4531521, %v447_v31  ;;  %v2120_v18 = vld [vmem:[#allocation13_spill] sm:$0xff] }
 0x150   :  { %v606_v38 = vmul.f32 %v2116_v47, %v1877_v37  ;;  %v713_v8 = vmul.f32 %v697_v5, %v1854_v62  ;;  %v504_v11 = vmul.f32 %v1886_v40, %v488_v15  ;;  %v477_v59 = vmul.f32 %v1962_v27, %v461_v13 }
 0x151   :  { %v460_v12 = vadd.f32 -1.4531521, %v444_v9  ;;  %946 = vmatmul.mubr.f32.gmra.mrb[10].mxu1 %v710_v14  ;;  %v683_v54 = vmul.f32 %v667_v0, %v1893_v52  ;;  %v506_v37 = vmul.f32 %v1917_v1, %v490_v46  ;;  %v479_v25 = vmul.f32 %v1973_v35, %v463_v21  ;;  %v1248_v9 = vpop.eup %1247  ;;  %v2121_v14 = vld [vmem:[#allocation9_spill] sm:$0xff]  ;;  %v2122_v0 = vld [vmem:[#allocation11_spill] sm:$0xff] }
 0x152   :  { %v446_v36 = vmul.f32 1.0614054, %v1958_v26  ;;  %865 = vmatprep.mubr.f32.mxu0 %v713_v8  ;;  %v520_v30 = vadd.f32 -0.28449672, %v504_v11  ;;  %v493_v10 = vadd.f32 1.4214138, %v477_v59  ;;  %v1250_v13 = vpop.eup %1249 }
 0x153   :  { %v476_v62 = vmul.f32 %v1936_v17, %v460_v12  ;;  %v699_v16 = vadd.f32 1.0, %v683_v54  ;;  %v522_v48 = vadd.f32 -0.28449672, %v506_v37  ;;  %v495_v3 = vadd.f32 1.4214138, %v479_v25  ;;  %v2123_v59 = vld [vmem:[#allocation3_spill] sm:$0xff] }
 0x154   :  { %v536_v52 = vmul.f32 %v1886_v40, %v520_v30  ;;  %v509_v6 = vmul.f32 %v1962_v27, %v493_v10  ;;  %v462_v44 = vadd.f32 -1.4531521, %v446_v36  ;;  %v636_v43 = vmul.f32 1.442695, %v606_v38  ;;  %v2124_v54 = vld [vmem:[#allocation5_spill] sm:$0xff] }
 0x155   :  { %v492_v57 = vadd.f32 1.4214138, %v476_v62  ;;  %v715_v49 = vmul.f32 %v699_v16, %v1882_v63  ;;  %v538_v39 = vmul.f32 %v1917_v1, %v522_v48  ;;  %v511_v22 = vmul.f32 %v1973_v35, %v495_v3 }
 0x156   :  { %v552_v50 = vadd.f32 0.2548296, %v536_v52  ;;  %v525_v58 = vadd.f32 -0.28449672, %v509_v6  ;;  %v478_v42 = vmul.f32 %v1958_v26, %v462_v44  ;;  %v296_v53 = vmul.f32 0.5, %v2117_v23  ;;  %v2125_v44 = vld [vmem:[#allocation7_spill] sm:$0xff] }
 0x157   :  { %v508_v19 = vmul.f32 %v1936_v17, %v492_v57  ;;  %950 = vmatprep.mubr.f32.mxu1 %v715_v49  ;;  %v554_v34 = vadd.f32 0.2548296, %v538_v39  ;;  %v527_v33 = vadd.f32 -0.28449672, %v511_v22  ;;  %1251 = vpow2.f32 %v636_v43  ;;  %v2126_v22 = vld [vmem:[#allocation8_spill] sm:$0xff] }
 0x158   :  { %v568_v2 = vmul.f32 %v1886_v40, %v552_v50  ;;  %v541_v63 = vmul.f32 %v1962_v27, %v525_v58  ;;  %v494_v61 = vadd.f32 1.4214138, %v478_v42  ;;  %v2119_v31 = vmov -1.0   ;;  %v2127_v42 = vld [vmem:[#allocation10_spill] sm:$0xff] }
 0x159   :  { %v524_v51 = vadd.f32 -0.28449672, %v508_v19  ;;  %v570_v20 = vmul.f32 %v1917_v1, %v554_v34  ;;  %v543_v24 = vmul.f32 %v1973_v35, %v527_v33  ;;  %v344_v40 = vsel %vm328_vm10, 1.0, %v2119_v31 }
 0x15a   :  { %v648_v41 = vmul.f32 %v2118_v60, %v568_v2  ;;  %v557_v56 = vadd.f32 0.2548296, %v541_v63  ;;  %v510_v7 = vmul.f32 %v1958_v26, %v494_v61  ;;  %v346_v29 = vsel %vm330_vm11, 1.0, %v2119_v31  ;;  %v2129_v60 = vld [vmem:[#allocation6_spill] sm:$0xff] }
 0x15b   :  { %v540_v55 = vmul.f32 %v1936_v17, %v524_v51  ;;  %v650_v28 = vmul.f32 %v2120_v18, %v570_v20  ;;  %v559_v1 = vadd.f32 0.2548296, %v543_v24  ;;  %vm333_vm12 = vcmp.ge.f32.partialorder %v2121_v14, 0.0 }
 0x15c   :  { %v664_v47 = vsub.f32 1.0, %v648_v41  ;;  %v573_v38 = vmul.f32 %v1962_v27, %v557_v56  ;;  %v526_v15 = vadd.f32 -0.28449672, %v510_v7  ;;  %vm335_vm13 = vcmp.ge.f32.partialorder %v2122_v0, 0.0 }
 0x15d   :  { %v556_v5 = vadd.f32 0.2548296, %v540_v55  ;;  %v666_v45 = vsub.f32 1.0, %v650_v28  ;;  %v575_v46 = vmul.f32 %v1973_v35, %v559_v1  ;;  %v298_v12 = vmul.f32 0.5, %v2123_v59 }
 0x15e   :  { %v680_v21 = vmul.f32 %v664_v47, %v344_v40  ;;  %v653_v4 = vmul.f32 %v1248_v9, %v573_v38  ;;  %v542_v11 = vmul.f32 %v1958_v26, %v526_v15  ;;  %vm332_vm14 = vcmp.ge.f32.partialorder %v2124_v54, 0.0 }
 0x15f   :  { %v572_v8 = vmul.f32 %v1936_v17, %v556_v5  ;;  %v682_v27 = vmul.f32 %v666_v45, %v346_v29  ;;  %v655_v37 = vmul.f32 %v1250_v13, %v575_v46  ;;  %v349_v35 = vsel %vm333_vm12, 1.0, %v2119_v31  ;;  %v970_v29 = vld [vmem:[%s2087_s4] ss:$0 sm:$0xff] }
 0x160   :  { %v696_v25 = vadd.f32 1.0, %v680_v21  ;;  %v669_v36 = vsub.f32 1.0, %v653_v4  ;;  %v558_v10 = vadd.f32 0.2548296, %v542_v11  ;;  %v351_v17 = vsel %vm335_vm13, 1.0, %v2119_v31 }
 0x161   :  { %v652_v30 = vmul.f32 %v1946_v32, %v572_v8  ;;  %v698_v62 = vadd.f32 1.0, %v682_v27  ;;  %v671_v16 = vsub.f32 1.0, %v655_v37  ;;  %v1252_v57 = vpop.eup %1251  ;;  %v348_v32 = vsel %vm332_vm14, 1.0, %v2119_v31 }
 0x162   :  { %v712_v48 = vmul.f32 %v696_v25, %v296_v53  ;;  %v685_v3 = vmul.f32 %v669_v36, %v349_v35  ;;  %v574_v6 = vmul.f32 %v1958_v26, %v558_v10  ;;  %v301_v43 = vmul.f32 0.5, %v2125_v44  ;;  %v2128_v26 = vld [vmem:[#allocation4_spill] sm:$0xff] }
 0x163   :  { %v668_v52 = vsub.f32 1.0, %v652_v30  ;;  %v714_v49 = vmul.f32 %v698_v62, %v298_v12  ;;  %v687_v39 = vmul.f32 %v671_v16, %v351_v17  ;;  %vm334_vm15 = vcmp.ge.f32.partialorder %v2126_v22, 0.0 }
 0x164   :  { %866 = vmatmul.mubr.f32.gmra.mrb[12].mxu0 %v712_v48  ;;  %v701_v50 = vadd.f32 1.0, %v685_v3  ;;  %v654_v19 = vmul.f32 %v1252_v57, %v574_v6  ;;  %v303_v34 = vmul.f32 0.5, %v2127_v42  ;;  %v300_v2 = vmul.f32 0.5, %v2128_v26 }
 0x165   :  { %v684_v58 = vmul.f32 %v668_v52, %v348_v32  ;;  %951 = vmatmul.mubr.f32.gmra.mrb[12].mxu1 %v714_v49  ;;  %v703_v33 = vadd.f32 1.0, %v687_v39  ;;  %v350_v23 = vsel %vm334_vm15, 1.0, %v2119_v31  ;;  %v302_v41 = vmul.f32 0.5, %v2129_v60 }
 0x166   :  { %v717_v63 = vmul.f32 %v701_v50, %v301_v43  ;;  %v670_v61 = vsub.f32 1.0, %v654_v19  ;;  %vm961_vm0 = vcmask 31744  }
 0x167   :  { %v700_v51 = vadd.f32 1.0, %v684_v58  ;;  %v719_v53 = vmul.f32 %v703_v33, %v303_v34 }
 0x168   :  { %870 = vmatprep.mubr.f32.mxu0 %v717_v63  ;;  %v686_v24 = vmul.f32 %v670_v61, %v350_v23 }
 0x169   :  { %v716_v20 = vmul.f32 %v700_v51, %v300_v2  ;;  %955 = vmatprep.mubr.f32.mxu1 %v719_v53 }
 0x16a   :  { %v702_v56 = vadd.f32 1.0, %v686_v24 }
 0x16b   :  { %871 = vmatmul.mubr.f32.gmra.mrb[14].mxu0 %v716_v20 }
 0x16c   :  { %v718_v55 = vmul.f32 %v702_v56, %v302_v41 }
 0x16e   :  { %956 = vmatmul.mubr.f32.gmra.mrb[14].mxu1 %v718_v55 }
 0x21c   :  { %v1003_v7 = vpop.f32.mrb[8].mxu0 }
 0x21d   :  { %v1047_v40 = vpop.f32.mrb[8].mxu1  ;;  %v1004_v18 = vpop.f32.mrb[9].mxu0 }
 0x21e   :  { %v1005_v28 = vadd.f32 %v1004_v18, %v1003_v7  ;;  %v1048_v31 = vpop.f32.mrb[9].mxu1 }
 0x21f   :  { %v1049_v1 = vadd.f32 %v1048_v31, %v1047_v40 }
 0x220   :  { %v858_v9 = vadd.f32 %v1005_v28, %v970_v29  ;;  %v1006_v47 = vpop.f32.mrb[10].mxu0 }
 0x221   :  { %v1007_v38 = vpop.f32.mrb[11].mxu0 }
 0x222   :  { %v943_v5 = vadd.f32 %v1049_v1, %v858_v9  ;;  %v1008_v15 = vadd.f32 %v1007_v38, %v1006_v47 }
 0x224   :  { %962 = vst.msk [vmem:[%s2088_s5] sm:$0xff] %vm961_vm0, %v943_v5  ;;  %v1050_v13 = vpop.f32.mrb[10].mxu1  ;;  %v863_v14 = vadd.f32 %v1008_v15, %v970_v29 }
 0x225   :  { %v1051_v0 = vpop.f32.mrb[11].mxu1 }
 0x226   :  { %v1052_v45 = vadd.f32 %v1051_v0, %v1050_v13 }
 0x228   :  { %v948_v46 = vadd.f32 %v1052_v45, %v863_v14 }
 0x22a   :  { %963 = vst.msk [vmem:[%s2088_s5 + $0x8] sm:$0xff] %vm961_vm0, %v948_v46 }
 0x237   :  { %v1009_v21 = vpop.f32.mrb[12].mxu0 }
 0x238   :  { %v1053_v4 = vpop.f32.mrb[12].mxu1  ;;  %v1010_v8 = vpop.f32.mrb[13].mxu0 }
 0x239   :  { %v1011_v11 = vadd.f32 %v1010_v8, %v1009_v21  ;;  %v1054_v59 = vpop.f32.mrb[13].mxu1 }
 0x23a   :  { %v1055_v12 = vadd.f32 %v1054_v59, %v1053_v4 }
 0x23b   :  { %v868_v54 = vadd.f32 %v1011_v11, %v970_v29 }
 0x23d   :  { %v953_v27 = vadd.f32 %v1055_v12, %v868_v54 }
 0x23e   :  { %v1012_v37 = vpop.f32.mrb[14].mxu0 }
 0x23f   :  { %v1013_v25 = vpop.f32.mrb[15].mxu0  ;;  %964 = vst.msk [vmem:[%s2088_s5 + $0x10] sm:$0xff] %vm961_vm0, %v953_v27 }
 0x240   :  { %v1014_v36 = vadd.f32 %v1013_v25, %v1012_v37 }
 0x241   :  { %v1056_v30 = vpop.f32.mrb[14].mxu1 }
 0x242   :  { %v873_v10 = vadd.f32 %v1014_v36, %v970_v29  ;;  %v1057_v35 = vpop.f32.mrb[15].mxu1 }
 0x243   :  { %v1058_v17 = vadd.f32 %v1057_v35, %v1056_v30 }
 0x245   :  { %v958_v62 = vadd.f32 %v1058_v17, %v873_v10 }
 0x247   :  { %965 = vst.msk [vmem:[%s2088_s5 + $0x18] sm:$0xff] %vm961_vm0, %v958_v62 }

</bundles_post_ra>
